<compile_context>
chip_gen: v7x
topology: tpu7x:2x2x1
jax: 0.10.0
libtpu: 0.0.40
codegen_flags: <defaults>
</compile_context>

<pallas_src>
import jax
import jax.numpy as jnp
from jax import lax
from jax.experimental import pallas as pl

LEAKY_SLOPE = 0.2
BN_EPS = 1e-5

# MXU operand dtype for layers 2..5 (accumulation is always f32).  Set to None
# for exact f32 matmuls.  bf16 deviates slightly from PyTorch's f32 convs
# (disclosed; ~1e-2-level on unit-scale post-BN activations).
_MATMUL_DTYPE = jnp.bfloat16


# ------------------------------ fused kernel ---------------------------------
#
# Polyphase layout: every activation is kept as a value of shape (P*B, N, C)
# where P is the number of "phases" (P = 32, 16, 8, 4, 2, 1 through the stack),
# N = L0 // 32 rows per phase (constant through the stack) and the leading
# index is z = phase * B + batch.  With this layout a k=4 / s=2 / p=1 conv only
# needs the 4 phases {2q-1, 2q, 2q+1, 2q+2} (contiguous leading-dim slices) and
# the two wrap-around taps become a +/-1 row shift whose inserted zero row IS
# the conv's p=1 zero padding.

def _disc_kernel(x_ref,
                 w1_ref,
                 w2_ref, g2_ref, b2_ref,
                 w3_ref, g3_ref, b3_ref,
                 w4_ref, g4_ref, b4_ref,
                 w5_ref, g5_ref, b5_ref,
                 wc_ref,
                 feat_ref, cls_ref):
    f32 = jnp.float32
    B, N, P0 = x_ref.shape          # (batch, rows per phase, 32 input phases)

    def shift_down(v):              # out[:, i] = v[:, i-1]; zero row at i=0  (== x[-1] = 0)
        return jnp.concatenate([jnp.zeros_like(v[:, :1]), v[:, :-1]], axis=1)

    def shift_up(v):                # out[:, i] = v[:, i+1]; zero row at i=N-1 (== x[L] = 0)
        return jnp.concatenate([v[:, 1:], jnp.zeros_like(v[:, :1])], axis=1)

    def leaky(y):
        return jnp.where(y > 0, y, LEAKY_SLOPE * y)

    def conv_mxu(patches, w_ref):
        # patches: (Z, N, 4*Cin)  ;  w_ref: (4*Cin, Cout)  -> (Z, N, Cout) f32.
        # One batched matmul per layer; single activation cast per layer.
        w = w_ref[...]
        p = patches.astype(w.dtype)
        wb = jnp.broadcast_to(w, (p.shape[0],) + w.shape)
        return jnp.einsum("znk,zko->zno", p, wb, preferred_element_type=f32)

    def make_patches(act, P):
        # act: (P*B, N, C) phase-major  ->  (P//2*B, N, 4*C), leading order (q, b).
        def slot(p):
            return act[p * B:(p + 1) * B]          # contiguous leading-dim slice
        blocks = []
        for q in range(P // 2):
            taps = []
            for t in range(4):
                v = 2 * q + t - 1                  # padded input position class
                s = slot(v % P)
                if v < 0:                          # only (q=0, t=0)
                    s = shift_down(s)
                elif v >= P:                       # only (q=P/2-1, t=3)
                    s = shift_up(s)
                taps.append(s)
            blocks.append(jnp.concatenate(taps, axis=-1))   # (B, N, 4*C)
        return jnp.concatenate(blocks, axis=0)

    def batchnorm(y, g_ref, b_ref):
        # Train-mode BatchNorm1d over batch*length, biased variance, two-pass.
        Z, n, _ = y.shape
        inv = 1.0 / float(Z * n)
        mean = jnp.sum(jnp.sum(y, axis=1, keepdims=True), axis=0, keepdims=True) * inv
        d = y - mean
        var = jnp.sum(jnp.sum(d * d, axis=1, keepdims=True), axis=0, keepdims=True) * inv
        scale = g_ref[...] * lax.rsqrt(var + BN_EPS)
        return d * scale + b_ref[...]

    # ---- layer 1: Conv(nc=1 -> ndf), no BN.  The 32 input phases sit on the
    #      lane axis, so each tap window is a contiguous lane slice; cin == 1 so
    #      the conv itself is 4 VPU broadcast-multiplies (an MXU pass would be
    #      ~99% padding).
    xr = x_ref[...]
    blocks = []
    for q in range(P0 // 2):
        lo = 2 * q - 1
        if lo < 0:
            blk = jnp.concatenate(
                [shift_down(xr[:, :, P0 - 1:P0]), xr[:, :, 0:3]], axis=-1)
        elif lo + 4 > P0:
            blk = jnp.concatenate(
                [xr[:, :, lo:P0], shift_up(xr[:, :, 0:1])], axis=-1)
        else:
            blk = xr[:, :, lo:lo + 4]
        blocks.append(blk)
    patches = jnp.concatenate(blocks, axis=0)          # (16*B, N, 4)

    ndf = w1_ref.shape[1]
    y = jnp.zeros((patches.shape[0], N, ndf), f32)
    for t in range(4):
        y = y + patches[:, :, t:t + 1] * w1_ref[t:t + 1, :]
    act = leaky(y)                                     # (16*B, N, ndf)

    # ---- layers 2..5: one batched matmul each (K = 4*Cin), BN(train) + LeakyReLU.
    P = P0 // 2
    for w_ref, g_ref, b_ref in ((w2_ref, g2_ref, b2_ref),
                                (w3_ref, g3_ref, b3_ref),
                                (w4_ref, g4_ref, b4_ref),
                                (w5_ref, g5_ref, b5_ref)):
        act = leaky(batchnorm(conv_mxu(make_patches(act, P), w_ref), g_ref, b_ref))
        P //= 2

    # act: (B, N, ndf*16) channel-last features (single phase left).
    feat_ref[...] = act

    # ---- classifier: Conv1d(ndf*16 -> 1, k=N) == full contraction, + Sigmoid.
    z = jnp.sum(jnp.sum(act * wc_ref[...], axis=2, keepdims=True), axis=1)   # (B, 1)
    cls_ref[...] = 1.0 / (1.0 + jnp.exp(-z))


# ------------------------------ wrapper ---------------------------------------

def _discriminator_pallas(x_phased, params):
    """x_phased: (B, N, 32) f32, x_phased[b, i, p] = x[b, 0, 32*i + p].
    Returns (features_channel_last (B, N, ndf*16), probs (B, 1))."""
    B, N, _ = x_phased.shape
    feats = params["features"]
    wc = params["classifier"]["w"]                 # (1, N, ndf*16)
    C5 = wc.shape[-1]

    args = [x_phased, feats[0]["w"]]
    for lyr in feats[1:]:
        args += [lyr["w"], lyr["gamma"], lyr["beta"]]
    args.append(wc)

    # Single fused pallas_call, whole-array (default) VMEM blocks, no grid:
    # the entire net is a few KB so everything is resident.
    # NOTE(v7x): with no grid this pins the net to one TensorCore; for large
    # production batches, add a batch grid axis marked "parallel" and combine BN
    # statistics across cores (also keeps per-core scratch well under the 64 MiB
    # v7x VMEM).  At B=2 this is a no-op.
    return pl.pallas_call(
        _disc_kernel,
        out_shape=(jax.ShapeDtypeStruct((B, N, C5), jnp.float32),
                   jax.ShapeDtypeStruct((B, 1), jnp.float32)),
    )(*args)


def discriminator_forward(x, params):
    """x: (B, nc=1, L) NCL as in PyTorch.
    Returns (classifier (B,), features (B, ndf*16, L//32)) like the PyTorch module."""
    B, nc, L = x.shape
    assert nc == 1, "Signal_Encoder here expects nc == 1 ECG input"
    assert L % 32 == 0, "input length must be divisible by the total stride (32)"
    N = L // 32
    assert params["classifier"]["w"].shape[1] == N, "classifier kernel must equal L // 32"

    # Phase-major relayout (pure layout plumbing, done by XLA; no data-dependent work).
    x_phased = x.astype(jnp.float32).reshape(B, N, 32)
    feat_cl, probs = _discriminator_pallas(x_phased, params)

    features = jnp.transpose(feat_cl, (0, 2, 1))   # back to PyTorch NCL (B, ndf*16, N)
    classifier = probs[:, 0]                       # == .view(-1, 1).squeeze(1)
    # NOTE: BatchNorm runs in train mode (batch statistics), matching the module's
    # default .train() state.
    # TODO(synk): running_mean/running_var bookkeeping (no effect on this forward output).
    return classifier, features


# ------------------------------ params ----------------------------------------

def init_torch_params(key, nc=1, ndf=4):
    """DCGAN-style init in the original PyTorch layouts:
       conv i: (Cout, Cin, 4);  BN gamma/beta: (Cout,);  classifier: (1, ndf*16, 10)."""
    cfgs = [
        (nc,      ndf,      False),
        (ndf,     ndf * 2,  True),
        (ndf * 2, ndf * 4,  True),
        (ndf * 4, ndf * 8,  True),
        (ndf * 8, ndf * 16, True),
    ]
    keys = jax.random.split(key, len(cfgs) + 1)
    feats = []
    for (cin, cout, bn), lk in zip(cfgs, keys[:-1]):
        wk, gk = jax.random.split(lk)
        layer = {"w": 0.02 * jax.random.normal(wk, (cout, cin, 4), jnp.float32)}
        if bn:
            layer["gamma"] = 1.0 + 0.02 * jax.random.normal(gk, (cout,), jnp.float32)
            layer["beta"] = jnp.zeros((cout,), jnp.float32)
        feats.append(layer)
    wc = 0.02 * jax.random.normal(keys[-1], (1, ndf * 16, 10), jnp.float32)
    return {"features": feats, "classifier": {"w": wc}}


def pack_params(tp, matmul_dtype=_MATMUL_DTYPE):
    """Convert PyTorch-layout params into kernel-ready layouts:
       feature conv: (4*Cin, Cout) with row t*Cin + c = W[o, c, t]  (taps folded into K),
       BN gamma/beta: (1, 1, Cout),  classifier: (1, k, Cin) channel-last."""
    feats = []
    for lyr in tp["features"]:
        cout, cin, k = lyr["w"].shape
        w_k = jnp.transpose(lyr["w"], (2, 1, 0)).reshape(k * cin, cout)
        if matmul_dtype is not None:
            w_k = w_k.astype(matmul_dtype)          # pre-cast once in the wrapper
        entry = {"w": w_k}
        if "gamma" in lyr:
            entry["gamma"] = lyr["gamma"].reshape(1, 1, cout).astype(jnp.float32)
            entry["beta"] = lyr["beta"].reshape(1, 1, cout).astype(jnp.float32)
        feats.append(entry)
    wc = tp["classifier"]["w"]                      # (1, C5, k)
    wck = jnp.transpose(wc[0], (1, 0))[None].astype(jnp.float32)   # (1, k, C5)
    return {"features": feats, "classifier": {"w": wck}}


# ------------------------------ reference (pure JAX/XLA) -----------------------

def _ref_forward(x, tp):
    """Plain XLA implementation of the same module, from PyTorch-layout params."""
    h = x.astype(jnp.float32)
    for lyr in tp["features"]:
        h = lax.conv_general_dilated(h, lyr["w"], window_strides=(2,),
                                     padding=[(1, 1)],
                                     dimension_numbers=("NCH", "OIH", "NCH"))
        if "gamma" in lyr:
            mean = jnp.mean(h, axis=(0, 2), keepdims=True)
            var = jnp.mean((h - mean) ** 2, axis=(0, 2), keepdims=True)
            h = (h - mean) * lax.rsqrt(var + BN_EPS)
            h = h * lyr["gamma"][None, :, None] + lyr["beta"][None, :, None]
        h = jnp.where(h > 0, h, LEAKY_SLOPE * h)
    feats = h
    z = jnp.einsum("bct,oct->bo", feats, tp["classifier"]["w"])
    probs = 1.0 / (1.0 + jnp.exp(-z))
    return probs[:, 0], feats


# --------------------------------- main ----------------------------------------

if __name__ == "__main__":
    key = jax.random.PRNGKey(0)
    kx, kp = jax.random.split(key)

    B, NC, L, NDF = 2, 1, 320, 4
    x = jax.random.normal(kx, (B, NC, L), dtype=jnp.float32)

    torch_params = init_torch_params(kp, nc=NC, ndf=NDF)
    params = pack_params(torch_params, matmul_dtype=_MATMUL_DTYPE)

    fwd = jax.jit(discriminator_forward)
    classifier, features = fwd(x, params)
    jax.block_until_ready((classifier, features))

    assert classifier.shape == (B,), classifier.shape
    assert features.shape == (B, NDF * 16, L // 32), features.shape
    assert bool(jnp.all(jnp.isfinite(features)))
    assert bool(jnp.all((classifier >= 0.0) & (classifier <= 1.0)))

    # Cross-check against the pure-JAX reference (loose tolerance absorbs the
    # in-kernel bf16 weight/activation rounding; real structural bugs show up
    # at O(0.5) on the unit-scale post-BN features).
    ref_cls, ref_feat = _ref_forward(x, torch_params)
    feat_err = float(jnp.max(jnp.abs(features - ref_feat)))
    cls_err = float(jnp.max(jnp.abs(classifier - ref_cls)))
    assert feat_err < 0.25, f"feature mismatch vs reference: {feat_err}"
    assert cls_err < 0.05, f"classifier mismatch vs reference: {cls_err}"

    print("KERNEL_OK")
</pallas_src>

<mosaic_0001>
module attributes {stable_mosaic.version = 11 : i64} {
  func.func @_disc_kernel(%arg0: memref<2x10x32xf32, #tpu.memory_space<vmem>>, %arg1: memref<4x4xbf16, #tpu.memory_space<vmem>>, %arg2: memref<16x8xbf16, #tpu.memory_space<vmem>>, %arg3: memref<1x1x8xf32, #tpu.memory_space<vmem>>, %arg4: memref<1x1x8xf32, #tpu.memory_space<vmem>>, %arg5: memref<32x16xbf16, #tpu.memory_space<vmem>>, %arg6: memref<1x1x16xf32, #tpu.memory_space<vmem>>, %arg7: memref<1x1x16xf32, #tpu.memory_space<vmem>>, %arg8: memref<64x32xbf16, #tpu.memory_space<vmem>>, %arg9: memref<1x1x32xf32, #tpu.memory_space<vmem>>, %arg10: memref<1x1x32xf32, #tpu.memory_space<vmem>>, %arg11: memref<128x64xbf16, #tpu.memory_space<vmem>>, %arg12: memref<1x1x64xf32, #tpu.memory_space<vmem>>, %arg13: memref<1x1x64xf32, #tpu.memory_space<vmem>>, %arg14: memref<1x10x64xf32, #tpu.memory_space<vmem>>, %arg15: memref<2x10x64xf32, #tpu.memory_space<vmem>>, %arg16: memref<2x1xf32, #tpu.memory_space<vmem>>) attributes {dimension_semantics = [], scalar_prefetch = 0 : i64, scratch_operands = 0 : i64, tpu.core_type = #tpu.core_type<tc>} {
    %c0 = arith.constant 0 : index
    %c0_0 = arith.constant 0 : index
    %c0_1 = arith.constant 0 : index
    %0 = vector.load %arg0[%c0, %c0_0, %c0_1] : memref<2x10x32xf32, #tpu.memory_space<vmem>>, vector<2x10x32xf32>
    %1 = vector.extract_strided_slice %0 {offsets = [0, 0, 31], sizes = [2, 10, 1], strides = [1, 1, 1]} : vector<2x10x32xf32> to vector<2x10x1xf32>
    %cst = arith.constant 0.000000e+00 : f32
    %2 = vector.broadcast %cst : f32 to vector<2x1x1xf32>
    %3 = vector.extract_strided_slice %1 {offsets = [0, 0, 0], sizes = [2, 9, 1], strides = [1, 1, 1]} : vector<2x10x1xf32> to vector<2x9x1xf32>
    %4 = tpu.concatenate %2, %3 in 1 : vector<2x1x1xf32>, vector<2x9x1xf32> -> vector<2x10x1xf32>
    %5 = vector.extract_strided_slice %0 {offsets = [0, 0, 0], sizes = [2, 10, 3], strides = [1, 1, 1]} : vector<2x10x32xf32> to vector<2x10x3xf32>
    %6 = tpu.concatenate %4, %5 in 2 : vector<2x10x1xf32>, vector<2x10x3xf32> -> vector<2x10x4xf32>
    %7 = vector.extract_strided_slice %0 {offsets = [0, 0, 1], sizes = [2, 10, 4], strides = [1, 1, 1]} : vector<2x10x32xf32> to vector<2x10x4xf32>
    %8 = vector.extract_strided_slice %0 {offsets = [0, 0, 3], sizes = [2, 10, 4], strides = [1, 1, 1]} : vector<2x10x32xf32> to vector<2x10x4xf32>
    %9 = vector.extract_strided_slice %0 {offsets = [0, 0, 5], sizes = [2, 10, 4], strides = [1, 1, 1]} : vector<2x10x32xf32> to vector<2x10x4xf32>
    %10 = vector.extract_strided_slice %0 {offsets = [0, 0, 7], sizes = [2, 10, 4], strides = [1, 1, 1]} : vector<2x10x32xf32> to vector<2x10x4xf32>
    %11 = vector.extract_strided_slice %0 {offsets = [0, 0, 9], sizes = [2, 10, 4], strides = [1, 1, 1]} : vector<2x10x32xf32> to vector<2x10x4xf32>
    %12 = vector.extract_strided_slice %0 {offsets = [0, 0, 11], sizes = [2, 10, 4], strides = [1, 1, 1]} : vector<2x10x32xf32> to vector<2x10x4xf32>
    %13 = vector.extract_strided_slice %0 {offsets = [0, 0, 13], sizes = [2, 10, 4], strides = [1, 1, 1]} : vector<2x10x32xf32> to vector<2x10x4xf32>
    %14 = vector.extract_strided_slice %0 {offsets = [0, 0, 15], sizes = [2, 10, 4], strides = [1, 1, 1]} : vector<2x10x32xf32> to vector<2x10x4xf32>
    %15 = vector.extract_strided_slice %0 {offsets = [0, 0, 17], sizes = [2, 10, 4], strides = [1, 1, 1]} : vector<2x10x32xf32> to vector<2x10x4xf32>
    %16 = vector.extract_strided_slice %0 {offsets = [0, 0, 19], sizes = [2, 10, 4], strides = [1, 1, 1]} : vector<2x10x32xf32> to vector<2x10x4xf32>
    %17 = vector.extract_strided_slice %0 {offsets = [0, 0, 21], sizes = [2, 10, 4], strides = [1, 1, 1]} : vector<2x10x32xf32> to vector<2x10x4xf32>
    %18 = vector.extract_strided_slice %0 {offsets = [0, 0, 23], sizes = [2, 10, 4], strides = [1, 1, 1]} : vector<2x10x32xf32> to vector<2x10x4xf32>
    %19 = vector.extract_strided_slice %0 {offsets = [0, 0, 25], sizes = [2, 10, 4], strides = [1, 1, 1]} : vector<2x10x32xf32> to vector<2x10x4xf32>
    %20 = vector.extract_strided_slice %0 {offsets = [0, 0, 27], sizes = [2, 10, 4], strides = [1, 1, 1]} : vector<2x10x32xf32> to vector<2x10x4xf32>
    %21 = vector.extract_strided_slice %0 {offsets = [0, 0, 29], sizes = [2, 10, 3], strides = [1, 1, 1]} : vector<2x10x32xf32> to vector<2x10x3xf32>
    %22 = vector.extract_strided_slice %0 {offsets = [0, 0, 0], sizes = [2, 10, 1], strides = [1, 1, 1]} : vector<2x10x32xf32> to vector<2x10x1xf32>
    %23 = vector.extract_strided_slice %22 {offsets = [0, 1, 0], sizes = [2, 9, 1], strides = [1, 1, 1]} : vector<2x10x1xf32> to vector<2x9x1xf32>
    %cst_2 = arith.constant 0.000000e+00 : f32
    %24 = vector.broadcast %cst_2 : f32 to vector<2x1x1xf32>
    %25 = tpu.concatenate %23, %24 in 1 : vector<2x9x1xf32>, vector<2x1x1xf32> -> vector<2x10x1xf32>
    %26 = tpu.concatenate %21, %25 in 2 : vector<2x10x3xf32>, vector<2x10x1xf32> -> vector<2x10x4xf32>
    %27 = tpu.concatenate %6, %7, %8, %9, %10, %11, %12, %13, %14, %15, %16, %17, %18, %19, %20, %26 in 0 : vector<2x10x4xf32>, vector<2x10x4xf32>, vector<2x10x4xf32>, vector<2x10x4xf32>, vector<2x10x4xf32>, vector<2x10x4xf32>, vector<2x10x4xf32>, vector<2x10x4xf32>, vector<2x10x4xf32>, vector<2x10x4xf32>, vector<2x10x4xf32>, vector<2x10x4xf32>, vector<2x10x4xf32>, vector<2x10x4xf32>, vector<2x10x4xf32>, vector<2x10x4xf32> -> vector<32x10x4xf32>
    %cst_3 = arith.constant 0.000000e+00 : f32
    %28 = vector.broadcast %cst_3 : f32 to vector<32x10x4xf32>
    %29 = vector.extract_strided_slice %27 {offsets = [0, 0, 0], sizes = [32, 10, 1], strides = [1, 1, 1]} : vector<32x10x4xf32> to vector<32x10x1xf32>
    %c0_4 = arith.constant 0 : index
    %c0_5 = arith.constant 0 : index
    %30 = vector.load %arg1[%c0_4, %c0_5] : memref<4x4xbf16, #tpu.memory_space<vmem>>, vector<1x4xbf16>
    %31 = arith.extf %30 : vector<1x4xbf16> to vector<1x4xf32>
    %32 = vector.shape_cast %31 : vector<1x4xf32> to vector<1x1x4xf32>
    %33 = vector.broadcast %29 : vector<32x10x1xf32> to vector<32x10x4xf32>
    %34 = vector.broadcast %32 : vector<1x1x4xf32> to vector<32x10x4xf32>
    %35 = arith.mulf %33, %34 : vector<32x10x4xf32>
    %36 = arith.addf %28, %35 : vector<32x10x4xf32>
    %37 = vector.extract_strided_slice %27 {offsets = [0, 0, 1], sizes = [32, 10, 1], strides = [1, 1, 1]} : vector<32x10x4xf32> to vector<32x10x1xf32>
    %c1 = arith.constant 1 : index
    %c0_6 = arith.constant 0 : index
    %38 = vector.load %arg1[%c1, %c0_6] : memref<4x4xbf16, #tpu.memory_space<vmem>>, vector<1x4xbf16>
    %39 = arith.extf %38 : vector<1x4xbf16> to vector<1x4xf32>
    %40 = vector.shape_cast %39 : vector<1x4xf32> to vector<1x1x4xf32>
    %41 = vector.broadcast %37 : vector<32x10x1xf32> to vector<32x10x4xf32>
    %42 = vector.broadcast %40 : vector<1x1x4xf32> to vector<32x10x4xf32>
    %43 = arith.mulf %41, %42 : vector<32x10x4xf32>
    %44 = arith.addf %36, %43 : vector<32x10x4xf32>
    %45 = vector.extract_strided_slice %27 {offsets = [0, 0, 2], sizes = [32, 10, 1], strides = [1, 1, 1]} : vector<32x10x4xf32> to vector<32x10x1xf32>
    %c2 = arith.constant 2 : index
    %c0_7 = arith.constant 0 : index
    %46 = vector.load %arg1[%c2, %c0_7] : memref<4x4xbf16, #tpu.memory_space<vmem>>, vector<1x4xbf16>
    %47 = arith.extf %46 : vector<1x4xbf16> to vector<1x4xf32>
    %48 = vector.shape_cast %47 : vector<1x4xf32> to vector<1x1x4xf32>
    %49 = vector.broadcast %45 : vector<32x10x1xf32> to vector<32x10x4xf32>
    %50 = vector.broadcast %48 : vector<1x1x4xf32> to vector<32x10x4xf32>
    %51 = arith.mulf %49, %50 : vector<32x10x4xf32>
    %52 = arith.addf %44, %51 : vector<32x10x4xf32>
    %53 = vector.extract_strided_slice %27 {offsets = [0, 0, 3], sizes = [32, 10, 1], strides = [1, 1, 1]} : vector<32x10x4xf32> to vector<32x10x1xf32>
    %c3 = arith.constant 3 : index
    %c0_8 = arith.constant 0 : index
    %54 = vector.load %arg1[%c3, %c0_8] : memref<4x4xbf16, #tpu.memory_space<vmem>>, vector<1x4xbf16>
    %55 = arith.extf %54 : vector<1x4xbf16> to vector<1x4xf32>
    %56 = vector.shape_cast %55 : vector<1x4xf32> to vector<1x1x4xf32>
    %57 = vector.broadcast %53 : vector<32x10x1xf32> to vector<32x10x4xf32>
    %58 = vector.broadcast %56 : vector<1x1x4xf32> to vector<32x10x4xf32>
    %59 = arith.mulf %57, %58 : vector<32x10x4xf32>
    %60 = arith.addf %52, %59 : vector<32x10x4xf32>
    %cst_9 = arith.constant 0.000000e+00 : f32
    %61 = vector.broadcast %cst_9 : f32 to vector<32x10x4xf32>
    %62 = arith.cmpf ogt, %60, %61 : vector<32x10x4xf32>
    %cst_10 = arith.constant 2.000000e-01 : f32
    %63 = vector.broadcast %cst_10 : f32 to vector<32x10x4xf32>
    %64 = arith.mulf %63, %60 : vector<32x10x4xf32>
    %65 = arith.select %62, %60, %64 : vector<32x10x4xi1>, vector<32x10x4xf32>
    %66 = vector.extract_strided_slice %65 {offsets = [30, 0, 0], sizes = [2, 10, 4], strides = [1, 1, 1]} : vector<32x10x4xf32> to vector<2x10x4xf32>
    %cst_11 = arith.constant 0.000000e+00 : f32
    %67 = vector.broadcast %cst_11 : f32 to vector<2x1x4xf32>
    %68 = vector.extract_strided_slice %66 {offsets = [0, 0, 0], sizes = [2, 9, 4], strides = [1, 1, 1]} : vector<2x10x4xf32> to vector<2x9x4xf32>
    %69 = tpu.concatenate %67, %68 in 1 : vector<2x1x4xf32>, vector<2x9x4xf32> -> vector<2x10x4xf32>
    %70 = vector.extract_strided_slice %65 {offsets = [0, 0, 0], sizes = [2, 10, 4], strides = [1, 1, 1]} : vector<32x10x4xf32> to vector<2x10x4xf32>
    %71 = vector.extract_strided_slice %65 {offsets = [2, 0, 0], sizes = [2, 10, 4], strides = [1, 1, 1]} : vector<32x10x4xf32> to vector<2x10x4xf32>
    %72 = vector.extract_strided_slice %65 {offsets = [4, 0, 0], sizes = [2, 10, 4], strides = [1, 1, 1]} : vector<32x10x4xf32> to vector<2x10x4xf32>
    %73 = tpu.concatenate %69, %70, %71, %72 in 2 : vector<2x10x4xf32>, vector<2x10x4xf32>, vector<2x10x4xf32>, vector<2x10x4xf32> -> vector<2x10x16xf32>
    %74 = vector.extract_strided_slice %65 {offsets = [2, 0, 0], sizes = [2, 10, 4], strides = [1, 1, 1]} : vector<32x10x4xf32> to vector<2x10x4xf32>
    %75 = vector.extract_strided_slice %65 {offsets = [4, 0, 0], sizes = [2, 10, 4], strides = [1, 1, 1]} : vector<32x10x4xf32> to vector<2x10x4xf32>
    %76 = vector.extract_strided_slice %65 {offsets = [6, 0, 0], sizes = [2, 10, 4], strides = [1, 1, 1]} : vector<32x10x4xf32> to vector<2x10x4xf32>
    %77 = vector.extract_strided_slice %65 {offsets = [8, 0, 0], sizes = [2, 10, 4], strides = [1, 1, 1]} : vector<32x10x4xf32> to vector<2x10x4xf32>
    %78 = tpu.concatenate %74, %75, %76, %77 in 2 : vector<2x10x4xf32>, vector<2x10x4xf32>, vector<2x10x4xf32>, vector<2x10x4xf32> -> vector<2x10x16xf32>
    %79 = vector.extract_strided_slice %65 {offsets = [6, 0, 0], sizes = [2, 10, 4], strides = [1, 1, 1]} : vector<32x10x4xf32> to vector<2x10x4xf32>
    %80 = vector.extract_strided_slice %65 {offsets = [8, 0, 0], sizes = [2, 10, 4], strides = [1, 1, 1]} : vector<32x10x4xf32> to vector<2x10x4xf32>
    %81 = vector.extract_strided_slice %65 {offsets = [10, 0, 0], sizes = [2, 10, 4], strides = [1, 1, 1]} : vector<32x10x4xf32> to vector<2x10x4xf32>
    %82 = vector.extract_strided_slice %65 {offsets = [12, 0, 0], sizes = [2, 10, 4], strides = [1, 1, 1]} : vector<32x10x4xf32> to vector<2x10x4xf32>
    %83 = tpu.concatenate %79, %80, %81, %82 in 2 : vector<2x10x4xf32>, vector<2x10x4xf32>, vector<2x10x4xf32>, vector<2x10x4xf32> -> vector<2x10x16xf32>
    %84 = vector.extract_strided_slice %65 {offsets = [10, 0, 0], sizes = [2, 10, 4], strides = [1, 1, 1]} : vector<32x10x4xf32> to vector<2x10x4xf32>
    %85 = vector.extract_strided_slice %65 {offsets = [12, 0, 0], sizes = [2, 10, 4], strides = [1, 1, 1]} : vector<32x10x4xf32> to vector<2x10x4xf32>
    %86 = vector.extract_strided_slice %65 {offsets = [14, 0, 0], sizes = [2, 10, 4], strides = [1, 1, 1]} : vector<32x10x4xf32> to vector<2x10x4xf32>
    %87 = vector.extract_strided_slice %65 {offsets = [16, 0, 0], sizes = [2, 10, 4], strides = [1, 1, 1]} : vector<32x10x4xf32> to vector<2x10x4xf32>
    %88 = tpu.concatenate %84, %85, %86, %87 in 2 : vector<2x10x4xf32>, vector<2x10x4xf32>, vector<2x10x4xf32>, vector<2x10x4xf32> -> vector<2x10x16xf32>
    %89 = vector.extract_strided_slice %65 {offsets = [14, 0, 0], sizes = [2, 10, 4], strides = [1, 1, 1]} : vector<32x10x4xf32> to vector<2x10x4xf32>
    %90 = vector.extract_strided_slice %65 {offsets = [16, 0, 0], sizes = [2, 10, 4], strides = [1, 1, 1]} : vector<32x10x4xf32> to vector<2x10x4xf32>
    %91 = vector.extract_strided_slice %65 {offsets = [18, 0, 0], sizes = [2, 10, 4], strides = [1, 1, 1]} : vector<32x10x4xf32> to vector<2x10x4xf32>
    %92 = vector.extract_strided_slice %65 {offsets = [20, 0, 0], sizes = [2, 10, 4], strides = [1, 1, 1]} : vector<32x10x4xf32> to vector<2x10x4xf32>
    %93 = tpu.concatenate %89, %90, %91, %92 in 2 : vector<2x10x4xf32>, vector<2x10x4xf32>, vector<2x10x4xf32>, vector<2x10x4xf32> -> vector<2x10x16xf32>
    %94 = vector.extract_strided_slice %65 {offsets = [18, 0, 0], sizes = [2, 10, 4], strides = [1, 1, 1]} : vector<32x10x4xf32> to vector<2x10x4xf32>
    %95 = vector.extract_strided_slice %65 {offsets = [20, 0, 0], sizes = [2, 10, 4], strides = [1, 1, 1]} : vector<32x10x4xf32> to vector<2x10x4xf32>
    %96 = vector.extract_strided_slice %65 {offsets = [22, 0, 0], sizes = [2, 10, 4], strides = [1, 1, 1]} : vector<32x10x4xf32> to vector<2x10x4xf32>
    %97 = vector.extract_strided_slice %65 {offsets = [24, 0, 0], sizes = [2, 10, 4], strides = [1, 1, 1]} : vector<32x10x4xf32> to vector<2x10x4xf32>
    %98 = tpu.concatenate %94, %95, %96, %97 in 2 : vector<2x10x4xf32>, vector<2x10x4xf32>, vector<2x10x4xf32>, vector<2x10x4xf32> -> vector<2x10x16xf32>
    %99 = vector.extract_strided_slice %65 {offsets = [22, 0, 0], sizes = [2, 10, 4], strides = [1, 1, 1]} : vector<32x10x4xf32> to vector<2x10x4xf32>
    %100 = vector.extract_strided_slice %65 {offsets = [24, 0, 0], sizes = [2, 10, 4], strides = [1, 1, 1]} : vector<32x10x4xf32> to vector<2x10x4xf32>
    %101 = vector.extract_strided_slice %65 {offsets = [26, 0, 0], sizes = [2, 10, 4], strides = [1, 1, 1]} : vector<32x10x4xf32> to vector<2x10x4xf32>
    %102 = vector.extract_strided_slice %65 {offsets = [28, 0, 0], sizes = [2, 10, 4], strides = [1, 1, 1]} : vector<32x10x4xf32> to vector<2x10x4xf32>
    %103 = tpu.concatenate %99, %100, %101, %102 in 2 : vector<2x10x4xf32>, vector<2x10x4xf32>, vector<2x10x4xf32>, vector<2x10x4xf32> -> vector<2x10x16xf32>
    %104 = vector.extract_strided_slice %65 {offsets = [26, 0, 0], sizes = [2, 10, 4], strides = [1, 1, 1]} : vector<32x10x4xf32> to vector<2x10x4xf32>
    %105 = vector.extract_strided_slice %65 {offsets = [28, 0, 0], sizes = [2, 10, 4], strides = [1, 1, 1]} : vector<32x10x4xf32> to vector<2x10x4xf32>
    %106 = vector.extract_strided_slice %65 {offsets = [30, 0, 0], sizes = [2, 10, 4], strides = [1, 1, 1]} : vector<32x10x4xf32> to vector<2x10x4xf32>
    %107 = vector.extract_strided_slice %65 {offsets = [0, 0, 0], sizes = [2, 10, 4], strides = [1, 1, 1]} : vector<32x10x4xf32> to vector<2x10x4xf32>
    %108 = vector.extract_strided_slice %107 {offsets = [0, 1, 0], sizes = [2, 9, 4], strides = [1, 1, 1]} : vector<2x10x4xf32> to vector<2x9x4xf32>
    %cst_12 = arith.constant 0.000000e+00 : f32
    %109 = vector.broadcast %cst_12 : f32 to vector<2x1x4xf32>
    %110 = tpu.concatenate %108, %109 in 1 : vector<2x9x4xf32>, vector<2x1x4xf32> -> vector<2x10x4xf32>
    %111 = tpu.concatenate %104, %105, %106, %110 in 2 : vector<2x10x4xf32>, vector<2x10x4xf32>, vector<2x10x4xf32>, vector<2x10x4xf32> -> vector<2x10x16xf32>
    %112 = tpu.concatenate %73, %78, %83, %88, %93, %98, %103, %111 in 0 : vector<2x10x16xf32>, vector<2x10x16xf32>, vector<2x10x16xf32>, vector<2x10x16xf32>, vector<2x10x16xf32>, vector<2x10x16xf32>, vector<2x10x16xf32>, vector<2x10x16xf32> -> vector<16x10x16xf32>
    %c0_13 = arith.constant 0 : index
    %c0_14 = arith.constant 0 : index
    %113 = vector.load %arg2[%c0_13, %c0_14] : memref<16x8xbf16, #tpu.memory_space<vmem>>, vector<16x8xbf16>
    %114 = arith.truncf %112 : vector<16x10x16xf32> to vector<16x10x16xbf16>
    %115 = vector.shape_cast %113 : vector<16x8xbf16> to vector<1x16x8xbf16>
    %116 = vector.broadcast %115 : vector<1x16x8xbf16> to vector<16x16x8xbf16>
    "tpu.trace_start"() <{level = 10 : i32, message = "znk,zko->zno"}> : () -> ()
    %cst_15 = arith.constant dense<0.000000e+00> : vector<16x10x8xf32>
    %117 = tpu.matmul %114, %116, %cst_15 {dimension_numbers = #tpu.dot_dimension_numbers<[2], [1], [1], [2], [0, 0, 0, 1, 1, 2], [0], [0]>} : vector<16x10x16xbf16>, vector<16x16x8xbf16>, vector<16x10x8xf32> -> vector<16x10x8xf32>
    "tpu.trace_stop"() : () -> ()
    %cst_16 = arith.constant dense<0.000000e+00> : vector<16x8xf32>
    %118 = vector.multi_reduction <add>, %117, %cst_16 [1] : vector<16x10x8xf32> to vector<16x8xf32>
    %119 = vector.shape_cast %118 : vector<16x8xf32> to vector<16x1x8xf32>
    %cst_17 = arith.constant dense<0.000000e+00> : vector<1x8xf32>
    %120 = vector.multi_reduction <add>, %119, %cst_17 [0] : vector<16x1x8xf32> to vector<1x8xf32>
    %121 = vector.shape_cast %120 : vector<1x8xf32> to vector<1x1x8xf32>
    %cst_18 = arith.constant 6.250000e-03 : f32
    %122 = vector.broadcast %cst_18 : f32 to vector<1x1x8xf32>
    %123 = arith.mulf %121, %122 : vector<1x1x8xf32>
    %124 = vector.broadcast %123 : vector<1x1x8xf32> to vector<16x10x8xf32>
    %125 = arith.subf %117, %124 : vector<16x10x8xf32>
    %126 = arith.mulf %125, %125 : vector<16x10x8xf32>
    %cst_19 = arith.constant dense<0.000000e+00> : vector<16x8xf32>
    %127 = vector.multi_reduction <add>, %126, %cst_19 [1] : vector<16x10x8xf32> to vector<16x8xf32>
    %128 = vector.shape_cast %127 : vector<16x8xf32> to vector<16x1x8xf32>
    %cst_20 = arith.constant dense<0.000000e+00> : vector<1x8xf32>
    %129 = vector.multi_reduction <add>, %128, %cst_20 [0] : vector<16x1x8xf32> to vector<1x8xf32>
    %130 = vector.shape_cast %129 : vector<1x8xf32> to vector<1x1x8xf32>
    %cst_21 = arith.constant 6.250000e-03 : f32
    %131 = vector.broadcast %cst_21 : f32 to vector<1x1x8xf32>
    %132 = arith.mulf %130, %131 : vector<1x1x8xf32>
    %c0_22 = arith.constant 0 : index
    %c0_23 = arith.constant 0 : index
    %c0_24 = arith.constant 0 : index
    %133 = vector.load %arg3[%c0_22, %c0_23, %c0_24] : memref<1x1x8xf32, #tpu.memory_space<vmem>>, vector<1x1x8xf32>
    %cst_25 = arith.constant 9.99999974E-6 : f32
    %134 = vector.broadcast %cst_25 : f32 to vector<1x1x8xf32>
    %135 = arith.addf %132, %134 : vector<1x1x8xf32>
    %136 = math.rsqrt %135 : vector<1x1x8xf32>
    %137 = arith.mulf %133, %136 : vector<1x1x8xf32>
    %138 = vector.broadcast %137 : vector<1x1x8xf32> to vector<16x10x8xf32>
    %139 = arith.mulf %125, %138 : vector<16x10x8xf32>
    %c0_26 = arith.constant 0 : index
    %c0_27 = arith.constant 0 : index
    %c0_28 = arith.constant 0 : index
    %140 = vector.load %arg4[%c0_26, %c0_27, %c0_28] : memref<1x1x8xf32, #tpu.memory_space<vmem>>, vector<1x1x8xf32>
    %141 = vector.broadcast %140 : vector<1x1x8xf32> to vector<16x10x8xf32>
    %142 = arith.addf %139, %141 : vector<16x10x8xf32>
    %cst_29 = arith.constant 0.000000e+00 : f32
    %143 = vector.broadcast %cst_29 : f32 to vector<16x10x8xf32>
    %144 = arith.cmpf ogt, %142, %143 : vector<16x10x8xf32>
    %cst_30 = arith.constant 2.000000e-01 : f32
    %145 = vector.broadcast %cst_30 : f32 to vector<16x10x8xf32>
    %146 = arith.mulf %145, %142 : vector<16x10x8xf32>
    %147 = arith.select %144, %142, %146 : vector<16x10x8xi1>, vector<16x10x8xf32>
    %148 = vector.extract_strided_slice %147 {offsets = [14, 0, 0], sizes = [2, 10, 8], strides = [1, 1, 1]} : vector<16x10x8xf32> to vector<2x10x8xf32>
    %cst_31 = arith.constant 0.000000e+00 : f32
    %149 = vector.broadcast %cst_31 : f32 to vector<2x1x8xf32>
    %150 = vector.extract_strided_slice %148 {offsets = [0, 0, 0], sizes = [2, 9, 8], strides = [1, 1, 1]} : vector<2x10x8xf32> to vector<2x9x8xf32>
    %151 = tpu.concatenate %149, %150 in 1 : vector<2x1x8xf32>, vector<2x9x8xf32> -> vector<2x10x8xf32>
    %152 = vector.extract_strided_slice %147 {offsets = [0, 0, 0], sizes = [2, 10, 8], strides = [1, 1, 1]} : vector<16x10x8xf32> to vector<2x10x8xf32>
    %153 = vector.extract_strided_slice %147 {offsets = [2, 0, 0], sizes = [2, 10, 8], strides = [1, 1, 1]} : vector<16x10x8xf32> to vector<2x10x8xf32>
    %154 = vector.extract_strided_slice %147 {offsets = [4, 0, 0], sizes = [2, 10, 8], strides = [1, 1, 1]} : vector<16x10x8xf32> to vector<2x10x8xf32>
    %155 = tpu.concatenate %151, %152, %153, %154 in 2 : vector<2x10x8xf32>, vector<2x10x8xf32>, vector<2x10x8xf32>, vector<2x10x8xf32> -> vector<2x10x32xf32>
    %156 = vector.extract_strided_slice %147 {offsets = [2, 0, 0], sizes = [2, 10, 8], strides = [1, 1, 1]} : vector<16x10x8xf32> to vector<2x10x8xf32>
    %157 = vector.extract_strided_slice %147 {offsets = [4, 0, 0], sizes = [2, 10, 8], strides = [1, 1, 1]} : vector<16x10x8xf32> to vector<2x10x8xf32>
    %158 = vector.extract_strided_slice %147 {offsets = [6, 0, 0], sizes = [2, 10, 8], strides = [1, 1, 1]} : vector<16x10x8xf32> to vector<2x10x8xf32>
    %159 = vector.extract_strided_slice %147 {offsets = [8, 0, 0], sizes = [2, 10, 8], strides = [1, 1, 1]} : vector<16x10x8xf32> to vector<2x10x8xf32>
    %160 = tpu.concatenate %156, %157, %158, %159 in 2 : vector<2x10x8xf32>, vector<2x10x8xf32>, vector<2x10x8xf32>, vector<2x10x8xf32> -> vector<2x10x32xf32>
    %161 = vector.extract_strided_slice %147 {offsets = [6, 0, 0], sizes = [2, 10, 8], strides = [1, 1, 1]} : vector<16x10x8xf32> to vector<2x10x8xf32>
    %162 = vector.extract_strided_slice %147 {offsets = [8, 0, 0], sizes = [2, 10, 8], strides = [1, 1, 1]} : vector<16x10x8xf32> to vector<2x10x8xf32>
    %163 = vector.extract_strided_slice %147 {offsets = [10, 0, 0], sizes = [2, 10, 8], strides = [1, 1, 1]} : vector<16x10x8xf32> to vector<2x10x8xf32>
    %164 = vector.extract_strided_slice %147 {offsets = [12, 0, 0], sizes = [2, 10, 8], strides = [1, 1, 1]} : vector<16x10x8xf32> to vector<2x10x8xf32>
    %165 = tpu.concatenate %161, %162, %163, %164 in 2 : vector<2x10x8xf32>, vector<2x10x8xf32>, vector<2x10x8xf32>, vector<2x10x8xf32> -> vector<2x10x32xf32>
    %166 = vector.extract_strided_slice %147 {offsets = [10, 0, 0], sizes = [2, 10, 8], strides = [1, 1, 1]} : vector<16x10x8xf32> to vector<2x10x8xf32>
    %167 = vector.extract_strided_slice %147 {offsets = [12, 0, 0], sizes = [2, 10, 8], strides = [1, 1, 1]} : vector<16x10x8xf32> to vector<2x10x8xf32>
    %168 = vector.extract_strided_slice %147 {offsets = [14, 0, 0], sizes = [2, 10, 8], strides = [1, 1, 1]} : vector<16x10x8xf32> to vector<2x10x8xf32>
    %169 = vector.extract_strided_slice %147 {offsets = [0, 0, 0], sizes = [2, 10, 8], strides = [1, 1, 1]} : vector<16x10x8xf32> to vector<2x10x8xf32>
    %170 = vector.extract_strided_slice %169 {offsets = [0, 1, 0], sizes = [2, 9, 8], strides = [1, 1, 1]} : vector<2x10x8xf32> to vector<2x9x8xf32>
    %cst_32 = arith.constant 0.000000e+00 : f32
    %171 = vector.broadcast %cst_32 : f32 to vector<2x1x8xf32>
    %172 = tpu.concatenate %170, %171 in 1 : vector<2x9x8xf32>, vector<2x1x8xf32> -> vector<2x10x8xf32>
    %173 = tpu.concatenate %166, %167, %168, %172 in 2 : vector<2x10x8xf32>, vector<2x10x8xf32>, vector<2x10x8xf32>, vector<2x10x8xf32> -> vector<2x10x32xf32>
    %174 = tpu.concatenate %155, %160, %165, %173 in 0 : vector<2x10x32xf32>, vector<2x10x32xf32>, vector<2x10x32xf32>, vector<2x10x32xf32> -> vector<8x10x32xf32>
    %c0_33 = arith.constant 0 : index
    %c0_34 = arith.constant 0 : index
    %175 = vector.load %arg5[%c0_33, %c0_34] : memref<32x16xbf16, #tpu.memory_space<vmem>>, vector<32x16xbf16>
    %176 = arith.truncf %174 : vector<8x10x32xf32> to vector<8x10x32xbf16>
    %177 = vector.shape_cast %175 : vector<32x16xbf16> to vector<1x32x16xbf16>
    %178 = vector.broadcast %177 : vector<1x32x16xbf16> to vector<8x32x16xbf16>
    "tpu.trace_start"() <{level = 10 : i32, message = "znk,zko->zno"}> : () -> ()
    %cst_35 = arith.constant dense<0.000000e+00> : vector<8x10x16xf32>
    %179 = tpu.matmul %176, %178, %cst_35 {dimension_numbers = #tpu.dot_dimension_numbers<[2], [1], [1], [2], [0, 0, 0, 1, 1, 2], [0], [0]>} : vector<8x10x32xbf16>, vector<8x32x16xbf16>, vector<8x10x16xf32> -> vector<8x10x16xf32>
    "tpu.trace_stop"() : () -> ()
    %cst_36 = arith.constant dense<0.000000e+00> : vector<8x16xf32>
    %180 = vector.multi_reduction <add>, %179, %cst_36 [1] : vector<8x10x16xf32> to vector<8x16xf32>
    %181 = vector.shape_cast %180 : vector<8x16xf32> to vector<8x1x16xf32>
    %cst_37 = arith.constant dense<0.000000e+00> : vector<1x16xf32>
    %182 = vector.multi_reduction <add>, %181, %cst_37 [0] : vector<8x1x16xf32> to vector<1x16xf32>
    %183 = vector.shape_cast %182 : vector<1x16xf32> to vector<1x1x16xf32>
    %cst_38 = arith.constant 1.250000e-02 : f32
    %184 = vector.broadcast %cst_38 : f32 to vector<1x1x16xf32>
    %185 = arith.mulf %183, %184 : vector<1x1x16xf32>
    %186 = vector.broadcast %185 : vector<1x1x16xf32> to vector<8x10x16xf32>
    %187 = arith.subf %179, %186 : vector<8x10x16xf32>
    %188 = arith.mulf %187, %187 : vector<8x10x16xf32>
    %cst_39 = arith.constant dense<0.000000e+00> : vector<8x16xf32>
    %189 = vector.multi_reduction <add>, %188, %cst_39 [1] : vector<8x10x16xf32> to vector<8x16xf32>
    %190 = vector.shape_cast %189 : vector<8x16xf32> to vector<8x1x16xf32>
    %cst_40 = arith.constant dense<0.000000e+00> : vector<1x16xf32>
    %191 = vector.multi_reduction <add>, %190, %cst_40 [0] : vector<8x1x16xf32> to vector<1x16xf32>
    %192 = vector.shape_cast %191 : vector<1x16xf32> to vector<1x1x16xf32>
    %cst_41 = arith.constant 1.250000e-02 : f32
    %193 = vector.broadcast %cst_41 : f32 to vector<1x1x16xf32>
    %194 = arith.mulf %192, %193 : vector<1x1x16xf32>
    %c0_42 = arith.constant 0 : index
    %c0_43 = arith.constant 0 : index
    %c0_44 = arith.constant 0 : index
    %195 = vector.load %arg6[%c0_42, %c0_43, %c0_44] : memref<1x1x16xf32, #tpu.memory_space<vmem>>, vector<1x1x16xf32>
    %cst_45 = arith.constant 9.99999974E-6 : f32
    %196 = vector.broadcast %cst_45 : f32 to vector<1x1x16xf32>
    %197 = arith.addf %194, %196 : vector<1x1x16xf32>
    %198 = math.rsqrt %197 : vector<1x1x16xf32>
    %199 = arith.mulf %195, %198 : vector<1x1x16xf32>
    %200 = vector.broadcast %199 : vector<1x1x16xf32> to vector<8x10x16xf32>
    %201 = arith.mulf %187, %200 : vector<8x10x16xf32>
    %c0_46 = arith.constant 0 : index
    %c0_47 = arith.constant 0 : index
    %c0_48 = arith.constant 0 : index
    %202 = vector.load %arg7[%c0_46, %c0_47, %c0_48] : memref<1x1x16xf32, #tpu.memory_space<vmem>>, vector<1x1x16xf32>
    %203 = vector.broadcast %202 : vector<1x1x16xf32> to vector<8x10x16xf32>
    %204 = arith.addf %201, %203 : vector<8x10x16xf32>
    %cst_49 = arith.constant 0.000000e+00 : f32
    %205 = vector.broadcast %cst_49 : f32 to vector<8x10x16xf32>
    %206 = arith.cmpf ogt, %204, %205 : vector<8x10x16xf32>
    %cst_50 = arith.constant 2.000000e-01 : f32
    %207 = vector.broadcast %cst_50 : f32 to vector<8x10x16xf32>
    %208 = arith.mulf %207, %204 : vector<8x10x16xf32>
    %209 = arith.select %206, %204, %208 : vector<8x10x16xi1>, vector<8x10x16xf32>
    %210 = vector.extract_strided_slice %209 {offsets = [6, 0, 0], sizes = [2, 10, 16], strides = [1, 1, 1]} : vector<8x10x16xf32> to vector<2x10x16xf32>
    %cst_51 = arith.constant 0.000000e+00 : f32
    %211 = vector.broadcast %cst_51 : f32 to vector<2x1x16xf32>
    %212 = vector.extract_strided_slice %210 {offsets = [0, 0, 0], sizes = [2, 9, 16], strides = [1, 1, 1]} : vector<2x10x16xf32> to vector<2x9x16xf32>
    %213 = tpu.concatenate %211, %212 in 1 : vector<2x1x16xf32>, vector<2x9x16xf32> -> vector<2x10x16xf32>
    %214 = vector.extract_strided_slice %209 {offsets = [0, 0, 0], sizes = [2, 10, 16], strides = [1, 1, 1]} : vector<8x10x16xf32> to vector<2x10x16xf32>
    %215 = vector.extract_strided_slice %209 {offsets = [2, 0, 0], sizes = [2, 10, 16], strides = [1, 1, 1]} : vector<8x10x16xf32> to vector<2x10x16xf32>
    %216 = vector.extract_strided_slice %209 {offsets = [4, 0, 0], sizes = [2, 10, 16], strides = [1, 1, 1]} : vector<8x10x16xf32> to vector<2x10x16xf32>
    %217 = tpu.concatenate %213, %214, %215, %216 in 2 : vector<2x10x16xf32>, vector<2x10x16xf32>, vector<2x10x16xf32>, vector<2x10x16xf32> -> vector<2x10x64xf32>
    %218 = vector.extract_strided_slice %209 {offsets = [2, 0, 0], sizes = [2, 10, 16], strides = [1, 1, 1]} : vector<8x10x16xf32> to vector<2x10x16xf32>
    %219 = vector.extract_strided_slice %209 {offsets = [4, 0, 0], sizes = [2, 10, 16], strides = [1, 1, 1]} : vector<8x10x16xf32> to vector<2x10x16xf32>
    %220 = vector.extract_strided_slice %209 {offsets = [6, 0, 0], sizes = [2, 10, 16], strides = [1, 1, 1]} : vector<8x10x16xf32> to vector<2x10x16xf32>
    %221 = vector.extract_strided_slice %209 {offsets = [0, 0, 0], sizes = [2, 10, 16], strides = [1, 1, 1]} : vector<8x10x16xf32> to vector<2x10x16xf32>
    %222 = vector.extract_strided_slice %221 {offsets = [0, 1, 0], sizes = [2, 9, 16], strides = [1, 1, 1]} : vector<2x10x16xf32> to vector<2x9x16xf32>
    %cst_52 = arith.constant 0.000000e+00 : f32
    %223 = vector.broadcast %cst_52 : f32 to vector<2x1x16xf32>
    %224 = tpu.concatenate %222, %223 in 1 : vector<2x9x16xf32>, vector<2x1x16xf32> -> vector<2x10x16xf32>
    %225 = tpu.concatenate %218, %219, %220, %224 in 2 : vector<2x10x16xf32>, vector<2x10x16xf32>, vector<2x10x16xf32>, vector<2x10x16xf32> -> vector<2x10x64xf32>
    %226 = tpu.concatenate %217, %225 in 0 : vector<2x10x64xf32>, vector<2x10x64xf32> -> vector<4x10x64xf32>
    %c0_53 = arith.constant 0 : index
    %c0_54 = arith.constant 0 : index
    %227 = vector.load %arg8[%c0_53, %c0_54] : memref<64x32xbf16, #tpu.memory_space<vmem>>, vector<64x32xbf16>
    %228 = arith.truncf %226 : vector<4x10x64xf32> to vector<4x10x64xbf16>
    %229 = vector.shape_cast %227 : vector<64x32xbf16> to vector<1x64x32xbf16>
    %230 = vector.broadcast %229 : vector<1x64x32xbf16> to vector<4x64x32xbf16>
    "tpu.trace_start"() <{level = 10 : i32, message = "znk,zko->zno"}> : () -> ()
    %cst_55 = arith.constant dense<0.000000e+00> : vector<4x10x32xf32>
    %231 = tpu.matmul %228, %230, %cst_55 {dimension_numbers = #tpu.dot_dimension_numbers<[2], [1], [1], [2], [0, 0, 0, 1, 1, 2], [0], [0]>} : vector<4x10x64xbf16>, vector<4x64x32xbf16>, vector<4x10x32xf32> -> vector<4x10x32xf32>
    "tpu.trace_stop"() : () -> ()
    %cst_56 = arith.constant dense<0.000000e+00> : vector<4x32xf32>
    %232 = vector.multi_reduction <add>, %231, %cst_56 [1] : vector<4x10x32xf32> to vector<4x32xf32>
    %233 = vector.shape_cast %232 : vector<4x32xf32> to vector<4x1x32xf32>
    %cst_57 = arith.constant dense<0.000000e+00> : vector<1x32xf32>
    %234 = vector.multi_reduction <add>, %233, %cst_57 [0] : vector<4x1x32xf32> to vector<1x32xf32>
    %235 = vector.shape_cast %234 : vector<1x32xf32> to vector<1x1x32xf32>
    %cst_58 = arith.constant 2.500000e-02 : f32
    %236 = vector.broadcast %cst_58 : f32 to vector<1x1x32xf32>
    %237 = arith.mulf %235, %236 : vector<1x1x32xf32>
    %238 = vector.broadcast %237 : vector<1x1x32xf32> to vector<4x10x32xf32>
    %239 = arith.subf %231, %238 : vector<4x10x32xf32>
    %240 = arith.mulf %239, %239 : vector<4x10x32xf32>
    %cst_59 = arith.constant dense<0.000000e+00> : vector<4x32xf32>
    %241 = vector.multi_reduction <add>, %240, %cst_59 [1] : vector<4x10x32xf32> to vector<4x32xf32>
    %242 = vector.shape_cast %241 : vector<4x32xf32> to vector<4x1x32xf32>
    %cst_60 = arith.constant dense<0.000000e+00> : vector<1x32xf32>
    %243 = vector.multi_reduction <add>, %242, %cst_60 [0] : vector<4x1x32xf32> to vector<1x32xf32>
    %244 = vector.shape_cast %243 : vector<1x32xf32> to vector<1x1x32xf32>
    %cst_61 = arith.constant 2.500000e-02 : f32
    %245 = vector.broadcast %cst_61 : f32 to vector<1x1x32xf32>
    %246 = arith.mulf %244, %245 : vector<1x1x32xf32>
    %c0_62 = arith.constant 0 : index
    %c0_63 = arith.constant 0 : index
    %c0_64 = arith.constant 0 : index
    %247 = vector.load %arg9[%c0_62, %c0_63, %c0_64] : memref<1x1x32xf32, #tpu.memory_space<vmem>>, vector<1x1x32xf32>
    %cst_65 = arith.constant 9.99999974E-6 : f32
    %248 = vector.broadcast %cst_65 : f32 to vector<1x1x32xf32>
    %249 = arith.addf %246, %248 : vector<1x1x32xf32>
    %250 = math.rsqrt %249 : vector<1x1x32xf32>
    %251 = arith.mulf %247, %250 : vector<1x1x32xf32>
    %252 = vector.broadcast %251 : vector<1x1x32xf32> to vector<4x10x32xf32>
    %253 = arith.mulf %239, %252 : vector<4x10x32xf32>
    %c0_66 = arith.constant 0 : index
    %c0_67 = arith.constant 0 : index
    %c0_68 = arith.constant 0 : index
    %254 = vector.load %arg10[%c0_66, %c0_67, %c0_68] : memref<1x1x32xf32, #tpu.memory_space<vmem>>, vector<1x1x32xf32>
    %255 = vector.broadcast %254 : vector<1x1x32xf32> to vector<4x10x32xf32>
    %256 = arith.addf %253, %255 : vector<4x10x32xf32>
    %cst_69 = arith.constant 0.000000e+00 : f32
    %257 = vector.broadcast %cst_69 : f32 to vector<4x10x32xf32>
    %258 = arith.cmpf ogt, %256, %257 : vector<4x10x32xf32>
    %cst_70 = arith.constant 2.000000e-01 : f32
    %259 = vector.broadcast %cst_70 : f32 to vector<4x10x32xf32>
    %260 = arith.mulf %259, %256 : vector<4x10x32xf32>
    %261 = arith.select %258, %256, %260 : vector<4x10x32xi1>, vector<4x10x32xf32>
    %262 = vector.extract_strided_slice %261 {offsets = [2, 0, 0], sizes = [2, 10, 32], strides = [1, 1, 1]} : vector<4x10x32xf32> to vector<2x10x32xf32>
    %cst_71 = arith.constant 0.000000e+00 : f32
    %263 = vector.broadcast %cst_71 : f32 to vector<2x1x32xf32>
    %264 = vector.extract_strided_slice %262 {offsets = [0, 0, 0], sizes = [2, 9, 32], strides = [1, 1, 1]} : vector<2x10x32xf32> to vector<2x9x32xf32>
    %265 = tpu.concatenate %263, %264 in 1 : vector<2x1x32xf32>, vector<2x9x32xf32> -> vector<2x10x32xf32>
    %266 = vector.extract_strided_slice %261 {offsets = [0, 0, 0], sizes = [2, 10, 32], strides = [1, 1, 1]} : vector<4x10x32xf32> to vector<2x10x32xf32>
    %267 = vector.extract_strided_slice %261 {offsets = [2, 0, 0], sizes = [2, 10, 32], strides = [1, 1, 1]} : vector<4x10x32xf32> to vector<2x10x32xf32>
    %268 = vector.extract_strided_slice %261 {offsets = [0, 0, 0], sizes = [2, 10, 32], strides = [1, 1, 1]} : vector<4x10x32xf32> to vector<2x10x32xf32>
    %269 = vector.extract_strided_slice %268 {offsets = [0, 1, 0], sizes = [2, 9, 32], strides = [1, 1, 1]} : vector<2x10x32xf32> to vector<2x9x32xf32>
    %cst_72 = arith.constant 0.000000e+00 : f32
    %270 = vector.broadcast %cst_72 : f32 to vector<2x1x32xf32>
    %271 = tpu.concatenate %269, %270 in 1 : vector<2x9x32xf32>, vector<2x1x32xf32> -> vector<2x10x32xf32>
    %272 = tpu.concatenate %265, %266, %267, %271 in 2 : vector<2x10x32xf32>, vector<2x10x32xf32>, vector<2x10x32xf32>, vector<2x10x32xf32> -> vector<2x10x128xf32>
    %c0_73 = arith.constant 0 : index
    %c0_74 = arith.constant 0 : index
    %273 = vector.load %arg11[%c0_73, %c0_74] : memref<128x64xbf16, #tpu.memory_space<vmem>>, vector<128x64xbf16>
    %274 = arith.truncf %272 : vector<2x10x128xf32> to vector<2x10x128xbf16>
    %275 = vector.shape_cast %273 : vector<128x64xbf16> to vector<1x128x64xbf16>
    %276 = vector.broadcast %275 : vector<1x128x64xbf16> to vector<2x128x64xbf16>
    "tpu.trace_start"() <{level = 10 : i32, message = "znk,zko->zno"}> : () -> ()
    %cst_75 = arith.constant dense<0.000000e+00> : vector<2x10x64xf32>
    %277 = tpu.matmul %274, %276, %cst_75 {dimension_numbers = #tpu.dot_dimension_numbers<[2], [1], [1], [2], [0, 0, 0, 1, 1, 2], [0], [0]>} : vector<2x10x128xbf16>, vector<2x128x64xbf16>, vector<2x10x64xf32> -> vector<2x10x64xf32>
    "tpu.trace_stop"() : () -> ()
    %cst_76 = arith.constant dense<0.000000e+00> : vector<2x64xf32>
    %278 = vector.multi_reduction <add>, %277, %cst_76 [1] : vector<2x10x64xf32> to vector<2x64xf32>
    %279 = vector.shape_cast %278 : vector<2x64xf32> to vector<2x1x64xf32>
    %cst_77 = arith.constant dense<0.000000e+00> : vector<1x64xf32>
    %280 = vector.multi_reduction <add>, %279, %cst_77 [0] : vector<2x1x64xf32> to vector<1x64xf32>
    %281 = vector.shape_cast %280 : vector<1x64xf32> to vector<1x1x64xf32>
    %cst_78 = arith.constant 5.000000e-02 : f32
    %282 = vector.broadcast %cst_78 : f32 to vector<1x1x64xf32>
    %283 = arith.mulf %281, %282 : vector<1x1x64xf32>
    %284 = vector.broadcast %283 : vector<1x1x64xf32> to vector<2x10x64xf32>
    %285 = arith.subf %277, %284 : vector<2x10x64xf32>
    %286 = arith.mulf %285, %285 : vector<2x10x64xf32>
    %cst_79 = arith.constant dense<0.000000e+00> : vector<2x64xf32>
    %287 = vector.multi_reduction <add>, %286, %cst_79 [1] : vector<2x10x64xf32> to vector<2x64xf32>
    %288 = vector.shape_cast %287 : vector<2x64xf32> to vector<2x1x64xf32>
    %cst_80 = arith.constant dense<0.000000e+00> : vector<1x64xf32>
    %289 = vector.multi_reduction <add>, %288, %cst_80 [0] : vector<2x1x64xf32> to vector<1x64xf32>
    %290 = vector.shape_cast %289 : vector<1x64xf32> to vector<1x1x64xf32>
    %cst_81 = arith.constant 5.000000e-02 : f32
    %291 = vector.broadcast %cst_81 : f32 to vector<1x1x64xf32>
    %292 = arith.mulf %290, %291 : vector<1x1x64xf32>
    %c0_82 = arith.constant 0 : index
    %c0_83 = arith.constant 0 : index
    %c0_84 = arith.constant 0 : index
    %293 = vector.load %arg12[%c0_82, %c0_83, %c0_84] : memref<1x1x64xf32, #tpu.memory_space<vmem>>, vector<1x1x64xf32>
    %cst_85 = arith.constant 9.99999974E-6 : f32
    %294 = vector.broadcast %cst_85 : f32 to vector<1x1x64xf32>
    %295 = arith.addf %292, %294 : vector<1x1x64xf32>
    %296 = math.rsqrt %295 : vector<1x1x64xf32>
    %297 = arith.mulf %293, %296 : vector<1x1x64xf32>
    %298 = vector.broadcast %297 : vector<1x1x64xf32> to vector<2x10x64xf32>
    %299 = arith.mulf %285, %298 : vector<2x10x64xf32>
    %c0_86 = arith.constant 0 : index
    %c0_87 = arith.constant 0 : index
    %c0_88 = arith.constant 0 : index
    %300 = vector.load %arg13[%c0_86, %c0_87, %c0_88] : memref<1x1x64xf32, #tpu.memory_space<vmem>>, vector<1x1x64xf32>
    %301 = vector.broadcast %300 : vector<1x1x64xf32> to vector<2x10x64xf32>
    %302 = arith.addf %299, %301 : vector<2x10x64xf32>
    %cst_89 = arith.constant 0.000000e+00 : f32
    %303 = vector.broadcast %cst_89 : f32 to vector<2x10x64xf32>
    %304 = arith.cmpf ogt, %302, %303 : vector<2x10x64xf32>
    %cst_90 = arith.constant 2.000000e-01 : f32
    %305 = vector.broadcast %cst_90 : f32 to vector<2x10x64xf32>
    %306 = arith.mulf %305, %302 : vector<2x10x64xf32>
    %307 = arith.select %304, %302, %306 : vector<2x10x64xi1>, vector<2x10x64xf32>
    %c0_91 = arith.constant 0 : index
    %c0_92 = arith.constant 0 : index
    %c0_93 = arith.constant 0 : index
    %308 = vector.load %arg15[%c0_91, %c0_92, %c0_93] : memref<2x10x64xf32, #tpu.memory_space<vmem>>, vector<2x10x64xf32>
    tpu.vector_store %arg15[%c0_91, %c0_92, %c0_93], %307 {strides = array<i32>} : memref<2x10x64xf32, #tpu.memory_space<vmem>>, vector<2x10x64xf32>,
    %c0_94 = arith.constant 0 : index
    %c0_95 = arith.constant 0 : index
    %c0_96 = arith.constant 0 : index
    %309 = vector.load %arg14[%c0_94, %c0_95, %c0_96] : memref<1x10x64xf32, #tpu.memory_space<vmem>>, vector<1x10x64xf32>
    %310 = vector.broadcast %309 : vector<1x10x64xf32> to vector<2x10x64xf32>
    %311 = arith.mulf %307, %310 : vector<2x10x64xf32>
    %cst_97 = arith.constant dense<0.000000e+00> : vector<2x10xf32>
    %312 = vector.multi_reduction <add>, %311, %cst_97 [2] : vector<2x10x64xf32> to vector<2x10xf32>
    %313 = vector.shape_cast %312 : vector<2x10xf32> to vector<2x10x1xf32>
    %cst_98 = arith.constant dense<0.000000e+00> : vector<2x1xf32>
    %314 = vector.multi_reduction <add>, %313, %cst_98 [1] : vector<2x10x1xf32> to vector<2x1xf32>
    %cst_99 = arith.constant 0.000000e+00 : f32
    %315 = vector.broadcast %cst_99 : f32 to vector<2x1xf32>
    %316 = arith.subf %315, %314 : vector<2x1xf32>
    %317 = math.exp %316 : vector<2x1xf32>
    %cst_100 = arith.constant 1.000000e+00 : f32
    %318 = vector.broadcast %cst_100 : f32 to vector<2x1xf32>
    %319 = arith.addf %318, %317 : vector<2x1xf32>
    %cst_101 = arith.constant 1.000000e+00 : f32
    %320 = vector.broadcast %cst_101 : f32 to vector<2x1xf32>
    %321 = arith.divf %320, %319 : vector<2x1xf32>
    %c0_102 = arith.constant 0 : index
    %c0_103 = arith.constant 0 : index
    %322 = vector.load %arg16[%c0_102, %c0_103] : memref<2x1xf32, #tpu.memory_space<vmem>>, vector<2x1xf32>
    tpu.vector_store %arg16[%c0_102, %c0_103], %321 {strides = array<i32>} : memref<2x1xf32, #tpu.memory_space<vmem>>, vector<2x1xf32>,
    return
  }
}

</mosaic_0001>

<bundles_post_ra>
// kernel: discriminator_forward.1
= control target key start
LH: loop header
LB: loop body
LE: loop exit
PB: predicated region body
PF: predicated region fallthrough
CT: control target
= control target key end

     0   :  { %s6647_s28 = smov 1   ;;  %vm61_vm0 = vcmask 1040384   ;;  %v9971_v10 = vmov 0   ;;  %s6650_s17 = smov 127   ;;  %v9969_v11 = vmov 1   ;;  %vm99_vm1 = vcmask 1046528   ;;  %s9951_s0 = inlined_call_operand.vmem [shape: f32[2,10,32], index: 0, kind: input, shape index: {}]   ;;  %s9952_s1 = inlined_call_operand.vmem [shape: bf16[4,4], index: 1, kind: input, shape index: {}]   ;;  %s9953_s2 = inlined_call_operand.vmem [shape: bf16[16,8], index: 2, kind: input, shape index: {}]   ;;  %s9954_s3 = inlined_call_operand.vmem [shape: f32[1,1,8], index: 3, kind: input, shape index: {}]   ;;  %s9955_s4 = inlined_call_operand.vmem [shape: f32[1,1,8], index: 4, kind: input, shape index: {}]   ;;  %s9956_s5 = inlined_call_operand.vmem [shape: bf16[32,16], index: 5, kind: input, shape index: {}]   ;;  %s9957_s8 = inlined_call_operand.vmem [shape: bf16[64,32], index: 8, kind: input, shape index: {}]   ;;  %s9958_s6 = inlined_call_operand.vmem [shape: f32[1,1,16], index: 6, kind: input, shape index: {}]   ;;  %s9959_s7 = inlined_call_operand.vmem [shape: f32[1,1,16], index: 7, kind: input, shape index: {}]   ;;  %s9960_s11 = inlined_call_operand.vmem [shape: bf16[128,64], index: 11, kind: input, shape index: {}]   ;;  %s9961_s9 = inlined_call_operand.vmem [shape: f32[1,1,32], index: 9, kind: input, shape index: {}]   ;;  %s9962_s10 = inlined_call_operand.vmem [shape: f32[1,1,32], index: 10, kind: input, shape index: {}]   ;;  %s9963_s12 = inlined_call_operand.vmem [shape: f32[1,1,64], index: 12, kind: input, shape index: {}]   ;;  %s9964_s13 = inlined_call_operand.vmem [shape: f32[1,1,64], index: 13, kind: input, shape index: {}]   ;;  %s9965_s14 = inlined_call_operand.vmem [shape: f32[1,10,64], index: 14, kind: input, shape index: {}]   ;;  %s9966_s15 = inlined_call_operand.vmem [shape: f32[2,10,64], index: 15, kind: output, shape index: {0}]   ;;  %s9967_s16 = inlined_call_operand.vmem [shape: f32[2,1], index: 16, kind: output, shape index: {1}]  }
   0x1   :  { %10054 = sst [smem:[#allocation110_spill]] %s9951_s0  ;;  %s6648_s0 = smov 97   ;;  %6058 = vset.pattern.permute.xlu1 %v9971_v10  ;;  %6060 = vset.pattern.permute.xlu0 %v9969_v11  ;;  %vm94_vm2 = vcmask 7168   ;;  %vm136_vm3 = vcmask 23552  }
   0x2   :  { %s10055_s23 = sld [smem:[#allocation110_spill]]  ;;  %s6652_s18 = smov 125  }
   0x3   :  { %s6653_s19 = smov 123   ;;  %s6654_s20 = smov 121  }
   0x4   :  { %s6655_s21 = smov 119   ;;  %s6656_s22 = smov 117  }
   0x5   :  { %s6658_s24 = smov 113   ;;  %s6659_s25 = smov 111  }
   0x6   :  { %s6660_s26 = smov 109   ;;  %s6661_s27 = smov 107  }
   0x7   :  { %s6663_s29 = smov 103   ;;  %s6664_s30 = smov 101  }
   0x8   :  { %v6768_v0 = vld [vmem:[%s10055_s23] sm:$0xff]  ;;  %v6773_v1 = vld [vmem:[%s10055_s23 + $0x8] sm:$0x3]  ;;  %v6778_v2 = vld [vmem:[%s10055_s23 + $0x10] sm:$0xff] }
   0x9   :  { %82 = vrot.lane.b32.xlu1 %v6768_v0, %s6647_s28  ;;  %v62_v3 = vrot.slane %v6768_v0, 7  ;;  %v63_v4 = vrot.slane %v6773_v1, 7  ;;  %v6786_v5 = vld [vmem:[%s10055_s23 + $0x18] sm:$0x3]  ;;  %v65_v6 = vrot.slane %v6778_v2, 7  ;;  %s6657_s23 = smov 115  }
   0xa   :  { %v66_v7 = vrot.slane %v6786_v5, 7  ;;  %v101_v18 = vrot.slane %v6773_v1, 1  ;;  %v100_v20 = vrot.slane %v6768_v0, 1  ;;  %v104_v26 = vrot.slane %v6786_v5, 1 }
   0xb   :  { %68 = vrot.lane.b32.xlu0 %v62_v3, %s6648_s0  ;;  %v64_v8 = vsel %vm61_vm0, %v62_v3, %v63_v4  ;;  %v103_v28 = vrot.slane %v6778_v2, 1 }
   0xc   :  { %v67_v9 = vsel %vm61_vm0, %v65_v6, %v66_v7  ;;  %v108_v22 = vsel %vm61_vm0, %v101_v18, 0.0  ;;  %v102_v24 = vsel %vm99_vm1, %v100_v20, %v101_v18  ;;  %v109_v30 = vsel %vm61_vm0, %v104_v26, 0.0 }
   0xd   :  { %84 = vrot.lane.b32.xlu1 %v6773_v1, %s6647_s28  ;;  %v105_v32 = vsel %vm99_vm1, %v103_v28, %v104_v26 }
   0xf   :  { %70 = vrot.lane.b32.xlu0 %v64_v8, %s6648_s0 }
  0x11   :  { %74 = vrot.lane.b32.xlu1 %v67_v9, %s6648_s0 }
  0x13   :  { %72 = vrot.lane.b32.xlu0 %v65_v6, %s6648_s0  ;;  %s6665_s0 = smov 99  }
  0x15   :  { %88 = vrot.lane.b32.xlu1 %v6786_v5, %s6647_s28 }
  0x17   :  { %86 = vrot.lane.b32.xlu0 %v6778_v2, %s6647_s28  ;;  %s6662_s28 = smov 105  }
  0x19   :  { %143 = vrot.lane.b32.xlu1 %v6773_v1, %s6650_s17 }
  0x1b   :  { %141 = vrot.lane.b32.xlu0 %v6768_v0, %s6650_s17 }
  0x1d   :  { %151 = vrot.lane.b32.xlu1 %v6773_v1, %s6652_s18 }
  0x1f   :  { %149 = vrot.lane.b32.xlu0 %v6768_v0, %s6652_s18 }
  0x21   :  { %147 = vrot.lane.b32.xlu1 %v6786_v5, %s6650_s17 }
  0x23   :  { %145 = vrot.lane.b32.xlu0 %v6778_v2, %s6650_s17  ;;  %s6666_s17 = smov 3  }
  0x25   :  { %155 = vrot.lane.b32.xlu1 %v6786_v5, %s6652_s18 }
  0x27   :  { %153 = vrot.lane.b32.xlu0 %v6778_v2, %s6652_s18 }
  0x29   :  { %159 = vrot.lane.b32.xlu1 %v6773_v1, %s6653_s19 }
  0x2b   :  { %157 = vrot.lane.b32.xlu0 %v6768_v0, %s6653_s19 }
  0x2d   :  { %167 = vrot.lane.b32.xlu1 %v6773_v1, %s6654_s20 }
  0x2f   :  { %165 = vrot.lane.b32.xlu0 %v6768_v0, %s6654_s20 }
  0x31   :  { %163 = vrot.lane.b32.xlu1 %v6786_v5, %s6653_s19 }
  0x33   :  { %161 = vrot.lane.b32.xlu0 %v6778_v2, %s6653_s19 }
  0x35   :  { %171 = vrot.lane.b32.xlu1 %v6786_v5, %s6654_s20 }
  0x37   :  { %169 = vrot.lane.b32.xlu0 %v6778_v2, %s6654_s20 }
  0x39   :  { %175 = vrot.lane.b32.xlu1 %v6773_v1, %s6655_s21 }
  0x3b   :  { %173 = vrot.lane.b32.xlu0 %v6768_v0, %s6655_s21 }
  0x3d   :  { %183 = vrot.lane.b32.xlu1 %v6773_v1, %s6656_s22 }
  0x3f   :  { %181 = vrot.lane.b32.xlu0 %v6768_v0, %s6656_s22 }
  0x41   :  { %179 = vrot.lane.b32.xlu1 %v6786_v5, %s6655_s21 }
  0x43   :  { %177 = vrot.lane.b32.xlu0 %v6778_v2, %s6655_s21 }
  0x45   :  { %187 = vrot.lane.b32.xlu1 %v6786_v5, %s6656_s22 }
  0x47   :  { %185 = vrot.lane.b32.xlu0 %v6778_v2, %s6656_s22  ;;  %s6670_s22 = smov 8  }
  0x49   :  { %191 = vrot.lane.b32.xlu1 %v6773_v1, %s6657_s23 }
  0x4b   :  { %189 = vrot.lane.b32.xlu0 %v6768_v0, %s6657_s23 }
  0x4d   :  { %199 = vrot.lane.b32.xlu1 %v6773_v1, %s6658_s24 }
  0x4f   :  { %197 = vrot.lane.b32.xlu0 %v6768_v0, %s6658_s24 }
  0x51   :  { %195 = vrot.lane.b32.xlu1 %v6786_v5, %s6657_s23 }
  0x53   :  { %193 = vrot.lane.b32.xlu0 %v6778_v2, %s6657_s23  ;;  %s6671_s23 = smov 12  }
  0x55   :  { %203 = vrot.lane.b32.xlu1 %v6786_v5, %s6658_s24 }
  0x57   :  { %201 = vrot.lane.b32.xlu0 %v6778_v2, %s6658_s24 }
  0x59   :  { %207 = vrot.lane.b32.xlu1 %v6773_v1, %s6659_s25 }
  0x5b   :  { %205 = vrot.lane.b32.xlu0 %v6768_v0, %s6659_s25 }
  0x5d   :  { %215 = vrot.lane.b32.xlu1 %v6773_v1, %s6660_s26 }
  0x5f   :  { %213 = vrot.lane.b32.xlu0 %v6768_v0, %s6660_s26 }
  0x61   :  { %211 = vrot.lane.b32.xlu1 %v6786_v5, %s6659_s25 }
  0x63   :  { %209 = vrot.lane.b32.xlu0 %v6778_v2, %s6659_s25 }
  0x65   :  { %219 = vrot.lane.b32.xlu1 %v6786_v5, %s6660_s26 }
  0x67   :  { %217 = vrot.lane.b32.xlu0 %v6778_v2, %s6660_s26  ;;  %s6679_s26 = smov 96  }
  0x69   :  { %223 = vrot.lane.b32.xlu1 %v6773_v1, %s6661_s27 }
  0x6b   :  { %221 = vrot.lane.b32.xlu0 %v6768_v0, %s6661_s27 }
  0x6d   :  { %231 = vrot.lane.b32.xlu1 %v6773_v1, %s6662_s28 }
  0x6f   :  { %229 = vrot.lane.b32.xlu0 %v6768_v0, %s6662_s28 }
  0x71   :  { %227 = vrot.lane.b32.xlu1 %v6786_v5, %s6661_s27 }
  0x73   :  { %225 = vrot.lane.b32.xlu0 %v6778_v2, %s6661_s27 }
  0x75   :  { %235 = vrot.lane.b32.xlu1 %v6786_v5, %s6662_s28 }
  0x77   :  { %233 = vrot.lane.b32.xlu0 %v6778_v2, %s6662_s28 }
  0x79   :  { %239 = vrot.lane.b32.xlu1 %v6773_v1, %s6663_s29 }
  0x7b   :  { %v83_v12 = vpop.permute.xlu1 %82  ;;  %237 = vrot.lane.b32.xlu0 %v6768_v0, %s6663_s29 }
  0x7d   :  { %247 = vrot.lane.b32.xlu1 %v6773_v1, %s6664_s30  ;;  %v69_v13 = vpop.permute.xlu0 %68 }
  0x7e   :  { %v80_v37 = vsel %vm61_vm0, 0.0, %v69_v13 }
  0x7f   :  { %v85_v14 = vpop.permute.xlu1 %84  ;;  %245 = vrot.lane.b32.xlu0 %v6768_v0, %s6664_s30  ;;  %v6895_v39 = vsel %vm94_vm2, %v80_v37, %v83_v12 }
  0x81   :  { %243 = vrot.lane.b32.xlu1 %v6786_v5, %s6663_s29  ;;  %v71_v15 = vpop.permute.xlu0 %70 }
  0x82   :  { %v6884_v35 = vsel %vm94_vm2, %v71_v15, %v85_v14 }
  0x83   :  { %v75_v16 = vpop.permute.xlu1 %74  ;;  %241 = vrot.lane.b32.xlu0 %v6778_v2, %s6663_s29 }
  0x85   :  { %251 = vrot.lane.b32.xlu1 %v6786_v5, %s6664_s30  ;;  %v6852_v17 = vpop.permute.xlu0 %72 }
  0x86   :  { %v81_v54 = vsel %vm61_vm0, 0.0, %v6852_v17 }
  0x87   :  { %v89_v19 = vpop.permute.xlu1 %88  ;;  %249 = vrot.lane.b32.xlu0 %v6778_v2, %s6664_s30 }
  0x88   :  { %v6906_v43 = vsel %vm94_vm2, %v75_v16, %v89_v19 }
  0x89   :  { %112 = vrot.lane.b32.xlu1 %v6773_v1, %s6665_s0  ;;  %v6858_v21 = vpop.permute.xlu0 %86 }
  0x8a   :  { %v6948_v56 = vsel %vm94_vm2, %v81_v54, %v6858_v21 }
  0x8b   :  { %v6861_v23 = vpop.permute.xlu1 %143  ;;  %110 = vrot.lane.b32.xlu0 %v6768_v0, %s6665_s0  ;;  %v9976_v0 = vmov 2  }
  0x8d   :  { %126 = vrot.lane.b32.xlu1 %v108_v22, %s6666_s17  ;;  %v6865_v25 = vpop.permute.xlu0 %141 }
  0x8f   :  { %v6868_v27 = vpop.permute.xlu1 %151  ;;  %124 = vrot.lane.b32.xlu0 %v102_v24, %s6666_s17 }
  0x91   :  { %116 = vrot.lane.b32.xlu1 %v6786_v5, %s6665_s0  ;;  %v6872_v29 = vpop.permute.xlu0 %149 }
  0x93   :  { %v6875_v31 = vpop.permute.xlu1 %147  ;;  %114 = vrot.lane.b32.xlu0 %v6778_v2, %s6665_s0 }
  0x95   :  { %130 = vrot.lane.b32.xlu1 %v109_v30, %s6666_s17  ;;  %v6879_v33 = vpop.permute.xlu0 %145  ;;  %v9973_v30 = vmov 3  }
  0x97   :  { %v6881_v34 = vpop.permute.xlu1 %155  ;;  %128 = vrot.lane.b32.xlu0 %v105_v32, %s6666_s17  ;;  %s6675_s17 = smov 24  }
  0x99   :  { %262 = vperm.xlu1 %6058, %v6884_v35   ;;  %v6887_v36 = vpop.permute.xlu0 %153 }
  0x9b   :  { %v6890_v38 = vpop.permute.xlu1 %159  ;;  %656 = vperm.xlu0 %6060, %v6884_v35  }
  0x9d   :  { %6059 = vset.pattern.permute.xlu1 %v9969_v11  ;;  %v6897_v40 = vpop.permute.xlu0 %157 }
  0x9e   :  { %652 = vperm.xlu1 %6059, %v6895_v39  }
  0x9f   :  { %v6900_v41 = vpop.permute.xlu1 %167  ;;  %668 = vperm.xlu0 %6060, %v6865_v25  }
  0xa1   :  { %v6903_v42 = vpop.permute.xlu0 %165 }
  0xa2   :  { %6061 = vset.pattern.permute.xlu1 %v9971_v10 }
  0xa3   :  { %v6909_v44 = vpop.permute.xlu1 %163  ;;  %664 = vperm.xlu0 %6060, %v6906_v43   ;;  %276 = vperm.xlu1 %6061, %v6865_v25  }
  0xa5   :  { %v6913_v45 = vpop.permute.xlu0 %161 }
  0xa7   :  { %v6915_v46 = vpop.permute.xlu1 %171  ;;  %704 = vperm.xlu0 %6060, %v6890_v38   ;;  %280 = vperm.xlu1 %6061, %v6861_v23  }
  0xa9   :  { %v6919_v47 = vpop.permute.xlu0 %169 }
  0xab   :  { %v6921_v48 = vpop.permute.xlu1 %175  ;;  %6062 = vset.pattern.permute.xlu1 %v9969_v11  ;;  %716 = vperm.xlu0 %6060, %v6903_v42  }
  0xac   :  { %672 = vperm.xlu1 %6062, %v6861_v23  }
  0xad   :  { %v6926_v49 = vpop.permute.xlu0 %173 }
  0xaf   :  { %v6928_v50 = vpop.permute.xlu1 %183  ;;  %712 = vperm.xlu0 %6060, %v6909_v44  }
  0xb0   :  { %6063 = vset.pattern.permute.xlu1 %v9971_v10 }
  0xb1   :  { %272 = vperm.xlu1 %6063, %v6906_v43   ;;  %v6933_v51 = vpop.permute.xlu0 %181 }
  0xb3   :  { %v6935_v52 = vpop.permute.xlu1 %179  ;;  %728 = vperm.xlu0 %6060, %v6915_v46  }
  0xb5   :  { %292 = vperm.xlu1 %6063, %v6872_v29   ;;  %v6939_v53 = vpop.permute.xlu0 %177 }
  0xb7   :  { %v6943_v55 = vpop.permute.xlu1 %187  ;;  %736 = vperm.xlu0 %6060, %v6921_v48  }
  0xb9   :  { %6064 = vset.pattern.permute.xlu1 %v9969_v11  ;;  %v6951_v57 = vpop.permute.xlu0 %185 }
  0xba   :  { %660 = vperm.xlu1 %6064, %v6948_v56  }
  0xbb   :  { %v6954_v58 = vpop.permute.xlu1 %191  ;;  %748 = vperm.xlu0 %6060, %v6933_v51  }
  0xbd   :  { %v6957_v59 = vpop.permute.xlu0 %189 }
  0xbe   :  { %684 = vperm.xlu1 %6064, %v6872_v29  }
  0xbf   :  { %v6960_v60 = vpop.permute.xlu1 %199  ;;  %744 = vperm.xlu0 %6060, %v6935_v52  }
  0xc1   :  { %v6963_v61 = vpop.permute.xlu0 %197 }
  0xc2   :  { %688 = vperm.xlu1 %6064, %v6868_v27  }
  0xc3   :  { %v6966_v62 = vpop.permute.xlu1 %195  ;;  %760 = vperm.xlu0 %6060, %v6943_v55  }
  0xc5   :  { %v6969_v63 = vpop.permute.xlu0 %193 }
  0xc6   :  { %6065 = vset.pattern.permute.xlu1 %v9976_v0 }
  0xc7   :  { %v6972_v1 = vpop.permute.xlu1 %203  ;;  %1046 = vperm.xlu1 %6065, %v6884_v35   ;;  %768 = vperm.xlu0 %6060, %v6954_v58  }
  0xc9   :  { %v6976_v2 = vpop.permute.xlu0 %201 }
  0xcb   :  { %v6978_v3 = vpop.permute.xlu1 %207  ;;  %6066 = vset.pattern.permute.xlu1 %v9971_v10  ;;  %780 = vperm.xlu0 %6060, %v6963_v61  }
  0xcc   :  { %284 = vperm.xlu1 %6066, %v6879_v33  }
  0xcd   :  { %v6983_v4 = vpop.permute.xlu0 %205 }
  0xce   :  { %10056 = vst [vmem:[#allocation2_spill] sm:$0xff] %v6983_v4 }
  0xcf   :  { %v6985_v5 = vpop.permute.xlu1 %215  ;;  %776 = vperm.xlu0 %6060, %v6966_v62  }
  0xd0   :  { %10057 = vst [vmem:[#allocation3_spill] sm:$0xff] %v6985_v5  ;;  %6067 = vset.pattern.permute.xlu1 %v9969_v11 }
  0xd1   :  { %676 = vperm.xlu1 %6067, %v6879_v33   ;;  %v6990_v6 = vpop.permute.xlu0 %213 }
  0xd2   :  { %10058 = vst [vmem:[#allocation4_spill] sm:$0xff] %v6990_v6 }
  0xd3   :  { %v6992_v7 = vpop.permute.xlu1 %211  ;;  %792 = vperm.xlu0 %6060, %v6972_v1  }
  0xd4   :  { %10059 = vst [vmem:[#allocation5_spill] sm:$0xff] %v6992_v7 }
  0xd5   :  { %680 = vperm.xlu1 %6067, %v6875_v31   ;;  %v6996_v8 = vpop.permute.xlu0 %209 }
  0xd6   :  { %10060 = vst [vmem:[#allocation6_spill] sm:$0xff] %v6996_v8 }
  0xd7   :  { %v6998_v9 = vpop.permute.xlu1 %219  ;;  %800 = vperm.xlu0 %6060, %v6978_v3  }
  0xd8   :  { %10061 = vst [vmem:[#allocation7_spill] sm:$0xff] %v6998_v9 }
  0xd9   :  { %6068 = vset.pattern.permute.xlu1 %v9976_v0  ;;  %v7002_v12 = vpop.permute.xlu0 %217 }
  0xda   :  { %1062 = vperm.xlu1 %6068, %v6861_v23  }
  0xdb   :  { %v7005_v13 = vpop.permute.xlu1 %223  ;;  %812 = vperm.xlu0 %6060, %v6990_v6  }
  0xdc   :  { %10062 = vst [vmem:[#allocation8_spill] sm:$0xff] %v7005_v13 }
  0xdd   :  { %v7008_v14 = vpop.permute.xlu0 %221 }
  0xde   :  { %10063 = vst [vmem:[#allocation9_spill] sm:$0xff] %v7008_v14  ;;  %6069 = vset.pattern.permute.xlu1 %v9971_v10 }
  0xdf   :  { %v7011_v15 = vpop.permute.xlu1 %231  ;;  %300 = vperm.xlu1 %6069, %v6887_v36   ;;  %808 = vperm.xlu0 %6060, %v6992_v7  }
  0xe0   :  { %10064 = vst [vmem:[#allocation10_spill] sm:$0xff] %v7011_v15 }
  0xe1   :  { %v7015_v16 = vpop.permute.xlu0 %229 }
  0xe3   :  { %v7017_v17 = vpop.permute.xlu1 %227  ;;  %6070 = vset.pattern.permute.xlu1 %v9969_v11  ;;  %824 = vperm.xlu0 %6060, %v6998_v9  }
  0xe4   :  { %10065 = vst [vmem:[#allocation11_spill] sm:$0xff] %v7017_v17  ;;  %692 = vperm.xlu1 %6070, %v6887_v36  }
  0xe5   :  { %v7022_v18 = vpop.permute.xlu0 %225 }
  0xe6   :  { %10066 = vst [vmem:[#allocation12_spill] sm:$0xff] %v7022_v18 }
  0xe7   :  { %v7024_v19 = vpop.permute.xlu1 %235  ;;  %832 = vperm.xlu0 %6060, %v7005_v13  }
  0xe8   :  { %10067 = vst [vmem:[#allocation13_spill] sm:$0xff] %v7024_v19  ;;  %696 = vperm.xlu1 %6070, %v6881_v34  }
  0xe9   :  { %v7028_v20 = vpop.permute.xlu0 %233 }
  0xea   :  { %10068 = vst [vmem:[#allocation14_spill] sm:$0xff] %v7028_v20 }
  0xeb   :  { %v7030_v21 = vpop.permute.xlu1 %239  ;;  %844 = vperm.xlu0 %6060, %v7015_v16  }
  0xec   :  { %10069 = vst [vmem:[#allocation15_spill] sm:$0xff] %v7030_v21  ;;  %6071 = vset.pattern.permute.xlu1 %v9976_v0 }
  0xed   :  { %1054 = vperm.xlu1 %6071, %v6906_v43   ;;  %v7035_v22 = vpop.permute.xlu0 %237 }
  0xee   :  { %10070 = vst [vmem:[#allocation16_spill] sm:$0xff] %v7035_v22 }
  0xef   :  { %v7037_v24 = vpop.permute.xlu1 %247  ;;  %840 = vperm.xlu0 %6060, %v7017_v17  }
  0xf0   :  { %10071 = vst [vmem:[#allocation17_spill] sm:$0xff] %v7037_v24  ;;  %v10077_v24 = vmov 3  }
  0xf1   :  { %1074 = vperm.xlu1 %6071, %v6872_v29   ;;  %v7041_v26 = vpop.permute.xlu0 %245 }
  0xf2   :  { %10072 = vst [vmem:[#allocation18_spill] sm:$0xff] %v7041_v26 }
  0xf3   :  { %v7043_v28 = vpop.permute.xlu1 %243  ;;  %856 = vperm.xlu0 %6060, %v7024_v19   ;;  %v10079_v19 = vmov 2  }
  0xf4   :  { %10073 = vst [vmem:[#allocation19_spill] sm:$0xff] %v7043_v28 }
  0xf5   :  { %6072 = vset.pattern.permute.xlu1 %v9973_v30  ;;  %v7048_v32 = vpop.permute.xlu0 %241 }
  0xf6   :  { %1430 = vperm.xlu1 %6072, %v6895_v39   ;;  %10074 = vst [vmem:[#allocation20_spill] sm:$0xff] %v7048_v32 }
  0xf7   :  { %v7050_v37 = vpop.permute.xlu1 %251  ;;  %864 = vperm.xlu0 %6060, %v7030_v21  }
  0xf8   :  { %10075 = vst [vmem:[#allocation21_spill] sm:$0xff] %v7050_v37 }
  0xf9   :  { %v7056_v54 = vpop.permute.xlu0 %249 }
  0xfa   :  { %6073 = vset.pattern.permute.xlu1 %v9976_v0  ;;  %10076 = vst [vmem:[#allocation22_spill] sm:$0xff] %v7056_v54 }
  0xfb   :  { %1066 = vperm.xlu1 %6073, %v6879_v33   ;;  %876 = vperm.xlu0 %6060, %v7041_v26   ;;  %v113_v11 = vpop.permute.xlu1 %112 }
  0xfd   :  { %v7060_v10 = vpop.permute.xlu0 %110 }
  0xff   :  { %1070 = vperm.xlu1 %6073, %v6875_v31   ;;  %872 = vperm.xlu0 %6060, %v7043_v28   ;;  %v127_v30 = vpop.permute.xlu1 %126  ;;  %v10080_v28 = vmov 0  }
 0x100   :  { %v7066_v0 = vsel %vm136_vm3, %v113_v11, %v127_v30 }
 0x101   :  { %10078 = vst [vmem:[#allocation23_spill] sm:$0xff] %v7066_v0  ;;  %v7070_v17 = vpop.permute.xlu0 %124 }
 0x103   :  { %6074 = vset.pattern.permute.xlu1 %v10077_v24  ;;  %888 = vperm.xlu0 %6060, %v7050_v37   ;;  %v7076_v37 = vpop.permute.xlu1 %116 }
 0x104   :  { %1450 = vperm.xlu1 %6074, %v6861_v23  }
 0x105   :  { %v7079_v11 = vpop.permute.xlu0 %114 }
 0x106   :  { %10081 = vst [vmem:[#allocation24_spill] sm:$0xff] %v7079_v11 }
 0x107   :  { %896 = vperm.xlu0 %6060, %v7066_v0   ;;  %v7083_v23 = vpop.permute.xlu1 %130 }
 0x108   :  { %6075 = vset.pattern.permute.xlu1 %v10079_v19 }
 0x109   :  { %1086 = vperm.xlu1 %6075, %v6881_v34   ;;  %v7086_v30 = vpop.permute.xlu0 %128 }
 0x10a   :  { %10082 = vst [vmem:[#allocation25_spill] sm:$0xff] %v7086_v30 }
 0x10b   :  { %6157 = vset.pattern.permute.xlu0 %v10080_v28 }
 0x10c   :  { %257 = vperm.xlu0 %6157, %v6895_v39  }
 0x10d   :  { %6076 = vset.pattern.permute.xlu1 %v10077_v24 }
 0x10e   :  { %1438 = vperm.xlu1 %6076, %v6948_v56  }
 0x110   :  { %267 = vperm.xlu0 %6157, %v6948_v56  }
 0x112   :  { %1462 = vperm.xlu1 %6076, %v6872_v29  }
 0x114   :  { %296 = vperm.xlu0 %6157, %v6868_v27  }
 0x116   :  { %1466 = vperm.xlu1 %6076, %v6868_v27  }
 0x118   :  { %v7089_v15 = vpop.permute.xlu1 %262  ;;  %288 = vperm.xlu0 %6157, %v6875_v31  }
 0x119   :  { %10083 = vst [vmem:[#allocation26_spill] sm:$0xff] %v7089_v15  ;;  %v10091_v15 = vmov 1  }
 0x11a   :  { %1458 = vperm.xlu1 %6076, %v6875_v31   ;;  %v7093_v9 = vpop.permute.xlu0 %656 }
 0x11b   :  { %10084 = vst [vmem:[#allocation27_spill] sm:$0xff] %v7093_v9 }
 0x11c   :  { %304 = vperm.xlu0 %6157, %v6881_v34  }
 0x11d   :  { %v7096_v11 = vpop.permute.xlu1 %652 }
 0x11e   :  { %10085 = vst [vmem:[#allocation28_spill] sm:$0xff] %v7096_v11  ;;  %1474 = vperm.xlu1 %6076, %v6881_v34   ;;  %v7099_v29 = vpop.permute.xlu0 %668 }
 0x11f   :  { %10086 = vst [vmem:[#allocation29_spill] sm:$0xff] %v7099_v29 }
 0x120   :  { %308 = vperm.xlu0 %6157, %v6897_v40  }
 0x122   :  { %v7102_v30 = vpop.permute.xlu1 %276  ;;  %6077 = vset.pattern.permute.xlu1 %v10080_v28  ;;  %v7105_v7 = vpop.permute.xlu0 %664 }
 0x123   :  { %10087 = vst [vmem:[#allocation30_spill] sm:$0xff] %v7102_v30  ;;  %10088 = vst [vmem:[#allocation31_spill] sm:$0xff] %v7105_v7  ;;  %312 = vperm.xlu1 %6077, %v6890_v38  }
 0x124   :  { %316 = vperm.xlu0 %6157, %v6913_v45  }
 0x126   :  { %v7109_v31 = vpop.permute.xlu1 %280  ;;  %v7111_v5 = vpop.permute.xlu0 %704 }
 0x127   :  { %10089 = vst [vmem:[#allocation32_spill] sm:$0xff] %v7109_v31  ;;  %10090 = vst [vmem:[#allocation33_spill] sm:$0xff] %v7111_v5  ;;  %6078 = vset.pattern.permute.xlu1 %v10091_v15 }
 0x128   :  { %700 = vperm.xlu1 %6078, %v6897_v40   ;;  %332 = vperm.xlu0 %6157, %v6919_v47  }
 0x12a   :  { %v7116_v34 = vpop.permute.xlu0 %716 }
 0x12b   :  { %10092 = vst [vmem:[#allocation34_spill] sm:$0xff] %v7116_v34  ;;  %v7118_v30 = vpop.permute.xlu1 %672 }
 0x12c   :  { %10093 = vst [vmem:[#allocation35_spill] sm:$0xff] %v7118_v30  ;;  %6079 = vset.pattern.permute.xlu1 %v10080_v28  ;;  %340 = vperm.xlu0 %6157, %v6926_v49  }
 0x12d   :  { %324 = vperm.xlu1 %6079, %v6903_v42  }
 0x12e   :  { %v7123_v29 = vpop.permute.xlu0 %712 }
 0x12f   :  { %10094 = vst [vmem:[#allocation36_spill] sm:$0xff] %v7123_v29 }
 0x130   :  { %v7125_v31 = vpop.permute.xlu1 %272  ;;  %348 = vperm.xlu0 %6157, %v6939_v53  }
 0x131   :  { %10095 = vst [vmem:[#allocation37_spill] sm:$0xff] %v7125_v31  ;;  %328 = vperm.xlu1 %6079, %v6900_v41  }
 0x132   :  { %v7129_v5 = vpop.permute.xlu0 %728 }
 0x133   :  { %10096 = vst [vmem:[#allocation38_spill] sm:$0xff] %v7129_v5 }
 0x134   :  { %v7131_v7 = vpop.permute.xlu1 %292  ;;  %364 = vperm.xlu0 %6157, %v6951_v57  }
 0x135   :  { %6080 = vset.pattern.permute.xlu1 %v10091_v15 }
 0x136   :  { %720 = vperm.xlu1 %6080, %v6900_v41   ;;  %v7136_v30 = vpop.permute.xlu0 %736 }
 0x137   :  { %10097 = vst [vmem:[#allocation39_spill] sm:$0xff] %v7136_v30 }
 0x138   :  { %372 = vperm.xlu0 %6157, %v6957_v59  }
 0x139   :  { %v7139_v29 = vpop.permute.xlu1 %660 }
 0x13a   :  { %10098 = vst [vmem:[#allocation40_spill] sm:$0xff] %v7139_v29  ;;  %6081 = vset.pattern.permute.xlu1 %v10080_v28  ;;  %v7142_v34 = vpop.permute.xlu0 %748 }
 0x13b   :  { %10099 = vst [vmem:[#allocation41_spill] sm:$0xff] %v7142_v34  ;;  %320 = vperm.xlu1 %6081, %v6909_v44  }
 0x13c   :  { %380 = vperm.xlu0 %6157, %v6969_v63  }
 0x13d   :  { %v7146_v5 = vpop.permute.xlu1 %684 }
 0x13e   :  { %v7148_v31 = vpop.permute.xlu0 %744 }
 0x13f   :  { %10100 = vst [vmem:[#allocation42_spill] sm:$0xff] %v7148_v31  ;;  %6082 = vset.pattern.permute.xlu1 %v10091_v15 }
 0x140   :  { %708 = vperm.xlu1 %6082, %v6913_v45   ;;  %396 = vperm.xlu0 %6157, %v6976_v2  }
 0x141   :  { %v7153_v30 = vpop.permute.xlu1 %688 }
 0x142   :  { %v7155_v29 = vpop.permute.xlu0 %760 }
 0x143   :  { %10101 = vst [vmem:[#allocation43_spill] sm:$0xff] %v7155_v29 }
 0x144   :  { %6083 = vset.pattern.permute.xlu1 %v10079_v19  ;;  %404 = vperm.xlu0 %6157, %v6983_v4  }
 0x145   :  { %1090 = vperm.xlu1 %6083, %v6897_v40  }
 0x146   :  { %v7160_v34 = vpop.permute.xlu1 %1046  ;;  %v7162_v9 = vpop.permute.xlu0 %768 }
 0x147   :  { %10102 = vst [vmem:[#allocation44_spill] sm:$0xff] %v7160_v34  ;;  %10103 = vst [vmem:[#allocation45_spill] sm:$0xff] %v7162_v9 }
 0x148   :  { %412 = vperm.xlu0 %6157, %v6996_v8  }
 0x149   :  { %1094 = vperm.xlu1 %6083, %v6890_v38  }
 0x14a   :  { %v7166_v31 = vpop.permute.xlu0 %780 }
 0x14b   :  { %10104 = vst [vmem:[#allocation46_spill] sm:$0xff] %v7166_v31  ;;  %v7168_v11 = vpop.permute.xlu1 %284 }
 0x14c   :  { %10105 = vst [vmem:[#allocation47_spill] sm:$0xff] %v7168_v11  ;;  %428 = vperm.xlu0 %6157, %v7002_v12  }
 0x14d   :  { %6084 = vset.pattern.permute.xlu1 %v10080_v28 }
 0x14e   :  { %336 = vperm.xlu1 %6084, %v6915_v46   ;;  %v7173_v29 = vpop.permute.xlu0 %776 }
 0x14f   :  { %10106 = vst [vmem:[#allocation48_spill] sm:$0xff] %v7173_v29 }
 0x150   :  { %v7175_v4 = vpop.permute.xlu1 %676  ;;  %436 = vperm.xlu0 %6157, %v7008_v14  }
 0x151   :  { %10107 = vst [vmem:[#allocation49_spill] sm:$0xff] %v7175_v4 }
 0x152   :  { %6085 = vset.pattern.permute.xlu1 %v10091_v15  ;;  %v7179_v9 = vpop.permute.xlu0 %792 }
 0x153   :  { %10108 = vst [vmem:[#allocation50_spill] sm:$0xff] %v7179_v9  ;;  %724 = vperm.xlu1 %6085, %v6919_v47  }
 0x154   :  { %v7182_v31 = vpop.permute.xlu1 %680  ;;  %444 = vperm.xlu0 %6157, %v7022_v18  }
 0x156   :  { %v7185_v11 = vpop.permute.xlu0 %800 }
 0x157   :  { %10109 = vst [vmem:[#allocation51_spill] sm:$0xff] %v7185_v11  ;;  %6086 = vset.pattern.permute.xlu1 %v10079_v19 }
 0x158   :  { %1106 = vperm.xlu1 %6086, %v6903_v42   ;;  %460 = vperm.xlu0 %6157, %v7028_v20  }
 0x159   :  { %v7190_v29 = vpop.permute.xlu1 %1062 }
 0x15a   :  { %10110 = vst [vmem:[#allocation52_spill] sm:$0xff] %v7190_v29  ;;  %v7192_v14 = vpop.permute.xlu0 %812  ;;  %v7211_v29 = vsel %vm136_vm3, %v7060_v10, %v7070_v17 }
 0x15b   :  { %10111 = vst [vmem:[#allocation53_spill] sm:$0xff] %v7192_v14  ;;  %10116 = vst [vmem:[#allocation58_spill] sm:$0xff] %v7211_v29 }
 0x15c   :  { %1110 = vperm.xlu1 %6086, %v6900_v41   ;;  %468 = vperm.xlu0 %6157, %v7035_v22   ;;  %v7226_v22 = vsel %vm136_vm3, %v7076_v37, %v7083_v23 }
 0x15d   :  { %10119 = vst [vmem:[#allocation61_spill] sm:$0xff] %v7226_v22 }
 0x15e   :  { %v7196_v9 = vpop.permute.xlu1 %300  ;;  %v7198_v4 = vpop.permute.xlu0 %808 }
 0x15f   :  { %10112 = vst [vmem:[#allocation54_spill] sm:$0xff] %v7196_v9  ;;  %10113 = vst [vmem:[#allocation55_spill] sm:$0xff] %v7198_v4 }
 0x160   :  { %1102 = vperm.xlu1 %6086, %v6909_v44   ;;  %476 = vperm.xlu0 %6157, %v7048_v32  }
 0x162   :  { %v7202_v11 = vpop.permute.xlu0 %824 }
 0x163   :  { %10114 = vst [vmem:[#allocation56_spill] sm:$0xff] %v7202_v11  ;;  %v7204_v34 = vpop.permute.xlu1 %692 }
 0x164   :  { %10115 = vst [vmem:[#allocation57_spill] sm:$0xff] %v7204_v34  ;;  %6087 = vset.pattern.permute.xlu1 %v10077_v24  ;;  %492 = vperm.xlu0 %6157, %v7056_v54  }
 0x165   :  { %1478 = vperm.xlu1 %6087, %v6897_v40  }
 0x166   :  { %v7214_v4 = vpop.permute.xlu0 %832 }
 0x167   :  { %10117 = vst [vmem:[#allocation59_spill] sm:$0xff] %v7214_v4  ;;  %v7216_v14 = vpop.permute.xlu1 %696 }
 0x168   :  { %501 = vperm.xlu0 %6157, %v7211_v29  }
 0x169   :  { %6088 = vset.pattern.permute.xlu1 %v10079_v19 }
 0x16a   :  { %1114 = vperm.xlu1 %6088, %v6919_v47   ;;  %v7221_v11 = vpop.permute.xlu0 %844 }
 0x16b   :  { %10118 = vst [vmem:[#allocation60_spill] sm:$0xff] %v7221_v11 }
 0x16c   :  { %v7228_v10 = vpop.permute.xlu1 %1054  ;;  %516 = vperm.xlu0 %6157, %v7226_v22  }
 0x16d   :  { %10120 = vst [vmem:[#allocation62_spill] sm:$0xff] %v7228_v10 }
 0x16e   :  { %1118 = vperm.xlu1 %6088, %v6915_v46   ;;  %v7232_v40 = vpop.permute.xlu0 %840 }
 0x16f   :  { %10121 = vst [vmem:[#allocation63_spill] sm:$0xff] %v7232_v40 }
 0x170   :  { %v7234_v17 = vpop.permute.xlu1 %1074  ;;  %6160 = vset.pattern.permute.xlu0 %v10079_v19 }
 0x171   :  { %1042 = vperm.xlu0 %6160, %v6895_v39  }
 0x172   :  { %6089 = vset.pattern.permute.xlu1 %v10077_v24  ;;  %v7239_v4 = vpop.permute.xlu0 %856 }
 0x173   :  { %10122 = vst [vmem:[#allocation64_spill] sm:$0xff] %v7239_v4  ;;  %1498 = vperm.xlu1 %6089, %v6900_v41  }
 0x175   :  { %v7242_v37 = vpop.permute.xlu1 %1430  ;;  %1058 = vperm.xlu0 %6160, %v6865_v25  }
 0x176   :  { %v7245_v23 = vpop.permute.xlu0 %864 }
 0x177   :  { %10123 = vst [vmem:[#allocation65_spill] sm:$0xff] %v7245_v23  ;;  %1490 = vperm.xlu1 %6089, %v6909_v44  }
 0x179   :  { %1050 = vperm.xlu0 %6160, %v6948_v56  }
 0x17a   :  { %v7249_v40 = vpop.permute.xlu1 %1066  ;;  %v7251_v11 = vpop.permute.xlu0 %876 }
 0x17b   :  { %10124 = vst [vmem:[#allocation66_spill] sm:$0xff] %v7249_v40  ;;  %10125 = vst [vmem:[#allocation67_spill] sm:$0xff] %v7251_v11  ;;  %1506 = vperm.xlu1 %6089, %v6915_v46  }
 0x17d   :  { %1078 = vperm.xlu0 %6160, %v6868_v27  }
 0x17e   :  { %v7255_v39 = vpop.permute.xlu1 %1070  ;;  %v7257_v41 = vpop.permute.xlu0 %872 }
 0x17f   :  { %10126 = vst [vmem:[#allocation68_spill] sm:$0xff] %v7257_v41  ;;  %6090 = vset.pattern.permute.xlu1 %v10080_v28 }
 0x180   :  { %344 = vperm.xlu1 %6090, %v6921_v48  }
 0x181   :  { %1082 = vperm.xlu0 %6160, %v6887_v36  }
 0x182   :  { %v7262_v44 = vpop.permute.xlu0 %888 }
 0x183   :  { %10127 = vst [vmem:[#allocation69_spill] sm:$0xff] %v7262_v44  ;;  %v7264_v56 = vpop.permute.xlu1 %1450 }
 0x184   :  { %10128 = vst [vmem:[#allocation70_spill] sm:$0xff] %v7264_v56  ;;  %6091 = vset.pattern.permute.xlu1 %v10091_v15 }
 0x185   :  { %732 = vperm.xlu1 %6091, %v6926_v49   ;;  %1098 = vperm.xlu0 %6160, %v6913_v45  }
 0x186   :  { %v7269_v27 = vpop.permute.xlu0 %896 }
 0x187   :  { %10129 = vst [vmem:[#allocation71_spill] sm:$0xff] %v7269_v27 }
 0x188   :  { %v7271_v46 = vpop.permute.xlu1 %1086 }
 0x189   :  { %10130 = vst [vmem:[#allocation72_spill] sm:$0xff] %v7271_v46  ;;  %6092 = vset.pattern.permute.xlu1 %v10080_v28  ;;  %1130 = vperm.xlu0 %6160, %v6939_v53  }
 0x18a   :  { %356 = vperm.xlu1 %6092, %v6933_v51  }
 0x18b   :  { %v7276_v41 = vpop.permute.xlu0 %257 }
 0x18d   :  { %v7278_v44 = vpop.permute.xlu1 %1438  ;;  %1162 = vperm.xlu0 %6160, %v6969_v63  }
 0x18e   :  { %360 = vperm.xlu1 %6092, %v6928_v50  }
 0x18f   :  { %v7282_v11 = vpop.permute.xlu0 %267 }
 0x191   :  { %v7284_v23 = vpop.permute.xlu1 %1462  ;;  %1194 = vperm.xlu0 %6160, %v6996_v8  }
 0x192   :  { %6093 = vset.pattern.permute.xlu1 %v10091_v15 }
 0x193   :  { %752 = vperm.xlu1 %6093, %v6928_v50   ;;  %v7289_v27 = vpop.permute.xlu0 %296 }
 0x195   :  { %v7291_v56 = vpop.permute.xlu1 %1466  ;;  %1226 = vperm.xlu0 %6160, %v7022_v18  }
 0x197   :  { %6094 = vset.pattern.permute.xlu1 %v10080_v28  ;;  %v7295_v4 = vpop.permute.xlu0 %288 }
 0x198   :  { %352 = vperm.xlu1 %6094, %v6935_v52  }
 0x199   :  { %v7298_v40 = vpop.permute.xlu1 %1458  ;;  %1258 = vperm.xlu0 %6160, %v7048_v32  }
 0x19b   :  { %v7301_v34 = vpop.permute.xlu0 %304 }
 0x19c   :  { %6095 = vset.pattern.permute.xlu1 %v10091_v15 }
 0x19d   :  { %v7304_v9 = vpop.permute.xlu1 %1474  ;;  %740 = vperm.xlu1 %6095, %v6939_v53   ;;  %1282 = vperm.xlu0 %6160, %v7211_v29  }
 0x19e   :  { %10131 = vst [vmem:[#allocation73_spill] sm:$0xff] %v7304_v9 }
 0x19f   :  { %v7308_v46 = vpop.permute.xlu0 %308 }
 0x1a0   :  { %10132 = vst [vmem:[#allocation74_spill] sm:$0xff] %v7308_v46 }
 0x1a1   :  { %6096 = vset.pattern.permute.xlu1 %v10079_v19  ;;  %1294 = vperm.xlu0 %6160, %v7226_v22  }
 0x1a2   :  { %v7312_v10 = vpop.permute.xlu1 %312  ;;  %1122 = vperm.xlu1 %6096, %v6926_v49  }
 0x1a3   :  { %10133 = vst [vmem:[#allocation75_spill] sm:$0xff] %v7312_v10  ;;  %v7315_v32 = vpop.permute.xlu0 %316 }
 0x1a5   :  { %6163 = vset.pattern.permute.xlu0 %v10077_v24 }
 0x1a6   :  { %1126 = vperm.xlu1 %6096, %v6921_v48   ;;  %1434 = vperm.xlu0 %6163, %v6884_v35  }
 0x1a7   :  { %v7320_v9 = vpop.permute.xlu1 %700  ;;  %v7322_v29 = vpop.permute.xlu0 %332 }
 0x1a8   :  { %10134 = vst [vmem:[#allocation76_spill] sm:$0xff] %v7320_v9  ;;  %10135 = vst [vmem:[#allocation77_spill] sm:$0xff] %v7322_v29 }
 0x1aa   :  { %6097 = vset.pattern.permute.xlu1 %v10080_v28  ;;  %1446 = vperm.xlu0 %6163, %v6865_v25  }
 0x1ab   :  { %368 = vperm.xlu1 %6097, %v6943_v55   ;;  %v7327_v46 = vpop.permute.xlu0 %340 }
 0x1ac   :  { %10136 = vst [vmem:[#allocation78_spill] sm:$0xff] %v7327_v46  ;;  %v7329_v10 = vpop.permute.xlu1 %324 }
 0x1ae   :  { %1442 = vperm.xlu0 %6163, %v6906_v43  }
 0x1af   :  { %6098 = vset.pattern.permute.xlu1 %v10091_v15  ;;  %v7333_v22 = vpop.permute.xlu0 %348 }
 0x1b0   :  { %10137 = vst [vmem:[#allocation79_spill] sm:$0xff] %v7333_v22  ;;  %v7335_v35 = vpop.permute.xlu1 %328  ;;  %756 = vperm.xlu1 %6098, %v6951_v57  }
 0x1b2   :  { %1454 = vperm.xlu0 %6163, %v6879_v33  }
 0x1b3   :  { %v7339_v9 = vpop.permute.xlu0 %364 }
 0x1b4   :  { %10138 = vst [vmem:[#allocation80_spill] sm:$0xff] %v7339_v9  ;;  %6099 = vset.pattern.permute.xlu1 %v10079_v19 }
 0x1b5   :  { %v7342_v25 = vpop.permute.xlu1 %720  ;;  %1138 = vperm.xlu1 %6099, %v6933_v51  }
 0x1b6   :  { %1470 = vperm.xlu0 %6163, %v6887_v36  }
 0x1b7   :  { %v7346_v43 = vpop.permute.xlu0 %372 }
 0x1b8   :  { %10139 = vst [vmem:[#allocation81_spill] sm:$0xff] %v7346_v43 }
 0x1b9   :  { %1142 = vperm.xlu1 %6099, %v6928_v50  }
 0x1ba   :  { %v7349_v46 = vpop.permute.xlu1 %320  ;;  %1482 = vperm.xlu0 %6163, %v6890_v38  }
 0x1bb   :  { %v7352_v22 = vpop.permute.xlu0 %380 }
 0x1bc   :  { %10140 = vst [vmem:[#allocation82_spill] sm:$0xff] %v7352_v22 }
 0x1bd   :  { %1134 = vperm.xlu1 %6099, %v6935_v52  }
 0x1be   :  { %1494 = vperm.xlu0 %6163, %v6903_v42  }
 0x1bf   :  { %v7356_v33 = vpop.permute.xlu1 %708  ;;  %v7358_v9 = vpop.permute.xlu0 %396 }
 0x1c0   :  { %10141 = vst [vmem:[#allocation83_spill] sm:$0xff] %v7358_v9 }
 0x1c1   :  { %6100 = vset.pattern.permute.xlu1 %v10077_v24 }
 0x1c2   :  { %1510 = vperm.xlu1 %6100, %v6926_v49   ;;  %1486 = vperm.xlu0 %6163, %v6913_v45  }
 0x1c3   :  { %v7363_v36 = vpop.permute.xlu0 %404 }
 0x1c4   :  { %10142 = vst [vmem:[#allocation84_spill] sm:$0xff] %v7363_v36  ;;  %v7365_v43 = vpop.permute.xlu1 %1090 }
 0x1c5   :  { %10143 = vst [vmem:[#allocation85_spill] sm:$0xff] %v7365_v43 }
 0x1c6   :  { %6101 = vset.pattern.permute.xlu1 %v10079_v19  ;;  %1502 = vperm.xlu0 %6163, %v6919_v47  }
 0x1c7   :  { %1146 = vperm.xlu1 %6101, %v6951_v57   ;;  %v7370_v38 = vpop.permute.xlu0 %412 }
 0x1c8   :  { %10144 = vst [vmem:[#allocation86_spill] sm:$0xff] %v7370_v38  ;;  %v7372_v42 = vpop.permute.xlu1 %1094 }
 0x1c9   :  { %10145 = vst [vmem:[#allocation87_spill] sm:$0xff] %v7372_v42 }
 0x1ca   :  { %1514 = vperm.xlu0 %6163, %v6921_v48  }
 0x1cb   :  { %1150 = vperm.xlu1 %6101, %v6943_v55   ;;  %v7376_v49 = vpop.permute.xlu0 %428 }
 0x1cc   :  { %10146 = vst [vmem:[#allocation88_spill] sm:$0xff] %v7376_v49 }
 0x1cd   :  { %v7378_v45 = vpop.permute.xlu1 %336 }
 0x1ce   :  { %10147 = vst [vmem:[#allocation89_spill] sm:$0xff] %v7378_v45  ;;  %1526 = vperm.xlu0 %6163, %v6933_v51  }
 0x1cf   :  { %6102 = vset.pattern.permute.xlu1 %v10077_v24  ;;  %v7382_v36 = vpop.permute.xlu0 %436 }
 0x1d0   :  { %10148 = vst [vmem:[#allocation90_spill] sm:$0xff] %v7382_v36  ;;  %1530 = vperm.xlu1 %6102, %v6928_v50  }
 0x1d2   :  { %v7385_v47 = vpop.permute.xlu1 %724  ;;  %1518 = vperm.xlu0 %6163, %v6939_v53  }
 0x1d3   :  { %10149 = vst [vmem:[#allocation91_spill] sm:$0xff] %v7385_v47  ;;  %v7388_v43 = vpop.permute.xlu0 %444 }
 0x1d4   :  { %10150 = vst [vmem:[#allocation92_spill] sm:$0xff] %v7388_v43  ;;  %1522 = vperm.xlu1 %6102, %v6935_v52   ;;  %v253_v43 = vld [vmem:[%s9952_s1] sm:$0x1] }
 0x1d6   :  { %1534 = vperm.xlu0 %6163, %v6951_v57  }
 0x1d7   :  { %v7392_v48 = vpop.permute.xlu1 %1106  ;;  %v7394_v42 = vpop.permute.xlu0 %460 }
 0x1d8   :  { %10151 = vst [vmem:[#allocation93_spill] sm:$0xff] %v7394_v42  ;;  %1538 = vperm.xlu1 %6102, %v6943_v55  }
 0x1da   :  { %1546 = vperm.xlu0 %6163, %v6954_v58  }
 0x1db   :  { %v7398_v51 = vpop.permute.xlu1 %1110  ;;  %v7400_v50 = vpop.permute.xlu0 %468 }
 0x1dc   :  { %10152 = vst [vmem:[#allocation94_spill] sm:$0xff] %v7400_v50  ;;  %6103 = vset.pattern.permute.xlu1 %v10080_v28 }
 0x1dd   :  { %376 = vperm.xlu1 %6103, %v6954_v58  }
 0x1de   :  { %1558 = vperm.xlu0 %6163, %v6963_v61  }
 0x1df   :  { %v7405_v52 = vpop.permute.xlu1 %1102  ;;  %v7407_v53 = vpop.permute.xlu0 %476 }
 0x1e0   :  { %10153 = vst [vmem:[#allocation95_spill] sm:$0xff] %v7407_v53  ;;  %v519_v53 = vlaneseq }
 0x1e1   :  { %6104 = vset.pattern.permute.xlu1 %v10091_v15 }
 0x1e2   :  { %764 = vperm.xlu1 %6104, %v6957_v59   ;;  %1550 = vperm.xlu0 %6163, %v6969_v63  }
 0x1e3   :  { %v7412_v55 = vpop.permute.xlu0 %492 }
 0x1e4   :  { %10154 = vst [vmem:[#allocation96_spill] sm:$0xff] %v7412_v55  ;;  %v7414_v57 = vpop.permute.xlu1 %1478 }
 0x1e5   :  { %10155 = vst [vmem:[#allocation97_spill] sm:$0xff] %v7414_v57  ;;  %v520_v57 = vshrl.u32 %v519_v53, 7 }
 0x1e6   :  { %6105 = vset.pattern.permute.xlu1 %v10080_v28  ;;  %1566 = vperm.xlu0 %6163, %v6976_v2  }
 0x1e7   :  { %388 = vperm.xlu1 %6105, %v6963_v61   ;;  %v7419_v50 = vpop.permute.xlu0 %501  ;;  %v909_v49 = vsub.s32 1, %v520_v57  ;;  %v7440_v9 = vsub.s32 0, %v520_v57  ;;  %v1299_v22 = vsub.s32 2, %v520_v57  ;;  %v1687_v47 = vsub.s32 3, %v520_v57 }
 0x1e8   :  { %10156 = vst [vmem:[#allocation98_spill] sm:$0xff] %v7419_v50  ;;  %v1039_v50 = vld [vmem:[%s9952_s1] sm:$0x2]  ;;  %s6669_s1 = smov 4  }
 0x1e9   :  { %v7421_v36 = vpop.permute.xlu1 %1114  ;;  %10160 = vst [vmem:[#allocation102_spill] sm:$0xff] %v7440_v9  ;;  %v1040_v53 = vunpack.c.l.bf16 %v1039_v50 }
 0x1ea   :  { %10157 = vst [vmem:[#allocation99_spill] sm:$0xff] %v7421_v36  ;;  %1578 = vperm.xlu0 %6163, %v6978_v3  }
 0x1eb   :  { %392 = vperm.xlu1 %6105, %v6960_v60   ;;  %v7425_v42 = vpop.permute.xlu0 %516  ;;  %v7456_v50 = vrot.slane %v1040_v53, %v1299_v22 }
 0x1ec   :  { %10158 = vst [vmem:[#allocation100_spill] sm:$0xff] %v7425_v42  ;;  %v254_v42 = vunpack.c.l.bf16 %v253_v43 }
 0x1ed   :  { %v7427_v55 = vpop.permute.xlu1 %1118  ;;  %v1309_v57 = vmul.f32 %v7456_v50, %v7234_v17 }
 0x1ee   :  { %10159 = vst [vmem:[#allocation101_spill] sm:$0xff] %v7427_v55  ;;  %1590 = vperm.xlu0 %6163, %v6990_v6   ;;  %v7445_v36 = vrot.slane %v254_v42, %v909_v49  ;;  %v7452_v29 = vrot.slane %v254_v42, %v7440_v9 }
 0x1ef   :  { %6106 = vset.pattern.permute.xlu1 %v10091_v15 }
 0x1f0   :  { %784 = vperm.xlu1 %6106, %v6960_v60   ;;  %v7438_v38 = vpop.permute.xlu0 %1042  ;;  %v919_v43 = vmul.f32 %v7445_v36, %v7146_v5  ;;  %v531_v49 = vmul.f32 %v7452_v29, %v7131_v7  ;;  %v532_v22 = vmul.f32 %v7452_v29, %v7289_v27  ;;  %v920_v7 = vmul.f32 %v7445_v36, %v7153_v30 }
 0x1f2   :  { %v7442_v6 = vpop.permute.xlu1 %1498  ;;  %1582 = vperm.xlu0 %6163, %v6996_v8   ;;  %v983_v42 = vadd.f32 %v919_v43, %v531_v49  ;;  %v984_v49 = vadd.f32 %v920_v7, %v532_v22 }
 0x1f4   :  { %6107 = vset.pattern.permute.xlu1 %v10080_v28  ;;  %v7448_v55 = vpop.permute.xlu0 %1058  ;;  %v1373_v17 = vadd.f32 %v1309_v57, %v983_v42 }
 0x1f5   :  { %10161 = vst [vmem:[#allocation103_spill] sm:$0xff] %v7448_v55  ;;  %384 = vperm.xlu1 %6107, %v6966_v62   ;;  %v7465_v55 = vrot.slane %v1040_v53, %v1687_v47 }
 0x1f6   :  { %v7458_v45 = vpop.permute.xlu1 %1490  ;;  %1598 = vperm.xlu0 %6163, %v7002_v12  }
 0x1f7   :  { %v1697_v5 = vmul.f32 %v7465_v55, %v7284_v23 }
 0x1f8   :  { %v7467_v8 = vpop.permute.xlu0 %1050 }
 0x1f9   :  { %6108 = vset.pattern.permute.xlu1 %v10091_v15  ;;  %v1761_v43 = vadd.f32 %v1697_v5, %v1373_v17 }
 0x1fa   :  { %v7474_v9 = vpop.permute.xlu1 %1506  ;;  %772 = vperm.xlu1 %6108, %v6969_v63   ;;  %1610 = vperm.xlu0 %6163, %v7005_v13   ;;  %v1698_v63 = vmul.f32 %v7465_v55, %v7291_v56 }
 0x1fb   :  { %v1889_v30 = vmul.f32 0.2, %v1761_v43  ;;  %vm1825_vm4 = vcmp.gt.f32.partialorder %v1761_v43, 0.0 }
 0x1fc   :  { %v1079_v47 = vpop.permute.xlu0 %1078 }
 0x1fd   :  { %v1310_v53 = vmul.f32 %v7456_v50, %v1079_v47  ;;  %v1953_v7 = vsel %vm1825_vm4, %v1761_v43, %v1889_v30 }
 0x1fe   :  { %6109 = vset.pattern.permute.xlu1 %v10079_v19  ;;  %1622 = vperm.xlu0 %6163, %v7015_v16  }
 0x1ff   :  { %v7483_v23 = vpop.permute.xlu1 %344  ;;  %1154 = vperm.xlu1 %6109, %v6957_v59   ;;  %v1374_v27 = vadd.f32 %v1310_v53, %v984_v49 }
 0x200   :  { %10162 = vst [vmem:[#allocation104_spill] sm:$0xff] %v7483_v23  ;;  %v7488_v13 = vpop.permute.xlu0 %1082 }
 0x201   :  { %v1762_v57 = vadd.f32 %v1698_v63, %v1374_v27 }
 0x202   :  { %1614 = vperm.xlu0 %6163, %v7022_v18   ;;  %v10184_v18 = vld [vmem:[#allocation57_spill] sm:$0xff] }
 0x203   :  { %1158 = vperm.xlu1 %6109, %v6954_v58   ;;  %vm1826_vm5 = vcmp.gt.f32.partialorder %v1762_v57, 0.0  ;;  %v1890_v42 = vmul.f32 0.2, %v1762_v57 }
 0x204   :  { %v7492_v5 = vpop.permute.xlu1 %732  ;;  %v7494_v22 = vpop.permute.xlu0 %1098 }
 0x205   :  { %10163 = vst [vmem:[#allocation105_spill] sm:$0xff] %v7492_v5  ;;  %v1954_v56 = vsel %vm1826_vm5, %v1762_v57, %v1890_v42  ;;  %v523_v57 = vmul.f32 %v7452_v29, %v7276_v41  ;;  %v918_v41 = vmul.f32 %v7445_v36, %v7182_v31  ;;  %v10174_v31 = vld [vmem:[#allocation40_spill] sm:$0xff] }
 0x206   :  { %1630 = vperm.xlu0 %6163, %v7028_v20   ;;  %v7498_v17 = vpack.i.bf16 %v1954_v56, %v1953_v7  ;;  %v10168_v7 = vld [vmem:[#allocation28_spill] sm:$0xff]  ;;  %v10178_v20 = vld [vmem:[#allocation49_spill] sm:$0xff] }
 0x207   :  { %6110 = vset.pattern.permute.xlu1 %v10080_v28  ;;  %v911_v56 = vmul.f32 %v7445_v36, %v10168_v7  ;;  %v10170_v7 = vld [vmem:[#allocation27_spill] sm:$0xff] }
 0x208   :  { %400 = vperm.xlu1 %6110, %v6972_v1   ;;  %v7501_v47 = vpop.permute.xlu0 %1130 }
 0x209   :  { %v7503_v53 = vpop.permute.xlu1 %356  ;;  %v975_v5 = vadd.f32 %v911_v56, %v523_v57  ;;  %v1689_v57 = vmul.f32 %v7465_v55, %v7242_v37  ;;  %v525_v56 = vmul.f32 %v7452_v29, %v7282_v11  ;;  %v1303_v37 = vmul.f32 %v7456_v50, %v7467_v8 }
 0x20a   :  { %1642 = vperm.xlu0 %6163, %v7030_v21   ;;  %v1308_v11 = vmul.f32 %v7456_v50, %v7255_v39 }
 0x20c   :  { %6111 = vset.pattern.permute.xlu1 %v10091_v15  ;;  %v7507_v58 = vpop.permute.xlu0 %1162 }
 0x20d   :  { %10164 = vst [vmem:[#allocation106_spill] sm:$0xff] %v7507_v58  ;;  %v7509_v43 = vpop.permute.xlu1 %360  ;;  %788 = vperm.xlu1 %6111, %v6976_v2   ;;  %v10185_v58 = vld [vmem:[#allocation66_spill] sm:$0xff] }
 0x20e   :  { %1654 = vperm.xlu0 %6163, %v7041_v26  }
 0x210   :  { %v7513_v49 = vpop.permute.xlu0 %1194 }
 0x211   :  { %10165 = vst [vmem:[#allocation107_spill] sm:$0xff] %v7513_v49  ;;  %6112 = vset.pattern.permute.xlu1 %v10079_v19  ;;  %v10175_v49 = vld [vmem:[#allocation44_spill] sm:$0xff] }
 0x212   :  { %v7516_v63 = vpop.permute.xlu1 %752  ;;  %1170 = vperm.xlu1 %6112, %v6963_v61   ;;  %1662 = vperm.xlu0 %6163, %v7056_v54   ;;  %v1301_v61 = vmul.f32 %v7456_v50, %v7438_v38  ;;  %v912_v38 = vmul.f32 %v7445_v36, %v10170_v7  ;;  %v1302_v7 = vmul.f32 %v7456_v50, %v10175_v49 }
 0x214   :  { %v7520_v27 = vpop.permute.xlu0 %1226  ;;  %v1365_v54 = vadd.f32 %v1301_v61, %v975_v5 }
 0x215   :  { %10166 = vst [vmem:[#allocation108_spill] sm:$0xff] %v7520_v27 }
 0x216   :  { %1174 = vperm.xlu1 %6112, %v6960_v60   ;;  %1674 = vperm.xlu0 %6163, %v7066_v0   ;;  %v530_v0 = vmul.f32 %v7452_v29, %v7295_v4  ;;  %v10172_v4 = vld [vmem:[#allocation26_spill] sm:$0xff]  ;;  %v1753_v26 = vadd.f32 %v1689_v57, %v1365_v54  ;;  %v922_v54 = vmul.f32 %v7445_v36, %v7216_v14 }
 0x217   :  { %v7524_v30 = vpop.permute.xlu1 %352  ;;  %v524_v5 = vmul.f32 %v7452_v29, %v10172_v4  ;;  %v10176_v4 = vld [vmem:[#allocation37_spill] sm:$0xff] }
 0x218   :  { %v7528_v42 = vpop.permute.xlu0 %1258  ;;  %v982_v61 = vadd.f32 %v918_v41, %v530_v0  ;;  %vm1817_vm6 = vcmp.gt.f32.partialorder %v1753_v26, 0.0 }
 0x219   :  { %10167 = vst [vmem:[#allocation109_spill] sm:$0xff] %v7528_v42  ;;  %v976_v0 = vadd.f32 %v912_v38, %v524_v5  ;;  %v917_v38 = vmul.f32 %v7445_v36, %v10178_v20  ;;  %v10179_v5 = vld [vmem:[#allocation31_spill] sm:$0xff] }
 0x21a   :  { %1166 = vperm.xlu1 %6112, %v6966_v62   ;;  %v1372_v49 = vadd.f32 %v1308_v11, %v982_v61  ;;  %v914_v14 = vmul.f32 %v7445_v36, %v10179_v5  ;;  %v1691_v61 = vmul.f32 %v7465_v55, %v7278_v44  ;;  %v10181_v11 = vld [vmem:[#allocation62_spill] sm:$0xff] }
 0x21b   :  { %v1366_v39 = vadd.f32 %v1302_v7, %v976_v0  ;;  %v10180_v7 = vld [vmem:[#allocation47_spill] sm:$0xff]  ;;  %v1304_v20 = vmul.f32 %v7456_v50, %v10181_v11  ;;  %v10182_v0 = vld [vmem:[#allocation72_spill] sm:$0xff]  ;;  %v921_v11 = vmul.f32 %v7445_v36, %v10184_v18 }
 0x21c   :  { %v7535_v23 = vpop.permute.xlu1 %740  ;;  %v7537_v27 = vpop.permute.xlu0 %1282 }
 0x21d   :  { %10169 = vst [vmem:[#allocation28_spill] sm:$0xff] %v7537_v27 }
 0x21e   :  { %6113 = vset.pattern.permute.xlu1 %v10077_v24 }
 0x21f   :  { %1542 = vperm.xlu1 %6113, %v6957_v59   ;;  %v913_v59 = vmul.f32 %v7445_v36, %v10174_v31  ;;  %v526_v31 = vmul.f32 %v7452_v29, %v10176_v4 }
 0x220   :  { %v7551_v27 = vpop.permute.xlu0 %1294 }
 0x221   :  { %10171 = vst [vmem:[#allocation27_spill] sm:$0xff] %v7551_v27  ;;  %v7555_v42 = vpop.permute.xlu1 %1122  ;;  %v534_v27 = vmul.f32 %v7452_v29, %v7301_v34  ;;  %v977_v41 = vadd.f32 %v913_v59, %v525_v56 }
 0x222   :  { %10173 = vst [vmem:[#allocation26_spill] sm:$0xff] %v7555_v42  ;;  %v1881_v42 = vmul.f32 0.2, %v1753_v26 }
 0x223   :  { %6114 = vset.pattern.permute.xlu1 %v10079_v19  ;;  %v1367_v21 = vadd.f32 %v1303_v37, %v977_v41  ;;  %v986_v56 = vadd.f32 %v922_v54, %v534_v27  ;;  %v529_v37 = vmul.f32 %v7452_v29, %v10180_v7 }
 0x224   :  { %1178 = vperm.xlu1 %6114, %v6976_v2   ;;  %v1696_v2 = vmul.f32 %v7465_v55, %v7298_v40  ;;  %v1312_v40 = vmul.f32 %v7456_v50, %v10182_v0  ;;  %v1945_v44 = vsel %vm1817_vm6, %v1753_v26, %v1881_v42 }
 0x225   :  { %v7573_v8 = vpop.permute.xlu1 %1126  ;;  %v1435_v57 = vpop.permute.xlu0 %1434  ;;  %v1755_v4 = vadd.f32 %v1691_v61, %v1367_v21  ;;  %v10186_v21 = vld [vmem:[#allocation73_spill] sm:$0xff]  ;;  %v2424_v42 = vrot.slane %v1945_v44, 1 }
 0x226   :  { %10177 = vst [vmem:[#allocation40_spill] sm:$0xff] %v7573_v8  ;;  %v1690_v34 = vmul.f32 %v7465_v55, %v1435_v57  ;;  %v1760_v27 = vadd.f32 %v1696_v2, %v1372_v49  ;;  %v1376_v5 = vadd.f32 %v1312_v40, %v986_v56  ;;  %v10183_v8 = vld [vmem:[#allocation54_spill] sm:$0xff]  ;;  %v1307_v49 = vmul.f32 %v7456_v50, %v10185_v58 }
 0x227   :  { %v533_v7 = vmul.f32 %v7452_v29, %v10183_v8  ;;  %v1700_v61 = vmul.f32 %v7465_v55, %v10186_v21  ;;  %v1883_v56 = vmul.f32 0.2, %v1755_v4  ;;  %vm1819_vm8 = vcmp.gt.f32.partialorder %v1755_v4, 0.0  ;;  %v10189_v40 = vld [vmem:[#allocation34_spill] sm:$0xff] }
 0x228   :  { %v1754_v59 = vadd.f32 %v1690_v34, %v1366_v39  ;;  %1182 = vperm.xlu1 %6114, %v6972_v1   ;;  %v978_v39 = vadd.f32 %v914_v14, %v526_v31  ;;  %v981_v34 = vadd.f32 %v917_v38, %v529_v37  ;;  %v1888_v8 = vmul.f32 0.2, %v1760_v27 }
 0x229   :  { %v7591_v41 = vpop.permute.xlu0 %1446  ;;  %v1764_v14 = vadd.f32 %v1700_v61, %v1376_v5  ;;  %vm1824_vm9 = vcmp.gt.f32.partialorder %v1760_v27, 0.0  ;;  %v1311_v5 = vmul.f32 %v7456_v50, %v7488_v13 }
 0x22a   :  { %vm1818_vm7 = vcmp.gt.f32.partialorder %v1754_v59, 0.0  ;;  %v1882_v54 = vmul.f32 0.2, %v1754_v59  ;;  %v7593_v57 = vpop.permute.xlu1 %368  ;;  %v1368_v38 = vadd.f32 %v1304_v20, %v978_v39  ;;  %v1371_v39 = vadd.f32 %v1307_v49, %v981_v34 }
 0x22b   :  { %vm1828_vm11 = vcmp.gt.f32.partialorder %v1764_v14, 0.0  ;;  %v539_v34 = vmul.f32 %v7452_v29, %v7329_v10 }
 0x22c   :  { %v1946_v2 = vsel %vm1818_vm7, %v1754_v59, %v1882_v54  ;;  %6115 = vset.pattern.permute.xlu1 %v10077_v24  ;;  %v927_v54 = vmul.f32 %v7445_v36, %v10189_v40 }
 0x22d   :  { %v2425_v0 = vrot.slane %v1946_v2, 1  ;;  %1562 = vperm.xlu1 %6115, %v6960_v60   ;;  %v1443_v26 = vpop.permute.xlu0 %1442  ;;  %v6165_v31 = vpack.i.bf16 %v1946_v2, %v1945_v44  ;;  %v985_v44 = vadd.f32 %v921_v11, %v533_v7  ;;  %v928_v7 = vmul.f32 %v7445_v36, %v7342_v25 }
 0x22e   :  { %v1692_v18 = vmul.f32 %v7465_v55, %v1443_v26  ;;  %v7624_v26 = vsel %vm1824_vm9, %v1760_v27, %v1888_v8 }
 0x22f   :  { %v7606_v58 = vpop.permute.xlu1 %756  ;;  %6166 = vrot.lane.b32.xlu0 %v6165_v31, %s6669_s1  ;;  %v7610_v59 = vsel %vm99_vm1, %v2424_v42, %v2425_v0  ;;  %v7613_v60 = vsel %vm61_vm0, %v2425_v0, 0.0  ;;  %v1947_v0 = vsel %vm1819_vm8, %v1755_v4, %v1883_v56  ;;  %10190 = vst [vmem:[#allocation49_spill] sm:$0xff] %v7624_v26  ;;  %v1892_v42 = vmul.f32 0.2, %v1764_v14 }
 0x230   :  { %10187 = vst [vmem:[#allocation44_spill] sm:$0xff] %v7610_v59  ;;  %10188 = vst [vmem:[#allocation37_spill] sm:$0xff] %v7613_v60  ;;  %v1756_v37 = vadd.f32 %v1692_v18, %v1368_v38  ;;  %v1318_v4 = vmul.f32 %v7456_v50, %v7398_v51  ;;  %v2427_v38 = vrot.slane %v1947_v0, 1  ;;  %v1375_v25 = vadd.f32 %v1311_v5, %v985_v44  ;;  %v10222_v5 = vld [vmem:[#allocation106_spill] sm:$0xff] }
 0x231   :  { %1554 = vperm.xlu1 %6115, %v6966_v62   ;;  %v1455_v2 = vpop.permute.xlu0 %1454  ;;  %v540_v62 = vmul.f32 %v7452_v29, %v7335_v35  ;;  %v538_v35 = vmul.f32 %v7452_v29, %v7349_v46  ;;  %v10194_v46 = vld [vmem:[#allocation36_spill] sm:$0xff] }
 0x232   :  { %vm1820_vm10 = vcmp.gt.f32.partialorder %v1756_v37, 0.0  ;;  %v1884_v21 = vmul.f32 0.2, %v1756_v37  ;;  %v1695_v61 = vmul.f32 %v7465_v55, %v1455_v2  ;;  %v926_v2 = vmul.f32 %v7445_v36, %v10194_v46 }
 0x233   :  { %v992_v18 = vadd.f32 %v928_v7, %v540_v62  ;;  %v1316_v62 = vmul.f32 %v7456_v50, %v7405_v52  ;;  %v1704_v52 = vmul.f32 %v7465_v55, %v7458_v45 }
 0x234   :  { %v1948_v13 = vsel %vm1820_vm10, %v1756_v37, %v1884_v21  ;;  %v1759_v11 = vadd.f32 %v1695_v61, %v1371_v39  ;;  %v7632_v49 = vpop.permute.xlu1 %1138  ;;  %v537_v21 = vmul.f32 %v7452_v29, %v7315_v32  ;;  %v1317_v61 = vmul.f32 %v7456_v50, %v7392_v48 }
 0x235   :  { %v2428_v27 = vrot.slane %v1948_v13, 1  ;;  %1570 = vperm.xlu1 %6115, %v6972_v1   ;;  %v1471_v31 = vpop.permute.xlu0 %1470  ;;  %v6175_v8 = vpack.i.bf16 %v1948_v13, %v1947_v0  ;;  %v1706_v1 = vmul.f32 %v7465_v55, %v7442_v6  ;;  %v1382_v7 = vadd.f32 %v1318_v4, %v992_v18 }
 0x236   :  { %vm1823_vm12 = vcmp.gt.f32.partialorder %v1759_v11, 0.0  ;;  %v1887_v56 = vmul.f32 0.2, %v1759_v11  ;;  %v1699_v10 = vmul.f32 %v7465_v55, %v1471_v31  ;;  %v1956_v32 = vsel %vm1828_vm11, %v1764_v14, %v1892_v42  ;;  %v10195_v31 = vld [vmem:[#allocation89_spill] sm:$0xff] }
 0x237   :  { %6176 = vrot.lane.b32.xlu0 %v6175_v8, %s6669_s1  ;;  %v7642_v37 = vsel %vm99_vm1, %v2427_v38, %v2428_v27  ;;  %v7645_v51 = vsel %vm61_vm0, %v2428_v27, 0.0  ;;  %v990_v27 = vadd.f32 %v926_v2, %v538_v35  ;;  %v925_v48 = vmul.f32 %v7445_v36, %v7356_v33  ;;  %v10197_v35 = vld [vmem:[#allocation77_spill] sm:$0xff]  ;;  %v10199_v2 = vld [vmem:[#allocation2_spill] sm:$0xff] }
 0x238   :  { %10191 = vst [vmem:[#allocation31_spill] sm:$0xff] %v7642_v37  ;;  %10192 = vst [vmem:[#allocation47_spill] sm:$0xff] %v7645_v51  ;;  %v7649_v40 = vsel %vm1823_vm12, %v1759_v11, %v1887_v56  ;;  %v1763_v44 = vadd.f32 %v1699_v10, %v1375_v25  ;;  %v7651_v39 = vpop.permute.xlu1 %1142  ;;  %v991_v11 = vadd.f32 %v927_v54, %v539_v34  ;;  %v10196_v56 = vld [vmem:[#allocation38_spill] sm:$0xff] }
 0x239   :  { %10193 = vst [vmem:[#allocation62_spill] sm:$0xff] %v7649_v40  ;;  %6116 = vset.pattern.permute.xlu1 %v10080_v28  ;;  %v7662_v6 = vpop.permute.xlu0 %1482  ;;  %v6185_v0 = vpack.i.bf16 %v7624_v26, %v7649_v40  ;;  %v542_v4 = vmul.f32 %v7452_v29, %v10195_v31  ;;  %v1770_v38 = vadd.f32 %v1706_v1, %v1382_v7  ;;  %v10238_v26 = vld [vmem:[#allocation107_spill] sm:$0xff] }
 0x23a   :  { %vm1827_vm13 = vcmp.gt.f32.partialorder %v1763_v44, 0.0  ;;  %v1891_v13 = vmul.f32 0.2, %v1763_v44  ;;  %408 = vperm.xlu1 %6116, %v6978_v3   ;;  %v930_v14 = vmul.f32 %v7445_v36, %v10196_v56  ;;  %v1381_v33 = vadd.f32 %v1317_v61, %v991_v11 }
 0x23b   :  { %6186 = vrot.lane.b32.xlu0 %v6185_v0, %s6670_s22  ;;  %v1380_v34 = vadd.f32 %v1316_v62, %v990_v27  ;;  %v1315_v10 = vmul.f32 %v7456_v50, %v7494_v22  ;;  %v541_v45 = vmul.f32 %v7452_v29, %v10197_v35  ;;  %v989_v1 = vadd.f32 %v925_v48, %v537_v21  ;;  %v10200_v62 = vld [vmem:[#allocation91_spill] sm:$0xff] }
 0x23c   :  { %v1955_v8 = vsel %vm1827_vm13, %v1763_v44, %v1891_v13  ;;  %v7677_v25 = vpop.permute.xlu1 %1134  ;;  %v10198_v44 = vld [vmem:[#allocation101_spill] sm:$0xff]  ;;  %v994_v61 = vadd.f32 %v930_v14, %v542_v4  ;;  %v1898_v0 = vmul.f32 0.2, %v1770_v38  ;;  %v929_v13 = vmul.f32 %v7445_v36, %v10200_v62 }
 0x23d   :  { %v1495_v54 = vpop.permute.xlu0 %1494  ;;  %v7681_v42 = vpack.i.bf16 %v1956_v32, %v1955_v8  ;;  %v1320_v46 = vmul.f32 %v7456_v50, %v10198_v44  ;;  %v1768_v7 = vadd.f32 %v1704_v52, %v1380_v34  ;;  %vm1834_vm14 = vcmp.gt.f32.partialorder %v1770_v38, 0.0  ;;  %v10201_v8 = vld [vmem:[#allocation99_spill] sm:$0xff]  ;;  %v10203_v62 = vld [vmem:[#allocation41_spill] sm:$0xff] }
 0x23e   :  { %v1705_v18 = vmul.f32 %v7465_v55, %v1495_v54  ;;  %6117 = vset.pattern.permute.xlu1 %v10091_v15  ;;  %v1708_v32 = vmul.f32 %v7465_v55, %v7474_v9  ;;  %v1379_v27 = vadd.f32 %v1315_v10, %v989_v1  ;;  %v1319_v4 = vmul.f32 %v7456_v50, %v10201_v8 }
 0x23f   :  { %796 = vperm.xlu1 %6117, %v10199_v2   ;;  %6196 = vrot.lane.b32.xlu0 %v7498_v17, %s6669_s1  ;;  %v1384_v52 = vadd.f32 %v1320_v46, %v994_v61  ;;  %v1962_v56 = vsel %vm1834_vm14, %v1770_v38, %v1898_v0  ;;  %v1896_v14 = vmul.f32 0.2, %v1768_v7  ;;  %v993_v34 = vadd.f32 %v929_v13, %v541_v45  ;;  %v10206_v13 = vld [vmem:[#allocation3_spill] sm:$0xff] }
 0x240   :  { %v1769_v22 = vadd.f32 %v1705_v18, %v1381_v33  ;;  %v10202_v33 = vld [vmem:[#allocation4_spill] sm:$0xff]  ;;  %vm1832_vm2 = vcmp.gt.f32.partialorder %v1768_v7, 0.0  ;;  %v935_v38 = vmul.f32 %v7445_v36, %v10203_v62 }
 0x241   :  { %v7698_v21 = vpop.permute.xlu1 %1510  ;;  %v1487_v11 = vpop.permute.xlu0 %1486  ;;  %v1772_v35 = vadd.f32 %v1708_v32, %v1384_v52  ;;  %v1383_v46 = vadd.f32 %v1319_v4, %v993_v34  ;;  %v7712_v0 = vsel %vm1832_vm2, %v1768_v7, %v1896_v14  ;;  %v1325_v4 = vmul.f32 %v7456_v50, %v7632_v49 }
 0x242   :  { %vm1833_vm15 = vcmp.gt.f32.partialorder %v1769_v22, 0.0  ;;  %v1897_v48 = vmul.f32 0.2, %v1769_v22  ;;  %v1703_v31 = vmul.f32 %v7465_v55, %v1487_v11  ;;  %10204 = vst [vmem:[#allocation72_spill] sm:$0xff] %v7712_v0  ;;  %v10207_v11 = vld [vmem:[#allocation79_spill] sm:$0xff]  ;;  %v548_v14 = vmul.f32 %v7452_v29, %v7509_v43 }
 0x243   :  { %6118 = vset.pattern.permute.xlu1 %v10080_v28  ;;  %6206 = vrot.lane.b32.xlu0 %v7681_v42, %s6669_s1  ;;  %v545_v32 = vmul.f32 %v7452_v29, %v10207_v11  ;;  %v1900_v8 = vmul.f32 0.2, %v1772_v35  ;;  %vm1836_vm5 = vcmp.gt.f32.partialorder %v1772_v35, 0.0  ;;  %v1323_v43 = vmul.f32 %v7456_v50, %v7501_v47 }
 0x244   :  { %v1961_v9 = vsel %vm1833_vm15, %v1769_v22, %v1897_v48  ;;  %v1767_v54 = vadd.f32 %v1703_v31, %v1379_v27  ;;  %420 = vperm.xlu1 %6118, %v10202_v33   ;;  %v547_v22 = vmul.f32 %v7452_v29, %v7503_v53  ;;  %v933_v27 = vmul.f32 %v7445_v36, %v7535_v23 }
 0x245   :  { %v1503_v10 = vpop.permute.xlu0 %1502  ;;  %v7707_v18 = vpack.i.bf16 %v1962_v56, %v1961_v9  ;;  %v936_v53 = vmul.f32 %v7445_v36, %v7516_v63  ;;  %v1326_v9 = vmul.f32 %v7456_v50, %v7651_v39  ;;  %v546_v39 = vmul.f32 %v7452_v29, %v7524_v30 }
 0x246   :  { %vm1831_vm4 = vcmp.gt.f32.partialorder %v1767_v54, 0.0  ;;  %v1895_v1 = vmul.f32 0.2, %v1767_v54  ;;  %v1147_v44 = vpop.permute.xlu1 %1146  ;;  %v1707_v61 = vmul.f32 %v7465_v55, %v1503_v10  ;;  %v999_v23 = vadd.f32 %v935_v38, %v547_v22 }
 0x247   :  { %v997_v34 = vadd.f32 %v933_v27, %v545_v32  ;;  %v937_v38 = vmul.f32 %v7445_v36, %v7606_v58  ;;  %v550_v47 = vmul.f32 %v7452_v29, %v7593_v57  ;;  %v1324_v30 = vmul.f32 %v7456_v50, %v7677_v25 }
 0x248   :  { %v7716_v45 = vsel %vm1831_vm4, %v1767_v54, %v1895_v1  ;;  %424 = vperm.xlu1 %6118, %v10206_v13   ;;  %v1771_v48 = vadd.f32 %v1707_v61, %v1383_v46  ;;  %v10208_v54 = vld [vmem:[#allocation80_spill] sm:$0xff]  ;;  %v1964_v1 = vsel %vm1836_vm5, %v1772_v35, %v1900_v8  ;;  %v1000_v46 = vadd.f32 %v936_v53, %v548_v14  ;;  %v10209_v35 = vld [vmem:[#allocation42_spill] sm:$0xff]  ;;  %v10210_v14 = vld [vmem:[#allocation5_spill] sm:$0xff] }
 0x249   :  { %10205 = vst [vmem:[#allocation54_spill] sm:$0xff] %v7716_v45  ;;  %v7723_v31 = vpop.permute.xlu0 %1514  ;;  %v6215_v7 = vpack.i.bf16 %v7712_v0, %v7716_v45  ;;  %v549_v63 = vmul.f32 %v7452_v29, %v10208_v54  ;;  %v1389_v61 = vadd.f32 %v1325_v4, %v999_v23  ;;  %v934_v32 = vmul.f32 %v7445_v36, %v10209_v35 }
 0x24a   :  { %v1151_v52 = vpop.permute.xlu1 %1150  ;;  %vm1835_vm6 = vcmp.gt.f32.partialorder %v1771_v48, 0.0  ;;  %v1899_v56 = vmul.f32 0.2, %v1771_v48  ;;  %v1390_v27 = vadd.f32 %v1326_v9, %v1000_v46  ;;  %v1387_v58 = vadd.f32 %v1323_v43, %v997_v34  ;;  %v10211_v9 = vld [vmem:[#allocation43_spill] sm:$0xff] }
 0x24b   :  { %6216 = vrot.lane.b32.xlu0 %v6215_v7, %s6670_s22  ;;  %v1327_v53 = vmul.f32 %v7456_v50, %v1147_v44  ;;  %v938_v54 = vmul.f32 %v7445_v36, %v10211_v9  ;;  %v1001_v57 = vadd.f32 %v937_v38, %v549_v63  ;;  %v1328_v25 = vmul.f32 %v7456_v50, %v1151_v52 }
 0x24c   :  { %6119 = vset.pattern.permute.xlu1 %v10091_v15  ;;  %v1963_v49 = vsel %vm1835_vm6, %v1771_v48, %v1899_v56 }
 0x24d   :  { %816 = vperm.xlu1 %6119, %v10206_v13   ;;  %v1527_v10 = vpop.permute.xlu0 %1526  ;;  %v7749_v11 = vpack.i.bf16 %v1964_v1, %v1963_v49  ;;  %v998_v49 = vadd.f32 %v934_v32, %v546_v39  ;;  %v1002_v1 = vadd.f32 %v938_v54, %v550_v47  ;;  %v1391_v43 = vadd.f32 %v1327_v53, %v1001_v57 }
 0x24e   :  { %v1713_v62 = vmul.f32 %v7465_v55, %v1527_v10 }
 0x24f   :  { %v1531_v22 = vpop.permute.xlu1 %1530  ;;  %6226 = vrot.lane.b32.xlu0 %v7707_v18, %s6669_s1  ;;  %v1388_v46 = vadd.f32 %v1324_v30, %v998_v49 }
 0x250   :  { %v1777_v48 = vadd.f32 %v1713_v62, %v1389_v61  ;;  %v1714_v7 = vmul.f32 %v7465_v55, %v1531_v22 }
 0x251   :  { %6120 = vset.pattern.permute.xlu1 %v10080_v28  ;;  %v1519_v8 = vpop.permute.xlu0 %1518 }
 0x252   :  { %v1905_v4 = vmul.f32 0.2, %v1777_v48  ;;  %v1778_v56 = vadd.f32 %v1714_v7, %v1390_v27  ;;  %v1711_v23 = vmul.f32 %v7465_v55, %v1519_v8  ;;  %416 = vperm.xlu1 %6120, %v10210_v14   ;;  %vm1841_vm7 = vcmp.gt.f32.partialorder %v1777_v48, 0.0  ;;  %v10212_v27 = vld [vmem:[#allocation6_spill] sm:$0xff] }
 0x253   :  { %v1523_v10 = vpop.permute.xlu1 %1522  ;;  %6236 = vrot.lane.b32.xlu0 %v7749_v11, %s6669_s1  ;;  %v1392_v7 = vadd.f32 %v1328_v25, %v1002_v1  ;;  %v10215_v25 = vld [vmem:[#allocation7_spill] sm:$0xff] }
 0x254   :  { %vm1842_vm8 = vcmp.gt.f32.partialorder %v1778_v56, 0.0  ;;  %v1906_v44 = vmul.f32 0.2, %v1778_v56  ;;  %v1775_v34 = vadd.f32 %v1711_v23, %v1387_v58  ;;  %v1712_v61 = vmul.f32 %v7465_v55, %v1523_v10 }
 0x255   :  { %v1535_v62 = vpop.permute.xlu0 %1534  ;;  %v1969_v22 = vsel %vm1841_vm7, %v1777_v48, %v1905_v4 }
 0x256   :  { %v1970_v35 = vsel %vm1842_vm8, %v1778_v56, %v1906_v44  ;;  %v1715_v63 = vmul.f32 %v7465_v55, %v1535_v62  ;;  %6121 = vset.pattern.permute.xlu1 %v10091_v15  ;;  %v1903_v39 = vmul.f32 0.2, %v1775_v34  ;;  %v1776_v38 = vadd.f32 %v1712_v61, %v1388_v46 }
 0x257   :  { %v1539_v32 = vpop.permute.xlu1 %1538  ;;  %804 = vperm.xlu1 %6121, %v10212_v27   ;;  %v7771_v52 = vpack.i.bf16 %v1970_v35, %v1969_v22  ;;  %vm1839_vm9 = vcmp.gt.f32.partialorder %v1775_v34, 0.0  ;;  %v10216_v35 = vld [vmem:[#allocation8_spill] sm:$0xff]  ;;  %v10219_v27 = vld [vmem:[#allocation82_spill] sm:$0xff] }
 0x258   :  { %v1779_v47 = vadd.f32 %v1715_v63, %v1391_v43  ;;  %v1716_v30 = vmul.f32 %v7465_v55, %v1539_v32  ;;  %vm1840_vm10 = vcmp.gt.f32.partialorder %v1776_v38, 0.0  ;;  %v1904_v58 = vmul.f32 0.2, %v1776_v38  ;;  %v10217_v63 = vld [vmem:[#allocation9_spill] sm:$0xff] }
 0x259   :  { %v7774_v53 = vsel %vm1839_vm9, %v1775_v34, %v1903_v39  ;;  %v7819_v39 = vpop.permute.xlu0 %1546 }
 0x25a   :  { %v1907_v48 = vmul.f32 0.2, %v1779_v47  ;;  %v1780_v8 = vadd.f32 %v1716_v30, %v1392_v7  ;;  %10213 = vst [vmem:[#allocation57_spill] sm:$0xff] %v7774_v53  ;;  %v7776_v4 = vsel %vm1840_vm10, %v1776_v38, %v1904_v58  ;;  %vm1843_vm11 = vcmp.gt.f32.partialorder %v1779_v47, 0.0 }
 0x25b   :  { %10214 = vst [vmem:[#allocation66_spill] sm:$0xff] %v7776_v4  ;;  %6122 = vset.pattern.permute.xlu1 %v10079_v19  ;;  %v6245_v9 = vpack.i.bf16 %v7776_v4, %v7774_v53  ;;  %v553_v7 = vmul.f32 %v7452_v29, %v10219_v27  ;;  %v1331_v27 = vmul.f32 %v7456_v50, %v10222_v5 }
 0x25c   :  { %vm1844_vm12 = vcmp.gt.f32.partialorder %v1780_v8, 0.0  ;;  %v1908_v56 = vmul.f32 0.2, %v1780_v8  ;;  %v7779_v23 = vpop.permute.xlu1 %376  ;;  %1186 = vperm.xlu1 %6122, %v10199_v2   ;;  %v1971_v54 = vsel %vm1843_vm11, %v1779_v47, %v1907_v48 }
 0x25d   :  { %6246 = vrot.lane.b32.xlu0 %v6245_v9, %s6670_s22  ;;  %v1559_v30 = vpop.permute.xlu0 %1558 }
 0x25e   :  { %v1972_v49 = vsel %vm1844_vm12, %v1780_v8, %v1908_v56  ;;  %v10220_v56 = vld [vmem:[#allocation10_spill] sm:$0xff] }
 0x25f   :  { %v7785_v57 = vpack.i.bf16 %v1972_v49, %v1971_v54 }
 0x260   :  { %1190 = vperm.xlu1 %6122, %v6978_v3  }
 0x261   :  { %v7788_v10 = vpop.permute.xlu1 %764  ;;  %6256 = vrot.lane.b32.xlu0 %v7771_v52, %s6669_s1  ;;  %v1551_v20 = vpop.permute.xlu0 %1550 }
 0x264   :  { %6123 = vset.pattern.permute.xlu1 %v10080_v28 }
 0x265   :  { %432 = vperm.xlu1 %6123, %v10215_v25   ;;  %6266 = vrot.lane.b32.xlu0 %v7785_v57, %s6669_s1 }
 0x266   :  { %v389_v44 = vpop.permute.xlu1 %388 }
 0x267   :  { %v555_v32 = vmul.f32 %v7452_v29, %v389_v44  ;;  %v10221_v44 = vld [vmem:[#allocation83_spill] sm:$0xff] }
 0x269   :  { %6124 = vset.pattern.permute.xlu1 %v10091_v15 }
 0x26a   :  { %v393_v34 = vpop.permute.xlu1 %392  ;;  %820 = vperm.xlu1 %6124, %v7002_v12  }
 0x26e   :  { %6125 = vset.pattern.permute.xlu1 %v10079_v19 }
 0x26f   :  { %v785_v3 = vpop.permute.xlu1 %784  ;;  %1202 = vperm.xlu1 %6125, %v10202_v33  }
 0x270   :  { %v944_v54 = vmul.f32 %v7445_v36, %v785_v3 }
 0x273   :  { %1206 = vperm.xlu1 %6125, %v10206_v13  }
 0x274   :  { %v385_v1 = vpop.permute.xlu1 %384 }
 0x275   :  { %v554_v3 = vmul.f32 %v7452_v29, %v385_v1 }
 0x277   :  { %1198 = vperm.xlu1 %6125, %v10210_v14  }
 0x279   :  { %v773_v46 = vpop.permute.xlu1 %772 }
 0x27a   :  { %v941_v47 = vmul.f32 %v7445_v36, %v773_v46  ;;  %v1721_v46 = vmul.f32 %v7465_v55, %v1559_v30 }
 0x27b   :  { %6126 = vset.pattern.permute.xlu1 %v10077_v24 }
 0x27c   :  { %1574 = vperm.xlu1 %6126, %v10199_v2   ;;  %v1005_v9 = vadd.f32 %v941_v47, %v553_v7 }
 0x27e   :  { %v7804_v61 = vpop.permute.xlu1 %1154  ;;  %v1395_v7 = vadd.f32 %v1331_v27, %v1005_v9 }
 0x280   :  { %6127 = vset.pattern.permute.xlu1 %v10079_v19 }
 0x281   :  { %1210 = vperm.xlu1 %6127, %v7002_v12  }
 0x282   :  { %v7808_v62 = vpop.permute.xlu1 %1158 }
 0x285   :  { %1214 = vperm.xlu1 %6127, %v10215_v25  }
 0x287   :  { %v401_v33 = vpop.permute.xlu1 %400 }
 0x288   :  { %v558_v27 = vmul.f32 %v7452_v29, %v401_v33 }
 0x289   :  { %6128 = vset.pattern.permute.xlu1 %v10077_v24 }
 0x28a   :  { %1594 = vperm.xlu1 %6128, %v10206_v13   ;;  %v10218_v13 = vld [vmem:[#allocation46_spill] sm:$0xff] }
 0x28c   :  { %v789_v43 = vpop.permute.xlu1 %788 }
 0x28e   :  { %1586 = vperm.xlu1 %6128, %v10210_v14   ;;  %v943_v14 = vmul.f32 %v7445_v36, %v10218_v13  ;;  %v557_v13 = vmul.f32 %v7452_v29, %v10221_v44 }
 0x290   :  { %v1007_v8 = vadd.f32 %v943_v14, %v555_v32  ;;  %v945_v14 = vmul.f32 %v7445_v36, %v789_v43 }
 0x291   :  { %v1171_v22 = vpop.permute.xlu1 %1170 }
 0x292   :  { %1602 = vperm.xlu1 %6128, %v10215_v25   ;;  %v1333_v58 = vmul.f32 %v7456_v50, %v1171_v22  ;;  %v556_v22 = vmul.f32 %v7452_v29, %v393_v34  ;;  %v1719_v34 = vmul.f32 %v7465_v55, %v1551_v20  ;;  %v10225_v20 = vld [vmem:[#allocation50_spill] sm:$0xff] }
 0x294   :  { %v1397_v49 = vadd.f32 %v1333_v58, %v1007_v8  ;;  %v1008_v47 = vadd.f32 %v944_v54, %v556_v22  ;;  %v10223_v8 = vld [vmem:[#allocation48_spill] sm:$0xff]  ;;  %v1783_v9 = vadd.f32 %v1719_v34, %v1395_v7  ;;  %v1567_v54 = vpop.permute.xlu0 %1566  ;;  %v10224_v22 = vld [vmem:[#allocation11_spill] sm:$0xff] }
 0x295   :  { %v1175_v2 = vpop.permute.xlu1 %1174  ;;  %v942_v30 = vmul.f32 %v7445_v36, %v10223_v8 }
 0x296   :  { %6129 = vset.pattern.permute.xlu1 %v10080_v28  ;;  %v1334_v32 = vmul.f32 %v7456_v50, %v1175_v2  ;;  %v1785_v58 = vadd.f32 %v1721_v46, %v1397_v49  ;;  %v1009_v2 = vadd.f32 %v945_v14, %v557_v13  ;;  %v1723_v13 = vmul.f32 %v7465_v55, %v1567_v54 }
 0x297   :  { %440 = vperm.xlu1 %6129, %v10216_v35   ;;  %v1006_v1 = vadd.f32 %v942_v30, %v554_v3  ;;  %vm1847_vm15 = vcmp.gt.f32.partialorder %v1783_v9, 0.0 }
 0x298   :  { %v1398_v53 = vadd.f32 %v1334_v32, %v1008_v47  ;;  %vm1849_vm13 = vcmp.gt.f32.partialorder %v1785_v58, 0.0  ;;  %v1911_v47 = vmul.f32 0.2, %v1783_v9 }
 0x299   :  { %v1167_v12 = vpop.permute.xlu1 %1166 }
 0x29a   :  { %v1332_v43 = vmul.f32 %v7456_v50, %v1167_v12  ;;  %v946_v12 = vmul.f32 %v7445_v36, %v10225_v20 }
 0x29b   :  { %6130 = vset.pattern.permute.xlu1 %v10091_v15 }
 0x29c   :  { %828 = vperm.xlu1 %6130, %v10217_v63   ;;  %v1396_v14 = vadd.f32 %v1332_v43, %v1006_v1  ;;  %v1010_v8 = vadd.f32 %v946_v12, %v558_v27 }
 0x29e   :  { %v7821_v38 = vpop.permute.xlu1 %1542 }
 0x2a0   :  { %6131 = vset.pattern.permute.xlu1 %v10080_v28 }
 0x2a1   :  { %452 = vperm.xlu1 %6131, %v7015_v16  }
 0x2a3   :  { %v1179_v48 = vpop.permute.xlu1 %1178 }
 0x2a4   :  { %v1335_v5 = vmul.f32 %v7456_v50, %v1179_v48  ;;  %v1913_v48 = vmul.f32 0.2, %v1785_v58 }
 0x2a5   :  { %456 = vperm.xlu1 %6131, %v10220_v56  }
 0x2a6   :  { %v1399_v49 = vadd.f32 %v1335_v5, %v1009_v2  ;;  %v1977_v30 = vsel %vm1849_vm13, %v1785_v58, %v1913_v48 }
 0x2a7   :  { %v1183_v25 = vpop.permute.xlu1 %1182 }
 0x2a8   :  { %v1336_v3 = vmul.f32 %v7456_v50, %v1183_v25  ;;  %v1787_v5 = vadd.f32 %v1723_v13, %v1399_v49  ;;  %v7866_v49 = vsel %vm1847_vm15, %v1783_v9, %v1911_v47 }
 0x2a9   :  { %6132 = vset.pattern.permute.xlu1 %v10091_v15  ;;  %10228 = vst [vmem:[#allocation34_spill] sm:$0xff] %v7866_v49 }
 0x2aa   :  { %848 = vperm.xlu1 %6132, %v10220_v56   ;;  %v1400_v2 = vadd.f32 %v1336_v3, %v1010_v8  ;;  %v1915_v54 = vmul.f32 0.2, %v1787_v5  ;;  %vm1851_vm4 = vcmp.gt.f32.partialorder %v1787_v5, 0.0 }
 0x2ac   :  { %v1563_v44 = vpop.permute.xlu1 %1562  ;;  %v1979_v13 = vsel %vm1851_vm4, %v1787_v5, %v1915_v54 }
 0x2ad   :  { %v1722_v4 = vmul.f32 %v7465_v55, %v1563_v44  ;;  %v10226_v44 = vld [vmem:[#allocation12_spill] sm:$0xff] }
 0x2ae   :  { %6133 = vset.pattern.permute.xlu1 %v10080_v28 }
 0x2af   :  { %v1786_v46 = vadd.f32 %v1722_v4, %v1398_v53  ;;  %448 = vperm.xlu1 %6133, %v10224_v22  }
 0x2b0   :  { %v1555_v32 = vpop.permute.xlu1 %1554 }
 0x2b1   :  { %vm1850_vm14 = vcmp.gt.f32.partialorder %v1786_v46, 0.0  ;;  %v1914_v33 = vmul.f32 0.2, %v1786_v46  ;;  %v1720_v7 = vmul.f32 %v7465_v55, %v1555_v32  ;;  %v10230_v32 = vld [vmem:[#allocation13_spill] sm:$0xff] }
 0x2b3   :  { %v1978_v53 = vsel %vm1850_vm14, %v1786_v46, %v1914_v33  ;;  %v1784_v4 = vadd.f32 %v1720_v7, %v1396_v14  ;;  %6134 = vset.pattern.permute.xlu1 %v10091_v15  ;;  %v10231_v7 = vld [vmem:[#allocation14_spill] sm:$0xff] }
 0x2b4   :  { %v1571_v34 = vpop.permute.xlu1 %1570  ;;  %836 = vperm.xlu1 %6134, %v10226_v44   ;;  %v7861_v43 = vpack.i.bf16 %v1978_v53, %v1977_v30 }
 0x2b5   :  { %vm1848_vm2 = vcmp.gt.f32.partialorder %v1784_v4, 0.0  ;;  %v1912_v25 = vmul.f32 0.2, %v1784_v4  ;;  %v1724_v1 = vmul.f32 %v7465_v55, %v1571_v34  ;;  %v10232_v34 = vld [vmem:[#allocation15_spill] sm:$0xff] }
 0x2b7   :  { %v7864_v20 = vsel %vm1848_vm2, %v1784_v4, %v1912_v25  ;;  %v1788_v27 = vadd.f32 %v1724_v1, %v1400_v2  ;;  %v10233_v2 = vld [vmem:[#allocation16_spill] sm:$0xff]  ;;  %v7909_v25 = vpop.permute.xlu0 %1578 }
 0x2b8   :  { %10227 = vst [vmem:[#allocation73_spill] sm:$0xff] %v7864_v20  ;;  %6135 = vset.pattern.permute.xlu1 %v10079_v19  ;;  %v6275_v58 = vpack.i.bf16 %v7864_v20, %v7866_v49  ;;  %v10237_v20 = vld [vmem:[#allocation17_spill] sm:$0xff] }
 0x2b9   :  { %vm1852_vm5 = vcmp.gt.f32.partialorder %v1788_v27, 0.0  ;;  %v1916_v48 = vmul.f32 0.2, %v1788_v27  ;;  %v7871_v46 = vpop.permute.xlu1 %408  ;;  %1218 = vperm.xlu1 %6135, %v10217_v63  }
 0x2ba   :  { %6276 = vrot.lane.b32.xlu0 %v6275_v58, %s6670_s22 }
 0x2bb   :  { %v1980_v12 = vsel %vm1852_vm5, %v1788_v27, %v1916_v48  ;;  %v10235_v27 = vld [vmem:[#allocation53_spill] sm:$0xff]  ;;  %v1591_v48 = vpop.permute.xlu0 %1590 }
 0x2bc   :  { %v7875_v14 = vpack.i.bf16 %v1980_v12, %v1979_v13  ;;  %v951_v58 = vmul.f32 %v7445_v36, %v10235_v27  ;;  %v1729_v27 = vmul.f32 %v7465_v55, %v1591_v48 }
 0x2bd   :  { %1222 = vperm.xlu1 %6135, %v10216_v35  }
 0x2be   :  { %10229 = vst [vmem:[#allocation36_spill] sm:$0xff] %v7875_v14  ;;  %v7878_v9 = vpop.permute.xlu1 %796  ;;  %6286 = vrot.lane.b32.xlu0 %v7861_v43, %s6669_s1 }
 0x2bf   :  { %v1583_v37 = vpop.permute.xlu0 %1582 }
 0x2c1   :  { %6136 = vset.pattern.permute.xlu1 %v10080_v28 }
 0x2c2   :  { %464 = vperm.xlu1 %6136, %v10230_v32   ;;  %6296 = vrot.lane.b32.xlu0 %v7875_v14, %s6669_s1 }
 0x2c3   :  { %v421_v3 = vpop.permute.xlu1 %420 }
 0x2c6   :  { %6137 = vset.pattern.permute.xlu1 %v10091_v15 }
 0x2c7   :  { %v425_v33 = vpop.permute.xlu1 %424  ;;  %852 = vperm.xlu1 %6137, %v10231_v7  }
 0x2cb   :  { %6138 = vset.pattern.permute.xlu1 %v10079_v19 }
 0x2cc   :  { %v817_v35 = vpop.permute.xlu1 %816  ;;  %1234 = vperm.xlu1 %6138, %v7015_v16  }
 0x2d0   :  { %1238 = vperm.xlu1 %6138, %v10220_v56  }
 0x2d1   :  { %v417_v47 = vpop.permute.xlu1 %416 }
 0x2d4   :  { %1230 = vperm.xlu1 %6138, %v10224_v22  }
 0x2d6   :  { %v805_v8 = vpop.permute.xlu1 %804 }
 0x2d7   :  { %v949_v54 = vmul.f32 %v7445_v36, %v805_v8  ;;  %v1339_v8 = vmul.f32 %v7456_v50, %v10238_v26 }
 0x2d8   :  { %6139 = vset.pattern.permute.xlu1 %v10077_v24 }
 0x2d9   :  { %1606 = vperm.xlu1 %6139, %v10217_v63  }
 0x2db   :  { %v7894_v5 = vpop.permute.xlu1 %1186 }
 0x2dd   :  { %6140 = vset.pattern.permute.xlu1 %v10079_v19 }
 0x2de   :  { %1242 = vperm.xlu1 %6140, %v10231_v7  }
 0x2df   :  { %v7898_v53 = vpop.permute.xlu1 %1190 }
 0x2e2   :  { %1246 = vperm.xlu1 %6140, %v10230_v32  }
 0x2e4   :  { %v433_v16 = vpop.permute.xlu1 %432 }
 0x2e6   :  { %6141 = vset.pattern.permute.xlu1 %v10077_v24 }
 0x2e7   :  { %1626 = vperm.xlu1 %6141, %v10220_v56   ;;  %v563_v56 = vmul.f32 %v7452_v29, %v421_v3  ;;  %v952_v3 = vmul.f32 %v7445_v36, %v817_v35 }
 0x2e9   :  { %v821_v4 = vpop.permute.xlu1 %820  ;;  %v1015_v49 = vadd.f32 %v951_v58, %v563_v56  ;;  %v562_v56 = vmul.f32 %v7452_v29, %v417_v47 }
 0x2ea   :  { %v953_v51 = vmul.f32 %v7445_v36, %v821_v4  ;;  %v1727_v4 = vmul.f32 %v7465_v55, %v1583_v37  ;;  %v10242_v37 = vld [vmem:[#allocation56_spill] sm:$0xff] }
 0x2eb   :  { %1618 = vperm.xlu1 %6141, %v10224_v22   ;;  %v10234_v22 = vld [vmem:[#allocation18_spill] sm:$0xff] }
 0x2ee   :  { %v1203_v30 = vpop.permute.xlu1 %1202 }
 0x2ef   :  { %1634 = vperm.xlu1 %6141, %v10230_v32   ;;  %v1341_v12 = vmul.f32 %v7456_v50, %v1203_v30  ;;  %v10236_v32 = vld [vmem:[#allocation86_spill] sm:$0xff]  ;;  %v564_v30 = vmul.f32 %v7452_v29, %v425_v33 }
 0x2f0   :  { %v561_v7 = vmul.f32 %v7452_v29, %v10236_v32 }
 0x2f1   :  { %v1405_v0 = vadd.f32 %v1341_v12, %v1015_v49  ;;  %v10239_v49 = vld [vmem:[#allocation88_spill] sm:$0xff]  ;;  %v1016_v26 = vadd.f32 %v952_v3, %v564_v30  ;;  %v10240_v12 = vld [vmem:[#allocation55_spill] sm:$0xff] }
 0x2f2   :  { %v1207_v63 = vpop.permute.xlu1 %1206  ;;  %v1013_v45 = vadd.f32 %v949_v54, %v561_v7  ;;  %v565_v35 = vmul.f32 %v7452_v29, %v10239_v49  ;;  %v950_v33 = vmul.f32 %v7445_v36, %v10240_v12  ;;  %v566_v49 = vmul.f32 %v7452_v29, %v433_v16  ;;  %v10241_v30 = vld [vmem:[#allocation19_spill] sm:$0xff] }
 0x2f3   :  { %6142 = vset.pattern.permute.xlu1 %v10080_v28  ;;  %v1342_v32 = vmul.f32 %v7456_v50, %v1207_v63  ;;  %v1793_v58 = vadd.f32 %v1729_v27, %v1405_v0  ;;  %v1599_v0 = vpop.permute.xlu0 %1598 }
 0x2f4   :  { %472 = vperm.xlu1 %6142, %v10232_v34   ;;  %v1403_v54 = vadd.f32 %v1339_v8, %v1013_v45  ;;  %v1017_v59 = vadd.f32 %v953_v51, %v565_v35  ;;  %v1014_v8 = vadd.f32 %v950_v33, %v562_v56  ;;  %v1731_v51 = vmul.f32 %v7465_v55, %v1599_v0 }
 0x2f5   :  { %v1406_v47 = vadd.f32 %v1342_v32, %v1016_v26  ;;  %vm1857_vm6 = vcmp.gt.f32.partialorder %v1793_v58, 0.0 }
 0x2f6   :  { %v1199_v44 = vpop.permute.xlu1 %1198  ;;  %v1791_v60 = vadd.f32 %v1727_v4, %v1403_v54 }
 0x2f7   :  { %v1340_v63 = vmul.f32 %v7456_v50, %v1199_v44  ;;  %v954_v44 = vmul.f32 %v7445_v36, %v10242_v37 }
 0x2f8   :  { %6143 = vset.pattern.permute.xlu1 %v10091_v15  ;;  %v1919_v26 = vmul.f32 0.2, %v1791_v60  ;;  %vm1855_vm8 = vcmp.gt.f32.partialorder %v1791_v60, 0.0 }
 0x2f9   :  { %860 = vperm.xlu1 %6143, %v10233_v2   ;;  %v1404_v32 = vadd.f32 %v1340_v63, %v1014_v8  ;;  %v1018_v12 = vadd.f32 %v954_v44, %v566_v49 }
 0x2fb   :  { %v7911_v1 = vpop.permute.xlu1 %1574 }
 0x2fd   :  { %6144 = vset.pattern.permute.xlu1 %v10080_v28 }
 0x2fe   :  { %484 = vperm.xlu1 %6144, %v10234_v22  }
 0x300   :  { %v1211_v13 = vpop.permute.xlu1 %1210 }
 0x301   :  { %v1343_v48 = vmul.f32 %v7456_v50, %v1211_v13  ;;  %v1921_v13 = vmul.f32 0.2, %v1793_v58 }
 0x302   :  { %488 = vperm.xlu1 %6144, %v10237_v20  }
 0x303   :  { %v1407_v3 = vadd.f32 %v1343_v48, %v1017_v59  ;;  %v1985_v4 = vsel %vm1857_vm6, %v1793_v58, %v1921_v13 }
 0x304   :  { %v1215_v40 = vpop.permute.xlu1 %1214 }
 0x305   :  { %v1344_v56 = vmul.f32 %v7456_v50, %v1215_v40  ;;  %v1795_v59 = vadd.f32 %v1731_v51, %v1407_v3  ;;  %v7956_v3 = vsel %vm1855_vm8, %v1791_v60, %v1919_v26  ;;  %vm6673_vm8 = vmmov 0  }
 0x306   :  { %6145 = vset.pattern.permute.xlu1 %v10091_v15  ;;  %10246 = vst [vmem:[#allocation77_spill] sm:$0xff] %v7956_v3 }
 0x307   :  { %880 = vperm.xlu1 %6145, %v10237_v20   ;;  %v1923_v0 = vmul.f32 0.2, %v1795_v59  ;;  %vm1859_vm10 = vcmp.gt.f32.partialorder %v1795_v59, 0.0 }
 0x309   :  { %v1595_v7 = vpop.permute.xlu1 %1594  ;;  %v1987_v51 = vsel %vm1859_vm10, %v1795_v59, %v1923_v0 }
 0x30a   :  { %v1730_v45 = vmul.f32 %v7465_v55, %v1595_v7 }
 0x30b   :  { %6146 = vset.pattern.permute.xlu1 %v10080_v28 }
 0x30c   :  { %v1794_v27 = vadd.f32 %v1730_v45, %v1406_v47  ;;  %480 = vperm.xlu1 %6146, %v10241_v30   ;;  %v10243_v47 = vld [vmem:[#allocation20_spill] sm:$0xff]  ;;  %v1408_v45 = vadd.f32 %v1344_v56, %v1018_v12 }
 0x30d   :  { %v1587_v35 = vpop.permute.xlu1 %1586 }
 0x30e   :  { %vm1858_vm7 = vcmp.gt.f32.partialorder %v1794_v27, 0.0  ;;  %v1922_v16 = vmul.f32 0.2, %v1794_v27  ;;  %v1728_v54 = vmul.f32 %v7465_v55, %v1587_v35  ;;  %v10248_v35 = vld [vmem:[#allocation21_spill] sm:$0xff] }
 0x310   :  { %v1986_v48 = vsel %vm1858_vm7, %v1794_v27, %v1922_v16  ;;  %v1792_v33 = vadd.f32 %v1728_v54, %v1404_v32  ;;  %6147 = vset.pattern.permute.xlu1 %v10091_v15  ;;  %v10249_v54 = vld [vmem:[#allocation22_spill] sm:$0xff] }
 0x311   :  { %v1603_v7 = vpop.permute.xlu1 %1602  ;;  %868 = vperm.xlu1 %6147, %v10243_v47   ;;  %v7951_v63 = vpack.i.bf16 %v1986_v48, %v1985_v4  ;;  %v10250_v4 = vld [vmem:[#allocation23_spill] sm:$0xff] }
 0x312   :  { %vm1856_vm9 = vcmp.gt.f32.partialorder %v1792_v33, 0.0  ;;  %v1920_v40 = vmul.f32 0.2, %v1792_v33  ;;  %v1732_v8 = vmul.f32 %v7465_v55, %v1603_v7  ;;  %v10251_v7 = vld [vmem:[#allocation58_spill] sm:$0xff] }
 0x313   :  { %10244 = vst [vmem:[#allocation89_spill] sm:$0xff] %v7951_v63 }
 0x314   :  { %v7954_v37 = vsel %vm1856_vm9, %v1792_v33, %v1920_v40  ;;  %v1796_v49 = vadd.f32 %v1732_v8, %v1408_v45  ;;  %v7999_v8 = vpop.permute.xlu0 %1610 }
 0x315   :  { %10245 = vst [vmem:[#allocation38_spill] sm:$0xff] %v7954_v37  ;;  %6148 = vset.pattern.permute.xlu1 %v10079_v19  ;;  %v6305_v58 = vpack.i.bf16 %v7954_v37, %v7956_v3  ;;  %10252 = vst [vmem:[#allocation2_spill] sm:$0xff] %v7999_v8  ;;  %v10256_v37 = vld [vmem:[#allocation25_spill] sm:$0xff] }
 0x316   :  { %vm1860_vm11 = vcmp.gt.f32.partialorder %v1796_v49, 0.0  ;;  %v1924_v13 = vmul.f32 0.2, %v1796_v49  ;;  %v7961_v27 = vpop.permute.xlu1 %440  ;;  %1250 = vperm.xlu1 %6148, %v10233_v2  }
 0x317   :  { %6306 = vrot.lane.b32.xlu0 %v6305_v58, %s6670_s22  ;;  %v10254_v58 = vld [vmem:[#allocation60_spill] sm:$0xff] }
 0x318   :  { %v1988_v44 = vsel %vm1860_vm11, %v1796_v49, %v1924_v13  ;;  %v959_v13 = vmul.f32 %v7445_v36, %v10254_v58 }
 0x319   :  { %v7965_v32 = vpack.i.bf16 %v1988_v44, %v1987_v51  ;;  %v1623_v44 = vpop.permute.xlu0 %1622 }
 0x31a   :  { %1254 = vperm.xlu1 %6148, %v10232_v34  }
 0x31b   :  { %10247 = vst [vmem:[#allocation101_spill] sm:$0xff] %v7965_v32  ;;  %v7968_v60 = vpop.permute.xlu1 %828  ;;  %6316 = vrot.lane.b32.xlu0 %v7951_v63, %s6669_s1 }
 0x31d   :  { %v1615_v14 = vpop.permute.xlu0 %1614 }
 0x31e   :  { %6149 = vset.pattern.permute.xlu1 %v10080_v28 }
 0x31f   :  { %496 = vperm.xlu1 %6149, %v10248_v35   ;;  %6326 = vrot.lane.b32.xlu0 %v7965_v32, %s6669_s1 }
 0x320   :  { %v453_v56 = vpop.permute.xlu1 %452 }
 0x321   :  { %v571_v0 = vmul.f32 %v7452_v29, %v453_v56 }
 0x323   :  { %6150 = vset.pattern.permute.xlu1 %v10091_v15  ;;  %v1023_v56 = vadd.f32 %v959_v13, %v571_v0 }
 0x324   :  { %v457_v16 = vpop.permute.xlu1 %456  ;;  %884 = vperm.xlu1 %6150, %v10249_v54  }
 0x328   :  { %6151 = vset.pattern.permute.xlu1 %v10079_v19 }
 0x329   :  { %v849_v34 = vpop.permute.xlu1 %848  ;;  %1266 = vperm.xlu1 %6151, %v10234_v22  }
 0x32d   :  { %1270 = vperm.xlu1 %6151, %v10237_v20  }
 0x32e   :  { %v449_v26 = vpop.permute.xlu1 %448 }
 0x331   :  { %1262 = vperm.xlu1 %6151, %v10241_v30  }
 0x333   :  { %v837_v12 = vpop.permute.xlu1 %836 }
 0x334   :  { %v957_v49 = vmul.f32 %v7445_v36, %v837_v12  ;;  %v960_v12 = vmul.f32 %v7445_v36, %v849_v34  ;;  %v10259_v34 = vld [vmem:[#allocation93_spill] sm:$0xff] }
 0x335   :  { %6152 = vset.pattern.permute.xlu1 %v10077_v24 }
 0x336   :  { %1638 = vperm.xlu1 %6152, %v10233_v2  }
 0x338   :  { %v7984_v59 = vpop.permute.xlu1 %1218 }
 0x33a   :  { %6153 = vset.pattern.permute.xlu1 %v10079_v19 }
 0x33b   :  { %1274 = vperm.xlu1 %6153, %v10249_v54  }
 0x33c   :  { %v7988_v48 = vpop.permute.xlu1 %1222 }
 0x33f   :  { %1278 = vperm.xlu1 %6153, %v10248_v35  }
 0x341   :  { %v465_v22 = vpop.permute.xlu1 %464 }
 0x343   :  { %6154 = vset.pattern.permute.xlu1 %v10077_v24 }
 0x344   :  { %1658 = vperm.xlu1 %6154, %v10237_v20  }
 0x346   :  { %v853_v33 = vpop.permute.xlu1 %852 }
 0x348   :  { %6155 = vset.pattern.permute.xlu1 %v10080_v28 }
 0x349   :  { %506 = vperm.xlu1 %6155, %v10250_v4  }
 0x34b   :  { %v1235_v2 = vpop.permute.xlu1 %1234 }
 0x34c   :  { %v1349_v51 = vmul.f32 %v7456_v50, %v1235_v2  ;;  %v10258_v2 = vld [vmem:[#allocation108_spill] sm:$0xff] }
 0x34d   :  { %6156 = vset.pattern.permute.xlu1 %v10091_v15  ;;  %v1347_v8 = vmul.f32 %v7456_v50, %v10258_v2 }
 0x34e   :  { %892 = vperm.xlu1 %6156, %v10251_v7   ;;  %v1413_v58 = vadd.f32 %v1349_v51, %v1023_v56 }
 0x34f   :  { %v1239_v45 = vpop.permute.xlu1 %1238 }
 0x350   :  { %v1350_v0 = vmul.f32 %v7456_v50, %v1239_v45 }
 0x352   :  { %6158 = vset.pattern.permute.xlu1 %v10077_v24 }
 0x353   :  { %v1231_v40 = vpop.permute.xlu1 %1230  ;;  %1646 = vperm.xlu1 %6158, %v10243_v47   ;;  %v10255_v47 = vld [vmem:[#allocation92_spill] sm:$0xff] }
 0x354   :  { %v569_v3 = vmul.f32 %v7452_v29, %v10255_v47  ;;  %v1737_v47 = vmul.f32 %v7465_v55, %v1623_v44  ;;  %v10260_v44 = vld [vmem:[#allocation63_spill] sm:$0xff]  ;;  %v1348_v45 = vmul.f32 %v7456_v50, %v1231_v40 }
 0x356   :  { %v1801_v51 = vadd.f32 %v1737_v47, %v1413_v58 }
 0x357   :  { %1650 = vperm.xlu1 %6158, %v10241_v30   ;;  %v10257_v30 = vld [vmem:[#allocation24_spill] sm:$0xff] }
 0x358   :  { %v8002_v20 = vpop.permute.xlu1 %1606  ;;  %v8015_v32 = vsel %vm136_vm3, %v10257_v30, %v10256_v37  ;;  %v961_v37 = vmul.f32 %v7445_v36, %v853_v33  ;;  %v1735_v33 = vmul.f32 %v7465_v55, %v1615_v14  ;;  %vm1865_vm3 = vcmp.gt.f32.partialorder %v1801_v51, 0.0 }
 0x359   :  { %10253 = vst [vmem:[#allocation91_spill] sm:$0xff] %v8002_v20  ;;  %v572_v20 = vmul.f32 %v7452_v29, %v457_v16  ;;  %v958_v16 = vmul.f32 %v7445_v36, %v10260_v44  ;;  %v10262_v44 = vld [vmem:[#allocation64_spill] sm:$0xff] }
 0x35a   :  { %v962_v14 = vmul.f32 %v7445_v36, %v10262_v44 }
 0x35b   :  { %1666 = vperm.xlu1 %6158, %v10248_v35   ;;  %v1021_v35 = vadd.f32 %v957_v49, %v569_v3  ;;  %v573_v49 = vmul.f32 %v7452_v29, %v10259_v34  ;;  %v1024_v13 = vadd.f32 %v960_v12, %v572_v20  ;;  %v574_v20 = vmul.f32 %v7452_v29, %v465_v22  ;;  %v1631_v12 = vpop.permute.xlu0 %1630  ;;  %v10261_v34 = vld [vmem:[#allocation61_spill] sm:$0xff] }
 0x35c   :  { %v1739_v40 = vmul.f32 %v7465_v55, %v1631_v12 }
 0x35d   :  { %v1243_v54 = vpop.permute.xlu1 %1242  ;;  %v1411_v3 = vadd.f32 %v1347_v8, %v1021_v35  ;;  %v1025_v8 = vadd.f32 %v961_v37, %v573_v49  ;;  %v1414_v56 = vadd.f32 %v1350_v0, %v1024_v13 }
 0x35e   :  { %v1351_v30 = vmul.f32 %v7456_v50, %v1243_v54  ;;  %v1929_v54 = vmul.f32 0.2, %v1801_v51 }
 0x35f   :  { %6159 = vset.pattern.permute.xlu1 %v10080_v28  ;;  %v570_v28 = vmul.f32 %v7452_v29, %v449_v26  ;;  %v1799_v2 = vadd.f32 %v1735_v33, %v1411_v3  ;;  %v10263_v3 = vld [vmem:[#allocation29_spill] sm:$0xff] }
 0x360   :  { %511 = vperm.xlu1 %6159, %v8015_v32   ;;  %v1415_v58 = vadd.f32 %v1351_v30, %v1025_v8  ;;  %v915_v13 = vmul.f32 %v7445_v36, %v10263_v3  ;;  %v10264_v30 = vld [vmem:[#allocation30_spill] sm:$0xff] }
 0x361   :  { %v1247_v63 = vpop.permute.xlu1 %1246  ;;  %v1022_v35 = vadd.f32 %v958_v16, %v570_v28  ;;  %v527_v16 = vmul.f32 %v7452_v29, %v10264_v30  ;;  %v1927_v33 = vmul.f32 0.2, %v1799_v2  ;;  %vm1863_vm13 = vcmp.gt.f32.partialorder %v1799_v2, 0.0  ;;  %v10265_v30 = vld [vmem:[#allocation32_spill] sm:$0xff] }
 0x362   :  { %v1352_v49 = vmul.f32 %v7456_v50, %v1247_v63  ;;  %v1803_v8 = vadd.f32 %v1739_v40, %v1415_v58  ;;  %v10266_v58 = vld [vmem:[#allocation35_spill] sm:$0xff] }
 0x363   :  { %v1412_v37 = vadd.f32 %v1348_v45, %v1022_v35  ;;  %v1993_v45 = vsel %vm1865_vm3, %v1801_v51, %v1929_v54  ;;  %v979_v3 = vadd.f32 %v915_v13, %v527_v16  ;;  %v8061_v40 = vsel %vm1863_vm13, %v1799_v2, %v1927_v33 }
 0x364   :  { %6161 = vset.pattern.permute.xlu1 %v10091_v15  ;;  %v1931_v54 = vmul.f32 0.2, %v1803_v8  ;;  %vm1867_vm15 = vcmp.gt.f32.partialorder %v1803_v8, 0.0 }
 0x365   :  { %900 = vperm.xlu1 %6161, %v8015_v32  }
 0x366   :  { %v1627_v26 = vpop.permute.xlu1 %1626 }
 0x367   :  { %v1738_v15 = vmul.f32 %v7465_v55, %v1627_v26  ;;  %v1026_v26 = vadd.f32 %v962_v14, %v574_v20  ;;  %v528_v20 = vmul.f32 %v7452_v29, %v10265_v30  ;;  %v10270_v30 = vld [vmem:[#allocation75_spill] sm:$0xff] }
 0x369   :  { %v1802_v47 = vadd.f32 %v1738_v15, %v1414_v56  ;;  %904 = vperm.xlu1 %6161, %v10261_v34   ;;  %v1416_v12 = vadd.f32 %v1352_v49, %v1026_v26 }
 0x36a   :  { %v1619_v0 = vpop.permute.xlu1 %1618 }
 0x36b   :  { %vm1866_vm12 = vcmp.gt.f32.partialorder %v1802_v47, 0.0  ;;  %v1930_v28 = vmul.f32 0.2, %v1802_v47  ;;  %v1736_v22 = vmul.f32 %v7465_v55, %v1619_v0 }
 0x36d   :  { %v1994_v56 = vsel %vm1866_vm12, %v1802_v47, %v1930_v28  ;;  %v1800_v15 = vadd.f32 %v1736_v22, %v1412_v37  ;;  %6162 = vset.pattern.permute.xlu1 %v10079_v19  ;;  %v916_v47 = vmul.f32 %v7445_v36, %v10266_v58  ;;  %v10267_v19 = vld [vmem:[#allocation103_spill] sm:$0xff]  ;;  %v10268_v37 = vld [vmem:[#allocation52_spill] sm:$0xff]  ;;  %v1693_v28 = vmul.f32 %v7465_v55, %v7591_v41  ;;  %v10271_v58 = vld [vmem:[#allocation74_spill] sm:$0xff] }
 0x36e   :  { %v1635_v35 = vpop.permute.xlu1 %1634  ;;  %1286 = vperm.xlu1 %6162, %v10250_v4   ;;  %v8050_v63 = vpack.i.bf16 %v1994_v56, %v1993_v45  ;;  %v1305_v51 = vmul.f32 %v7456_v50, %v10267_v19  ;;  %v1306_v49 = vmul.f32 %v7456_v50, %v10268_v37  ;;  %v10269_v56 = vld [vmem:[#allocation70_spill] sm:$0xff]  ;;  %v1995_v45 = vsel %vm1867_vm15, %v1803_v8, %v1931_v54  ;;  %v10274_v54 = vld [vmem:[#allocation87_spill] sm:$0xff]  ;;  %v10275_v37 = vld [vmem:[#allocation85_spill] sm:$0xff] }
 0x36f   :  { %vm1864_vm14 = vcmp.gt.f32.partialorder %v1800_v15, 0.0  ;;  %v1928_v44 = vmul.f32 0.2, %v1800_v15  ;;  %v1740_v0 = vmul.f32 %v7465_v55, %v1635_v35  ;;  %v980_v26 = vadd.f32 %v916_v47, %v528_v20  ;;  %v10272_v47 = vld [vmem:[#allocation76_spill] sm:$0xff] }
 0x370   :  { %v1694_v2 = vmul.f32 %v7465_v55, %v10269_v56  ;;  %v1369_v33 = vadd.f32 %v1305_v51, %v979_v3  ;;  %v536_v3 = vmul.f32 %v7452_v29, %v10270_v30  ;;  %v535_v8 = vmul.f32 %v7452_v29, %v10271_v58  ;;  %v10276_v56 = vld [vmem:[#allocation97_spill] sm:$0xff] }
 0x371   :  { %v8059_v4 = vsel %vm1864_vm14, %v1800_v15, %v1928_v44  ;;  %v1804_v14 = vadd.f32 %v1740_v0, %v1416_v12  ;;  %v1370_v41 = vadd.f32 %v1306_v49, %v980_v26  ;;  %v1313_v49 = vmul.f32 %v7456_v50, %v10275_v37 }
 0x372   :  { %1290 = vperm.xlu1 %6162, %v8015_v32   ;;  %v6335_v22 = vpack.i.bf16 %v8059_v4, %v8061_v40  ;;  %v1757_v35 = vadd.f32 %v1693_v28, %v1369_v33 }
 0x373   :  { %vm1868_vm2 = vcmp.gt.f32.partialorder %v1804_v14, 0.0  ;;  %v1932_v13 = vmul.f32 0.2, %v1804_v14  ;;  %v8070_v16 = vpop.permute.xlu1 %472  ;;  %v1758_v44 = vadd.f32 %v1694_v2, %v1370_v41  ;;  %v1701_v2 = vmul.f32 %v7465_v55, %v10276_v56 }
 0x374   :  { %6336 = vrot.lane.b32.xlu0 %v6335_v22, %s6670_s22  ;;  %v1885_v20 = vmul.f32 0.2, %v1757_v35  ;;  %vm1821_vm4 = vcmp.gt.f32.partialorder %v1757_v35, 0.0  ;;  %v10039_v56 = vmov 0.0  }
 0x375   :  { %v1996_v15 = vsel %vm1868_vm2, %v1804_v14, %v1932_v13  ;;  %v1886_v51 = vmul.f32 0.2, %v1758_v44  ;;  %v1314_v14 = vmul.f32 %v7456_v50, %v10274_v54  ;;  %vm1822_vm5 = vcmp.gt.f32.partialorder %v1758_v44, 0.0  ;;  %v10281_v54 = vld [vmem:[#allocation40_spill] sm:$0xff]  ;;  %5777 = vmatprep.subr.bf16.mxu0 %v10039_v56  ;;  %5783 = vmatprep.subr.bf16.mxu1 %v10039_v56 }
 0x376   :  { %6164 = vset.pattern.permute.xlu1 %v10077_v24  ;;  %v8076_v12 = vpack.i.bf16 %v1996_v15, %v1995_v45  ;;  %v923_v24 = vmul.f32 %v7445_v36, %v10272_v47  ;;  %v8100_v13 = vsel %vm1821_vm4, %v1757_v35, %v1885_v20  ;;  %5779 = vmatprep.mubr.msk.bf16.mxu0 %vm6673_vm8, %v10039_v56 }
 0x377   :  { %1670 = vperm.xlu1 %6164, %v10251_v7   ;;  %v10273_v7 = vld [vmem:[#allocation33_spill] sm:$0xff]  ;;  %v8107_v33 = vsel %vm1822_vm5, %v1758_v44, %v1886_v51  ;;  %5785 = vmatprep.mubr.msk.bf16.mxu1 %vm6673_vm8, %v10039_v56 }
 0x378   :  { %v8079_v0 = vpop.permute.xlu1 %860  ;;  %6346 = vrot.lane.b32.xlu0 %v8050_v63, %s6669_s1  ;;  %v924_v19 = vmul.f32 %v7445_v36, %v10273_v7  ;;  %v987_v26 = vadd.f32 %v923_v24, %v535_v8  ;;  %v6170_v30 = vpack.i.bf16 %v8107_v33, %v8100_v13  ;;  %v10279_v24 = vld [vmem:[#allocation78_spill] sm:$0xff] }
 0x379   :  { %v543_v7 = vmul.f32 %v7452_v29, %v10279_v24  ;;  %v10284_v24 = vld [vmem:[#allocation45_spill] sm:$0xff] }
 0x37a   :  { %v988_v22 = vadd.f32 %v924_v19, %v536_v3  ;;  %v1377_v45 = vadd.f32 %v1313_v49, %v987_v26  ;;  %v10280_v19 = vld [vmem:[#allocation105_spill] sm:$0xff]  ;;  %v1710_v26 = vmul.f32 %v7465_v55, %v7723_v31 }
 0x37b   :  { %1678 = vperm.xlu1 %6164, %v8015_v32   ;;  %v1702_v32 = vmul.f32 %v7465_v55, %v7662_v6  ;;  %v10277_v6 = vld [vmem:[#allocation104_spill] sm:$0xff]  ;;  %v931_v51 = vmul.f32 %v7445_v36, %v10280_v19  ;;  %v8131_v49 = vld [vmem:[%s9953_s2] sm:$0xff]  }
 0x37c   :  { %6356 = vrot.lane.b32.xlu0 %v8076_v12, %s6669_s1  ;;  %v1378_v15 = vadd.f32 %v1314_v14, %v988_v22  ;;  %v1765_v3 = vadd.f32 %v1701_v2, %v1377_v45  ;;  %v544_v20 = vmul.f32 %v7452_v29, %v10277_v6  ;;  %v1322_v14 = vmul.f32 %v7456_v50, %v10281_v54  ;;  %v10282_v22 = vld [vmem:[#allocation26_spill] sm:$0xff] }
 0x37d   :  { %v8098_v28 = vpop.permute.xlu1 %484  ;;  %5778 = vmatpush3.bf16.msra.mxu0 %v8131_v49  ;;  %v995_v45 = vadd.f32 %v931_v51, %v543_v7  ;;  %5784 = vmatpush3.bf16.msra.mxu1 %v8131_v49  ;;  %v940_v7 = vmul.f32 %v7445_v36, %v10284_v24  ;;  %v1329_v51 = vmul.f32 %v7456_v50, %v7804_v61 }
 0x37e   :  { %v1766_v35 = vadd.f32 %v1702_v32, %v1378_v15  ;;  %v1893_v47 = vmul.f32 0.2, %v1765_v3  ;;  %vm1829_vm7 = vcmp.gt.f32.partialorder %v1765_v3, 0.0  ;;  %v1321_v32 = vmul.f32 %v7456_v50, %v10282_v22  ;;  %5789 = vmatprep.subr.bf16.mxu0 %v10039_v56  ;;  %5795 = vmatprep.subr.bf16.mxu1 %v10039_v56 }
 0x37f   :  { %1682 = vperm.xlu1 %6164, %v10261_v34   ;;  %v10278_v34 = vld [vmem:[#allocation39_spill] sm:$0xff]  ;;  %v1330_v54 = vmul.f32 %v7456_v50, %v7808_v62  ;;  %v1725_v24 = vmul.f32 %v7465_v55, %v7911_v1 }
 0x380   :  { %v1894_v58 = vmul.f32 0.2, %v1766_v35  ;;  %v932_v44 = vmul.f32 %v7445_v36, %v10278_v34  ;;  %vm1830_vm6 = vcmp.gt.f32.partialorder %v1766_v35, 0.0  ;;  %v8141_v2 = vsel %vm1829_vm7, %v1765_v3, %v1893_v47 }
 0x381   :  { %v8109_v41 = vpop.permute.xlu1 %488  ;;  %v939_v47 = vmul.f32 %v7445_v36, %v7788_v10 }
 0x382   :  { %v996_v37 = vadd.f32 %v932_v44, %v544_v20  ;;  %v10283_v20 = vld [vmem:[#allocation81_spill] sm:$0xff]  ;;  %v552_v44 = vmul.f32 %v7452_v29, %v7779_v23 }
 0x383   :  { %6171 = vrot.lane.b32.xlu1 %v6170_v30, %s6670_s22 }
 0x384   :  { %v1386_v30 = vadd.f32 %v1322_v14, %v996_v37  ;;  %v1004_v10 = vadd.f32 %v940_v7, %v552_v44 }
 0x386   :  { %v8116_v8 = vpop.permute.xlu1 %880  ;;  %v1774_v3 = vadd.f32 %v1710_v26, %v1386_v30  ;;  %v1394_v61 = vadd.f32 %v1330_v54, %v1004_v10 }
 0x387   :  { %6181 = vrot.lane.b32.xlu1 %v7498_v17, %s6671_s23  ;;  %v8135_v17 = vsel %vm1830_vm6, %v1766_v35, %v1894_v58  ;;  %v1709_v35 = vmul.f32 %v7465_v55, %v7698_v21  ;;  %v551_v58 = vmul.f32 %v7452_v29, %v10283_v20 }
 0x388   :  { %v6200_v31 = vpack.i.bf16 %v8135_v17, %v8141_v2  ;;  %v1902_v34 = vmul.f32 0.2, %v1774_v3  ;;  %vm1838_vm9 = vcmp.gt.f32.partialorder %v1774_v3, 0.0 }
 0x389   :  { %v1003_v37 = vadd.f32 %v939_v47, %v551_v58 }
 0x38a   :  { %v8178_v23 = vsel %vm1838_vm9, %v1774_v3, %v1902_v34  ;;  %v10285_v3 = vld [vmem:[#allocation51_spill] sm:$0xff]  ;;  %v1337_v34 = vmul.f32 %v7456_v50, %v7894_v5 }
 0x38b   :  { %v8143_v15 = vpop.permute.xlu1 %480  ;;  %6191 = vrot.lane.b32.xlu1 %v7681_v42, %s6671_s23  ;;  %v1385_v42 = vadd.f32 %v1321_v32, %v995_v45  ;;  %v1393_v32 = vadd.f32 %v1329_v51, %v1003_v37  ;;  %v1718_v45 = vmul.f32 %v7465_v55, %v7819_v39  ;;  %v10286_v39 = vld [vmem:[#allocation84_spill] sm:$0xff]  ;;  %v955_v37 = vmul.f32 %v7445_v36, %v7968_v60 }
 0x38c   :  { %v559_v20 = vmul.f32 %v7452_v29, %v10286_v39  ;;  %v1346_v60 = vmul.f32 %v7456_v50, %v7988_v48 }
 0x38d   :  { %v1773_v21 = vadd.f32 %v1709_v35, %v1385_v42  ;;  %v1782_v35 = vadd.f32 %v1718_v45, %v1394_v61 }
 0x38f   :  { %6201 = vrot.lane.b32.xlu1 %v6200_v31, %s6670_s22  ;;  %v1901_v19 = vmul.f32 0.2, %v1773_v21  ;;  %vm1837_vm10 = vcmp.gt.f32.partialorder %v1773_v21, 0.0  ;;  %v947_v31 = vmul.f32 %v7445_v36, %v7878_v9  ;;  %v1910_v58 = vmul.f32 0.2, %v1782_v35 }
 0x390   :  { %v8160_v6 = vpop.permute.xlu1 %868  ;;  %vm1846_vm3 = vcmp.gt.f32.partialorder %v1782_v35, 0.0 }
 0x391   :  { %v8184_v22 = vsel %vm1837_vm10, %v1773_v21, %v1901_v19  ;;  %v948_v21 = vmul.f32 %v7445_v36, %v10285_v3  ;;  %v1011_v47 = vadd.f32 %v947_v31, %v559_v20  ;;  %v8217_v51 = vsel %vm1846_vm3, %v1782_v35, %v1910_v58 }
 0x392   :  { %v6230_v62 = vpack.i.bf16 %v8178_v23, %v8184_v22 }
 0x393   :  { %6211 = vrot.lane.b32.xlu1 %v7707_v18, %s6671_s23  ;;  %v1717_v18 = vmul.f32 %v7465_v55, %v7821_v38 }
 0x395   :  { %v8176_v14 = vpop.permute.xlu1 %1250  ;;  %v1781_v30 = vadd.f32 %v1717_v18, %v1393_v32  ;;  %v10287_v32 = vld [vmem:[#allocation90_spill] sm:$0xff] }
 0x396   :  { %v567_v61 = vmul.f32 %v7452_v29, %v10287_v32 }
 0x397   :  { %6221 = vrot.lane.b32.xlu1 %v7749_v11, %s6671_s23  ;;  %v1909_v38 = vmul.f32 0.2, %v1781_v30  ;;  %v560_v11 = vmul.f32 %v7452_v29, %v7871_v46  ;;  %vm1845_vm11 = vcmp.gt.f32.partialorder %v1781_v30, 0.0  ;;  %v1338_v46 = vmul.f32 %v7456_v50, %v7898_v53 }
 0x398   :  { %v1726_v53 = vmul.f32 %v7465_v55, %v7909_v25  ;;  %v10288_v25 = vld [vmem:[#allocation59_spill] sm:$0xff] }
 0x399   :  { %v8186_v26 = vpop.permute.xlu1 %1254  ;;  %v8209_v9 = vsel %vm1845_vm11, %v1781_v30, %v1909_v38  ;;  %v1012_v44 = vadd.f32 %v948_v21, %v560_v11  ;;  %v956_v45 = vmul.f32 %v7445_v36, %v10288_v25  ;;  %v10289_v38 = vld [vmem:[#allocation91_spill] sm:$0xff]  ;;  %v10290_v21 = vld [vmem:[#allocation36_spill] sm:$0xff] }
 0x39a   :  { %v6260_v5 = vpack.i.bf16 %v8217_v51, %v8209_v9  ;;  %v1733_v11 = vmul.f32 %v7465_v55, %v10289_v38  ;;  %v1354_v32 = vmul.f32 %v7456_v50, %v8186_v26 }
 0x39b   :  { %6231 = vrot.lane.b32.xlu1 %v6230_v62, %s6670_s22  ;;  %v1402_v19 = vadd.f32 %v1338_v46, %v1012_v44  ;;  %v1345_v62 = vmul.f32 %v7456_v50, %v7984_v59 }
 0x39d   :  { %v1790_v10 = vadd.f32 %v1726_v53, %v1402_v19  ;;  %v963_v19 = vmul.f32 %v7445_v36, %v8079_v0 }
 0x39e   :  { %v8197_v42 = vpop.permute.xlu1 %496 }
 0x39f   :  { %6241 = vrot.lane.b32.xlu1 %v7771_v52, %s6671_s23  ;;  %v1401_v52 = vadd.f32 %v1337_v34, %v1011_v47  ;;  %v1918_v30 = vmul.f32 0.2, %v1790_v10  ;;  %vm1854_vm13 = vcmp.gt.f32.partialorder %v1790_v10, 0.0  ;;  %v10291_v34 = vld [vmem:[#allocation2_spill] sm:$0xff] }
 0x3a0   :  { %v1734_v46 = vmul.f32 %v7465_v55, %v10291_v34  ;;  %v580_v34 = vmul.f32 %v7452_v29, %v8109_v41 }
 0x3a1   :  { %v1789_v54 = vadd.f32 %v1725_v24, %v1401_v52  ;;  %v8244_v39 = vsel %vm1854_vm13, %v1790_v10, %v1918_v30  ;;  %v576_v52 = vmul.f32 %v7452_v29, %v8070_v16  ;;  %v10294_v10 = vld [vmem:[#allocation94_spill] sm:$0xff]  ;;  %v10295_v30 = vld [vmem:[#allocation67_spill] sm:$0xff] }
 0x3a3   :  { %v8213_v7 = vpop.permute.xlu1 %884  ;;  %6251 = vrot.lane.b32.xlu1 %v7785_v57, %s6671_s23  ;;  %v1917_v18 = vmul.f32 0.2, %v1789_v54  ;;  %v568_v57 = vmul.f32 %v7452_v29, %v7961_v27  ;;  %vm1853_vm12 = vcmp.gt.f32.partialorder %v1789_v54, 0.0  ;;  %v1019_v27 = vadd.f32 %v955_v37, %v567_v61 }
 0x3a4   :  { %v575_v37 = vmul.f32 %v7452_v29, %v10294_v10 }
 0x3a5   :  { %v8240_v31 = vsel %vm1853_vm12, %v1789_v54, %v1917_v18  ;;  %v1020_v3 = vadd.f32 %v956_v45, %v568_v57  ;;  %v1409_v59 = vadd.f32 %v1345_v62, %v1019_v27  ;;  %v10293_v54 = vld [vmem:[#allocation89_spill] sm:$0xff]  ;;  %v1353_v57 = vmul.f32 %v7456_v50, %v8176_v14  ;;  %v1643_v27 = vpop.permute.xlu0 %1642 }
 0x3a6   :  { %v6290_v48 = vpack.i.bf16 %v8244_v39, %v8240_v31  ;;  %v1027_v61 = vadd.f32 %v963_v19, %v575_v37  ;;  %v579_v62 = vmul.f32 %v7452_v29, %v8098_v28  ;;  %v10296_v14 = vld [vmem:[#allocation101_spill] sm:$0xff]  ;;  %v1742_v28 = vmul.f32 %v7465_v55, %v1643_v27 }
 0x3a7   :  { %6261 = vrot.lane.b32.xlu1 %v6260_v5, %s6670_s22  ;;  %v1797_v58 = vadd.f32 %v1733_v11, %v1409_v59  ;;  %v10292_v5 = vld [vmem:[#allocation65_spill] sm:$0xff] }
 0x3a8   :  { %v1267_v1 = vpop.permute.xlu1 %1266  ;;  %v964_v53 = vmul.f32 %v7445_v36, %v10292_v5  ;;  %v1417_v38 = vadd.f32 %v1353_v57, %v1027_v61  ;;  %v965_v61 = vmul.f32 %v7445_v36, %v8160_v6 }
 0x3a9   :  { %v1925_v47 = vmul.f32 0.2, %v1797_v58  ;;  %vm1861_vm14 = vcmp.gt.f32.partialorder %v1797_v58, 0.0  ;;  %v1357_v11 = vmul.f32 %v7456_v50, %v1267_v1 }
 0x3aa   :  { %v1028_v0 = vadd.f32 %v964_v53, %v576_v52 }
 0x3ab   :  { %6271 = vrot.lane.b32.xlu1 %v7861_v43, %s6671_s23  ;;  %v1410_v43 = vadd.f32 %v1346_v60, %v1020_v3  ;;  %v8267_v16 = vsel %vm1861_vm14, %v1797_v58, %v1925_v47  ;;  %v967_v60 = vmul.f32 %v7445_v36, %v10295_v30  ;;  %v1655_v47 = vpop.permute.xlu0 %1654  ;;  %vm2073_vm14 = vcmask 31744  }
 0x3ac   :  { %v1271_v35 = vpop.permute.xlu1 %1270  ;;  %v1418_v26 = vadd.f32 %v1354_v32, %v1028_v0 }
 0x3ad   :  { %v1798_v44 = vadd.f32 %v1734_v46, %v1410_v43  ;;  %v968_v43 = vmul.f32 %v7445_v36, %v8116_v8 }
 0x3ae   :  { %v1806_v46 = vadd.f32 %v1742_v28, %v1418_v26 }
 0x3af   :  { %6281 = vrot.lane.b32.xlu1 %v10290_v21, %s6671_s23  ;;  %v1926_v18 = vmul.f32 0.2, %v1798_v44  ;;  %vm1862_vm15 = vcmp.gt.f32.partialorder %v1798_v44, 0.0  ;;  %v1031_v21 = vadd.f32 %v967_v60, %v579_v62  ;;  %v1032_v52 = vadd.f32 %v968_v43, %v580_v34 }
 0x3b0   :  { %v8246_v20 = vpop.permute.xlu1 %1262  ;;  %v1934_v8 = vmul.f32 0.2, %v1806_v46  ;;  %vm1870_vm4 = vcmp.gt.f32.partialorder %v1806_v46, 0.0 }
 0x3b1   :  { %v8277_v3 = vsel %vm1862_vm15, %v1798_v44, %v1926_v18  ;;  %v1421_v1 = vadd.f32 %v1357_v11, %v1031_v21  ;;  %v1358_v44 = vmul.f32 %v7456_v50, %v1271_v35  ;;  %v10299_v11 = vld [vmem:[#allocation109_spill] sm:$0xff]  ;;  %v10300_v21 = vld [vmem:[#allocation68_spill] sm:$0xff]  ;;  %vm2078_vm15 = vcmask 64512  }
 0x3b2   :  { %v6320_v59 = vpack.i.bf16 %v8277_v3, %v8267_v16  ;;  %v8298_v32 = vsel %vm1870_vm4, %v1806_v46, %v1934_v8  ;;  %v1355_v6 = vmul.f32 %v7456_v50, %v10299_v11  ;;  %v966_v43 = vmul.f32 %v7445_v36, %v10300_v21 }
 0x3b3   :  { %6291 = vrot.lane.b32.xlu1 %v6290_v48, %s6670_s22  ;;  %vm2083_vm4 = vcmask 97280  }
 0x3b5   :  { %v1639_v24 = vpop.permute.xlu1 %1638 }
 0x3b6   :  { %v1741_v25 = vmul.f32 %v7465_v55, %v1639_v24  ;;  %v1745_v24 = vmul.f32 %v7465_v55, %v1655_v47  ;;  %v582_v47 = vmul.f32 %v7452_v29, %v8197_v42 }
 0x3b7   :  { %6301 = vrot.lane.b32.xlu1 %v10293_v54, %s6671_s23  ;;  %v1422_v54 = vadd.f32 %v1358_v44, %v1032_v52 }
 0x3b8   :  { %v1805_v58 = vadd.f32 %v1741_v25, %v1417_v38  ;;  %v1809_v53 = vadd.f32 %v1745_v24, %v1421_v1  ;;  %v10297_v25 = vld [vmem:[#allocation95_spill] sm:$0xff]  ;;  %v10298_v38 = vld [vmem:[#allocation96_spill] sm:$0xff] }
 0x3b9   :  { %v581_v26 = vmul.f32 %v7452_v29, %v10298_v38 }
 0x3ba   :  { %v1275_v45 = vpop.permute.xlu1 %1274  ;;  %v1933_v19 = vmul.f32 0.2, %v1805_v58  ;;  %vm1869_vm2 = vcmp.gt.f32.partialorder %v1805_v58, 0.0  ;;  %v1937_v35 = vmul.f32 0.2, %v1809_v53  ;;  %vm1873_vm6 = vcmp.gt.f32.partialorder %v1809_v53, 0.0 }
 0x3bb   :  { %6311 = vrot.lane.b32.xlu1 %v10296_v14, %s6671_s23  ;;  %v969_v14 = vmul.f32 %v7445_v36, %v8213_v7  ;;  %v1359_v28 = vmul.f32 %v7456_v50, %v1275_v45  ;;  %v1356_v7 = vmul.f32 %v7456_v50, %v8246_v20 }
 0x3bc   :  { %v8292_v41 = vsel %vm1869_vm2, %v1805_v58, %v1933_v19  ;;  %v2001_v62 = vsel %vm1873_vm6, %v1809_v53, %v1937_v35  ;;  %v1663_v19 = vpop.permute.xlu0 %1662  ;;  %vm3214_vm6 = vcmask 58368  }
 0x3bd   :  { %v1033_v34 = vadd.f32 %v969_v14, %v581_v26  ;;  %v1747_v8 = vmul.f32 %v7465_v55, %v1663_v19 }
 0x3be   :  { %v1279_v48 = vpop.permute.xlu1 %1278 }
 0x3bf   :  { %6321 = vrot.lane.b32.xlu1 %v6320_v59, %s6670_s22  ;;  %v578_v59 = vmul.f32 %v7452_v29, %v8143_v15  ;;  %v1423_v24 = vadd.f32 %v1359_v28, %v1033_v34  ;;  %v10301_v15 = vld [vmem:[#allocation69_spill] sm:$0xff] }
 0x3c0   :  { %v970_v45 = vmul.f32 %v7445_v36, %v10301_v15 }
 0x3c1   :  { %v1030_v44 = vadd.f32 %v966_v43, %v578_v59  ;;  %v1675_v59 = vpop.permute.xlu0 %1674 }
 0x3c3   :  { %v1659_v5 = vpop.permute.xlu1 %1658  ;;  %6331 = vrot.lane.b32.xlu1 %v8050_v63, %s6671_s23  ;;  %v6350_v63 = vpack.i.bf16 %v8298_v32, %v8292_v41  ;;  %v1420_v53 = vadd.f32 %v1356_v7, %v1030_v44  ;;  %v10302_v7 = vld [vmem:[#allocation71_spill] sm:$0xff] }
 0x3c4   :  { %v1746_v10 = vmul.f32 %v7465_v55, %v1659_v5 }
 0x3c5   :  { %v8339_v21 = vpop.permute.xlu0 %6166 }
 0x3c6   :  { %v1810_v37 = vadd.f32 %v1746_v10, %v1422_v54  ;;  %v1360_v54 = vmul.f32 %v7456_v50, %v1279_v48  ;;  %v1034_v10 = vadd.f32 %v970_v45, %v582_v47 }
 0x3c7   :  { %6341 = vrot.lane.b32.xlu1 %v8076_v12, %s6671_s23  ;;  %v577_v12 = vmul.f32 %v7452_v29, %v10297_v25 }
 0x3c8   :  { %vm1874_vm5 = vcmp.gt.f32.partialorder %v1810_v37, 0.0  ;;  %v1938_v18 = vmul.f32 0.2, %v1810_v37  ;;  %v8296_v57 = vpop.permute.xlu1 %506 }
 0x3c9   :  { %v1029_v27 = vadd.f32 %v965_v61, %v577_v12  ;;  %v584_v34 = vmul.f32 %v7452_v29, %v8296_v57  ;;  %v10304_v57 = vld [vmem:[#allocation28_spill] sm:$0xff] }
 0x3ca   :  { %v2002_v0 = vsel %vm1874_vm5, %v1810_v37, %v1938_v18  ;;  %v1811_v37 = vadd.f32 %v1747_v8, %v1423_v24  ;;  %v10303_v24 = vld [vmem:[#allocation98_spill] sm:$0xff]  ;;  %vm2508_vm5 = vcmask 130048  }
 0x3cb   :  { %6351 = vrot.lane.b32.xlu1 %v6350_v63, %s6670_s22  ;;  %v6360_v60 = vpack.i.bf16 %v2002_v0, %v2001_v62  ;;  %v1419_v46 = vadd.f32 %v1355_v6, %v1029_v27  ;;  %v1424_v63 = vadd.f32 %v1360_v54, %v1034_v10 }
 0x3cc   :  { %v1939_v62 = vmul.f32 0.2, %v1811_v37  ;;  %vm1875_vm10 = vcmp.gt.f32.partialorder %v1811_v37, 0.0 }
 0x3cd   :  { %v893_v30 = vpop.permute.xlu1 %892 }
 0x3ce   :  { %v2003_v11 = vsel %vm1875_vm10, %v1811_v37, %v1939_v62 }
 0x3cf   :  { %6361 = vrot.lane.b32.xlu1 %v6360_v60, %s6671_s23 }
 0x3d2   :  { %v1647_v58 = vpop.permute.xlu1 %1646 }
 0x3d3   :  { %v1743_v1 = vmul.f32 %v7465_v55, %v1647_v58  ;;  %v8342_v58 = vpop.permute.xlu0 %6176 }
 0x3d5   :  { %v1807_v52 = vadd.f32 %v1743_v1, %v1419_v46  ;;  %v972_v46 = vmul.f32 %v7445_v36, %v10302_v7 }
 0x3d6   :  { %v1651_v5 = vpop.permute.xlu1 %1650 }
 0x3d7   :  { %v1744_v20 = vmul.f32 %v7465_v55, %v1651_v5  ;;  %v1935_v35 = vmul.f32 0.2, %v1807_v52  ;;  %vm1871_vm7 = vcmp.gt.f32.partialorder %v1807_v52, 0.0  ;;  %v1036_v47 = vadd.f32 %v972_v46, %v584_v34  ;;  %v8352_v15 = vpop.permute.xlu0 %6186 }
 0x3d8   :  { %v1750_v5 = vmul.f32 %v7465_v55, %v1675_v59 }
 0x3d9   :  { %v1808_v18 = vadd.f32 %v1744_v20, %v1420_v53  ;;  %v8330_v25 = vsel %vm1871_vm7, %v1807_v52, %v1935_v35  ;;  %v583_v52 = vmul.f32 %v7452_v29, %v10303_v24  ;;  %v1361_v53 = vmul.f32 %v7456_v50, %v10304_v57 }
 0x3da   :  { %v1667_v42 = vpop.permute.xlu1 %1666 }
 0x3db   :  { %vm1872_vm9 = vcmp.gt.f32.partialorder %v1808_v18, 0.0  ;;  %v1936_v0 = vmul.f32 0.2, %v1808_v18  ;;  %v1748_v61 = vmul.f32 %v7465_v55, %v1667_v42 }
 0x3dd   :  { %v8332_v12 = vsel %vm1872_vm9, %v1808_v18, %v1936_v0  ;;  %v1812_v27 = vadd.f32 %v1748_v61, %v1424_v63  ;;  %v10305_v0 = vld [vmem:[#allocation100_spill] sm:$0xff] }
 0x3de   :  { %v6365_v48 = vpack.i.bf16 %v8332_v12, %v8330_v25  ;;  %v586_v61 = vmul.f32 %v7452_v29, %v10305_v0 }
 0x3df   :  { %vm1876_vm11 = vcmp.gt.f32.partialorder %v1812_v27, 0.0  ;;  %v1940_v14 = vmul.f32 0.2, %v1812_v27  ;;  %v512_v38 = vpop.permute.xlu1 %511 }
 0x3e0   :  { %6366 = vrot.lane.b32.xlu0 %v6365_v48, %s6670_s22  ;;  %v585_v35 = vmul.f32 %v7452_v29, %v512_v38  ;;  %v10306_v38 = vld [vmem:[#allocation27_spill] sm:$0xff] }
 0x3e1   :  { %v2004_v26 = vsel %vm1876_vm11, %v1812_v27, %v1940_v14  ;;  %v1364_v59 = vmul.f32 %v7456_v50, %v10306_v38 }
 0x3e2   :  { %v6370_v6 = vpack.i.bf16 %v2004_v26, %v2003_v11 }
 0x3e4   :  { %v901_v28 = vpop.permute.xlu1 %900  ;;  %6376 = vrot.lane.b32.xlu0 %v6360_v60, %s6669_s1  ;;  %6371 = vrot.lane.b32.xlu1 %v6370_v6, %s6671_s23  ;;  %v971_v60 = vmul.f32 %v7445_v36, %v893_v30  ;;  %v8359_v30 = vpop.permute.xlu0 %6196 }
 0x3e5   :  { %v973_v54 = vmul.f32 %v7445_v36, %v901_v28 }
 0x3e6   :  { %v1035_v8 = vadd.f32 %v971_v60, %v583_v52 }
 0x3e7   :  { %v1037_v62 = vadd.f32 %v973_v54, %v585_v35 }
 0x3e8   :  { %v905_v43 = vpop.permute.xlu1 %904  ;;  %6386 = vrot.lane.b32.xlu0 %v6370_v6, %s6669_s1  ;;  %v1425_v42 = vadd.f32 %v1361_v53, %v1035_v8  ;;  %v8369_v28 = vpop.permute.xlu0 %6206  ;;  %v6169_v8 = vunpack.i.h.bf16 %v8339_v21 }
 0x3e9   :  { %v974_v10 = vmul.f32 %v7445_v36, %v905_v43 }
 0x3eb   :  { %v1038_v14 = vadd.f32 %v974_v10, %v586_v61  ;;  %v10307_v10 = vld [vmem:[#allocation37_spill] sm:$0xff] }
 0x3ec   :  { %v8373_v24 = vpop.permute.xlu0 %6216 }
 0x3ed   :  { %v1287_v1 = vpop.permute.xlu1 %1286 }
 0x3ee   :  { %v1362_v44 = vmul.f32 %v7456_v50, %v1287_v1 }
 0x3f0   :  { %v1426_v45 = vadd.f32 %v1362_v44, %v1036_v47  ;;  %v1428_v44 = vadd.f32 %v1364_v59, %v1038_v14  ;;  %v8386_v14 = vpop.permute.xlu0 %6226  ;;  %v10310_v59 = vld [vmem:[#allocation47_spill] sm:$0xff] }
 0x3f1   :  { %v1291_v19 = vpop.permute.xlu1 %1290 }
 0x3f2   :  { %v1814_v20 = vadd.f32 %v1750_v5, %v1426_v45  ;;  %v1363_v18 = vmul.f32 %v7456_v50, %v1291_v19 }
 0x3f4   :  { %v1942_v27 = vmul.f32 0.2, %v1814_v20  ;;  %vm1878_vm3 = vcmp.gt.f32.partialorder %v1814_v20, 0.0  ;;  %v1427_v36 = vadd.f32 %v1363_v18, %v1037_v62  ;;  %v6168_v18 = vunpack.i.l.bf16 %v8339_v21 }
 0x3f6   :  { %v1671_v37 = vpop.permute.xlu1 %1670  ;;  %v2006_v7 = vsel %vm1878_vm3, %v1814_v20, %v1942_v27 }
 0x3f7   :  { %v1749_v63 = vmul.f32 %v7465_v55, %v1671_v37  ;;  %v2014_v19 = vrot.slane %v2006_v7, 7  ;;  %v10308_v37 = vld [vmem:[#allocation44_spill] sm:$0xff] }
 0x3f8   :  { %v10309_v35 = vpack.i.bf16 %v10307_v10, %v10308_v37 }
 0x3f9   :  { %v1813_v48 = vadd.f32 %v1749_v63, %v1425_v42  ;;  %v6179_v42 = vunpack.i.h.bf16 %v8342_v58  ;;  %v6178_v63 = vunpack.i.l.bf16 %v8342_v58 }
 0x3fa   :  { %v1679_v26 = vpop.permute.xlu1 %1678 }
 0x3fb   :  { %vm1877_vm12 = vcmp.gt.f32.partialorder %v1813_v48, 0.0  ;;  %v1941_v11 = vmul.f32 0.2, %v1813_v48  ;;  %v1751_v6 = vmul.f32 %v7465_v55, %v1679_v26 }
 0x3fd   :  { %v2005_v43 = vsel %vm1877_vm12, %v1813_v48, %v1941_v11  ;;  %v1815_v34 = vadd.f32 %v1751_v6, %v1427_v36 }
 0x3fe   :  { %v1683_v29 = vpop.permute.xlu1 %1682  ;;  %v6380_v46 = vpack.i.bf16 %v2006_v7, %v2005_v43  ;;  %v2013_v60 = vrot.slane %v2005_v43, 7  ;;  %v10311_v43 = vld [vmem:[#allocation31_spill] sm:$0xff] }
 0x3ff   :  { %vm1879_vm13 = vcmp.gt.f32.partialorder %v1815_v34, 0.0  ;;  %v1943_v1 = vmul.f32 0.2, %v1815_v34  ;;  %v1752_v47 = vmul.f32 %v7465_v55, %v1683_v29 }
 0x400   :  { %6381 = vrot.lane.b32.xlu1 %v6380_v46, %s6670_s22  ;;  %v2023_v53 = vsel %vm61_vm0, 0.0, %v2013_v60  ;;  %v2015_v20 = vsel %vm61_vm0, %v2013_v60, %v2014_v19 }
 0x401   :  { %v2007_v52 = vsel %vm1879_vm13, %v1815_v34, %v1943_v1  ;;  %v1816_v45 = vadd.f32 %v1752_v47, %v1428_v44  ;;  %v2074_v26 = vsel %vm2073_vm14, %v2023_v53, %v6168_v18  ;;  %v2075_v36 = vsel %vm2073_vm14, %v2015_v20, %v6169_v8  ;;  %v8407_v8 = vpop.permute.xlu0 %6236 }
 0x402   :  { %v2016_v50 = vrot.slane %v2007_v52, 7  ;;  %v6172_v5 = vpop.permute.xlu1 %6171  ;;  %v10312_v34 = vpack.i.bf16 %v10310_v59, %v10311_v43  ;;  %v6189_v44 = vunpack.i.h.bf16 %v8352_v15  ;;  %v6188_v47 = vunpack.i.l.bf16 %v8352_v15 }
 0x403   :  { %vm1880_vm2 = vcmp.gt.f32.partialorder %v1816_v45, 0.0  ;;  %v1944_v57 = vmul.f32 0.2, %v1816_v45  ;;  %v6174_v54 = vunpack.i.h.bf16 %v6172_v5  ;;  %v6173_v55 = vunpack.i.l.bf16 %v6172_v5 }
 0x404   :  { %6391 = vrot.lane.b32.xlu1 %v10309_v35, %s6671_s23  ;;  %v2024_v61 = vsel %vm61_vm0, 0.0, %v2016_v50  ;;  %v6199_v15 = vunpack.i.h.bf16 %v8359_v30 }
 0x405   :  { %v2008_v0 = vsel %vm1880_vm2, %v1816_v45, %v1944_v57  ;;  %v2079_v38 = vsel %vm2078_vm15, %v2074_v26, %v6173_v55  ;;  %v2080_v58 = vsel %vm2078_vm15, %v2075_v36, %v6174_v54  ;;  %v2076_v46 = vsel %vm2073_vm14, %v2024_v61, %v6178_v63  ;;  %v8418_v35 = vpop.permute.xlu0 %6246 }
 0x406   :  { %v2017_v62 = vrot.slane %v2008_v0, 7  ;;  %v6182_v27 = vpop.permute.xlu1 %6181  ;;  %v6395_v48 = vpack.i.bf16 %v2008_v0, %v2007_v52  ;;  %v2081_v19 = vsel %vm2078_vm15, %v2076_v46, %v6188_v47  ;;  %v6198_v54 = vunpack.i.l.bf16 %v8359_v30 }
 0x407   :  { %v6184_v11 = vunpack.i.h.bf16 %v6182_v27  ;;  %v6183_v6 = vunpack.i.l.bf16 %v6182_v27  ;;  %v2133_v18 = vsel %vm2073_vm14, %v8107_v33, %v6199_v15  ;;  %v6209_v63 = vunpack.i.h.bf16 %v8369_v28 }
 0x408   :  { %v2018_v21 = vsel %vm61_vm0, %v2016_v50, %v2017_v62  ;;  %6396 = vrot.lane.b32.xlu0 %v6395_v48, %s6670_s22  ;;  %6401 = vrot.lane.b32.xlu1 %v10312_v34, %s6671_s23  ;;  %v2132_v30 = vsel %vm2073_vm14, %v8100_v13, %v6198_v54  ;;  %v6208_v0 = vunpack.i.l.bf16 %v8369_v28  ;;  %v6219_v27 = vunpack.i.h.bf16 %v8373_v24  ;;  %v10314_v28 = vld [vmem:[#allocation62_spill] sm:$0xff] }
 0x409   :  { %v2084_v7 = vsel %vm2083_vm4, %v2079_v38, %v6183_v6  ;;  %v2085_v29 = vsel %vm2083_vm4, %v2080_v58, %v6184_v11  ;;  %v2077_v1 = vsel %vm2073_vm14, %v2018_v21, %v6179_v42  ;;  %v6218_v48 = vunpack.i.l.bf16 %v8373_v24  ;;  %v10313_v21 = vld [vmem:[#allocation49_spill] sm:$0xff]  ;;  %v8440_v59 = vpop.permute.xlu0 %6256 }
 0x40a   :  { %v2486_v60 = vpack.c.bf16 %v2085_v29, %v2084_v7  ;;  %v6192_v52 = vpop.permute.xlu1 %6191  ;;  %v2082_v5 = vsel %vm2078_vm15, %v2077_v1, %v6189_v44  ;;  %v2135_v38 = vsel %vm2073_vm14, %v10313_v21, %v6209_v63  ;;  %v2134_v58 = vsel %vm2073_vm14, %v10314_v28, %v6208_v0  ;;  %v10315_v63 = vld [vmem:[#allocation72_spill] sm:$0xff]  ;;  %v10316_v0 = vld [vmem:[#allocation54_spill] sm:$0xff] }
 0x40b   :  { %v6194_v45 = vunpack.i.h.bf16 %v6192_v52  ;;  %v6193_v50 = vunpack.i.l.bf16 %v6192_v52  ;;  %v2138_v34 = vsel %vm2078_vm15, %v2134_v58, %v6218_v48  ;;  %v2139_v7 = vsel %vm2078_vm15, %v2135_v38, %v6219_v27 }
 0x40c   :  { %5780 = vmatmul.mubr.msk.bf16.vlgmr.msra.gmra.mrb[0].mxu0 %vm2508_vm5, %v2486_v60  ;;  %v6229_v1 = vunpack.i.h.bf16 %v8386_v14  ;;  %v6228_v44 = vunpack.i.l.bf16 %v8386_v14 }
 0x40d   :  { %v2086_v57 = vsel %vm2083_vm4, %v2081_v19, %v6193_v50  ;;  %v2087_v53 = vsel %vm2083_vm4, %v2082_v5, %v6194_v45  ;;  %5790 = vmatpush3.bf16.msra.mxu0 %v8131_v49  ;;  %5791 = vmatprep.mubr.msk.bf16.mxu0 %vm6673_vm8, %v10039_v56  ;;  %v6267_v50 = vpop.permute.xlu0 %6266 }
 0x40e   :  { %v2487_v55 = vpack.c.bf16 %v2087_v53, %v2086_v57  ;;  %v6202_v20 = vpop.permute.xlu1 %6201  ;;  %5801 = vmatprep.subr.bf16.mxu0 %v10039_v56  ;;  %v2189_v19 = vsel %vm2073_vm14, %v8135_v17, %v6229_v1  ;;  %v2188_v14 = vsel %vm2073_vm14, %v8141_v2, %v6228_v44  ;;  %v6239_v57 = vunpack.i.h.bf16 %v8407_v8 }
 0x40f   :  { %v6204_v10 = vunpack.i.h.bf16 %v6202_v20  ;;  %v6203_v37 = vunpack.i.l.bf16 %v6202_v20  ;;  %v6238_v53 = vunpack.i.l.bf16 %v8407_v8  ;;  %v6248_v20 = vunpack.i.l.bf16 %v8418_v35 }
 0x410   :  { %5786 = vmatmul.mubr.msk.bf16.vlgmr.msra.gmra.mrb[0].mxu1 %vm2508_vm5, %v2487_v55  ;;  %v6249_v55 = vunpack.i.h.bf16 %v8418_v35  ;;  %v2191_v8 = vsel %vm2073_vm14, %v10315_v63, %v6239_v57 }
 0x411   :  { %5796 = vmatpush3.bf16.msra.mxu1 %v8131_v49  ;;  %5797 = vmatprep.mubr.msk.bf16.mxu1 %vm6673_vm8, %v10039_v56  ;;  %v2136_v26 = vsel %vm2078_vm15, %v2132_v30, %v6203_v37  ;;  %v2137_v33 = vsel %vm2078_vm15, %v2133_v18, %v6204_v10  ;;  %v6277_v37 = vpop.permute.xlu0 %6276 }
 0x412   :  { %v6212_v42 = vpop.permute.xlu1 %6211  ;;  %5807 = vmatprep.subr.bf16.mxu1 %v10039_v56  ;;  %v2195_v48 = vsel %vm2078_vm15, %v2191_v8, %v6249_v55  ;;  %v6278_v1 = vunpack.i.l.bf16 %v6277_v37 }
 0x413   :  { %v6214_v61 = vunpack.i.h.bf16 %v6212_v42  ;;  %v6213_v62 = vunpack.i.l.bf16 %v6212_v42 }
 0x415   :  { %v2140_v36 = vsel %vm2083_vm4, %v2136_v26, %v6213_v62  ;;  %v2141_v13 = vsel %vm2083_vm4, %v2137_v33, %v6214_v61  ;;  %v2190_v61 = vsel %vm2073_vm14, %v10316_v0, %v6238_v53  ;;  %v6287_v21 = vpop.permute.xlu0 %6286 }
 0x416   :  { %v2488_v11 = vpack.c.bf16 %v2141_v13, %v2140_v36  ;;  %v6222_v6 = vpop.permute.xlu1 %6221  ;;  %v2194_v35 = vsel %vm2078_vm15, %v2190_v61, %v6248_v20  ;;  %v6259_v36 = vunpack.i.h.bf16 %v8440_v59  ;;  %v6258_v13 = vunpack.i.l.bf16 %v8440_v59 }
 0x417   :  { %v6224_v43 = vunpack.i.h.bf16 %v6222_v6  ;;  %v6223_v24 = vunpack.i.l.bf16 %v6222_v6 }
 0x418   :  { %5792 = vmatmul.mubr.msk.bf16.vlgmr.msra.gmra.mrb[4].mxu0 %vm2508_vm5, %v2488_v11  ;;  %v2245_v58 = vsel %vm2073_vm14, %v8178_v23, %v6259_v36  ;;  %v2244_v59 = vsel %vm2073_vm14, %v8184_v22, %v6258_v13 }
 0x419   :  { %v2142_v29 = vsel %vm2083_vm4, %v2138_v34, %v6223_v24  ;;  %v2143_v46 = vsel %vm2083_vm4, %v2139_v7, %v6224_v43  ;;  %5802 = vmatpush3.bf16.msra.mxu0 %v8131_v49  ;;  %5803 = vmatprep.mubr.msk.bf16.mxu0 %vm6673_vm8, %v10039_v56  ;;  %v6269_v24 = vunpack.i.h.bf16 %v6267_v50  ;;  %v6268_v34 = vunpack.i.l.bf16 %v6267_v50 }
 0x41a   :  { %v2489_v47 = vpack.c.bf16 %v2143_v46, %v2142_v29  ;;  %v6232_v60 = vpop.permute.xlu1 %6231  ;;  %5813 = vmatprep.subr.bf16.mxu0 %v10039_v56  ;;  %v6279_v46 = vunpack.i.h.bf16 %v6277_v37  ;;  %v6288_v37 = vunpack.i.l.bf16 %v6287_v21 }
 0x41b   :  { %v6234_v52 = vunpack.i.h.bf16 %v6232_v60  ;;  %v6233_v45 = vunpack.i.l.bf16 %v6232_v60  ;;  %v6297_v60 = vpop.permute.xlu0 %6296 }
 0x41c   :  { %5798 = vmatmul.mubr.msk.bf16.vlgmr.msra.gmra.mrb[4].mxu1 %vm2508_vm5, %v2489_v47  ;;  %v2300_v8 = vsel %vm2073_vm14, %v8209_v9, %v6288_v37  ;;  %v6299_v61 = vunpack.i.h.bf16 %v6297_v60 }
 0x41d   :  { %5808 = vmatpush3.bf16.msra.mxu1 %v8131_v49  ;;  %5809 = vmatprep.mubr.msk.bf16.mxu1 %vm6673_vm8, %v10039_v56  ;;  %v2192_v10 = vsel %vm2078_vm15, %v2188_v14, %v6233_v45  ;;  %v2193_v17 = vsel %vm2078_vm15, %v2189_v19, %v6234_v52  ;;  %v10317_v19 = vld [vmem:[#allocation66_spill] sm:$0xff] }
 0x41e   :  { %v6242_v5 = vpop.permute.xlu1 %6241  ;;  %5819 = vmatprep.subr.bf16.mxu1 %v10039_v56  ;;  %v2247_v14 = vsel %vm2073_vm14, %v10317_v19, %v6269_v24 }
 0x41f   :  { %v6244_v15 = vunpack.i.h.bf16 %v6242_v5  ;;  %v6243_v54 = vunpack.i.l.bf16 %v6242_v5  ;;  %v10318_v5 = vld [vmem:[#allocation57_spill] sm:$0xff]  ;;  %v6307_v55 = vpop.permute.xlu0 %6306 }
 0x420   :  { %v2246_v50 = vsel %vm2073_vm14, %v10318_v5, %v6268_v34 }
 0x421   :  { %v2196_v2 = vsel %vm2083_vm4, %v2192_v10, %v6243_v54  ;;  %v2197_v18 = vsel %vm2083_vm4, %v2193_v17, %v6244_v15  ;;  %v2250_v15 = vsel %vm2078_vm15, %v2246_v50, %v6278_v1  ;;  %v2251_v54 = vsel %vm2078_vm15, %v2247_v14, %v6279_v46 }
 0x422   :  { %v2490_v30 = vpack.c.bf16 %v2197_v18, %v2196_v2  ;;  %v6252_v42 = vpop.permute.xlu1 %6251  ;;  %v6289_v17 = vunpack.i.h.bf16 %v6287_v21  ;;  %v10319_v21 = vld [vmem:[#allocation73_spill] sm:$0xff] }
 0x423   :  { %v6254_v62 = vunpack.i.h.bf16 %v6252_v42  ;;  %v6253_v27 = vunpack.i.l.bf16 %v6252_v42 }
 0x424   :  { %5804 = vmatmul.mubr.msk.bf16.vlgmr.msra.gmra.mrb[8].mxu0 %vm2508_vm5, %v2490_v30  ;;  %v2301_v63 = vsel %vm2073_vm14, %v8217_v51, %v6289_v17 }
 0x425   :  { %v2198_v26 = vsel %vm2083_vm4, %v2194_v35, %v6253_v27  ;;  %v2199_v33 = vsel %vm2083_vm4, %v2195_v48, %v6254_v62  ;;  %5814 = vmatpush3.bf16.msra.mxu0 %v8131_v49  ;;  %5815 = vmatprep.mubr.msk.bf16.mxu0 %vm6673_vm8, %v10039_v56  ;;  %v6298_v62 = vunpack.i.l.bf16 %v6297_v60  ;;  %v6317_v27 = vpop.permute.xlu0 %6316 }
 0x426   :  { %v2491_v11 = vpack.c.bf16 %v2199_v33, %v2198_v26  ;;  %v6262_v6 = vpop.permute.xlu1 %6261  ;;  %5825 = vmatprep.subr.bf16.mxu0 %v10039_v56  ;;  %v6309_v26 = vunpack.i.h.bf16 %v6307_v55  ;;  %v6308_v33 = vunpack.i.l.bf16 %v6307_v55  ;;  %v6319_v1 = vunpack.i.h.bf16 %v6317_v27 }
 0x427   :  { %v6264_v38 = vunpack.i.h.bf16 %v6262_v6  ;;  %v6263_v28 = vunpack.i.l.bf16 %v6262_v6 }
 0x428   :  { %5810 = vmatmul.mubr.msk.bf16.vlgmr.msra.gmra.mrb[8].mxu1 %vm2508_vm5, %v2491_v11 }
 0x429   :  { %5820 = vmatpush3.bf16.msra.mxu1 %v8131_v49  ;;  %5821 = vmatprep.mubr.msk.bf16.mxu1 %vm6673_vm8, %v10039_v56  ;;  %v2248_v44 = vsel %vm2078_vm15, %v2244_v59, %v6263_v28  ;;  %v2249_v47 = vsel %vm2078_vm15, %v2245_v58, %v6264_v38  ;;  %v2303_v38 = vsel %vm2073_vm14, %v10319_v21, %v6299_v61  ;;  %v10320_v28 = vld [vmem:[#allocation34_spill] sm:$0xff] }
 0x42a   :  { %v6272_v43 = vpop.permute.xlu1 %6271  ;;  %5831 = vmatprep.subr.bf16.mxu1 %v10039_v56  ;;  %v2302_v58 = vsel %vm2073_vm14, %v10320_v28, %v6298_v62  ;;  %v2307_v34 = vsel %vm2078_vm15, %v2303_v38, %v6309_v26 }
 0x42b   :  { %v6274_v7 = vunpack.i.h.bf16 %v6272_v43  ;;  %v6273_v29 = vunpack.i.l.bf16 %v6272_v43  ;;  %v2306_v24 = vsel %vm2078_vm15, %v2302_v58, %v6308_v33 }
 0x42d   :  { %v2252_v52 = vsel %vm2083_vm4, %v2248_v44, %v6273_v29  ;;  %v2253_v23 = vsel %vm2083_vm4, %v2249_v47, %v6274_v7  ;;  %v6327_v7 = vpop.permute.xlu0 %6326  ;;  %v6318_v44 = vunpack.i.l.bf16 %v6317_v27  ;;  %v6646_v27 = vld [vmem:[%s9953_s2] sm:$0xff]   ;;  %s6677_s2 = smov 48  }
 0x42e   :  { %v2492_v45 = vpack.c.bf16 %v2253_v23, %v2252_v52  ;;  %v6282_v22 = vpop.permute.xlu1 %6281  ;;  %v6329_v5 = vunpack.i.h.bf16 %v6327_v7  ;;  %v6328_v50 = vunpack.i.l.bf16 %v6327_v7 }
 0x42f   :  { %v6284_v57 = vunpack.i.h.bf16 %v6282_v22  ;;  %v6283_v53 = vunpack.i.l.bf16 %v6282_v22  ;;  %v2357_v22 = vsel %vm2073_vm14, %v8244_v39, %v6319_v1  ;;  %v2356_v19 = vsel %vm2073_vm14, %v8240_v31, %v6318_v44  ;;  %v10321_v31 = vld [vmem:[#allocation38_spill] sm:$0xff] }
 0x430   :  { %5816 = vmatmul.mubr.msk.bf16.vlgmr.msra.gmra.mrb[12].mxu0 %vm2508_vm5, %v2492_v45  ;;  %v2359_v37 = vsel %vm2073_vm14, %v10321_v31, %v6329_v5 }
 0x431   :  { %v2254_v20 = vsel %vm2083_vm4, %v2250_v15, %v6283_v53  ;;  %v2255_v10 = vsel %vm2083_vm4, %v2251_v54, %v6284_v57  ;;  %5826 = vmatpush3.bf16.msra.mxu0 %v8131_v49  ;;  %5827 = vmatprep.mubr.msk.bf16.mxu0 %vm6673_vm8, %v10039_v56  ;;  %v6337_v45 = vpop.permute.xlu0 %6336 }
 0x432   :  { %v2493_v2 = vpack.c.bf16 %v2255_v10, %v2254_v20  ;;  %v6292_v18 = vpop.permute.xlu1 %6291  ;;  %5837 = vmatprep.subr.bf16.mxu0 %v10039_v56  ;;  %v6339_v15 = vunpack.i.h.bf16 %v6337_v45  ;;  %v6338_v54 = vunpack.i.l.bf16 %v6337_v45 }
 0x433   :  { %v6294_v30 = vunpack.i.h.bf16 %v6292_v18  ;;  %v6293_v42 = vunpack.i.l.bf16 %v6292_v18 }
 0x434   :  { %5822 = vmatmul.mubr.msk.bf16.vlgmr.msra.gmra.mrb[12].mxu1 %vm2508_vm5, %v2493_v2  ;;  %v10322_v2 = vld [vmem:[#allocation77_spill] sm:$0xff] }
 0x435   :  { %5832 = vmatpush3.bf16.msra.mxu1 %v8131_v49  ;;  %5833 = vmatprep.mubr.msk.bf16.mxu1 %vm6673_vm8, %v10039_v56  ;;  %v2304_v36 = vsel %vm2078_vm15, %v2300_v8, %v6293_v42  ;;  %v2305_v13 = vsel %vm2078_vm15, %v2301_v63, %v6294_v30  ;;  %v2358_v18 = vsel %vm2073_vm14, %v10322_v2, %v6328_v50 }
 0x436   :  { %v6302_v0 = vpop.permute.xlu1 %6301  ;;  %5843 = vmatprep.subr.bf16.mxu1 %v10039_v56  ;;  %v2362_v63 = vsel %vm2078_vm15, %v2358_v18, %v6338_v54  ;;  %v2363_v8 = vsel %vm2078_vm15, %v2359_v37, %v6339_v15 }
 0x437   :  { %v6304_v35 = vunpack.i.h.bf16 %v6302_v0  ;;  %v6303_v48 = vunpack.i.l.bf16 %v6302_v0  ;;  %v6347_v0 = vpop.permute.xlu0 %6346 }
 0x438   :  { %v6349_v26 = vunpack.i.h.bf16 %v6347_v0  ;;  %v6348_v33 = vunpack.i.l.bf16 %v6347_v0 }
 0x439   :  { %v2308_v11 = vsel %vm2083_vm4, %v2304_v36, %v6303_v48  ;;  %v2309_v51 = vsel %vm2083_vm4, %v2305_v13, %v6304_v35 }
 0x43a   :  { %v2494_v6 = vpack.c.bf16 %v2309_v51, %v2308_v11  ;;  %v6312_v9 = vpop.permute.xlu1 %6311 }
 0x43b   :  { %v6314_v59 = vunpack.i.h.bf16 %v6312_v9  ;;  %v6313_v43 = vunpack.i.l.bf16 %v6312_v9  ;;  %v6357_v11 = vpop.permute.xlu0 %6356  ;;  %v2412_v9 = vsel %vm2073_vm14, %v8267_v16, %v6348_v33 }
 0x43c   :  { %5828 = vmatmul.mubr.msk.bf16.vlgmr.msra.gmra.mrb[16].mxu0 %vm2508_vm5, %v2494_v6  ;;  %v2413_v6 = vsel %vm2073_vm14, %v8277_v3, %v6349_v26  ;;  %v6359_v7 = vunpack.i.h.bf16 %v6357_v11 }
 0x43d   :  { %v2310_v29 = vsel %vm2083_vm4, %v2306_v24, %v6313_v43  ;;  %v2311_v46 = vsel %vm2083_vm4, %v2307_v34, %v6314_v59  ;;  %5838 = vmatpush3.bf16.msra.mxu0 %v8131_v49  ;;  %5839 = vmatprep.mubr.msk.bf16.mxu0 %vm6673_vm8, %v10039_v56 }
 0x43e   :  { %v2495_v47 = vpack.c.bf16 %v2311_v46, %v2310_v29  ;;  %v6322_v60 = vpop.permute.xlu1 %6321  ;;  %5849 = vmatprep.subr.bf16.mxu0 %v10039_v56  ;;  %v6358_v29 = vunpack.i.l.bf16 %v6357_v11  ;;  %v2415_v3 = vsel %vm2073_vm14, %v8059_v4, %v6359_v7 }
 0x43f   :  { %v6324_v52 = vunpack.i.h.bf16 %v6322_v60  ;;  %v6323_v23 = vunpack.i.l.bf16 %v6322_v60 }
 0x440   :  { %5834 = vmatmul.mubr.msk.bf16.vlgmr.msra.gmra.mrb[16].mxu1 %vm2508_vm5, %v2495_v47  ;;  %v2414_v44 = vsel %vm2073_vm14, %v8061_v40, %v6358_v29 }
 0x441   :  { %5844 = vmatpush3.bf16.msra.mxu1 %v8131_v49  ;;  %5845 = vmatprep.mubr.msk.bf16.mxu1 %vm6673_vm8, %v10039_v56  ;;  %v2360_v49 = vsel %vm2078_vm15, %v2356_v19, %v6323_v23  ;;  %v2361_v55 = vsel %vm2078_vm15, %v2357_v22, %v6324_v52 }
 0x442   :  { %v6332_v14 = vpop.permute.xlu1 %6331  ;;  %5855 = vmatprep.subr.bf16.mxu1 %v10039_v56 }
 0x443   :  { %v6334_v57 = vunpack.i.h.bf16 %v6332_v14  ;;  %v6333_v53 = vunpack.i.l.bf16 %v6332_v14 }
 0x445   :  { %v2364_v20 = vsel %vm2083_vm4, %v2360_v49, %v6333_v53  ;;  %v2365_v39 = vsel %vm2083_vm4, %v2361_v55, %v6334_v57 }
 0x446   :  { %v2496_v10 = vpack.c.bf16 %v2365_v39, %v2364_v20  ;;  %v6342_v17 = vpop.permute.xlu1 %6341 }
 0x447   :  { %v6344_v30 = vunpack.i.h.bf16 %v6342_v17  ;;  %v6343_v42 = vunpack.i.l.bf16 %v6342_v17 }
 0x448   :  { %5840 = vmatmul.mubr.msk.bf16.vlgmr.msra.gmra.mrb[20].mxu0 %vm2508_vm5, %v2496_v10 }
 0x449   :  { %v2366_v61 = vsel %vm2083_vm4, %v2362_v63, %v6343_v42  ;;  %v2367_v62 = vsel %vm2083_vm4, %v2363_v8, %v6344_v30  ;;  %5850 = vmatpush3.bf16.msra.mxu0 %v6646_v27  ;;  %5851 = vmatprep.mubr.msk.bf16.mxu0 %vm6673_vm8, %v10039_v56 }
 0x44a   :  { %v2497_v35 = vpack.c.bf16 %v2367_v62, %v2366_v61  ;;  %v6352_v48 = vpop.permute.xlu1 %6351  ;;  %5861 = vmatprep.subr.bf16.mxu0 %v10039_v56 }
 0x44b   :  { %v6354_v36 = vunpack.i.h.bf16 %v6352_v48  ;;  %v6353_v13 = vunpack.i.l.bf16 %v6352_v48 }
 0x44c   :  { %5846 = vmatmul.mubr.msk.bf16.vlgmr.msra.gmra.mrb[20].mxu1 %vm2508_vm5, %v2497_v35 }
 0x44d   :  { %5856 = vmatpush3.bf16.msra.mxu1 %v6646_v27  ;;  %5857 = vmatprep.mubr.msk.bf16.mxu1 %vm6673_vm8, %v10039_v56  ;;  %v2416_v28 = vsel %vm2078_vm15, %v2412_v9, %v6353_v13  ;;  %v2417_v58 = vsel %vm2078_vm15, %v2413_v6, %v6354_v36 }
 0x44e   :  { %v6362_v51 = vpop.permute.xlu1 %6361  ;;  %5867 = vmatprep.subr.bf16.mxu1 %v10039_v56 }
 0x44f   :  { %v6364_v21 = vunpack.i.h.bf16 %v6362_v51  ;;  %v6363_v38 = vunpack.i.l.bf16 %v6362_v51 }
 0x451   :  { %v2420_v59 = vsel %vm2083_vm4, %v2416_v28, %v6363_v38  ;;  %v2421_v43 = vsel %vm2083_vm4, %v2417_v58, %v6364_v21 }
 0x452   :  { %v2498_v24 = vpack.c.bf16 %v2421_v43, %v2420_v59  ;;  %v6367_v34 = vpop.permute.xlu0 %6366 }
 0x453   :  { %v6369_v46 = vunpack.i.h.bf16 %v6367_v34  ;;  %v6368_v1 = vunpack.i.l.bf16 %v6367_v34 }
 0x454   :  { %5852 = vmatmul.mubr.msk.bf16.vlgmr.msra.gmra.mrb[24].mxu0 %vm2508_vm5, %v2498_v24 }
 0x455   :  { %5862 = vmatpush3.bf16.msra.mxu0 %v6646_v27  ;;  %5863 = vmatprep.mubr.msk.bf16.mxu0 %vm6673_vm8, %v10039_v56  ;;  %v2418_v52 = vsel %vm2078_vm15, %v2414_v44, %v6368_v1  ;;  %v2419_v23 = vsel %vm2078_vm15, %v2415_v3, %v6369_v46 }
 0x456   :  { %v6372_v16 = vpop.permute.xlu1 %6371  ;;  %5873 = vmatprep.subr.bf16.mxu0 %v10039_v56  ;;  %v6377_v4 = vpop.permute.xlu0 %6376 }
 0x457   :  { %v6374_v47 = vunpack.i.h.bf16 %v6372_v16  ;;  %v6373_v60 = vunpack.i.l.bf16 %v6372_v16  ;;  %v6379_v14 = vunpack.i.h.bf16 %v6377_v4  ;;  %v6378_v5 = vunpack.i.l.bf16 %v6377_v4 }
 0x459   :  { %v2422_v45 = vsel %vm2083_vm4, %v2418_v52, %v6373_v60  ;;  %v2423_v22 = vsel %vm2083_vm4, %v2419_v23, %v6374_v47  ;;  %v2473_v54 = vsel %vm2073_vm14, %v8298_v32, %v6379_v14  ;;  %v2472_v49 = vsel %vm2073_vm14, %v8292_v41, %v6378_v5 }
 0x45a   :  { %v2499_v19 = vpack.c.bf16 %v2423_v22, %v2422_v45  ;;  %v6387_v53 = vpop.permute.xlu0 %6386 }
 0x45b   :  { %v6389_v39 = vunpack.i.h.bf16 %v6387_v53  ;;  %v6388_v10 = vunpack.i.l.bf16 %v6387_v53 }
 0x45c   :  { %5858 = vmatmul.mubr.msk.bf16.vlgmr.msra.gmra.mrb[24].mxu1 %vm2508_vm5, %v2499_v19 }
 0x45d   :  { %5868 = vmatpush3.bf16.msra.mxu1 %v6646_v27  ;;  %5869 = vmatprep.mubr.msk.bf16.mxu1 %vm6673_vm8, %v10039_v56  ;;  %v2475_v41 = vsel %vm2073_vm14, %v8332_v12, %v6389_v39  ;;  %v2474_v61 = vsel %vm2073_vm14, %v8330_v25, %v6388_v10 }
 0x45e   :  { %5881 = vmatprep.subr.bf16.mxu1 %v10039_v56 }
 0x472   :  { %v6382_v40 = vpop.permute.xlu1 %6381 }
 0x473   :  { %v6384_v50 = vunpack.i.h.bf16 %v6382_v40  ;;  %v6383_v57 = vunpack.i.l.bf16 %v6382_v40 }
 0x475   :  { %v2476_v17 = vsel %vm2078_vm15, %v2472_v49, %v6383_v57  ;;  %v2477_v31 = vsel %vm2078_vm15, %v2473_v54, %v6384_v50 }
 0x476   :  { %v6392_v15 = vpop.permute.xlu1 %6391 }
 0x477   :  { %v6394_v55 = vunpack.i.h.bf16 %v6392_v15  ;;  %v6393_v20 = vunpack.i.l.bf16 %v6392_v15 }
 0x479   :  { %v2480_v37 = vsel %vm2083_vm4, %v2476_v17, %v6393_v20  ;;  %v2481_v2 = vsel %vm2083_vm4, %v2477_v31, %v6394_v55 }
 0x47a   :  { %v2500_v18 = vpack.c.bf16 %v2481_v2, %v2480_v37  ;;  %v6402_v30 = vpop.permute.xlu1 %6401  ;;  %v6397_v42 = vpop.permute.xlu0 %6396 }
 0x47b   :  { %v6404_v63 = vunpack.i.h.bf16 %v6402_v30  ;;  %v6403_v32 = vunpack.i.l.bf16 %v6402_v30  ;;  %v6399_v8 = vunpack.i.h.bf16 %v6397_v42  ;;  %v6398_v0 = vunpack.i.l.bf16 %v6397_v42 }
 0x47c   :  { %5864 = vmatmul.mubr.msk.bf16.vlgmr.msra.gmra.mrb[28].mxu0 %vm2508_vm5, %v2500_v18 }
 0x47d   :  { %v2478_v62 = vsel %vm2078_vm15, %v2474_v61, %v6398_v0  ;;  %v2479_v27 = vsel %vm2078_vm15, %v2475_v41, %v6399_v8  ;;  %5877 = vmatprep.mubr.msk.bf16.mxu0 %vm6673_vm8, %v10039_v56 }
 0x47e   :  { %v2482_v35 = vsel %vm2083_vm4, %v2478_v62, %v6403_v32  ;;  %v2483_v48 = vsel %vm2083_vm4, %v2479_v27, %v6404_v63 }
 0x47f   :  { %v2501_v26 = vpack.c.bf16 %v2483_v48, %v2482_v35 }
 0x481   :  { %5870 = vmatmul.mubr.msk.bf16.vlgmr.msra.gmra.mrb[28].mxu1 %vm2508_vm5, %v2501_v26 }
 0x482   :  { %5885 = vmatprep.mubr.msk.bf16.mxu1 %vm6673_vm8, %v10039_v56 }
 0x4df   :  { %v8615_v25 = vpop.f32.mrb[0].mxu0 }
 0x4e0   :  { %v5781_v12 = vpop.f32.mrb[1].mxu0  ;;  %v3213_v36 = vsel %vm2078_vm15, %v8615_v25, 0.0 }
 0x4e1   :  { %v8617_v33 = vpop.f32.mrb[2].mxu0 }
 0x4e2   :  { %v3215_v13 = vsel %vm3214_vm6, %v8617_v33, 0.0  ;;  %v5782_v11 = vpop.f32.mrb[3].mxu0 }
 0x4e3   :  { %v3216_v51 = vadd.f32 %v3215_v13, %v3213_v36  ;;  %v8623_v6 = vpop.f32.mrb[0].mxu1 }
 0x4e4   :  { %v5787_v9 = vpop.f32.mrb[1].mxu1  ;;  %v3223_v28 = vsel %vm2078_vm15, %v8623_v6, 0.0 }
 0x4e5   :  { %v3217_v21 = vrot.slane %v3216_v51, 4  ;;  %v8625_v38 = vpop.f32.mrb[2].mxu1 }
 0x4e6   :  { %v3224_v58 = vsel %vm3214_vm6, %v8625_v38, 0.0  ;;  %v5788_v59 = vpop.f32.mrb[3].mxu1 }
 0x4e7   :  { %v3218_v43 = vadd.f32 %v3217_v21, %v3216_v51  ;;  %v3225_v24 = vadd.f32 %v3224_v58, %v3223_v28 }
 0x4e9   :  { %v3219_v34 = vrot.slane %v3218_v43, 2  ;;  %v3226_v7 = vrot.slane %v3225_v24, 4 }
 0x4eb   :  { %v3220_v29 = vadd.f32 %v3219_v34, %v3218_v43  ;;  %v3227_v46 = vadd.f32 %v3226_v7, %v3225_v24  ;;  %v8631_v1 = vpop.f32.mrb[4].mxu0 }
 0x4ec   :  { %v5793_v16 = vpop.f32.mrb[5].mxu0  ;;  %v3232_v60 = vsel %vm2078_vm15, %v8631_v1, 0.0 }
 0x4ed   :  { %v3221_v3 = vrot.slane %v3220_v29, 1  ;;  %v3228_v44 = vrot.slane %v3227_v46, 2  ;;  %v8633_v47 = vpop.f32.mrb[6].mxu0 }
 0x4ee   :  { %v3233_v52 = vsel %vm3214_vm6, %v8633_v47, 0.0  ;;  %v5794_v23 = vpop.f32.mrb[7].mxu0 }
 0x4ef   :  { %v3229_v45 = vadd.f32 %v3228_v44, %v3227_v46  ;;  %v3234_v22 = vadd.f32 %v3233_v52, %v3232_v60  ;;  %v8639_v19 = vpop.f32.mrb[4].mxu1  ;;  %v3222_v40 = vadd.f32 %v3221_v3, %v3220_v29 }
 0x4f0   :  { %v5799_v4 = vpop.f32.mrb[5].mxu1  ;;  %v3241_v57 = vsel %vm2078_vm15, %v8639_v19, 0.0 }
 0x4f1   :  { %v3230_v14 = vrot.slane %v3229_v45, 1  ;;  %v3235_v5 = vrot.slane %v3234_v22, 4  ;;  %v8641_v50 = vpop.f32.mrb[6].mxu1  ;;  %v3358_v20 = vsel %vm2078_vm15, %v3222_v40, 0.0 }
 0x4f2   :  { %v3242_v53 = vsel %vm3214_vm6, %v8641_v50, 0.0  ;;  %v5800_v15 = vpop.f32.mrb[7].mxu1 }
 0x4f3   :  { %v3231_v54 = vadd.f32 %v3230_v14, %v3229_v45  ;;  %v3236_v49 = vadd.f32 %v3235_v5, %v3234_v22  ;;  %v3243_v55 = vadd.f32 %v3242_v53, %v3241_v57 }
 0x4f5   :  { %v3359_v39 = vsel %vm2078_vm15, %v3231_v54, 0.0  ;;  %v3237_v10 = vrot.slane %v3236_v49, 2  ;;  %v3244_v17 = vrot.slane %v3243_v55, 4 }
 0x4f6   :  { %v3360_v31 = vadd.f32 %v3359_v39, %v3358_v20 }
 0x4f7   :  { %v3238_v37 = vadd.f32 %v3237_v10, %v3236_v49  ;;  %v3245_v2 = vadd.f32 %v3244_v17, %v3243_v55  ;;  %v8649_v18 = vpop.f32.mrb[8].mxu0 }
 0x4f8   :  { %v5805_v30 = vpop.f32.mrb[9].mxu0  ;;  %v3250_v8 = vsel %vm2078_vm15, %v8649_v18, 0.0 }
 0x4f9   :  { %v3239_v42 = vrot.slane %v3238_v37, 1  ;;  %v3246_v63 = vrot.slane %v3245_v2, 2  ;;  %v8651_v32 = vpop.f32.mrb[10].mxu0 }
 0x4fa   :  { %v3251_v0 = vsel %vm3214_vm6, %v8651_v32, 0.0  ;;  %v5806_v41 = vpop.f32.mrb[11].mxu0 }
 0x4fb   :  { %v3240_v61 = vadd.f32 %v3239_v42, %v3238_v37  ;;  %v3247_v62 = vadd.f32 %v3246_v63, %v3245_v2  ;;  %v3252_v27 = vadd.f32 %v3251_v0, %v3250_v8  ;;  %v8657_v35 = vpop.f32.mrb[8].mxu1 }
 0x4fc   :  { %v5811_v48 = vpop.f32.mrb[9].mxu1  ;;  %v3259_v51 = vsel %vm2078_vm15, %v8657_v35, 0.0 }
 0x4fd   :  { %v3361_v26 = vsel %vm2078_vm15, %v3240_v61, 0.0  ;;  %v3248_v12 = vrot.slane %v3247_v62, 1  ;;  %v3253_v36 = vrot.slane %v3252_v27, 4  ;;  %v8660_v13 = vpop.f32.mrb[10].mxu1 }
 0x4fe   :  { %v3362_v11 = vadd.f32 %v3361_v26, %v3360_v31  ;;  %v3260_v9 = vsel %vm3214_vm6, %v8660_v13, 0.0  ;;  %v5812_v21 = vpop.f32.mrb[11].mxu1 }
 0x4ff   :  { %v3249_v28 = vadd.f32 %v3248_v12, %v3247_v62  ;;  %v3254_v58 = vadd.f32 %v3253_v36, %v3252_v27  ;;  %v3261_v59 = vadd.f32 %v3260_v9, %v3259_v51 }
 0x501   :  { %v3363_v43 = vsel %vm2078_vm15, %v3249_v28, 0.0  ;;  %v3255_v24 = vrot.slane %v3254_v58, 2  ;;  %v3262_v34 = vrot.slane %v3261_v59, 4 }
 0x502   :  { %v3364_v7 = vadd.f32 %v3363_v43, %v3362_v11 }
 0x503   :  { %v3256_v29 = vadd.f32 %v3255_v24, %v3254_v58  ;;  %v3263_v46 = vadd.f32 %v3262_v34, %v3261_v59  ;;  %v8667_v16 = vpop.f32.mrb[12].mxu0 }
 0x504   :  { %v5817_v3 = vpop.f32.mrb[13].mxu0  ;;  %v3268_v23 = vsel %vm2078_vm15, %v8667_v16, 0.0 }
 0x505   :  { %v3257_v44 = vrot.slane %v3256_v29, 1  ;;  %v3264_v60 = vrot.slane %v3263_v46, 2  ;;  %v8669_v52 = vpop.f32.mrb[14].mxu0 }
 0x506   :  { %v3269_v45 = vsel %vm3214_vm6, %v8669_v52, 0.0  ;;  %v5818_v22 = vpop.f32.mrb[15].mxu0 }
 0x507   :  { %v3258_v4 = vadd.f32 %v3257_v44, %v3256_v29  ;;  %v3265_v40 = vadd.f32 %v3264_v60, %v3263_v46  ;;  %v3270_v14 = vadd.f32 %v3269_v45, %v3268_v23  ;;  %v8675_v5 = vpop.f32.mrb[12].mxu1 }
 0x508   :  { %v5823_v57 = vpop.f32.mrb[13].mxu1  ;;  %v3277_v20 = vsel %vm2078_vm15, %v8675_v5, 0.0 }
 0x509   :  { %v3365_v53 = vsel %vm2078_vm15, %v3258_v4, 0.0  ;;  %v3266_v15 = vrot.slane %v3265_v40, 1  ;;  %v3271_v54 = vrot.slane %v3270_v14, 4  ;;  %v8678_v49 = vpop.f32.mrb[14].mxu1 }
 0x50a   :  { %v3366_v55 = vadd.f32 %v3365_v53, %v3364_v7  ;;  %v3278_v39 = vsel %vm3214_vm6, %v8678_v49, 0.0  ;;  %v5824_v10 = vpop.f32.mrb[15].mxu1 }
 0x50b   :  { %v3267_v17 = vadd.f32 %v3266_v15, %v3265_v40  ;;  %v3272_v31 = vadd.f32 %v3271_v54, %v3270_v14  ;;  %v3279_v37 = vadd.f32 %v3278_v39, %v3277_v20 }
 0x50d   :  { %v3367_v2 = vsel %vm2078_vm15, %v3267_v17, 0.0  ;;  %v3273_v30 = vrot.slane %v3272_v31, 2  ;;  %v3280_v42 = vrot.slane %v3279_v37, 4 }
 0x50e   :  { %v3368_v63 = vadd.f32 %v3367_v2, %v3366_v55 }
 0x50f   :  { %v3274_v8 = vadd.f32 %v3273_v30, %v3272_v31  ;;  %v3281_v0 = vadd.f32 %v3280_v42, %v3279_v37  ;;  %v8685_v41 = vpop.f32.mrb[16].mxu0 }
 0x510   :  { %v5829_v61 = vpop.f32.mrb[17].mxu0  ;;  %v3286_v26 = vsel %vm2078_vm15, %v8685_v41, 0.0 }
 0x511   :  { %v3275_v62 = vrot.slane %v3274_v8, 1  ;;  %v3282_v27 = vrot.slane %v3281_v0, 2  ;;  %v8687_v48 = vpop.f32.mrb[18].mxu0 }
 0x512   :  { %v3287_v12 = vsel %vm3214_vm6, %v8687_v48, 0.0  ;;  %v5830_v36 = vpop.f32.mrb[19].mxu0 }
 0x513   :  { %v3276_v11 = vadd.f32 %v3275_v62, %v3274_v8  ;;  %v3283_v51 = vadd.f32 %v3282_v27, %v3281_v0  ;;  %v3288_v9 = vadd.f32 %v3287_v12, %v3286_v26  ;;  %v8693_v21 = vpop.f32.mrb[16].mxu1 }
 0x514   :  { %v5835_v28 = vpop.f32.mrb[17].mxu1  ;;  %v3295_v7 = vsel %vm2078_vm15, %v8693_v21, 0.0 }
 0x515   :  { %v3369_v58 = vsel %vm2078_vm15, %v3276_v11, 0.0  ;;  %v3284_v59 = vrot.slane %v3283_v51, 1  ;;  %v3289_v43 = vrot.slane %v3288_v9, 4  ;;  %v8696_v24 = vpop.f32.mrb[18].mxu1 }
 0x516   :  { %v3370_v34 = vadd.f32 %v3369_v58, %v3368_v63  ;;  %v3296_v29 = vsel %vm3214_vm6, %v8696_v24, 0.0  ;;  %v5836_v46 = vpop.f32.mrb[19].mxu1 }
 0x517   :  { %v3285_v3 = vadd.f32 %v3284_v59, %v3283_v51  ;;  %v3290_v44 = vadd.f32 %v3289_v43, %v3288_v9  ;;  %v3297_v60 = vadd.f32 %v3296_v29, %v3295_v7 }
 0x519   :  { %v3371_v23 = vsel %vm2078_vm15, %v3285_v3, 0.0  ;;  %v3291_v45 = vrot.slane %v3290_v44, 2  ;;  %v3298_v22 = vrot.slane %v3297_v60, 4 }
 0x51a   :  { %v3372_v4 = vadd.f32 %v3371_v23, %v3370_v34 }
 0x51b   :  { %v3292_v40 = vadd.f32 %v3291_v45, %v3290_v44  ;;  %v3299_v14 = vadd.f32 %v3298_v22, %v3297_v60  ;;  %v8703_v57 = vpop.f32.mrb[20].mxu0 }
 0x51c   :  { %v5841_v53 = vpop.f32.mrb[21].mxu0  ;;  %v3304_v20 = vsel %vm2078_vm15, %v8703_v57, 0.0 }
 0x51d   :  { %v3293_v15 = vrot.slane %v3292_v40, 1  ;;  %v3300_v54 = vrot.slane %v3299_v14, 2  ;;  %v8705_v55 = vpop.f32.mrb[22].mxu0 }
 0x51e   :  { %v3305_v39 = vsel %vm3214_vm6, %v8705_v55, 0.0  ;;  %v5842_v10 = vpop.f32.mrb[23].mxu0 }
 0x51f   :  { %v3294_v17 = vadd.f32 %v3293_v15, %v3292_v40  ;;  %v3301_v31 = vadd.f32 %v3300_v54, %v3299_v14  ;;  %v3306_v37 = vadd.f32 %v3305_v39, %v3304_v20  ;;  %v8711_v2 = vpop.f32.mrb[20].mxu1 }
 0x520   :  { %v5847_v30 = vpop.f32.mrb[21].mxu1  ;;  %v3313_v62 = vsel %vm2078_vm15, %v8711_v2, 0.0 }
 0x521   :  { %v3373_v42 = vsel %vm2078_vm15, %v3294_v17, 0.0  ;;  %v3302_v63 = vrot.slane %v3301_v31, 1  ;;  %v3307_v8 = vrot.slane %v3306_v37, 4  ;;  %v8714_v0 = vpop.f32.mrb[22].mxu1 }
 0x522   :  { %v3374_v61 = vadd.f32 %v3373_v42, %v3372_v4  ;;  %v3314_v27 = vsel %vm3214_vm6, %v8714_v0, 0.0  ;;  %v5848_v26 = vpop.f32.mrb[23].mxu1 }
 0x523   :  { %v3303_v12 = vadd.f32 %v3302_v63, %v3301_v31  ;;  %v3308_v36 = vadd.f32 %v3307_v8, %v3306_v37  ;;  %v3315_v11 = vadd.f32 %v3314_v27, %v3313_v62 }
 0x525   :  { %v3375_v51 = vsel %vm2078_vm15, %v3303_v12, 0.0  ;;  %v3309_v9 = vrot.slane %v3308_v36, 2  ;;  %v3316_v28 = vrot.slane %v3315_v11, 4 }
 0x526   :  { %v3376_v58 = vadd.f32 %v3375_v51, %v3374_v61 }
 0x527   :  { %v3310_v59 = vadd.f32 %v3309_v9, %v3308_v36  ;;  %v3317_v43 = vadd.f32 %v3316_v28, %v3315_v11  ;;  %v8721_v34 = vpop.f32.mrb[24].mxu0 }
 0x528   :  { %v5853_v7 = vpop.f32.mrb[25].mxu0  ;;  %v3322_v44 = vsel %vm2078_vm15, %v8721_v34, 0.0 }
 0x529   :  { %v3311_v29 = vrot.slane %v3310_v59, 1  ;;  %v3318_v46 = vrot.slane %v3317_v43, 2  ;;  %v8723_v3 = vpop.f32.mrb[26].mxu0 }
 0x52a   :  { %v3323_v60 = vsel %vm3214_vm6, %v8723_v3, 0.0  ;;  %v5854_v23 = vpop.f32.mrb[27].mxu0 }
 0x52b   :  { %v3312_v45 = vadd.f32 %v3311_v29, %v3310_v59  ;;  %v3319_v22 = vadd.f32 %v3318_v46, %v3317_v43  ;;  %v3324_v4 = vadd.f32 %v3323_v60, %v3322_v44 }
 0x52d   :  { %v3377_v40 = vsel %vm2078_vm15, %v3312_v45, 0.0  ;;  %v3320_v14 = vrot.slane %v3319_v22, 1  ;;  %v3325_v53 = vrot.slane %v3324_v4, 4 }
 0x52e   :  { %v3378_v15 = vadd.f32 %v3377_v40, %v3376_v58 }
 0x52f   :  { %v3321_v54 = vadd.f32 %v3320_v14, %v3319_v22  ;;  %v3326_v20 = vadd.f32 %v3325_v53, %v3324_v4  ;;  %v8730_v39 = vpop.f32.mrb[24].mxu1 }
 0x530   :  { %v5859_v10 = vpop.f32.mrb[25].mxu1  ;;  %v3331_v42 = vsel %vm2078_vm15, %v8730_v39, 0.0 }
 0x531   :  { %v3379_v17 = vsel %vm2078_vm15, %v3321_v54, 0.0  ;;  %v3327_v31 = vrot.slane %v3326_v20, 2  ;;  %v8733_v37 = vpop.f32.mrb[26].mxu1 }
 0x532   :  { %v3380_v30 = vadd.f32 %v3379_v17, %v3378_v15  ;;  %v3332_v63 = vsel %vm3214_vm6, %v8733_v37, 0.0  ;;  %v5860_v8 = vpop.f32.mrb[27].mxu1 }
 0x533   :  { %v3328_v61 = vadd.f32 %v3327_v31, %v3326_v20  ;;  %v3333_v62 = vadd.f32 %v3332_v63, %v3331_v42 }
 0x535   :  { %v3329_v27 = vrot.slane %v3328_v61, 1  ;;  %v3334_v26 = vrot.slane %v3333_v62, 4 }
 0x537   :  { %v3330_v12 = vadd.f32 %v3329_v27, %v3328_v61  ;;  %v3335_v36 = vadd.f32 %v3334_v26, %v3333_v62 }
 0x539   :  { %v3381_v11 = vsel %vm2078_vm15, %v3330_v12, 0.0  ;;  %v3336_v51 = vrot.slane %v3335_v36, 2 }
 0x53a   :  { %v3382_v9 = vadd.f32 %v3381_v11, %v3380_v30 }
 0x53b   :  { %v3337_v28 = vadd.f32 %v3336_v51, %v3335_v36 }
 0x53d   :  { %v3338_v58 = vrot.slane %v3337_v28, 1 }
 0x53f   :  { %v3339_v59 = vadd.f32 %v3338_v58, %v3337_v28 }
 0x541   :  { %v3383_v43 = vsel %vm2078_vm15, %v3339_v59, 0.0 }
 0x542   :  { %v3384_v7 = vadd.f32 %v3383_v43, %v3382_v9 }
 0x54f   :  { %v3162_v29 = vpop.f32.mrb[28].mxu0 }
 0x550   :  { %v5865_v46 = vpop.f32.mrb[29].mxu0  ;;  %v3340_v60 = vsel %vm2078_vm15, %v3162_v29, 0.0 }
 0x551   :  { %v3165_v44 = vpop.f32.mrb[30].mxu0 }
 0x552   :  { %v3341_v23 = vsel %vm3214_vm6, %v3165_v44, 0.0  ;;  %v5866_v45 = vpop.f32.mrb[31].mxu0 }
 0x553   :  { %v3342_v22 = vadd.f32 %v3341_v23, %v3340_v60 }
 0x554   :  { %v3206_v4 = vpop.f32.mrb[28].mxu1 }
 0x555   :  { %v3343_v40 = vrot.slane %v3342_v22, 4  ;;  %v5871_v14 = vpop.f32.mrb[29].mxu1  ;;  %v3349_v54 = vsel %vm2078_vm15, %v3206_v4, 0.0 }
 0x556   :  { %v3209_v53 = vpop.f32.mrb[30].mxu1 }
 0x557   :  { %v3344_v15 = vadd.f32 %v3343_v40, %v3342_v22  ;;  %v3350_v20 = vsel %vm3214_vm6, %v3209_v53, 0.0  ;;  %v5872_v10 = vpop.f32.mrb[31].mxu1 }
 0x558   :  { %v3351_v17 = vadd.f32 %v3350_v20, %v3349_v54 }
 0x559   :  { %v3345_v31 = vrot.slane %v3344_v15, 2 }
 0x55a   :  { %v3352_v30 = vrot.slane %v3351_v17, 4 }
 0x55b   :  { %v3346_v42 = vadd.f32 %v3345_v31, %v3344_v15 }
 0x55c   :  { %v3353_v63 = vadd.f32 %v3352_v30, %v3351_v17 }
 0x55d   :  { %v3347_v8 = vrot.slane %v3346_v42, 1 }
 0x55e   :  { %v3354_v61 = vrot.slane %v3353_v63, 2 }
 0x55f   :  { %v3348_v62 = vadd.f32 %v3347_v8, %v3346_v42 }
 0x560   :  { %v3355_v27 = vadd.f32 %v3354_v61, %v3353_v63 }
 0x561   :  { %v3385_v26 = vsel %vm2078_vm15, %v3348_v62, 0.0 }
 0x562   :  { %v3386_v12 = vadd.f32 %v3385_v26, %v3384_v7  ;;  %v3356_v36 = vrot.slane %v3355_v27, 1 }
 0x564   :  { %v3357_v11 = vadd.f32 %v3356_v36, %v3355_v27 }
 0x566   :  { %v3387_v51 = vsel %vm2078_vm15, %v3357_v11, 0.0 }
 0x567   :  { %v3388_v9 = vadd.f32 %v3387_v51, %v3386_v12 }
 0x569   :  { %v3389_v28 = vmul.f32 0.00625, %v3388_v9 }
 0x56b   :  { %v8748_v58 = vsub.f32 %v8615_v25, %v3389_v28  ;;  %v8751_v59 = vsub.f32 %v8617_v33, %v3389_v28  ;;  %v8754_v43 = vsub.f32 %v8623_v6, %v3389_v28  ;;  %v8757_v46 = vsub.f32 %v8625_v38, %v3389_v28 }
 0x56c   :  { %v8760_v7 = vsub.f32 %v8631_v1, %v3389_v28  ;;  %v8763_v60 = vsub.f32 %v8633_v47, %v3389_v28  ;;  %v8766_v23 = vsub.f32 %v8639_v19, %v3389_v28  ;;  %v8769_v25 = vsub.f32 %v8641_v50, %v3389_v28 }
 0x56d   :  { %v8772_v33 = vsub.f32 %v8649_v18, %v3389_v28  ;;  %v8775_v6 = vsub.f32 %v8651_v32, %v3389_v28  ;;  %v8778_v38 = vsub.f32 %v8657_v35, %v3389_v28  ;;  %v8781_v1 = vsub.f32 %v8660_v13, %v3389_v28 }
 0x56e   :  { %v8784_v47 = vsub.f32 %v8667_v16, %v3389_v28  ;;  %v8787_v19 = vsub.f32 %v8669_v52, %v3389_v28  ;;  %v8790_v50 = vsub.f32 %v8675_v5, %v3389_v28  ;;  %v8793_v18 = vsub.f32 %v8678_v49, %v3389_v28 }
 0x56f   :  { %v8796_v32 = vsub.f32 %v8685_v41, %v3389_v28  ;;  %v8799_v35 = vsub.f32 %v8687_v48, %v3389_v28  ;;  %v8802_v13 = vsub.f32 %v8693_v21, %v3389_v28  ;;  %v8805_v16 = vsub.f32 %v8696_v24, %v3389_v28 }
 0x570   :  { %v8808_v52 = vsub.f32 %v8703_v57, %v3389_v28  ;;  %v8811_v5 = vsub.f32 %v8705_v55, %v3389_v28  ;;  %v8814_v49 = vsub.f32 %v8711_v2, %v3389_v28  ;;  %v8817_v41 = vsub.f32 %v8714_v0, %v3389_v28 }
 0x571   :  { %10323 = vst [vmem:[#allocation99_spill] sm:$0xff] %v8802_v13  ;;  %10324 = vst [vmem:[#allocation4_spill] sm:$0xff] %v8805_v16  ;;  %v8820_v48 = vsub.f32 %v8721_v34, %v3389_v28  ;;  %v8823_v21 = vsub.f32 %v8723_v3, %v3389_v28  ;;  %v8826_v24 = vsub.f32 %v8730_v39, %v3389_v28 }
 0x572   :  { %10325 = vst [vmem:[#allocation41_spill] sm:$0xff] %v8808_v52  ;;  %10326 = vst [vmem:[#allocation3_spill] sm:$0xff] %v8811_v5  ;;  %v8829_v57 = vsub.f32 %v8733_v37, %v3389_v28  ;;  %v8831_v55 = vsub.f32 %v3162_v29, %v3389_v28  ;;  %v8833_v45 = vsub.f32 %v3165_v44, %v3389_v28 }
 0x573   :  { %10327 = vst [vmem:[#allocation79_spill] sm:$0xff] %v8814_v49  ;;  %10328 = vst [vmem:[#allocation80_spill] sm:$0xff] %v8817_v41  ;;  %v8835_v2 = vsub.f32 %v3206_v4, %v3389_v28  ;;  %v8837_v0 = vsub.f32 %v3209_v53, %v3389_v28  ;;  %v3422_v34 = vmul.f32 %v8748_v58, %v8748_v58 }
 0x574   :  { %10329 = vst [vmem:[#allocation42_spill] sm:$0xff] %v8820_v48  ;;  %10330 = vst [vmem:[#allocation5_spill] sm:$0xff] %v8823_v21  ;;  %v3423_v3 = vmul.f32 %v8751_v59, %v8751_v59  ;;  %v3424_v39 = vmul.f32 %v8754_v43, %v8754_v43  ;;  %v3425_v37 = vmul.f32 %v8757_v46, %v8757_v46 }
 0x575   :  { %10331 = vst [vmem:[#allocation43_spill] sm:$0xff] %v8826_v24  ;;  %10332 = vst [vmem:[#allocation6_spill] sm:$0xff] %v8829_v57  ;;  %v3426_v29 = vmul.f32 %v8760_v7, %v8760_v7  ;;  %v3427_v44 = vmul.f32 %v8763_v60, %v8763_v60  ;;  %v3428_v22 = vmul.f32 %v8766_v23, %v8766_v23  ;;  %v3454_v53 = vsel %vm2078_vm15, %v3422_v34, 0.0 }
 0x576   :  { %10333 = vst [vmem:[#allocation7_spill] sm:$0xff] %v8831_v55  ;;  %10334 = vst [vmem:[#allocation8_spill] sm:$0xff] %v8833_v45  ;;  %v3429_v4 = vmul.f32 %v8769_v25, %v8769_v25  ;;  %v3430_v40 = vmul.f32 %v8772_v33, %v8772_v33  ;;  %v3431_v14 = vmul.f32 %v8775_v6, %v8775_v6  ;;  %v3455_v15 = vsel %vm3214_vm6, %v3423_v3, 0.0 }
 0x577   :  { %10335 = vst [vmem:[#allocation9_spill] sm:$0xff] %v8835_v2  ;;  %v3463_v54 = vsel %vm2078_vm15, %v3424_v39, 0.0  ;;  %v3464_v20 = vsel %vm3214_vm6, %v3425_v37, 0.0  ;;  %v3456_v10 = vadd.f32 %v3455_v15, %v3454_v53  ;;  %v3472_v31 = vsel %vm2078_vm15, %v3426_v29, 0.0 }
 0x578   :  { %v3465_v17 = vadd.f32 %v3464_v20, %v3463_v54  ;;  %v3473_v30 = vsel %vm3214_vm6, %v3427_v44, 0.0  ;;  %v3481_v63 = vsel %vm2078_vm15, %v3428_v22, 0.0  ;;  %v3482_v8 = vsel %vm3214_vm6, %v3429_v4, 0.0 }
 0x579   :  { %v3474_v42 = vadd.f32 %v3473_v30, %v3472_v31  ;;  %v3432_v61 = vmul.f32 %v8778_v38, %v8778_v38  ;;  %v3433_v62 = vmul.f32 %v8781_v1, %v8781_v1  ;;  %v3457_v27 = vrot.slane %v3456_v10, 4 }
 0x57a   :  { %v3466_v26 = vrot.slane %v3465_v17, 4  ;;  %v3490_v12 = vsel %vm2078_vm15, %v3430_v40, 0.0  ;;  %v3491_v36 = vsel %vm3214_vm6, %v3431_v14, 0.0  ;;  %v3483_v11 = vadd.f32 %v3482_v8, %v3481_v63 }
 0x57b   :  { %v3434_v51 = vmul.f32 %v8784_v47, %v8784_v47  ;;  %v3435_v9 = vmul.f32 %v8787_v19, %v8787_v19  ;;  %v3436_v28 = vmul.f32 %v8790_v50, %v8790_v50  ;;  %v3475_v34 = vrot.slane %v3474_v42, 4 }
 0x57c   :  { %v3437_v3 = vmul.f32 %v8793_v18, %v8793_v18  ;;  %v3492_v39 = vadd.f32 %v3491_v36, %v3490_v12  ;;  %v3499_v37 = vsel %vm2078_vm15, %v3432_v61, 0.0  ;;  %v3500_v29 = vsel %vm3214_vm6, %v3433_v62, 0.0 }
 0x57d   :  { %v3438_v44 = vmul.f32 %v8796_v32, %v8796_v32  ;;  %v3439_v22 = vmul.f32 %v8799_v35, %v8799_v35  ;;  %v3458_v4 = vadd.f32 %v3457_v27, %v3456_v10  ;;  %v3467_v40 = vadd.f32 %v3466_v26, %v3465_v17 }
 0x57e   :  { %v3440_v14 = vmul.f32 %v8802_v13, %v8802_v13  ;;  %v3441_v53 = vmul.f32 %v8805_v16, %v8805_v16  ;;  %v3442_v15 = vmul.f32 %v8808_v52, %v8808_v52  ;;  %v3484_v54 = vrot.slane %v3483_v11, 4 }
 0x57f   :  { %v3476_v20 = vadd.f32 %v3475_v34, %v3474_v42  ;;  %v3501_v31 = vadd.f32 %v3500_v29, %v3499_v37  ;;  %v3508_v30 = vsel %vm2078_vm15, %v3434_v51, 0.0  ;;  %v3509_v63 = vsel %vm3214_vm6, %v3435_v9, 0.0 }
 0x580   :  { %v3443_v10 = vmul.f32 %v8811_v5, %v8811_v5  ;;  %v3444_v17 = vmul.f32 %v8814_v49, %v8814_v49  ;;  %v3445_v8 = vmul.f32 %v8817_v41, %v8817_v41  ;;  %v3493_v61 = vrot.slane %v3492_v39, 4 }
 0x581   :  { %v3459_v62 = vrot.slane %v3458_v4, 2  ;;  %v3468_v27 = vrot.slane %v3467_v40, 2  ;;  %v3517_v26 = vsel %vm2078_vm15, %v3436_v28, 0.0  ;;  %v3518_v42 = vsel %vm3214_vm6, %v3437_v3, 0.0 }
 0x582   :  { %v3446_v12 = vmul.f32 %v8820_v48, %v8820_v48  ;;  %v3447_v36 = vmul.f32 %v8823_v21, %v8823_v21  ;;  %v3448_v51 = vmul.f32 %v8826_v24, %v8826_v24  ;;  %v3510_v9 = vadd.f32 %v3509_v63, %v3508_v30 }
 0x583   :  { %v3449_v34 = vmul.f32 %v8829_v57, %v8829_v57  ;;  %v3477_v37 = vrot.slane %v3476_v20, 2  ;;  %v3485_v29 = vadd.f32 %v3484_v54, %v3483_v11  ;;  %v3502_v56 = vrot.slane %v3501_v31, 4 }
 0x584   :  { %v3450_v28 = vmul.f32 %v8831_v55, %v8831_v55  ;;  %v3519_v3 = vadd.f32 %v3518_v42, %v3517_v26  ;;  %v3526_v41 = vsel %vm2078_vm15, %v3438_v44, 0.0  ;;  %v3527_v48 = vsel %vm3214_vm6, %v3439_v22, 0.0 }
 0x585   :  { %v3451_v21 = vmul.f32 %v8833_v45, %v8833_v45  ;;  %v3460_v49 = vadd.f32 %v3459_v62, %v3458_v4  ;;  %v3469_v24 = vadd.f32 %v3468_v27, %v3467_v40  ;;  %v3494_v30 = vadd.f32 %v3493_v61, %v3492_v39 }
 0x586   :  { %v3511_v63 = vrot.slane %v3510_v9, 4  ;;  %v3528_v5 = vadd.f32 %v3527_v48, %v3526_v41  ;;  %v3535_v57 = vsel %vm2078_vm15, %v3440_v14, 0.0  ;;  %v3536_v11 = vsel %vm3214_vm6, %v3441_v53, 0.0 }
 0x587   :  { %v3452_v54 = vmul.f32 %v8835_v2, %v8835_v2  ;;  %v3478_v26 = vadd.f32 %v3477_v37, %v3476_v20  ;;  %v3486_v42 = vrot.slane %v3485_v29, 2  ;;  %v3503_v44 = vadd.f32 %v3502_v56, %v3501_v31 }
 0x588   :  { %v3520_v55 = vrot.slane %v3519_v3, 4  ;;  %v3537_v22 = vadd.f32 %v3536_v11, %v3535_v57  ;;  %v3544_v52 = vsel %vm2078_vm15, %v3442_v15, 0.0  ;;  %v3545_v4 = vsel %vm3214_vm6, %v3443_v10, 0.0 }
 0x589   :  { %v3453_v39 = vmul.f32 %v8837_v0, %v8837_v0  ;;  %v3461_v41 = vrot.slane %v3460_v49, 1  ;;  %v3470_v48 = vrot.slane %v3469_v24, 1  ;;  %v3495_v40 = vrot.slane %v3494_v30, 2 }
 0x58a   :  { %v3512_v14 = vadd.f32 %v3511_v63, %v3510_v9  ;;  %v3529_v53 = vrot.slane %v3528_v5, 4  ;;  %v3553_v61 = vsel %vm2078_vm15, %v3444_v17, 0.0  ;;  %v3554_v20 = vsel %vm3214_vm6, %v3445_v8, 0.0 }
 0x58b   :  { %v3479_v62 = vrot.slane %v3478_v26, 1  ;;  %v3487_v56 = vadd.f32 %v3486_v42, %v3485_v29  ;;  %v3504_v31 = vrot.slane %v3503_v44, 2  ;;  %v3546_v57 = vadd.f32 %v3545_v4, %v3544_v52 }
 0x58c   :  { %v3521_v27 = vadd.f32 %v3520_v55, %v3519_v3  ;;  %v3538_v15 = vrot.slane %v3537_v22, 4  ;;  %v3562_v10 = vsel %vm2078_vm15, %v3446_v12, 0.0  ;;  %v3563_v37 = vsel %vm3214_vm6, %v3447_v36, 0.0 }
 0x58d   :  { %v3462_v11 = vadd.f32 %v3461_v41, %v3460_v49  ;;  %v3471_v2 = vadd.f32 %v3470_v48, %v3469_v24  ;;  %v3496_v45 = vadd.f32 %v3495_v40, %v3494_v30  ;;  %v3555_v16 = vadd.f32 %v3554_v20, %v3553_v61 }
 0x58e   :  { %v3513_v9 = vrot.slane %v3512_v14, 2  ;;  %v3530_v63 = vadd.f32 %v3529_v53, %v3528_v5  ;;  %v3571_v17 = vsel %vm2078_vm15, %v3448_v51, 0.0  ;;  %v3572_v8 = vsel %vm3214_vm6, %v3449_v34, 0.0 }
 0x58f   :  { %v3488_v13 = vrot.slane %v3487_v56, 1  ;;  %v3505_v29 = vadd.f32 %v3504_v31, %v3503_v44  ;;  %v3547_v42 = vrot.slane %v3546_v57, 4  ;;  %v3564_v52 = vadd.f32 %v3563_v37, %v3562_v10 }
 0x590   :  { %v3522_v55 = vrot.slane %v3521_v27, 2  ;;  %v3539_v3 = vadd.f32 %v3538_v15, %v3537_v22  ;;  %v3580_v12 = vsel %vm2078_vm15, %v3450_v28, 0.0  ;;  %v3581_v36 = vsel %vm3214_vm6, %v3451_v21, 0.0 }
 0x591   :  { %v3480_v49 = vadd.f32 %v3479_v62, %v3478_v26  ;;  %v3497_v24 = vrot.slane %v3496_v45, 1  ;;  %v3556_v30 = vrot.slane %v3555_v16, 4  ;;  %v3573_v4 = vadd.f32 %v3572_v8, %v3571_v17 }
 0x592   :  { %v3514_v41 = vadd.f32 %v3513_v9, %v3512_v14  ;;  %v3531_v5 = vrot.slane %v3530_v63, 2  ;;  %v3589_v51 = vsel %vm2078_vm15, %v3452_v54, 0.0  ;;  %v3590_v34 = vsel %vm3214_vm6, %v3453_v39, 0.0 }
 0x593   :  { %v3489_v48 = vadd.f32 %v3488_v13, %v3487_v56  ;;  %v3548_v44 = vadd.f32 %v3547_v42, %v3546_v57  ;;  %v3565_v40 = vrot.slane %v3564_v52, 4  ;;  %v3582_v53 = vadd.f32 %v3581_v36, %v3580_v12 }
 0x594   :  { %v3506_v61 = vrot.slane %v3505_v29, 1  ;;  %v3523_v22 = vadd.f32 %v3522_v55, %v3521_v27  ;;  %v3540_v20 = vrot.slane %v3539_v3, 2  ;;  %v3598_v28 = vsel %vm2078_vm15, %v3462_v11, 0.0 }
 0x595   :  { %v3557_v21 = vadd.f32 %v3556_v30, %v3555_v16  ;;  %v3574_v26 = vrot.slane %v3573_v4, 4  ;;  %v3591_v62 = vadd.f32 %v3590_v34, %v3589_v51  ;;  %v3599_v31 = vsel %vm2078_vm15, %v3471_v2, 0.0 }
 0x596   :  { %v3498_v14 = vadd.f32 %v3497_v24, %v3496_v45  ;;  %v3515_v15 = vrot.slane %v3514_v41, 1  ;;  %v3532_v10 = vadd.f32 %v3531_v5, %v3530_v63  ;;  %v3600_v54 = vadd.f32 %v3599_v31, %v3598_v28 }
 0x597   :  { %v3549_v37 = vrot.slane %v3548_v44, 2  ;;  %v3566_v39 = vadd.f32 %v3565_v40, %v3564_v52  ;;  %v3583_v13 = vrot.slane %v3582_v53, 4  ;;  %v3601_v56 = vsel %vm2078_vm15, %v3480_v49, 0.0 }
 0x598   :  { %v3507_v57 = vadd.f32 %v3506_v61, %v3505_v29  ;;  %v3524_v9 = vrot.slane %v3523_v22, 1  ;;  %v3541_v27 = vadd.f32 %v3540_v20, %v3539_v3  ;;  %v3602_v17 = vadd.f32 %v3601_v56, %v3600_v54 }
 0x599   :  { %v3558_v8 = vrot.slane %v3557_v21, 2  ;;  %v3575_v11 = vadd.f32 %v3574_v26, %v3573_v4  ;;  %v3592_v16 = vrot.slane %v3591_v62, 4  ;;  %v3603_v42 = vsel %vm2078_vm15, %v3489_v48, 0.0 }
 0x59a   :  { %v3516_v55 = vadd.f32 %v3515_v15, %v3514_v41  ;;  %v3533_v2 = vrot.slane %v3532_v10, 1  ;;  %v3604_v45 = vadd.f32 %v3603_v42, %v3602_v17  ;;  %v3550_v12 = vadd.f32 %v3549_v37, %v3548_v44 }
 0x59b   :  { %v3567_v63 = vrot.slane %v3566_v39, 2  ;;  %v3584_v36 = vadd.f32 %v3583_v13, %v3582_v53  ;;  %v3605_v52 = vsel %vm2078_vm15, %v3498_v14, 0.0  ;;  %v3525_v24 = vadd.f32 %v3524_v9, %v3523_v22 }
 0x59c   :  { %v3542_v30 = vrot.slane %v3541_v27, 1  ;;  %v3606_v49 = vadd.f32 %v3605_v52, %v3604_v45  ;;  %v3559_v29 = vadd.f32 %v3558_v8, %v3557_v21  ;;  %v3576_v5 = vrot.slane %v3575_v11, 2 }
 0x59d   :  { %v3593_v3 = vadd.f32 %v3592_v16, %v3591_v62  ;;  %v3607_v51 = vsel %vm2078_vm15, %v3507_v57, 0.0  ;;  %v3534_v4 = vadd.f32 %v3533_v2, %v3532_v10  ;;  %v3551_v40 = vrot.slane %v3550_v12, 1 }
 0x59e   :  { %v3608_v34 = vadd.f32 %v3607_v51, %v3606_v49  ;;  %v3568_v48 = vadd.f32 %v3567_v63, %v3566_v39  ;;  %v3585_v41 = vrot.slane %v3584_v36, 2  ;;  %v3609_v61 = vsel %vm2078_vm15, %v3516_v55, 0.0  ;;  %v3630_v51 = vld [vmem:[%s9954_s3] sm:$0x1]  ;;  %s6674_s3 = smov 16  }
 0x59f   :  { %v3543_v44 = vadd.f32 %v3542_v30, %v3541_v27  ;;  %v3560_v53 = vrot.slane %v3559_v29, 1  ;;  %v3577_v28 = vadd.f32 %v3576_v5, %v3575_v11  ;;  %v3594_v26 = vrot.slane %v3593_v3, 2 }
 0x5a0   :  { %v3610_v20 = vadd.f32 %v3609_v61, %v3608_v34  ;;  %v3611_v22 = vsel %vm2078_vm15, %v3525_v24, 0.0  ;;  %v3552_v21 = vadd.f32 %v3551_v40, %v3550_v12  ;;  %v3569_v14 = vrot.slane %v3568_v48, 1  ;;  %v10336_v34 = vld [vmem:[#allocation102_spill] sm:$0xff]  ;;  %v8960_v61 = vld [vmem:[%s9955_s4] ss:$0 sm:$0xff] }
 0x5a1   :  { %v3586_v62 = vadd.f32 %v3585_v41, %v3584_v36  ;;  %v3613_v15 = vsel %vm2078_vm15, %v3534_v4, 0.0  ;;  %v3561_v54 = vadd.f32 %v3560_v53, %v3559_v29  ;;  %v3578_v37 = vrot.slane %v3577_v28, 1 }
 0x5a2   :  { %v3612_v31 = vadd.f32 %v3611_v22, %v3610_v20  ;;  %v3595_v39 = vadd.f32 %v3594_v26, %v3593_v3  ;;  %v3615_v13 = vsel %vm2078_vm15, %v3543_v44, 0.0  ;;  %v3570_v57 = vadd.f32 %v3569_v14, %v3568_v48 }
 0x5a3   :  { %v3587_v9 = vrot.slane %v3586_v62, 1  ;;  %v3617_v27 = vsel %vm2078_vm15, %v3552_v21, 0.0  ;;  %v3579_v8 = vadd.f32 %v3578_v37, %v3577_v28  ;;  %v3619_v16 = vsel %vm2078_vm15, %v3561_v54, 0.0  ;;  %v10338_v54 = vld [vmem:[#allocation4_spill] sm:$0xff]  ;;  %v10339_v37 = vld [vmem:[#allocation41_spill] sm:$0xff] }
 0x5a4   :  { %v3614_v10 = vadd.f32 %v3613_v15, %v3612_v31  ;;  %v3596_v11 = vrot.slane %v3595_v39, 1  ;;  %v3621_v2 = vsel %vm2078_vm15, %v3570_v57, 0.0 }
 0x5a5   :  { %v3588_v55 = vadd.f32 %v3587_v9, %v3586_v62  ;;  %v3623_v63 = vsel %vm2078_vm15, %v3579_v8, 0.0 }
 0x5a6   :  { %v3616_v56 = vadd.f32 %v3615_v13, %v3614_v10  ;;  %v3597_v12 = vadd.f32 %v3596_v11, %v3595_v39  ;;  %v10337_v10 = vld [vmem:[#allocation99_spill] sm:$0xff] }
 0x5a7   :  { %v3625_v52 = vsel %vm2078_vm15, %v3588_v55, 0.0  ;;  %v10340_v39 = vld [vmem:[#allocation3_spill] sm:$0xff]  ;;  %v10346_v55 = vld [vmem:[#allocation6_spill] sm:$0xff] }
 0x5a8   :  { %v3618_v17 = vadd.f32 %v3617_v27, %v3616_v56  ;;  %v3627_v30 = vsel %vm2078_vm15, %v3597_v12, 0.0  ;;  %v10341_v13 = vld [vmem:[#allocation79_spill] sm:$0xff]  ;;  %v10344_v27 = vld [vmem:[#allocation5_spill] sm:$0xff] }
 0x5aa   :  { %v3620_v42 = vadd.f32 %v3619_v16, %v3618_v17  ;;  %v10345_v16 = vld [vmem:[#allocation43_spill] sm:$0xff] }
 0x5ac   :  { %v3622_v45 = vadd.f32 %v3621_v2, %v3620_v42 }
 0x5ae   :  { %v3624_v36 = vadd.f32 %v3623_v63, %v3622_v45  ;;  %v10347_v45 = vld [vmem:[#allocation7_spill] sm:$0xff] }
 0x5b0   :  { %v3626_v24 = vadd.f32 %v3625_v52, %v3624_v36  ;;  %v10348_v36 = vld [vmem:[#allocation8_spill] sm:$0xff] }
 0x5b2   :  { %v3628_v49 = vadd.f32 %v3627_v30, %v3626_v24  ;;  %v10349_v24 = vld [vmem:[#allocation9_spill] sm:$0xff] }
 0x5b4   :  { %v3629_v29 = vmul.f32 0.00625, %v3628_v49 }
 0x5b6   :  { %v3631_v5 = vadd.f32 1e-05, %v3629_v29 }
 0x5b8   :  { %6630 = vrsqrt.f32 %v3631_v5 }
 0x5c2   :  { %v6631_v3 = vpop.eup %6630 }
 0x5c3   :  { %v3633_v4 = vmul.f32 %v6631_v3, %v3630_v51 }
 0x5c5   :  { %v3638_v40 = vrot.slane %v3633_v4, %v10336_v34 }
 0x5c7   :  { %v3644_v48 = vmul.f32 %v3638_v40, %v8760_v7  ;;  %v3645_v41 = vmul.f32 %v3638_v40, %v8763_v60  ;;  %v3671_v44 = vmul.f32 %v3638_v40, %v8837_v0  ;;  %v3640_v20 = vmul.f32 %v3638_v40, %v8748_v58 }
 0x5c8   :  { %v3641_v26 = vmul.f32 %v3638_v40, %v8751_v59  ;;  %v3642_v22 = vmul.f32 %v3638_v40, %v8754_v43  ;;  %v3643_v7 = vmul.f32 %v3638_v40, %v8757_v46  ;;  %v3646_v60 = vmul.f32 %v3638_v40, %v8766_v23 }
 0x5c9   :  { %v3683_v53 = vadd.f32 %v8960_v61, %v3644_v48  ;;  %v3684_v28 = vadd.f32 %v8960_v61, %v3645_v41  ;;  %v8971_v31 = vadd.f32 %v8960_v61, %v3671_v44  ;;  %v3647_v21 = vmul.f32 %v3638_v40, %v8769_v25 }
 0x5ca   :  { %v3648_v0 = vmul.f32 %v3638_v40, %v8772_v33  ;;  %v3649_v58 = vmul.f32 %v3638_v40, %v8775_v6  ;;  %v3650_v14 = vmul.f32 %v3638_v40, %v8778_v38  ;;  %v3651_v62 = vmul.f32 %v3638_v40, %v8781_v1 }
 0x5cb   :  { %v3652_v59 = vmul.f32 %v3638_v40, %v8784_v47  ;;  %v3653_v43 = vmul.f32 %v3638_v40, %v8787_v19  ;;  %v3654_v46 = vmul.f32 %v3638_v40, %v8790_v50  ;;  %v3655_v23 = vmul.f32 %v3638_v40, %v8793_v18  ;;  %v10342_v18 = vld [vmem:[#allocation80_spill] sm:$0xff] }
 0x5cc   :  { %vm3715_vm7 = vcmp.gt.f32.partialorder %v3683_v53, 0.0  ;;  %vm3716_vm9 = vcmp.gt.f32.partialorder %v3684_v28, 0.0  ;;  %v3656_v25 = vmul.f32 %v3638_v40, %v8796_v32  ;;  %v3657_v33 = vmul.f32 %v3638_v40, %v8799_v35  ;;  %v10343_v35 = vld [vmem:[#allocation42_spill] sm:$0xff] }
 0x5cd   :  { %v3747_v15 = vmul.f32 0.2, %v3683_v53  ;;  %v3748_v6 = vmul.f32 0.2, %v3684_v28  ;;  %v3658_v38 = vmul.f32 %v3638_v40, %v10337_v10  ;;  %v3659_v1 = vmul.f32 %v3638_v40, %v10338_v54 }
 0x5ce   :  { %v3660_v47 = vmul.f32 %v3638_v40, %v10339_v37  ;;  %v3661_v19 = vmul.f32 %v3638_v40, %v10340_v39  ;;  %v8989_v50 = vmul.f32 %v3638_v40, %v10341_v13  ;;  %v8992_v56 = vmul.f32 %v3638_v40, %v10342_v18 }
 0x5cf   :  { %v8994_v57 = vsel %vm3715_vm7, %v3683_v53, %v3747_v15  ;;  %v8996_v32 = vsel %vm3716_vm9, %v3684_v28, %v3748_v6  ;;  %v3664_v9 = vmul.f32 %v3638_v40, %v10343_v35  ;;  %v9000_v17 = vmul.f32 %v3638_v40, %v10344_v27 }
 0x5d0   :  { %v3679_v8 = vadd.f32 %v8960_v61, %v3640_v20  ;;  %v6410_v11 = vpack.i.bf16 %v8996_v32, %v8994_v57  ;;  %v9006_v42 = vmul.f32 %v3638_v40, %v10345_v16  ;;  %v9009_v2 = vmul.f32 %v3638_v40, %v10346_v55 }
 0x5d1   :  { %v9012_v12 = vmul.f32 %v3638_v40, %v10347_v45  ;;  %v3680_v63 = vadd.f32 %v8960_v61, %v3641_v26  ;;  %v9016_v52 = vmul.f32 %v3638_v40, %v10348_v36  ;;  %v9019_v30 = vmul.f32 %v3638_v40, %v10349_v24  ;;  %v9035_v40 = vld [vmem:[%s9956_s5] sm:$0xff]  }
 0x5d2   :  { %v3681_v49 = vadd.f32 %v8960_v61, %v3642_v22  ;;  %v3682_v29 = vadd.f32 %v8960_v61, %v3643_v7  ;;  %6411 = vrot.lane.b32.xlu1 %v6410_v11, %s6674_s3  ;;  %v9025_v5 = vadd.f32 %v8960_v61, %v3646_v60  ;;  %v9028_v3 = vadd.f32 %v8960_v61, %v3647_v21  ;;  %v9111_v11 = vld [vmem:[%s9956_s5 + $0x8] sm:$0xff]  }
 0x5d3   :  { %v3687_v51 = vadd.f32 %v8960_v61, %v3648_v0  ;;  %v3688_v4 = vadd.f32 %v8960_v61, %v3649_v58  ;;  %v3689_v48 = vadd.f32 %v8960_v61, %v3650_v14  ;;  %v3690_v41 = vadd.f32 %v8960_v61, %v3651_v62  ;;  %5874 = vmatpush3.bf16.msra.mxu0 %v9035_v40 }
 0x5d4   :  { %v9040_v44 = vadd.f32 %v8960_v61, %v3652_v59  ;;  %vm3711_vm10 = vcmp.gt.f32.partialorder %v3679_v8, 0.0  ;;  %v9043_v20 = vadd.f32 %v8960_v61, %v3653_v43  ;;  %vm3712_vm11 = vcmp.gt.f32.partialorder %v3680_v63, 0.0  ;;  %5882 = vmatpush3.bf16.msra.mxu1 %v9035_v40 }
 0x5d5   :  { %v3743_v53 = vmul.f32 0.2, %v3679_v8  ;;  %v3744_v28 = vmul.f32 0.2, %v3680_v63  ;;  %v9048_v26 = vmul.f32 0.2, %v8971_v31  ;;  %v9051_v22 = vadd.f32 %v8960_v61, %v3654_v46 }
 0x5d6   :  { %v9054_v7 = vadd.f32 %v8960_v61, %v3655_v23  ;;  %v9057_v60 = vadd.f32 %v8960_v61, %v3656_v25  ;;  %v10350_v21 = vmov 0.0   ;;  %vm3719_vm3 = vcmp.gt.f32.partialorder %v3687_v51, 0.0 }
 0x5d7   :  { %5875 = vmatprep.subr.bf16.mxu0 %v10350_v21  ;;  %5883 = vmatprep.subr.bf16.mxu1 %v10350_v21  ;;  %v3751_v0 = vmul.f32 0.2, %v3687_v51  ;;  %v3752_v58 = vmul.f32 0.2, %v3688_v4  ;;  %v9062_v14 = vsel %vm3711_vm10, %v3679_v8, %v3743_v53  ;;  %v9065_v62 = vadd.f32 %v8960_v61, %v3657_v33 }
 0x5d8   :  { %v9068_v59 = vadd.f32 %v8960_v61, %v3658_v38  ;;  %vm3720_vm12 = vcmp.gt.f32.partialorder %v3688_v4, 0.0  ;;  %v9071_v43 = vsel %vm3712_vm11, %v3680_v63, %v3744_v28  ;;  %v9074_v46 = vadd.f32 %v8960_v61, %v3659_v1  ;;  %5876 = vmatpush3.bf16.msra.mxu0 %v9111_v11  ;;  %5884 = vmatpush3.bf16.msra.mxu1 %v9111_v11 }
 0x5d9   :  { %v9077_v23 = vadd.f32 %v8960_v61, %v3660_v47  ;;  %v3745_v25 = vmul.f32 0.2, %v3681_v49  ;;  %v6405_v15 = vpack.i.bf16 %v9071_v43, %v9062_v14  ;;  %v9082_v33 = vadd.f32 %v8960_v61, %v3661_v19  ;;  %5889 = vmatprep.subr.bf16.mxu0 %v10350_v21  ;;  %5897 = vmatprep.subr.bf16.mxu1 %v10350_v21 }
 0x5da   :  { %vm3713_vm13 = vcmp.gt.f32.partialorder %v3681_v49, 0.0  ;;  %v3746_v6 = vmul.f32 0.2, %v3682_v29  ;;  %v3783_v10 = vsel %vm3719_vm3, %v3687_v51, %v3751_v0  ;;  %v9085_v38 = vadd.f32 %v8960_v61, %v3664_v9 }
 0x5db   :  { %vm3714_vm14 = vcmp.gt.f32.partialorder %v3682_v29, 0.0  ;;  %vm3717_vm2 = vcmp.gt.f32.partialorder %v9025_v5, 0.0  ;;  %6406 = vrot.lane.b32.xlu0 %v6405_v15, %s6670_s22  ;;  %v3784_v54 = vsel %vm3720_vm12, %v3688_v4, %v3752_v58  ;;  %vm3742_vm4 = vcmp.gt.f32.partialorder %v8971_v31, 0.0 }
 0x5dc   :  { %v3749_v1 = vmul.f32 0.2, %v9025_v5  ;;  %v3753_v37 = vmul.f32 0.2, %v3689_v48  ;;  %v3754_v47 = vmul.f32 0.2, %v3690_v41  ;;  %v6420_v39 = vpack.i.bf16 %v3784_v54, %v3783_v10 }
 0x5dd   :  { %vm3721_vm6 = vcmp.gt.f32.partialorder %v3689_v48, 0.0  ;;  %vm3722_vm7 = vcmp.gt.f32.partialorder %v3690_v41, 0.0  ;;  %v3750_v19 = vmul.f32 0.2, %v9028_v3  ;;  %v9093_v13 = vsel %vm3713_vm13, %v3681_v49, %v3745_v25 }
 0x5de   :  { %vm3718_vm9 = vcmp.gt.f32.partialorder %v9028_v3, 0.0  ;;  %v3755_v18 = vmul.f32 0.2, %v9040_v44  ;;  %v3756_v35 = vmul.f32 0.2, %v9043_v20  ;;  %6421 = vrot.lane.b32.xlu1 %v6420_v39, %s6675_s17  ;;  %v9100_v9 = vsel %vm3714_vm14, %v3682_v29, %v3746_v6 }
 0x5df   :  { %v3707_v27 = vadd.f32 %v8960_v61, %v9012_v12  ;;  %vm3723_vm10 = vcmp.gt.f32.partialorder %v9040_v44, 0.0  ;;  %vm3724_vm11 = vcmp.gt.f32.partialorder %v9043_v20, 0.0  ;;  %v6415_v8 = vpack.i.bf16 %v9100_v9, %v9093_v13 }
 0x5e0   :  { %v3708_v16 = vadd.f32 %v8960_v61, %v9016_v52  ;;  %v3785_v55 = vsel %vm3721_vm6, %v3689_v48, %v3753_v37  ;;  %v3786_v45 = vsel %vm3722_vm7, %v3690_v41, %v3754_v47  ;;  %v9120_v12 = vsel %vm3717_vm2, %v9025_v5, %v3749_v1 }
 0x5e1   :  { %v9124_v63 = vadd.f32 %v8960_v61, %v9000_v17  ;;  %v3709_v36 = vadd.f32 %v8960_v61, %v9019_v30  ;;  %6416 = vrot.lane.b32.xlu0 %v6415_v8, %s6670_s22  ;;  %v6430_v24 = vpack.i.bf16 %v3786_v45, %v3785_v55  ;;  %v9132_v52 = vsel %vm3718_vm9, %v9028_v3, %v3750_v19 }
 0x5e2   :  { %v3759_v49 = vmul.f32 0.2, %v9057_v60  ;;  %v3760_v29 = vmul.f32 0.2, %v9065_v62  ;;  %v9137_v5 = vsel %vm3723_vm10, %v9040_v44, %v3755_v18  ;;  %v9140_v17 = vsel %vm3724_vm11, %v9043_v20, %v3756_v35 }
 0x5e3   :  { %vm3725_vm3 = vcmp.gt.f32.partialorder %v9051_v22, 0.0  ;;  %vm3727_vm12 = vcmp.gt.f32.partialorder %v9057_v60, 0.0  ;;  %vm3728_vm13 = vcmp.gt.f32.partialorder %v9065_v62, 0.0  ;;  %6431 = vrot.lane.b32.xlu1 %v6430_v24, %s6675_s17  ;;  %v6425_v30 = vpack.i.bf16 %v9132_v52, %v9120_v12 }
 0x5e4   :  { %vm3726_vm14 = vcmp.gt.f32.partialorder %v9054_v7, 0.0  ;;  %vm3729_vm2 = vcmp.gt.f32.partialorder %v9068_v59, 0.0  ;;  %v3771_v3 = vmul.f32 0.2, %v3707_v27  ;;  %v3772_v51 = vmul.f32 0.2, %v3708_v16 }
 0x5e5   :  { %vm3730_vm6 = vcmp.gt.f32.partialorder %v9074_v46, 0.0  ;;  %vm3739_vm7 = vcmp.gt.f32.partialorder %v3707_v27, 0.0  ;;  %vm3740_vm9 = vcmp.gt.f32.partialorder %v3708_v16, 0.0  ;;  %6426 = vrot.lane.b32.xlu0 %v6425_v30, %s6674_s3  ;;  %v6440_v4 = vpack.i.bf16 %v9140_v17, %v9137_v5 }
 0x5e6   :  { %v3761_v48 = vmul.f32 0.2, %v9068_v59  ;;  %v3762_v41 = vmul.f32 0.2, %v9074_v46  ;;  %v3791_v44 = vsel %vm3727_vm12, %v9057_v60, %v3759_v49  ;;  %v3792_v20 = vsel %vm3728_vm13, %v9065_v62, %v3760_v29 }
 0x5e7   :  { %vm3741_vm10 = vcmp.gt.f32.partialorder %v3709_v36, 0.0  ;;  %v3773_v53 = vmul.f32 0.2, %v3709_v36  ;;  %6441 = vrot.lane.b32.xlu1 %v6440_v4, %s6674_s3  ;;  %v9170_v28 = vsel %vm3742_vm4, %v8971_v31, %v9048_v26  ;;  %v3757_v0 = vmul.f32 0.2, %v9051_v22 }
 0x5e8   :  { %v3758_v60 = vmul.f32 0.2, %v9054_v7  ;;  %v9174_v58 = vsel %vm3739_vm7, %v3707_v27, %v3771_v3  ;;  %v9176_v25 = vsel %vm3740_vm9, %v3708_v16, %v3772_v51  ;;  %vm3731_vm11 = vcmp.gt.f32.partialorder %v9077_v23, 0.0 }
 0x5e9   :  { %6436 = vrot.lane.b32.xlu0 %v6420_v39, %s6670_s22  ;;  %v6450_v62 = vpack.i.bf16 %v3792_v20, %v3791_v44  ;;  %v3812_v15 = vrot.slane %v9176_v25, 7  ;;  %v3811_v31 = vrot.slane %v9174_v58, 7  ;;  %v3763_v26 = vmul.f32 0.2, %v9077_v23 }
 0x5ea   :  { %v3764_v6 = vmul.f32 0.2, %v9082_v33  ;;  %v3793_v10 = vsel %vm3729_vm2, %v9068_v59, %v3761_v48  ;;  %v3794_v54 = vsel %vm3730_vm6, %v9074_v46, %v3762_v41  ;;  %vm3732_vm4 = vcmp.gt.f32.partialorder %v9082_v33, 0.0 }
 0x5eb   :  { %6451 = vrot.lane.b32.xlu1 %v6450_v62, %s6675_s17  ;;  %v9194_v1 = vsel %vm3741_vm10, %v3709_v36, %v3773_v53  ;;  %v3815_v37 = vrot.slane %v9170_v28, 7  ;;  %v9200_v47 = vsel %vm3725_vm3, %v9051_v22, %v3757_v0  ;;  %v9205_v59 = vsel %vm3726_vm14, %v9054_v7, %v3758_v60 }
 0x5ec   :  { %v3814_v46 = vrot.slane %v9194_v1, 7  ;;  %v9211_v39 = vsel %vm61_vm0, %v3811_v31, %v3812_v15  ;;  %v3705_v19 = vadd.f32 %v8960_v61, %v9006_v42  ;;  %v3706_v18 = vadd.f32 %v8960_v61, %v9009_v2 }
 0x5ed   :  { %v3767_v22 = vmul.f32 0.2, %v9085_v38  ;;  %6446 = vrot.lane.b32.xlu0 %v6430_v24, %s6670_s22  ;;  %v6460_v35 = vpack.i.bf16 %v3794_v54, %v3793_v10  ;;  %v3768_v7 = vmul.f32 0.2, %v9124_v63  ;;  %v9223_v27 = vsel %vm3731_vm11, %v9077_v23, %v3763_v26 }
 0x5ee   :  { %v9226_v8 = vsel %vm3732_vm4, %v9082_v33, %v3764_v6  ;;  %v9231_v42 = vsel %vm61_vm0, %v3814_v46, %v3815_v37  ;;  %vm3735_vm3 = vcmp.gt.f32.partialorder %v9085_v38, 0.0  ;;  %vm3736_vm12 = vcmp.gt.f32.partialorder %v9124_v63, 0.0 }
 0x5ef   :  { %6461 = vrot.lane.b32.xlu1 %v6460_v35, %s6675_s17  ;;  %v6455_v2 = vpack.i.bf16 %v9205_v59, %v9200_v47  ;;  %v3701_v23 = vadd.f32 %v8960_v61, %v8989_v50  ;;  %v3702_v33 = vadd.f32 %v8960_v61, %v8992_v56  ;;  %v6470_v16 = vpack.i.bf16 %v9226_v8, %v9223_v27 }
 0x5f0   :  { %v3769_v55 = vmul.f32 0.2, %v3705_v19  ;;  %v3770_v45 = vmul.f32 0.2, %v3706_v18  ;;  %v3799_v36 = vsel %vm3735_vm3, %v9085_v38, %v3767_v22  ;;  %v3800_v24 = vsel %vm3736_vm12, %v9124_v63, %v3768_v7 }
 0x5f1   :  { %6456 = vrot.lane.b32.xlu0 %v6455_v2, %s6674_s3  ;;  %vm3737_vm13 = vcmp.gt.f32.partialorder %v3705_v19, 0.0  ;;  %vm3738_vm14 = vcmp.gt.f32.partialorder %v3706_v18, 0.0  ;;  %v3765_v49 = vmul.f32 0.2, %v3701_v23  ;;  %v3766_v50 = vmul.f32 0.2, %v3702_v33 }
 0x5f2   :  { %vm3733_vm2 = vcmp.gt.f32.partialorder %v3701_v23, 0.0  ;;  %vm3734_vm6 = vcmp.gt.f32.partialorder %v3702_v33, 0.0  ;;  %v6480_v61 = vpack.i.bf16 %v3800_v24, %v3799_v36  ;;  %v3801_v56 = vsel %vm3737_vm13, %v3705_v19, %v3769_v55 }
 0x5f3   :  { %6471 = vrot.lane.b32.xlu1 %v6470_v16, %s6674_s3  ;;  %v3802_v29 = vsel %vm3738_vm14, %v3706_v18, %v3770_v45  ;;  %v9250_v30 = vsel %vm3733_vm2, %v3701_v23, %v3765_v49  ;;  %v9252_v38 = vsel %vm3734_vm6, %v3702_v33, %v3766_v50  ;;  %v3997_v3 = vrot.slane %v9071_v43, 1 }
 0x5f4   :  { %v6490_v63 = vpack.i.bf16 %v3802_v29, %v3801_v56  ;;  %v3996_v51 = vrot.slane %v9062_v14, 1  ;;  %v6485_v4 = vpack.i.bf16 %v9252_v38, %v9250_v30  ;;  %v6500_v48 = vpack.i.bf16 %v9176_v25, %v9174_v58 }
 0x5f5   :  { %6466 = vrot.lane.b32.xlu0 %v6450_v62, %s6670_s22  ;;  %v4000_v41 = vrot.slane %v9100_v9, 1  ;;  %v3999_v44 = vrot.slane %v9093_v13, 1  ;;  %v4004_v43 = vsel %vm61_vm0, %v3997_v3, 0.0  ;;  %v6515_v13 = vpack.i.bf16 %v9170_v28, %v9194_v1 }
 0x5f6   :  { %v3998_v20 = vsel %vm99_vm1, %v3996_v51, %v3997_v3  ;;  %v3821_v10 = vsel %vm61_vm0, 0.0, %v3811_v31  ;;  %vm3879_vm7 = vcmask 195584   ;;  %vm4080_vm9 = vcmask 261120  }
 0x5f7   :  { %6481 = vrot.lane.b32.xlu1 %v6480_v61, %s6675_s17  ;;  %v6510_v14 = vpack.i.bf16 %v4004_v43, %v3998_v20  ;;  %v4001_v53 = vsel %vm99_vm1, %v3999_v44, %v4000_v41  ;;  %v4005_v0 = vsel %vm61_vm0, %v4000_v41, 0.0  ;;  %v3822_v36 = vsel %vm61_vm0, 0.0, %v3814_v46 }
 0x5f8   :  { %v6520_v9 = vpack.i.bf16 %v4005_v0, %v4001_v53  ;;  %vm4434_vm10 = vcmask 123904  }
 0x5f9   :  { %6476 = vrot.lane.b32.xlu0 %v6460_v35, %s6670_s22 }
 0x5fb   :  { %6491 = vrot.lane.b32.xlu1 %v6490_v63, %s6675_s17 }
 0x5fd   :  { %6486 = vrot.lane.b32.xlu0 %v6485_v4, %s6674_s3 }
 0x5ff   :  { %6501 = vrot.lane.b32.xlu1 %v6500_v48, %s6674_s3 }
 0x601   :  { %6496 = vrot.lane.b32.xlu0 %v6480_v61, %s6670_s22 }
 0x603   :  { %6511 = vrot.lane.b32.xlu1 %v6510_v14, %s6675_s17 }
 0x605   :  { %6506 = vrot.lane.b32.xlu0 %v6490_v63, %s6670_s22 }
 0x607   :  { %6521 = vrot.lane.b32.xlu1 %v6520_v9, %s6675_s17 }
 0x609   :  { %6516 = vrot.lane.b32.xlu0 %v6515_v13, %s6674_s3 }
 0x644   :  { %v6412_v60 = vpop.permute.xlu1 %6411 }
 0x645   :  { %v6414_v62 = vunpack.i.h.bf16 %v6412_v60  ;;  %v6413_v15 = vunpack.i.l.bf16 %v6412_v60 }
 0x64d   :  { %v6407_v25 = vpop.permute.xlu0 %6406 }
 0x64e   :  { %v6409_v26 = vunpack.i.h.bf16 %v6407_v25  ;;  %v6408_v6 = vunpack.i.l.bf16 %v6407_v25 }
 0x650   :  { %v3872_v54 = vsel %vm2078_vm15, %v9211_v39, %v6409_v26  ;;  %v3871_v37 = vsel %vm2078_vm15, %v3821_v10, %v6408_v6  ;;  %v6422_v28 = vpop.permute.xlu1 %6421 }
 0x651   :  { %v6424_v19 = vunpack.i.h.bf16 %v6422_v28  ;;  %v6423_v18 = vunpack.i.l.bf16 %v6422_v28  ;;  %v3875_v22 = vsel %vm2508_vm5, %v3871_v37, %v6413_v15  ;;  %v3876_v35 = vsel %vm2508_vm5, %v3872_v54, %v6414_v62 }
 0x653   :  { %v3880_v7 = vsel %vm3879_vm7, %v3875_v22, %v6423_v18  ;;  %v3881_v2 = vsel %vm3879_vm7, %v3876_v35, %v6424_v19  ;;  %v6417_v58 = vpop.permute.xlu0 %6416 }
 0x654   :  { %v4060_v31 = vpack.c.bf16 %v3881_v2, %v3880_v7  ;;  %v6419_v23 = vunpack.i.h.bf16 %v6417_v58  ;;  %v6418_v33 = vunpack.i.l.bf16 %v6417_v58 }
 0x655   :  { %v6432_v39 = vpop.permute.xlu1 %6431 }
 0x656   :  { %5878 = vmatmul.mubr.msk.bf16.vlgmr.msra.gmra.mrb[32].mxu0 %vm4080_vm9, %v4060_v31  ;;  %v6434_v16 = vunpack.i.h.bf16 %v6432_v39  ;;  %v6433_v55 = vunpack.i.l.bf16 %v6432_v39  ;;  %v3874_v50 = vsel %vm2078_vm15, %v9231_v42, %v6419_v23  ;;  %v3873_v61 = vsel %vm2078_vm15, %v3822_v36, %v6418_v33 }
 0x657   :  { %v6427_v45 = vpop.permute.xlu0 %6426  ;;  %5890 = vmatpush3.bf16.msra.mxu0 %v9035_v40  ;;  %5893 = vmatprep.mubr.msk.bf16.mxu0 %vm6673_vm8, %v10350_v21 }
 0x658   :  { %v6429_v24 = vunpack.i.h.bf16 %v6427_v45  ;;  %v6428_v49 = vunpack.i.l.bf16 %v6427_v45  ;;  %5891 = vmatprep.subr.bf16.mxu0 %v10350_v21 }
 0x659   :  { %v6442_v56 = vpop.permute.xlu1 %6441 }
 0x65a   :  { %v3877_v29 = vsel %vm2508_vm5, %v3873_v61, %v6428_v49  ;;  %v3878_v63 = vsel %vm2508_vm5, %v3874_v50, %v6429_v24  ;;  %v6444_v51 = vunpack.i.h.bf16 %v6442_v56  ;;  %v6443_v46 = vunpack.i.l.bf16 %v6442_v56 }
 0x65b   :  { %v3882_v3 = vsel %vm3879_vm7, %v3877_v29, %v6433_v55  ;;  %v3883_v1 = vsel %vm3879_vm7, %v3878_v63, %v6434_v16  ;;  %v6437_v4 = vpop.permute.xlu0 %6436  ;;  %5892 = vmatpush3.bf16.msra.mxu0 %v9111_v11 }
 0x65c   :  { %v4061_v48 = vpack.c.bf16 %v3883_v1, %v3882_v3  ;;  %v6439_v41 = vunpack.i.h.bf16 %v6437_v4  ;;  %v6438_v44 = vunpack.i.l.bf16 %v6437_v4  ;;  %5905 = vmatprep.subr.bf16.mxu0 %v10350_v21 }
 0x65d   :  { %v6452_v42 = vpop.permute.xlu1 %6451 }
 0x65e   :  { %v3929_v20 = vsel %vm2078_vm15, %v8996_v32, %v6439_v41  ;;  %v3928_v43 = vsel %vm2078_vm15, %v8994_v57, %v6438_v44  ;;  %5886 = vmatmul.mubr.msk.bf16.vlgmr.msra.gmra.mrb[32].mxu1 %vm4080_vm9, %v4061_v48  ;;  %v6454_v14 = vunpack.i.h.bf16 %v6452_v42  ;;  %v6453_v53 = vunpack.i.l.bf16 %v6452_v42 }
 0x65f   :  { %v3932_v0 = vsel %vm2508_vm5, %v3928_v43, %v6443_v46  ;;  %v3933_v9 = vsel %vm2508_vm5, %v3929_v20, %v6444_v51  ;;  %v6447_v13 = vpop.permute.xlu0 %6446  ;;  %5898 = vmatpush3.bf16.msra.mxu1 %v9035_v40  ;;  %5901 = vmatprep.mubr.msk.bf16.mxu1 %vm6673_vm8, %v10350_v21 }
 0x660   :  { %v3936_v60 = vsel %vm3879_vm7, %v3932_v0, %v6453_v53  ;;  %v3937_v32 = vsel %vm3879_vm7, %v3933_v9, %v6454_v14  ;;  %5899 = vmatprep.subr.bf16.mxu1 %v10350_v21  ;;  %v6449_v25 = vunpack.i.h.bf16 %v6447_v13  ;;  %v6448_v62 = vunpack.i.l.bf16 %v6447_v13 }
 0x661   :  { %v4062_v57 = vpack.c.bf16 %v3937_v32, %v3936_v60  ;;  %v6462_v15 = vpop.permute.xlu1 %6461 }
 0x662   :  { %v6464_v26 = vunpack.i.h.bf16 %v6462_v15  ;;  %v6463_v6 = vunpack.i.l.bf16 %v6462_v15  ;;  %v3931_v28 = vsel %vm2078_vm15, %v9132_v52, %v6449_v25  ;;  %v3930_v19 = vsel %vm2078_vm15, %v9120_v12, %v6448_v62 }
 0x663   :  { %v6457_v10 = vpop.permute.xlu0 %6456  ;;  %5894 = vmatmul.mubr.msk.bf16.vlgmr.msra.gmra.mrb[36].mxu0 %vm4080_vm9, %v4062_v57  ;;  %5900 = vmatpush3.bf16.msra.mxu1 %v9111_v11 }
 0x664   :  { %v6459_v54 = vunpack.i.h.bf16 %v6457_v10  ;;  %v6458_v37 = vunpack.i.l.bf16 %v6457_v10  ;;  %5906 = vmatpush3.bf16.msra.mxu0 %v9035_v40  ;;  %5913 = vmatprep.subr.bf16.mxu1 %v10350_v21 }
 0x665   :  { %v6472_v18 = vpop.permute.xlu1 %6471  ;;  %5907 = vmatprep.subr.bf16.mxu0 %v10350_v21  ;;  %5909 = vmatprep.mubr.msk.bf16.mxu0 %vm6673_vm8, %v10350_v21 }
 0x666   :  { %v3934_v22 = vsel %vm2508_vm5, %v3930_v19, %v6458_v37  ;;  %v3935_v35 = vsel %vm2508_vm5, %v3931_v28, %v6459_v54  ;;  %v6474_v58 = vunpack.i.h.bf16 %v6472_v18  ;;  %v6473_v31 = vunpack.i.l.bf16 %v6472_v18 }
 0x667   :  { %v3938_v7 = vsel %vm3879_vm7, %v3934_v22, %v6463_v6  ;;  %v3939_v2 = vsel %vm3879_vm7, %v3935_v35, %v6464_v26  ;;  %v6467_v52 = vpop.permute.xlu0 %6466 }
 0x668   :  { %v4063_v23 = vpack.c.bf16 %v3939_v2, %v3938_v7  ;;  %v6469_v33 = vunpack.i.h.bf16 %v6467_v52  ;;  %v6468_v12 = vunpack.i.l.bf16 %v6467_v52  ;;  %5908 = vmatpush3.bf16.msra.mxu0 %v9111_v11 }
 0x669   :  { %v6482_v39 = vpop.permute.xlu1 %6481  ;;  %5921 = vmatprep.subr.bf16.mxu0 %v10350_v21 }
 0x66a   :  { %v3985_v16 = vsel %vm2078_vm15, %v9140_v17, %v6469_v33  ;;  %v3984_v55 = vsel %vm2078_vm15, %v9137_v5, %v6468_v12  ;;  %5902 = vmatmul.mubr.msk.bf16.vlgmr.msra.gmra.mrb[36].mxu1 %vm4080_vm9, %v4063_v23  ;;  %v6484_v45 = vunpack.i.h.bf16 %v6482_v39  ;;  %v6483_v36 = vunpack.i.l.bf16 %v6482_v39 }
 0x66b   :  { %v3988_v24 = vsel %vm2508_vm5, %v3984_v55, %v6473_v31  ;;  %v3989_v49 = vsel %vm2508_vm5, %v3985_v16, %v6474_v58  ;;  %v6477_v50 = vpop.permute.xlu0 %6476  ;;  %5914 = vmatpush3.bf16.msra.mxu1 %v9035_v40  ;;  %5917 = vmatprep.mubr.msk.bf16.mxu1 %vm6673_vm8, %v10350_v21 }
 0x66c   :  { %v3992_v61 = vsel %vm3879_vm7, %v3988_v24, %v6483_v36  ;;  %v3993_v17 = vsel %vm3879_vm7, %v3989_v49, %v6484_v45  ;;  %5915 = vmatprep.subr.bf16.mxu1 %v10350_v21  ;;  %v6479_v56 = vunpack.i.h.bf16 %v6477_v50  ;;  %v6478_v29 = vunpack.i.l.bf16 %v6477_v50 }
 0x66d   :  { %v4064_v5 = vpack.c.bf16 %v3993_v17, %v3992_v61  ;;  %v6492_v63 = vpop.permute.xlu1 %6491 }
 0x66e   :  { %v6494_v3 = vunpack.i.h.bf16 %v6492_v63  ;;  %v6493_v1 = vunpack.i.l.bf16 %v6492_v63  ;;  %v3987_v48 = vsel %vm2078_vm15, %v9205_v59, %v6479_v56  ;;  %v3986_v41 = vsel %vm2078_vm15, %v9200_v47, %v6478_v29 }
 0x66f   :  { %v6487_v51 = vpop.permute.xlu0 %6486  ;;  %5910 = vmatmul.mubr.msk.bf16.vlgmr.msra.gmra.mrb[40].mxu0 %vm4080_vm9, %v4064_v5  ;;  %5916 = vmatpush3.bf16.msra.mxu1 %v9111_v11 }
 0x670   :  { %v6489_v46 = vunpack.i.h.bf16 %v6487_v51  ;;  %v6488_v4 = vunpack.i.l.bf16 %v6487_v51  ;;  %5922 = vmatpush3.bf16.msra.mxu0 %v9035_v40  ;;  %5929 = vmatprep.subr.bf16.mxu1 %v10350_v21 }
 0x671   :  { %v6502_v44 = vpop.permute.xlu1 %6501  ;;  %5923 = vmatprep.subr.bf16.mxu0 %v10350_v21  ;;  %5925 = vmatprep.mubr.msk.bf16.mxu0 %vm6673_vm8, %v10350_v21 }
 0x672   :  { %v3990_v42 = vsel %vm2508_vm5, %v3986_v41, %v6488_v4  ;;  %v3991_v20 = vsel %vm2508_vm5, %v3987_v48, %v6489_v46  ;;  %v6504_v53 = vunpack.i.h.bf16 %v6502_v44  ;;  %v6503_v0 = vunpack.i.l.bf16 %v6502_v44 }
 0x673   :  { %v3994_v43 = vsel %vm3879_vm7, %v3990_v42, %v6493_v1  ;;  %v3995_v14 = vsel %vm3879_vm7, %v3991_v20, %v6494_v3  ;;  %v6497_v59 = vpop.permute.xlu0 %6496 }
 0x674   :  { %v4065_v9 = vpack.c.bf16 %v3995_v14, %v3994_v43  ;;  %v6499_v13 = vunpack.i.h.bf16 %v6497_v59  ;;  %v6498_v47 = vunpack.i.l.bf16 %v6497_v59  ;;  %5924 = vmatpush3.bf16.msra.mxu0 %v9111_v11 }
 0x675   :  { %v6512_v60 = vpop.permute.xlu1 %6511  ;;  %5937 = vmatprep.subr.bf16.mxu0 %v10350_v21 }
 0x676   :  { %v4045_v32 = vsel %vm2078_vm15, %v9226_v8, %v6499_v13  ;;  %v4044_v57 = vsel %vm2078_vm15, %v9223_v27, %v6498_v47  ;;  %5918 = vmatmul.mubr.msk.bf16.vlgmr.msra.gmra.mrb[40].mxu1 %vm4080_vm9, %v4065_v9  ;;  %v6514_v25 = vunpack.i.h.bf16 %v6512_v60  ;;  %v6513_v62 = vunpack.i.l.bf16 %v6512_v60 }
 0x677   :  { %v6507_v15 = vpop.permute.xlu0 %6506  ;;  %v4048_v26 = vsel %vm2508_vm5, %v4044_v57, %v6503_v0  ;;  %v4049_v6 = vsel %vm2508_vm5, %v4045_v32, %v6504_v53  ;;  %5930 = vmatpush3.bf16.msra.mxu1 %v9035_v40  ;;  %5933 = vmatprep.mubr.msk.bf16.mxu1 %vm6673_vm8, %v10350_v21 }
 0x678   :  { %v4053_v10 = vsel %vm3879_vm7, %v4049_v6, %v6514_v25  ;;  %v4052_v8 = vsel %vm3879_vm7, %v4048_v26, %v6513_v62  ;;  %5931 = vmatprep.subr.bf16.mxu1 %v10350_v21  ;;  %v6509_v27 = vunpack.i.h.bf16 %v6507_v15  ;;  %v6508_v54 = vunpack.i.l.bf16 %v6507_v15 }
 0x679   :  { %v4066_v37 = vpack.c.bf16 %v4053_v10, %v4052_v8  ;;  %v6522_v28 = vpop.permute.xlu1 %6521 }
 0x67a   :  { %v6524_v18 = vunpack.i.h.bf16 %v6522_v28  ;;  %v6523_v22 = vunpack.i.l.bf16 %v6522_v28  ;;  %v4047_v7 = vsel %vm2078_vm15, %v9252_v38, %v6509_v27  ;;  %v4046_v2 = vsel %vm2078_vm15, %v9250_v30, %v6508_v54 }
 0x67b   :  { %v6517_v19 = vpop.permute.xlu0 %6516  ;;  %5926 = vmatmul.mubr.msk.bf16.vlgmr.msra.gmra.mrb[44].mxu0 %vm4080_vm9, %v4066_v37  ;;  %5932 = vmatpush3.bf16.msra.mxu1 %v9111_v11 }
 0x67c   :  { %v6519_v40 = vunpack.i.h.bf16 %v6517_v19  ;;  %v6518_v35 = vunpack.i.l.bf16 %v6517_v19  ;;  %5949 = vmatprep.subr.bf16.mxu1 %v10350_v21  ;;  %5945 = vmatprep.mubr.msk.bf16.mxu0 %vm6673_vm8, %v10350_v21 }
 0x67e   :  { %v4050_v58 = vsel %vm2508_vm5, %v4046_v2, %v6518_v35  ;;  %v4051_v31 = vsel %vm2508_vm5, %v4047_v7, %v6519_v40 }
 0x67f   :  { %v4055_v52 = vsel %vm3879_vm7, %v4051_v31, %v6524_v18  ;;  %v4054_v11 = vsel %vm3879_vm7, %v4050_v58, %v6523_v22 }
 0x680   :  { %v4067_v23 = vpack.c.bf16 %v4055_v52, %v4054_v11 }
 0x682   :  { %5934 = vmatmul.mubr.msk.bf16.vlgmr.msra.gmra.mrb[44].mxu1 %vm4080_vm9, %v4067_v23 }
 0x683   :  { %5957 = vmatprep.mubr.msk.bf16.mxu1 %vm6673_vm8, %v10350_v21 }
 0x729   :  { %v9393_v33 = vpop.f32.mrb[32].mxu0 }
 0x72a   :  { %v5879_v38 = vpop.f32.mrb[33].mxu0  ;;  %v4433_v30 = vsel %vm2508_vm5, %v9393_v33, 0.0 }
 0x72b   :  { %v9395_v12 = vpop.f32.mrb[34].mxu0 }
 0x72c   :  { %v4435_v39 = vsel %vm4434_vm10, %v9395_v12, 0.0  ;;  %v5880_v16 = vpop.f32.mrb[35].mxu0 }
 0x72d   :  { %v4436_v55 = vadd.f32 %v4435_v39, %v4433_v30  ;;  %v9441_v39 = vld [vmem:[%s9957_s8] sm:$0xff]  }
 0x72e   :  { %5938 = vmatpush3.bf16.msra.mxu0 %v9441_v39  ;;  %5950 = vmatpush3.bf16.msra.mxu1 %v9441_v39 }
 0x72f   :  { %v4437_v45 = vrot.slane %v4436_v55, 4  ;;  %5939 = vmatprep.subr.bf16.mxu0 %v10350_v21  ;;  %5951 = vmatprep.subr.bf16.mxu1 %v10350_v21 }
 0x731   :  { %v4438_v36 = vadd.f32 %v4437_v45, %v4436_v55  ;;  %v9401_v24 = vpop.f32.mrb[32].mxu1  ;;  %v9446_v45 = vld [vmem:[%s9957_s8 + $0x8] sm:$0xff]  }
 0x732   :  { %v5887_v49 = vpop.f32.mrb[33].mxu1  ;;  %v4443_v17 = vsel %vm2508_vm5, %v9401_v24, 0.0  ;;  %5940 = vmatpush3.bf16.msra.mxu0 %v9446_v45  ;;  %5952 = vmatpush3.bf16.msra.mxu1 %v9446_v45 }
 0x733   :  { %v4439_v50 = vrot.slane %v4438_v36, 2  ;;  %v9403_v61 = vpop.f32.mrb[34].mxu1  ;;  %5941 = vmatprep.subr.bf16.mxu0 %v10350_v21  ;;  %5953 = vmatprep.subr.bf16.mxu1 %v10350_v21 }
 0x734   :  { %v4444_v5 = vsel %vm4434_vm10, %v9403_v61, 0.0  ;;  %v5888_v56 = vpop.f32.mrb[35].mxu1 }
 0x735   :  { %v4445_v29 = vadd.f32 %v4444_v5, %v4443_v17  ;;  %v4440_v3 = vadd.f32 %v4439_v50, %v4438_v36 }
 0x736   :  { %v9409_v63 = vpop.f32.mrb[36].mxu0 }
 0x737   :  { %v4446_v1 = vrot.slane %v4445_v29, 4  ;;  %v5895_v51 = vpop.f32.mrb[37].mxu0  ;;  %v4452_v48 = vsel %vm2508_vm5, %v9409_v63, 0.0  ;;  %v4441_v20 = vrot.slane %v4440_v3, 1 }
 0x738   :  { %v9411_v46 = vpop.f32.mrb[38].mxu0 }
 0x739   :  { %v4447_v4 = vadd.f32 %v4446_v1, %v4445_v29  ;;  %v4453_v41 = vsel %vm4434_vm10, %v9411_v46, 0.0  ;;  %v5896_v44 = vpop.f32.mrb[39].mxu0  ;;  %v4442_v13 = vadd.f32 %v4441_v20, %v4440_v3 }
 0x73a   :  { %v4454_v42 = vadd.f32 %v4453_v41, %v4452_v48 }
 0x73b   :  { %v4448_v43 = vrot.slane %v4447_v4, 2  ;;  %v4506_v8 = vsel %vm2508_vm5, %v4442_v13, 0.0 }
 0x73c   :  { %v4455_v14 = vrot.slane %v4454_v42, 4 }
 0x73d   :  { %v4449_v53 = vadd.f32 %v4448_v43, %v4447_v4  ;;  %v9417_v0 = vpop.f32.mrb[36].mxu1 }
 0x73e   :  { %v4456_v59 = vadd.f32 %v4455_v14, %v4454_v42  ;;  %v5903_v9 = vpop.f32.mrb[37].mxu1  ;;  %v4461_v57 = vsel %vm2508_vm5, %v9417_v0, 0.0 }
 0x73f   :  { %v4450_v47 = vrot.slane %v4449_v53, 1  ;;  %v9419_v60 = vpop.f32.mrb[38].mxu1 }
 0x740   :  { %v4457_v32 = vrot.slane %v4456_v59, 2  ;;  %v4462_v25 = vsel %vm4434_vm10, %v9419_v60, 0.0  ;;  %v5904_v62 = vpop.f32.mrb[39].mxu1 }
 0x741   :  { %v4451_v15 = vadd.f32 %v4450_v47, %v4449_v53  ;;  %v4463_v26 = vadd.f32 %v4462_v25, %v4461_v57 }
 0x742   :  { %v4458_v6 = vadd.f32 %v4457_v32, %v4456_v59  ;;  %v9425_v10 = vpop.f32.mrb[40].mxu0 }
 0x743   :  { %v4507_v27 = vsel %vm2508_vm5, %v4451_v15, 0.0  ;;  %v4464_v54 = vrot.slane %v4463_v26, 4  ;;  %v5911_v37 = vpop.f32.mrb[41].mxu0  ;;  %v4470_v40 = vsel %vm2508_vm5, %v9425_v10, 0.0 }
 0x744   :  { %v4508_v28 = vadd.f32 %v4507_v27, %v4506_v8  ;;  %v4459_v19 = vrot.slane %v4458_v6, 1  ;;  %v9429_v18 = vpop.f32.mrb[42].mxu0 }
 0x745   :  { %v4465_v22 = vadd.f32 %v4464_v54, %v4463_v26  ;;  %v4471_v35 = vsel %vm4434_vm10, %v9429_v18, 0.0  ;;  %v5912_v7 = vpop.f32.mrb[43].mxu0 }
 0x746   :  { %v4460_v2 = vadd.f32 %v4459_v19, %v4458_v6  ;;  %v4472_v58 = vadd.f32 %v4471_v35, %v4470_v40 }
 0x747   :  { %v4466_v31 = vrot.slane %v4465_v22, 2 }
 0x748   :  { %v4509_v52 = vsel %vm2508_vm5, %v4460_v2, 0.0  ;;  %v4473_v11 = vrot.slane %v4472_v58, 4 }
 0x749   :  { %v4510_v23 = vadd.f32 %v4509_v52, %v4508_v28  ;;  %v4467_v38 = vadd.f32 %v4466_v31, %v4465_v22  ;;  %v9436_v30 = vpop.f32.mrb[40].mxu1 }
 0x74a   :  { %v4474_v16 = vadd.f32 %v4473_v11, %v4472_v58  ;;  %v5919_v55 = vpop.f32.mrb[41].mxu1  ;;  %v4479_v17 = vsel %vm2508_vm5, %v9436_v30, 0.0 }
 0x74b   :  { %v4468_v36 = vrot.slane %v4467_v38, 1  ;;  %v9448_v49 = vpop.f32.mrb[42].mxu1 }
 0x74c   :  { %v4475_v50 = vrot.slane %v4474_v16, 2  ;;  %v4480_v5 = vsel %vm4434_vm10, %v9448_v49, 0.0  ;;  %v5920_v56 = vpop.f32.mrb[43].mxu1 }
 0x74d   :  { %v4469_v29 = vadd.f32 %v4468_v36, %v4467_v38  ;;  %v4481_v3 = vadd.f32 %v4480_v5, %v4479_v17 }
 0x74e   :  { %v4476_v1 = vadd.f32 %v4475_v50, %v4474_v16  ;;  %v4382_v51 = vpop.f32.mrb[44].mxu0 }
 0x74f   :  { %v4511_v4 = vsel %vm2508_vm5, %v4469_v29, 0.0  ;;  %v4482_v48 = vrot.slane %v4481_v3, 4  ;;  %v5927_v41 = vpop.f32.mrb[45].mxu0  ;;  %v4488_v14 = vsel %vm2508_vm5, %v4382_v51, 0.0 }
 0x750   :  { %v4512_v44 = vadd.f32 %v4511_v4, %v4510_v23  ;;  %v4477_v42 = vrot.slane %v4476_v1, 1  ;;  %v4385_v20 = vpop.f32.mrb[46].mxu0 }
 0x751   :  { %v4483_v43 = vadd.f32 %v4482_v48, %v4481_v3  ;;  %v4489_v53 = vsel %vm4434_vm10, %v4385_v20, 0.0  ;;  %v5928_v59 = vpop.f32.mrb[47].mxu0 }
 0x752   :  { %v4478_v9 = vadd.f32 %v4477_v42, %v4476_v1  ;;  %v4490_v13 = vadd.f32 %v4489_v53, %v4488_v14 }
 0x753   :  { %v4484_v47 = vrot.slane %v4483_v43, 2 }
 0x754   :  { %v4513_v32 = vsel %vm2508_vm5, %v4478_v9, 0.0  ;;  %v4491_v57 = vrot.slane %v4490_v13, 4 }
 0x755   :  { %v4514_v25 = vadd.f32 %v4513_v32, %v4512_v44  ;;  %v4485_v62 = vadd.f32 %v4484_v47, %v4483_v43  ;;  %v4426_v15 = vpop.f32.mrb[44].mxu1 }
 0x756   :  { %v4492_v26 = vadd.f32 %v4491_v57, %v4490_v13  ;;  %v5935_v6 = vpop.f32.mrb[45].mxu1  ;;  %v4497_v37 = vsel %vm2508_vm5, %v4426_v15, 0.0 }
 0x757   :  { %v4486_v8 = vrot.slane %v4485_v62, 1  ;;  %v4429_v27 = vpop.f32.mrb[46].mxu1 }
 0x758   :  { %v4493_v54 = vrot.slane %v4492_v26, 2  ;;  %v4498_v28 = vsel %vm4434_vm10, %v4429_v27, 0.0  ;;  %v5936_v19 = vpop.f32.mrb[47].mxu1 }
 0x759   :  { %v4487_v22 = vadd.f32 %v4486_v8, %v4485_v62  ;;  %v4499_v40 = vadd.f32 %v4498_v28, %v4497_v37 }
 0x75a   :  { %v4494_v35 = vadd.f32 %v4493_v54, %v4492_v26 }
 0x75b   :  { %v4515_v7 = vsel %vm2508_vm5, %v4487_v22, 0.0  ;;  %v4500_v2 = vrot.slane %v4499_v40, 4 }
 0x75c   :  { %v4516_v58 = vadd.f32 %v4515_v7, %v4514_v25  ;;  %v4495_v31 = vrot.slane %v4494_v35, 1 }
 0x75d   :  { %v4501_v52 = vadd.f32 %v4500_v2, %v4499_v40 }
 0x75e   :  { %v4496_v11 = vadd.f32 %v4495_v31, %v4494_v35 }
 0x75f   :  { %v4502_v23 = vrot.slane %v4501_v52, 2 }
 0x760   :  { %v4517_v38 = vsel %vm2508_vm5, %v4496_v11, 0.0 }
 0x761   :  { %v4518_v16 = vadd.f32 %v4517_v38, %v4516_v58  ;;  %v4503_v55 = vadd.f32 %v4502_v23, %v4501_v52 }
 0x763   :  { %v4504_v36 = vrot.slane %v4503_v55, 1 }
 0x765   :  { %v4505_v50 = vadd.f32 %v4504_v36, %v4503_v55 }
 0x767   :  { %v4519_v17 = vsel %vm2508_vm5, %v4505_v50, 0.0 }
 0x768   :  { %v4520_v5 = vadd.f32 %v4519_v17, %v4518_v16 }
 0x76a   :  { %v4521_v56 = vmul.f32 0.0125, %v4520_v5 }
 0x76c   :  { %v9472_v29 = vsub.f32 %v9393_v33, %v4521_v56  ;;  %v9475_v3 = vsub.f32 %v9395_v12, %v4521_v56  ;;  %v9478_v1 = vsub.f32 %v9401_v24, %v4521_v56  ;;  %v9481_v4 = vsub.f32 %v9403_v61, %v4521_v56 }
 0x76d   :  { %v9484_v48 = vsub.f32 %v9409_v63, %v4521_v56  ;;  %v9487_v41 = vsub.f32 %v9411_v46, %v4521_v56  ;;  %v9490_v44 = vsub.f32 %v9417_v0, %v4521_v56  ;;  %v9493_v33 = vsub.f32 %v9419_v60, %v4521_v56 }
 0x76e   :  { %v9496_v12 = vsub.f32 %v9425_v10, %v4521_v56  ;;  %v9499_v24 = vsub.f32 %v9429_v18, %v4521_v56  ;;  %v9502_v61 = vsub.f32 %v9436_v30, %v4521_v56  ;;  %v9505_v63 = vsub.f32 %v9448_v49, %v4521_v56 }
 0x76f   :  { %v9507_v46 = vsub.f32 %v4382_v51, %v4521_v56  ;;  %v9509_v42 = vsub.f32 %v4385_v20, %v4521_v56  ;;  %v9511_v0 = vsub.f32 %v4426_v15, %v4521_v56  ;;  %v9513_v60 = vsub.f32 %v4429_v27, %v4521_v56 }
 0x770   :  { %v4538_v10 = vmul.f32 %v9472_v29, %v9472_v29  ;;  %v4539_v18 = vmul.f32 %v9475_v3, %v9475_v3  ;;  %v4540_v30 = vmul.f32 %v9478_v1, %v9478_v1  ;;  %v4541_v49 = vmul.f32 %v9481_v4, %v9481_v4 }
 0x771   :  { %v4542_v51 = vmul.f32 %v9484_v48, %v9484_v48  ;;  %v4543_v20 = vmul.f32 %v9487_v41, %v9487_v41  ;;  %v4544_v43 = vmul.f32 %v9490_v44, %v9490_v44  ;;  %v4545_v14 = vmul.f32 %v9493_v33, %v9493_v33 }
 0x772   :  { %v4546_v53 = vmul.f32 %v9496_v12, %v9496_v12  ;;  %v4547_v59 = vmul.f32 %v9499_v24, %v9499_v24  ;;  %v4548_v9 = vmul.f32 %v9502_v61, %v9502_v61  ;;  %v4549_v13 = vmul.f32 %v9505_v63, %v9505_v63 }
 0x773   :  { %v4550_v47 = vmul.f32 %v9507_v46, %v9507_v46  ;;  %v4551_v32 = vmul.f32 %v9509_v42, %v9509_v42  ;;  %v4552_v57 = vmul.f32 %v9511_v0, %v9511_v0  ;;  %v4553_v25 = vmul.f32 %v9513_v60, %v9513_v60 }
 0x774   :  { %v4554_v62 = vsel %vm2508_vm5, %v4538_v10, 0.0  ;;  %v4555_v15 = vsel %vm4434_vm10, %v4539_v18, 0.0  ;;  %v4563_v26 = vsel %vm2508_vm5, %v4540_v30, 0.0  ;;  %v4564_v6 = vsel %vm4434_vm10, %v4541_v49, 0.0 }
 0x775   :  { %v4556_v8 = vadd.f32 %v4555_v15, %v4554_v62  ;;  %v4565_v27 = vadd.f32 %v4564_v6, %v4563_v26  ;;  %v4572_v54 = vsel %vm2508_vm5, %v4542_v51, 0.0  ;;  %v4573_v37 = vsel %vm4434_vm10, %v4543_v20, 0.0 }
 0x776   :  { %v4574_v28 = vadd.f32 %v4573_v37, %v4572_v54  ;;  %v4581_v19 = vsel %vm2508_vm5, %v4544_v43, 0.0  ;;  %v4582_v22 = vsel %vm4434_vm10, %v4545_v14, 0.0  ;;  %v4590_v40 = vsel %vm2508_vm5, %v4546_v53, 0.0 }
 0x777   :  { %v4557_v35 = vrot.slane %v4556_v8, 4  ;;  %v4566_v7 = vrot.slane %v4565_v27, 4  ;;  %v4583_v2 = vadd.f32 %v4582_v22, %v4581_v19  ;;  %v4591_v58 = vsel %vm4434_vm10, %v4547_v59, 0.0 }
 0x778   :  { %v4575_v31 = vrot.slane %v4574_v28, 4  ;;  %v4592_v52 = vadd.f32 %v4591_v58, %v4590_v40  ;;  %v4599_v11 = vsel %vm2508_vm5, %v4548_v9, 0.0  ;;  %v4600_v23 = vsel %vm4434_vm10, %v4549_v13, 0.0 }
 0x779   :  { %v4558_v38 = vadd.f32 %v4557_v35, %v4556_v8  ;;  %v4567_v16 = vadd.f32 %v4566_v7, %v4565_v27  ;;  %v4584_v55 = vrot.slane %v4583_v2, 4  ;;  %v4601_v36 = vadd.f32 %v4600_v23, %v4599_v11 }
 0x77a   :  { %v4576_v50 = vadd.f32 %v4575_v31, %v4574_v28  ;;  %v4593_v17 = vrot.slane %v4592_v52, 4  ;;  %v4608_v5 = vsel %vm2508_vm5, %v4550_v47, 0.0  ;;  %v4609_v56 = vsel %vm4434_vm10, %v4551_v32, 0.0 }
 0x77b   :  { %v4559_v10 = vrot.slane %v4558_v38, 2  ;;  %v4568_v18 = vrot.slane %v4567_v16, 2  ;;  %v4585_v30 = vadd.f32 %v4584_v55, %v4583_v2  ;;  %v4602_v49 = vrot.slane %v4601_v36, 4 }
 0x77c   :  { %v4577_v51 = vrot.slane %v4576_v50, 2  ;;  %v4594_v20 = vadd.f32 %v4593_v17, %v4592_v52  ;;  %v4610_v43 = vadd.f32 %v4609_v56, %v4608_v5  ;;  %v4617_v14 = vsel %vm2508_vm5, %v4552_v57, 0.0 }
 0x77d   :  { %v4560_v53 = vadd.f32 %v4559_v10, %v4558_v38  ;;  %v4569_v59 = vadd.f32 %v4568_v18, %v4567_v16  ;;  %v4586_v9 = vrot.slane %v4585_v30, 2  ;;  %v4603_v13 = vadd.f32 %v4602_v49, %v4601_v36 }
 0x77e   :  { %v4578_v62 = vadd.f32 %v4577_v51, %v4576_v50  ;;  %v4595_v15 = vrot.slane %v4594_v20, 2  ;;  %v4611_v26 = vrot.slane %v4610_v43, 4  ;;  %v4618_v47 = vsel %vm4434_vm10, %v4553_v25, 0.0 }
 0x77f   :  { %v4561_v6 = vrot.slane %v4560_v53, 1  ;;  %v4570_v32 = vrot.slane %v4569_v59, 1  ;;  %v4587_v8 = vadd.f32 %v4586_v9, %v4585_v30  ;;  %v4604_v27 = vrot.slane %v4603_v13, 2 }
 0x780   :  { %v4579_v54 = vrot.slane %v4578_v62, 1  ;;  %v4596_v37 = vadd.f32 %v4595_v15, %v4594_v20  ;;  %v4612_v28 = vadd.f32 %v4611_v26, %v4610_v43  ;;  %v4619_v19 = vadd.f32 %v4618_v47, %v4617_v14 }
 0x781   :  { %v4562_v22 = vadd.f32 %v4561_v6, %v4560_v53  ;;  %v4571_v40 = vadd.f32 %v4570_v32, %v4569_v59  ;;  %v4588_v57 = vrot.slane %v4587_v8, 1  ;;  %v4605_v35 = vadd.f32 %v4604_v27, %v4603_v13  ;;  %v4642_v32 = vld [vmem:[%s9958_s6] sm:$0x1] }
 0x782   :  { %v4580_v7 = vadd.f32 %v4579_v54, %v4578_v62  ;;  %v4597_v2 = vrot.slane %v4596_v37, 1  ;;  %v4613_v58 = vrot.slane %v4612_v28, 2  ;;  %v4620_v31 = vrot.slane %v4619_v19, 4 }
 0x783   :  { %v4589_v52 = vadd.f32 %v4588_v57, %v4587_v8  ;;  %v4606_v11 = vrot.slane %v4605_v35, 1  ;;  %v4626_v25 = vsel %vm2508_vm5, %v4562_v22, 0.0  ;;  %v4627_v23 = vsel %vm2508_vm5, %v4571_v40, 0.0  ;;  %v9595_v57 = vld [vmem:[%s9957_s8 + $0x10] sm:$0xff]  }
 0x784   :  { %v4614_v38 = vadd.f32 %v4613_v58, %v4612_v28  ;;  %v4621_v16 = vadd.f32 %v4620_v31, %v4619_v19  ;;  %v4628_v55 = vadd.f32 %v4627_v23, %v4626_v25  ;;  %v4598_v36 = vadd.f32 %v4597_v2, %v4596_v37  ;;  %v9580_v37 = vld [vmem:[%s9959_s7] ss:$0 sm:$0xff]  ;;  %5942 = vmatpush3.bf16.msra.mxu0 %v9595_v57 }
 0x785   :  { %v4629_v50 = vsel %vm2508_vm5, %v4580_v7, 0.0  ;;  %v4607_v10 = vadd.f32 %v4606_v11, %v4605_v35  ;;  %v4631_v18 = vsel %vm2508_vm5, %v4589_v52, 0.0  ;;  %5943 = vmatprep.subr.bf16.mxu0 %v10350_v21  ;;  %5954 = vmatpush3.bf16.msra.mxu1 %v9595_v57 }
 0x786   :  { %v4615_v17 = vrot.slane %v4614_v38, 1  ;;  %v4622_v5 = vrot.slane %v4621_v16, 2  ;;  %v4630_v56 = vadd.f32 %v4629_v50, %v4628_v55  ;;  %v4633_v20 = vsel %vm2508_vm5, %v4598_v36, 0.0  ;;  %5955 = vmatprep.subr.bf16.mxu1 %v10350_v21  ;;  %v9630_v36 = vld [vmem:[%s9957_s8 + $0x18] sm:$0xff]   ;;  %s6676_s8 = smov 32  }
 0x787   :  { %v4635_v53 = vsel %vm2508_vm5, %v4607_v10, 0.0 }
 0x788   :  { %v4623_v30 = vadd.f32 %v4622_v5, %v4621_v16  ;;  %v4632_v49 = vadd.f32 %v4631_v18, %v4630_v56  ;;  %v4616_v51 = vadd.f32 %v4615_v17, %v4614_v38  ;;  %5944 = vmatpush3.bf16.msra.mxu0 %v9630_v36 }
 0x789   :  { %5956 = vmatpush3.bf16.msra.mxu1 %v9630_v36  ;;  %5961 = vmatprep.subr.bf16.mxu0 %v10350_v21 }
 0x78a   :  { %v4624_v43 = vrot.slane %v4623_v30, 1  ;;  %v4634_v14 = vadd.f32 %v4633_v20, %v4632_v49  ;;  %v4637_v13 = vsel %vm2508_vm5, %v4616_v51, 0.0  ;;  %5973 = vmatprep.subr.bf16.mxu1 %v10350_v21 }
 0x78c   :  { %v4625_v59 = vadd.f32 %v4624_v43, %v4623_v30  ;;  %v4636_v9 = vadd.f32 %v4635_v53, %v4634_v14 }
 0x78e   :  { %v4638_v62 = vadd.f32 %v4637_v13, %v4636_v9  ;;  %v4639_v15 = vsel %vm2508_vm5, %v4625_v59, 0.0 }
 0x790   :  { %v4640_v26 = vadd.f32 %v4639_v15, %v4638_v62 }
 0x792   :  { %v4641_v47 = vmul.f32 0.0125, %v4640_v26 }
 0x794   :  { %v4643_v6 = vadd.f32 1e-05, %v4641_v47 }
 0x796   :  { %6632 = vrsqrt.f32 %v4643_v6 }
 0x7a0   :  { %v6633_v8 = vpop.eup %6632 }
 0x7a1   :  { %v4645_v27 = vmul.f32 %v6633_v8, %v4642_v32 }
 0x7a3   :  { %v9575_v54 = vrot.slane %v4645_v27, %v10336_v34 }
 0x7a5   :  { %v9584_v28 = vmul.f32 %v9575_v54, %v9511_v0  ;;  %v4667_v19 = vmul.f32 %v9575_v54, %v9513_v60  ;;  %v4656_v22 = vmul.f32 %v9575_v54, %v9484_v48  ;;  %v4657_v40 = vmul.f32 %v9575_v54, %v9487_v41 }
 0x7a6   :  { %v4652_v35 = vmul.f32 %v9575_v54, %v9472_v29  ;;  %v4653_v0 = vmul.f32 %v9575_v54, %v9475_v3  ;;  %v4660_v60 = vmul.f32 %v9575_v54, %v9496_v12  ;;  %v4661_v48 = vmul.f32 %v9575_v54, %v9499_v24 }
 0x7a7   :  { %v9606_v7 = vadd.f32 %v9580_v37, %v4667_v19  ;;  %v4679_v41 = vadd.f32 %v9580_v37, %v4656_v22  ;;  %v4680_v2 = vadd.f32 %v9580_v37, %v4657_v40  ;;  %v4654_v58 = vmul.f32 %v9575_v54, %v9478_v1 }
 0x7a8   :  { %v4675_v29 = vadd.f32 %v9580_v37, %v4652_v35  ;;  %v4676_v3 = vadd.f32 %v9580_v37, %v4653_v0  ;;  %v4683_v12 = vadd.f32 %v9580_v37, %v4660_v60  ;;  %v4684_v24 = vadd.f32 %v9580_v37, %v4661_v48 }
 0x7a9   :  { %v9619_v31 = vmul.f32 0.2, %v9606_v7  ;;  %vm4695_vm15 = vcmp.gt.f32.partialorder %v4679_v41, 0.0  ;;  %vm4696_vm11 = vcmp.gt.f32.partialorder %v4680_v2, 0.0  ;;  %v4711_v1 = vmul.f32 0.2, %v4679_v41 }
 0x7aa   :  { %v4712_v52 = vmul.f32 0.2, %v4680_v2  ;;  %vm4691_vm4 = vcmp.gt.f32.partialorder %v4675_v29, 0.0  ;;  %vm4692_vm3 = vcmp.gt.f32.partialorder %v4676_v3, 0.0  ;;  %v4707_v11 = vmul.f32 0.2, %v4675_v29 }
 0x7ab   :  { %v4708_v25 = vmul.f32 0.2, %v4676_v3  ;;  %vm4699_vm12 = vcmp.gt.f32.partialorder %v4683_v12, 0.0  ;;  %vm4700_vm13 = vcmp.gt.f32.partialorder %v4684_v24, 0.0  ;;  %v9623_v23 = vsel %vm4695_vm15, %v4679_v41, %v4711_v1 }
 0x7ac   :  { %v9625_v38 = vsel %vm4696_vm11, %v4680_v2, %v4712_v52  ;;  %v4715_v16 = vmul.f32 0.2, %v4683_v12  ;;  %v4716_v55 = vmul.f32 0.2, %v4684_v24  ;;  %v9634_v17 = vsel %vm4691_vm4, %v4675_v29, %v4707_v11 }
 0x7ad   :  { %v6530_v50 = vpack.i.bf16 %v9625_v38, %v9623_v23  ;;  %v9636_v5 = vsel %vm4692_vm3, %v4676_v3, %v4708_v25  ;;  %v4655_v56 = vmul.f32 %v9575_v54, %v9481_v4  ;;  %v4816_v30 = vrot.slane %v9634_v17, 1 }
 0x7ae   :  { %v4817_v10 = vrot.slane %v9636_v5, 1  ;;  %v6525_v18 = vpack.i.bf16 %v9636_v5, %v9634_v17  ;;  %v4731_v49 = vsel %vm4699_vm12, %v4683_v12, %v4715_v16  ;;  %v4732_v51 = vsel %vm4700_vm13, %v4684_v24, %v4716_v55 }
 0x7af   :  { %6531 = vrot.lane.b32.xlu1 %v6530_v50, %s6676_s8  ;;  %v4677_v20 = vadd.f32 %v9580_v37, %v4654_v58  ;;  %v4678_v4 = vadd.f32 %v9580_v37, %v4655_v56  ;;  %v4662_v43 = vmul.f32 %v9575_v54, %v9502_v61  ;;  %vm4706_vm14 = vcmp.gt.f32.partialorder %v9606_v7, 0.0 }
 0x7b0   :  { %6526 = vrot.lane.b32.xlu0 %v6525_v18, %s6674_s3  ;;  %v9654_v14 = vpack.i.bf16 %v4732_v51, %v4731_v49  ;;  %v4663_v53 = vmul.f32 %v9575_v54, %v9505_v63  ;;  %v4658_v59 = vmul.f32 %v9575_v54, %v9490_v44  ;;  %v4659_v9 = vmul.f32 %v9575_v54, %v9493_v33 }
 0x7b1   :  { %vm4693_vm2 = vcmp.gt.f32.partialorder %v4677_v20, 0.0  ;;  %vm4694_vm6 = vcmp.gt.f32.partialorder %v4678_v4, 0.0  ;;  %v4709_v13 = vmul.f32 0.2, %v4677_v20  ;;  %v4710_v62 = vmul.f32 0.2, %v4678_v4 }
 0x7b2   :  { %v4685_v61 = vadd.f32 %v9580_v37, %v4662_v43  ;;  %v4686_v15 = vadd.f32 %v9580_v37, %v4663_v53  ;;  %v4681_v63 = vadd.f32 %v9580_v37, %v4658_v59  ;;  %v4682_v26 = vadd.f32 %v9580_v37, %v4659_v9 }
 0x7b3   :  { %6541 = vrot.lane.b32.xlu1 %v9654_v14, %s6677_s2  ;;  %v4725_v44 = vsel %vm4693_vm2, %v4677_v20, %v4709_v13  ;;  %v4726_v33 = vsel %vm4694_vm6, %v4678_v4, %v4710_v62  ;;  %v4664_v47 = vmul.f32 %v9575_v54, %v9507_v46  ;;  %v4665_v6 = vmul.f32 %v9575_v54, %v9509_v42 }
 0x7b4   :  { %v4820_v32 = vrot.slane %v4726_v33, 1  ;;  %v6535_v8 = vpack.i.bf16 %v4726_v33, %v4725_v44  ;;  %v4819_v27 = vrot.slane %v4725_v44, 1  ;;  %vm4701_vm7 = vcmp.gt.f32.partialorder %v4685_v61, 0.0 }
 0x7b5   :  { %vm4702_vm10 = vcmp.gt.f32.partialorder %v4686_v15, 0.0  ;;  %v4717_v19 = vmul.f32 0.2, %v4685_v61  ;;  %v4718_v22 = vmul.f32 0.2, %v4686_v15  ;;  %vm4697_vm15 = vcmp.gt.f32.partialorder %v4681_v63, 0.0 }
 0x7b6   :  { %6536 = vrot.lane.b32.xlu0 %v6535_v8, %s6674_s3  ;;  %vm4698_vm11 = vcmp.gt.f32.partialorder %v4682_v26, 0.0  ;;  %v4713_v40 = vmul.f32 0.2, %v4681_v63  ;;  %v4714_v35 = vmul.f32 0.2, %v4682_v26  ;;  %v4687_v0 = vadd.f32 %v9580_v37, %v4664_v47 }
 0x7b7   :  { %v4733_v60 = vsel %vm4701_vm7, %v4685_v61, %v4717_v19  ;;  %v4734_v46 = vsel %vm4702_vm10, %v4686_v15, %v4718_v22  ;;  %v4688_v48 = vadd.f32 %v9580_v37, %v4665_v6  ;;  %v4818_v3 = vsel %vm99_vm1, %v4816_v30, %v4817_v10 }
 0x7b8   :  { %v6550_v42 = vpack.i.bf16 %v4734_v46, %v4733_v60  ;;  %v9677_v54 = vsel %vm4697_vm15, %v4681_v63, %v4713_v40  ;;  %v9679_v41 = vsel %vm4698_vm11, %v4682_v26, %v4714_v35  ;;  %vm4703_vm4 = vcmp.gt.f32.partialorder %v4687_v0, 0.0 }
 0x7b9   :  { %v6545_v2 = vpack.i.bf16 %v9679_v41, %v9677_v54  ;;  %vm4704_vm3 = vcmp.gt.f32.partialorder %v4688_v48, 0.0  ;;  %v4719_v58 = vmul.f32 0.2, %v4687_v0  ;;  %v4720_v29 = vmul.f32 0.2, %v4688_v48 }
 0x7ba   :  { %6551 = vrot.lane.b32.xlu1 %v6550_v42, %s6677_s2  ;;  %v4824_v12 = vsel %vm61_vm0, %v4817_v10, 0.0  ;;  %v4689_v24 = vadd.f32 %v9580_v37, %v9584_v28  ;;  %v4738_v25 = vsel %vm4706_vm14, %v9606_v7, %v9619_v31  ;;  %v4821_v5 = vsel %vm99_vm1, %v4819_v27, %v4820_v32 }
 0x7bb   :  { %6546 = vrot.lane.b32.xlu0 %v6545_v2, %s6676_s8  ;;  %v4735_v1 = vsel %vm4703_vm4, %v4687_v0, %v4719_v58  ;;  %v4736_v52 = vsel %vm4704_vm3, %v4688_v48, %v4720_v29  ;;  %v6575_v11 = vpack.i.bf16 %v4824_v12, %v4818_v3  ;;  %v4825_v56 = vsel %vm61_vm0, %v4820_v32, 0.0 }
 0x7bc   :  { %v4744_v16 = vrot.slane %v4736_v52, 7  ;;  %v6560_v55 = vpack.i.bf16 %v4736_v52, %v4735_v1  ;;  %v4743_v50 = vrot.slane %v4735_v1, 7  ;;  %vm4705_vm12 = vcmp.gt.f32.partialorder %v4689_v24, 0.0 }
 0x7bd   :  { %v4721_v17 = vmul.f32 0.2, %v4689_v24  ;;  %v4747_v37 = vrot.slane %v4738_v25, 7  ;;  %v6580_v28 = vpack.i.bf16 %v4825_v56, %v4821_v5  ;;  %vm4811_vm13 = vcmask 392192  }
 0x7be   :  { %6561 = vrot.lane.b32.xlu1 %v6560_v55, %s6676_s8  ;;  %v4745_v10 = vsel %vm61_vm0, %v4743_v50, %v4744_v16  ;;  %vm4912_vm14 = vcmask 523264  }
 0x7bf   :  { %6556 = vrot.lane.b32.xlu0 %v9654_v14, %s6674_s3  ;;  %v4737_v18 = vsel %vm4705_vm12, %v4689_v24, %v4721_v17  ;;  %v4753_v14 = vsel %vm61_vm0, 0.0, %v4743_v50 }
 0x7c0   :  { %v6570_v7 = vpack.i.bf16 %v4738_v25, %v4737_v18  ;;  %v4746_v31 = vrot.slane %v4737_v18, 7 }
 0x7c2   :  { %6576 = vrot.lane.b32.xlu1 %v6575_v11, %s6677_s2  ;;  %v4748_v30 = vsel %vm61_vm0, %v4746_v31, %v4747_v37  ;;  %v4754_v40 = vsel %vm61_vm0, 0.0, %v4746_v31 }
 0x7c3   :  { %6566 = vrot.lane.b32.xlu0 %v6550_v42, %s6674_s3 }
 0x7c6   :  { %6581 = vrot.lane.b32.xlu1 %v6580_v28, %s6677_s2 }
 0x7c7   :  { %6571 = vrot.lane.b32.xlu0 %v6570_v7, %s6676_s8 }
 0x821   :  { %v6532_v49 = vpop.permute.xlu1 %6531 }
 0x822   :  { %v6527_v51 = vpop.permute.xlu0 %6526  ;;  %v6534_v20 = vunpack.i.h.bf16 %v6532_v49  ;;  %v6533_v4 = vunpack.i.l.bf16 %v6532_v49 }
 0x823   :  { %v6529_v43 = vunpack.i.h.bf16 %v6527_v51  ;;  %v6528_v53 = vunpack.i.l.bf16 %v6527_v51 }
 0x825   :  { %v4804_v59 = vsel %vm2508_vm5, %v4745_v10, %v6529_v43  ;;  %v4803_v9 = vsel %vm2508_vm5, %v4753_v14, %v6528_v53  ;;  %v6542_v13 = vpop.permute.xlu1 %6541  ;;  %v6623_v14 = vld [vmem:[%s9960_s11 + $0x8] sm:$0xff]  }
 0x826   :  { %v6544_v62 = vunpack.i.h.bf16 %v6542_v13  ;;  %v6543_v61 = vunpack.i.l.bf16 %v6542_v13  ;;  %v4807_v15 = vsel %vm4080_vm9, %v4803_v9, %v6533_v4  ;;  %v4808_v63 = vsel %vm4080_vm9, %v4804_v59, %v6534_v20  ;;  %v6625_v59 = vld [vmem:[%s9960_s11 + $0x18] sm:$0xff]   ;;  %v6626_v13 = vld [vmem:[%s9960_s11 + $0x20] sm:$0xff]  }
 0x828   :  { %v4812_v26 = vsel %vm4811_vm13, %v4807_v15, %v6543_v61  ;;  %v4813_v44 = vsel %vm4811_vm13, %v4808_v63, %v6544_v62  ;;  %v6537_v33 = vpop.permute.xlu0 %6536 }
 0x829   :  { %v4884_v47 = vpack.c.bf16 %v4813_v44, %v4812_v26  ;;  %v6539_v6 = vunpack.i.h.bf16 %v6537_v33  ;;  %v6538_v32 = vunpack.i.l.bf16 %v6537_v33 }
 0x82b   :  { %5946 = vmatmul.mubr.msk.bf16.vlgmr.msra.gmra.mrb[48].mxu0 %vm4912_vm14, %v4884_v47  ;;  %v4806_v60 = vsel %vm2508_vm5, %v4748_v30, %v6539_v6  ;;  %v4805_v46 = vsel %vm2508_vm5, %v4754_v40, %v6538_v32 }
 0x82c   :  { %v6552_v8 = vpop.permute.xlu1 %6551  ;;  %5962 = vmatpush3.bf16.msra.mxu0 %v9441_v39  ;;  %5969 = vmatprep.mubr.msk.bf16.mxu0 %vm6673_vm8, %v10350_v21 }
 0x82d   :  { %v6554_v27 = vunpack.i.h.bf16 %v6552_v8  ;;  %v6553_v19 = vunpack.i.l.bf16 %v6552_v8  ;;  %v6547_v22 = vpop.permute.xlu0 %6546  ;;  %5963 = vmatprep.subr.bf16.mxu0 %v10350_v21 }
 0x82e   :  { %v6549_v35 = vunpack.i.h.bf16 %v6547_v22  ;;  %v6548_v0 = vunpack.i.l.bf16 %v6547_v22 }
 0x830   :  { %v4809_v48 = vsel %vm4080_vm9, %v4805_v46, %v6548_v0  ;;  %v4810_v42 = vsel %vm4080_vm9, %v4806_v60, %v6549_v35  ;;  %v6562_v2 = vpop.permute.xlu1 %6561  ;;  %5964 = vmatpush3.bf16.msra.mxu0 %v9446_v45 }
 0x831   :  { %v4814_v58 = vsel %vm4811_vm13, %v4809_v48, %v6553_v19  ;;  %v4815_v29 = vsel %vm4811_vm13, %v4810_v42, %v6554_v27  ;;  %v6564_v3 = vunpack.i.h.bf16 %v6562_v2  ;;  %v6557_v12 = vpop.permute.xlu0 %6556  ;;  %5965 = vmatprep.subr.bf16.mxu0 %v10350_v21  ;;  %v6563_v1 = vunpack.i.l.bf16 %v6562_v2 }
 0x832   :  { %v4885_v24 = vpack.c.bf16 %v4815_v29, %v4814_v58  ;;  %v6559_v52 = vunpack.i.h.bf16 %v6557_v12  ;;  %v6558_v11 = vunpack.i.l.bf16 %v6557_v12 }
 0x834   :  { %v4865_v25 = vsel %vm2508_vm5, %v9625_v38, %v6559_v52  ;;  %v4864_v16 = vsel %vm2508_vm5, %v9623_v23, %v6558_v11  ;;  %5958 = vmatmul.mubr.msk.bf16.vlgmr.msra.gmra.mrb[48].mxu1 %vm4912_vm14, %v4885_v24  ;;  %v6577_v55 = vpop.permute.xlu1 %6576  ;;  %5966 = vmatpush3.bf16.msra.mxu0 %v9595_v57 }
 0x835   :  { %5974 = vmatpush3.bf16.msra.mxu1 %v9441_v39  ;;  %v6567_v50 = vpop.permute.xlu0 %6566  ;;  %v6579_v17 = vunpack.i.h.bf16 %v6577_v55  ;;  %v6578_v5 = vunpack.i.l.bf16 %v6577_v55  ;;  %5967 = vmatprep.subr.bf16.mxu0 %v10350_v21  ;;  %v4868_v56 = vsel %vm4080_vm9, %v4864_v16, %v6563_v1  ;;  %v4869_v37 = vsel %vm4080_vm9, %v4865_v25, %v6564_v3 }
 0x836   :  { %5975 = vmatprep.subr.bf16.mxu1 %v10350_v21  ;;  %5981 = vmatprep.mubr.msk.bf16.mxu1 %vm6673_vm8, %v10350_v21  ;;  %v6569_v23 = vunpack.i.h.bf16 %v6567_v50  ;;  %v6568_v38 = vunpack.i.l.bf16 %v6567_v50 }
 0x837   :  { %v4873_v28 = vsel %vm4811_vm13, %v4869_v37, %v6579_v17  ;;  %v4872_v39 = vsel %vm4811_vm13, %v4868_v56, %v6578_v5 }
 0x838   :  { %v6582_v10 = vpop.permute.xlu1 %6581  ;;  %5968 = vmatpush3.bf16.msra.mxu0 %v9630_v36  ;;  %v4886_v18 = vpack.c.bf16 %v4873_v28, %v4872_v39  ;;  %v4867_v49 = vsel %vm2508_vm5, %v9679_v41, %v6569_v23  ;;  %v4866_v51 = vsel %vm2508_vm5, %v9677_v54, %v6568_v38 }
 0x839   :  { %5976 = vmatpush3.bf16.msra.mxu1 %v9446_v45  ;;  %v6572_v7 = vpop.permute.xlu0 %6571  ;;  %5985 = vmatprep.subr.bf16.mxu0 %v10350_v21  ;;  %v6584_v20 = vunpack.i.h.bf16 %v6582_v10  ;;  %v6583_v4 = vunpack.i.l.bf16 %v6582_v10 }
 0x83a   :  { %v6574_v31 = vunpack.i.h.bf16 %v6572_v7  ;;  %v6573_v30 = vunpack.i.l.bf16 %v6572_v7  ;;  %5977 = vmatprep.subr.bf16.mxu1 %v10350_v21 }
 0x83b   :  { %5970 = vmatmul.mubr.msk.bf16.vlgmr.msra.gmra.mrb[52].mxu0 %vm4912_vm14, %v4886_v18 }
 0x83c   :  { %v4870_v43 = vsel %vm4080_vm9, %v4866_v51, %v6573_v30  ;;  %v4871_v45 = vsel %vm4080_vm9, %v4867_v49, %v6574_v31  ;;  %6001 = vmatprep.mubr.msk.bf16.mxu0 %vm6673_vm8, %v10350_v21 }
 0x83d   :  { %5978 = vmatpush3.bf16.msra.mxu1 %v9595_v57  ;;  %v4875_v41 = vsel %vm4811_vm13, %v4871_v45, %v6584_v20  ;;  %v4874_v53 = vsel %vm4811_vm13, %v4870_v43, %v6583_v4  ;;  %v6622_v57 = vld [vmem:[%s9960_s11] sm:$0xff]  }
 0x83e   :  { %5979 = vmatprep.subr.bf16.mxu1 %v10350_v21  ;;  %v4887_v54 = vpack.c.bf16 %v4875_v41, %v4874_v53  ;;  %5986 = vmatpush3.bf16.msra.mxu0 %v6622_v57 }
 0x83f   :  { %5987 = vmatprep.subr.bf16.mxu0 %v10350_v21 }
 0x841   :  { %5980 = vmatpush3.bf16.msra.mxu1 %v9630_v36  ;;  %v6624_v36 = vld [vmem:[%s9960_s11 + $0x10] sm:$0xff]  }
 0x842   :  { %6005 = vmatprep.subr.bf16.mxu1 %v10350_v21  ;;  %5988 = vmatpush3.bf16.msra.mxu0 %v6623_v14 }
 0x843   :  { %5989 = vmatprep.subr.bf16.mxu0 %v10350_v21 }
 0x844   :  { %5982 = vmatmul.mubr.msk.bf16.vlgmr.msra.gmra.mrb[52].mxu1 %vm4912_vm14, %v4887_v54 }
 0x845   :  { %6021 = vmatprep.mubr.msk.bf16.mxu1 %vm6673_vm8, %v10350_v21  ;;  %6006 = vmatpush3.bf16.msra.mxu1 %v6622_v57  ;;  %vm5090_vm8 = vcmask 254976  }
 0x846   :  { %6007 = vmatprep.subr.bf16.mxu1 %v10350_v21  ;;  %5990 = vmatpush3.bf16.msra.mxu0 %v6624_v36 }
 0x847   :  { %5991 = vmatprep.subr.bf16.mxu0 %v10350_v21 }
 0x849   :  { %6008 = vmatpush3.bf16.msra.mxu1 %v6623_v14 }
 0x84a   :  { %6009 = vmatprep.subr.bf16.mxu1 %v10350_v21  ;;  %5992 = vmatpush3.bf16.msra.mxu0 %v6625_v59 }
 0x84b   :  { %5993 = vmatprep.subr.bf16.mxu0 %v10350_v21 }
 0x84d   :  { %6010 = vmatpush3.bf16.msra.mxu1 %v6624_v36 }
 0x84e   :  { %6011 = vmatprep.subr.bf16.mxu1 %v10350_v21  ;;  %5994 = vmatpush3.bf16.msra.mxu0 %v6626_v13 }
 0x84f   :  { %5995 = vmatprep.subr.bf16.mxu0 %v10350_v21 }
 0x851   :  { %6012 = vmatpush3.bf16.msra.mxu1 %v6625_v59 }
 0x852   :  { %6013 = vmatprep.subr.bf16.mxu1 %v10350_v21 }
 0x855   :  { %6014 = vmatpush3.bf16.msra.mxu1 %v6626_v13 }
 0x856   :  { %6015 = vmatprep.subr.bf16.mxu1 %v10350_v21 }
 0x8fe   :  { %v9780_v9 = vpop.f32.mrb[48].mxu0 }
 0x8ff   :  { %v5947_v62 = vpop.f32.mrb[49].mxu0  ;;  %v5089_v15 = vsel %vm4080_vm9, %v9780_v9, 0.0 }
 0x900   :  { %v9787_v61 = vpop.f32.mrb[50].mxu0 }
 0x901   :  { %v5091_v63 = vsel %vm5090_vm8, %v9787_v61, 0.0  ;;  %v5948_v26 = vpop.f32.mrb[51].mxu0 }
 0x902   :  { %v5092_v44 = vadd.f32 %v5091_v63, %v5089_v15 }
 0x904   :  { %v5093_v33 = vrot.slane %v5092_v44, 4 }
 0x906   :  { %v5094_v47 = vadd.f32 %v5093_v33, %v5092_v44 }
 0x907   :  { %v4994_v6 = vpop.f32.mrb[48].mxu1 }
 0x908   :  { %v5959_v32 = vpop.f32.mrb[49].mxu1  ;;  %v5095_v8 = vrot.slane %v5094_v47, 2  ;;  %v5099_v19 = vsel %vm4080_vm9, %v4994_v6, 0.0 }
 0x909   :  { %v4997_v27 = vpop.f32.mrb[50].mxu1 }
 0x90a   :  { %v5100_v22 = vsel %vm5090_vm8, %v4997_v27, 0.0  ;;  %v5960_v40 = vpop.f32.mrb[51].mxu1  ;;  %v5096_v0 = vadd.f32 %v5095_v8, %v5094_v47 }
 0x90b   :  { %v5101_v35 = vadd.f32 %v5100_v22, %v5099_v19 }
 0x90c   :  { %v5097_v58 = vrot.slane %v5096_v0, 1 }
 0x90d   :  { %v5102_v60 = vrot.slane %v5101_v35, 4 }
 0x90e   :  { %v5038_v46 = vpop.f32.mrb[52].mxu0  ;;  %v5098_v25 = vadd.f32 %v5097_v58, %v5096_v0 }
 0x90f   :  { %v5103_v48 = vadd.f32 %v5102_v60, %v5101_v35  ;;  %v5971_v42 = vpop.f32.mrb[53].mxu0  ;;  %v5108_v3 = vsel %vm4080_vm9, %v5038_v46, 0.0 }
 0x910   :  { %v5041_v2 = vpop.f32.mrb[54].mxu0  ;;  %v5126_v37 = vsel %vm4080_vm9, %v5098_v25, 0.0 }
 0x911   :  { %v5104_v29 = vrot.slane %v5103_v48, 2  ;;  %v5109_v12 = vsel %vm5090_vm8, %v5041_v2, 0.0  ;;  %v5972_v24 = vpop.f32.mrb[55].mxu0 }
 0x912   :  { %v5110_v1 = vadd.f32 %v5109_v12, %v5108_v3 }
 0x913   :  { %v5105_v52 = vadd.f32 %v5104_v29, %v5103_v48 }
 0x914   :  { %v5111_v11 = vrot.slane %v5110_v1, 4 }
 0x915   :  { %v5106_v16 = vrot.slane %v5105_v52, 1 }
 0x916   :  { %v5112_v55 = vadd.f32 %v5111_v11, %v5110_v1 }
 0x917   :  { %v5107_v50 = vadd.f32 %v5106_v16, %v5105_v52  ;;  %v5082_v17 = vpop.f32.mrb[52].mxu1 }
 0x918   :  { %v5113_v5 = vrot.slane %v5112_v55, 2  ;;  %v5983_v56 = vpop.f32.mrb[53].mxu1  ;;  %v5117_v10 = vsel %vm4080_vm9, %v5082_v17, 0.0 }
 0x919   :  { %v5127_v23 = vsel %vm4080_vm9, %v5107_v50, 0.0  ;;  %v5085_v38 = vpop.f32.mrb[54].mxu1 }
 0x91a   :  { %v5128_v28 = vadd.f32 %v5127_v23, %v5126_v37  ;;  %v5114_v39 = vadd.f32 %v5113_v5, %v5112_v55  ;;  %v5118_v18 = vsel %vm5090_vm8, %v5085_v38, 0.0  ;;  %v5984_v7 = vpop.f32.mrb[55].mxu1 }
 0x91b   :  { %v5119_v31 = vadd.f32 %v5118_v18, %v5117_v10 }
 0x91c   :  { %v5115_v30 = vrot.slane %v5114_v39, 1 }
 0x91d   :  { %v5120_v49 = vrot.slane %v5119_v31, 4 }
 0x91e   :  { %v5116_v51 = vadd.f32 %v5115_v30, %v5114_v39 }
 0x91f   :  { %v5121_v20 = vadd.f32 %v5120_v49, %v5119_v31 }
 0x920   :  { %v5129_v4 = vsel %vm4080_vm9, %v5116_v51, 0.0 }
 0x921   :  { %v5130_v43 = vadd.f32 %v5129_v4, %v5128_v28  ;;  %v5122_v45 = vrot.slane %v5121_v20, 2 }
 0x923   :  { %v5123_v41 = vadd.f32 %v5122_v45, %v5121_v20 }
 0x925   :  { %v5124_v53 = vrot.slane %v5123_v41, 1 }
 0x927   :  { %v5125_v54 = vadd.f32 %v5124_v53, %v5123_v41 }
 0x929   :  { %v5131_v57 = vsel %vm4080_vm9, %v5125_v54, 0.0 }
 0x92a   :  { %v5132_v14 = vadd.f32 %v5131_v57, %v5130_v43 }
 0x92c   :  { %v5133_v36 = vmul.f32 0.025, %v5132_v14 }
 0x92e   :  { %v9806_v59 = vsub.f32 %v9780_v9, %v5133_v36  ;;  %v9809_v13 = vsub.f32 %v9787_v61, %v5133_v36  ;;  %v9811_v62 = vsub.f32 %v4994_v6, %v5133_v36  ;;  %v9813_v15 = vsub.f32 %v4997_v27, %v5133_v36 }
 0x92f   :  { %v9815_v63 = vsub.f32 %v5038_v46, %v5133_v36  ;;  %v9817_v26 = vsub.f32 %v5041_v2, %v5133_v36  ;;  %v9819_v44 = vsub.f32 %v5082_v17, %v5133_v36  ;;  %v9821_v33 = vsub.f32 %v5085_v38, %v5133_v36  ;;  %v5194_v36 = vld [vmem:[%s9961_s9] sm:$0x1] }
 0x930   :  { %v5142_v47 = vmul.f32 %v9806_v59, %v9806_v59  ;;  %v5143_v9 = vmul.f32 %v9809_v13, %v9809_v13  ;;  %v5144_v61 = vmul.f32 %v9811_v62, %v9811_v62  ;;  %v5145_v6 = vmul.f32 %v9813_v15, %v9813_v15 }
 0x931   :  { %v5146_v32 = vmul.f32 %v9815_v63, %v9815_v63  ;;  %v5147_v8 = vmul.f32 %v9817_v26, %v9817_v26  ;;  %v5148_v27 = vmul.f32 %v9819_v44, %v9819_v44  ;;  %v5149_v19 = vmul.f32 %v9821_v33, %v9821_v33 }
 0x932   :  { %v5150_v22 = vsel %vm4080_vm9, %v5142_v47, 0.0  ;;  %v5151_v40 = vsel %vm5090_vm8, %v5143_v9, 0.0  ;;  %v5159_v35 = vsel %vm4080_vm9, %v5144_v61, 0.0  ;;  %v5160_v0 = vsel %vm5090_vm8, %v5145_v6, 0.0  ;;  %v5673_v6 = vld [vmem:[%s9962_s10] ss:$0 sm:$0xff] }
 0x933   :  { %v5152_v60 = vadd.f32 %v5151_v40, %v5150_v22  ;;  %v5161_v46 = vadd.f32 %v5160_v0, %v5159_v35  ;;  %v5168_v48 = vsel %vm4080_vm9, %v5146_v32, 0.0  ;;  %v5169_v42 = vsel %vm5090_vm8, %v5147_v8, 0.0 }
 0x934   :  { %v5170_v2 = vadd.f32 %v5169_v42, %v5168_v48  ;;  %v5177_v58 = vsel %vm4080_vm9, %v5148_v27, 0.0  ;;  %v5178_v29 = vsel %vm5090_vm8, %v5149_v19, 0.0  ;;  %vm5592_vm8 = vcmask 1041408  }
 0x935   :  { %v5153_v3 = vrot.slane %v5152_v60, 4  ;;  %v5162_v12 = vrot.slane %v5161_v46, 4  ;;  %v5179_v24 = vadd.f32 %v5178_v29, %v5177_v58 }
 0x936   :  { %v5171_v1 = vrot.slane %v5170_v2, 4 }
 0x937   :  { %v5154_v52 = vadd.f32 %v5153_v3, %v5152_v60  ;;  %v5163_v11 = vadd.f32 %v5162_v12, %v5161_v46  ;;  %v5180_v25 = vrot.slane %v5179_v24, 4  ;;  %v6627_v60 = vld [vmem:[%s9960_s11 + $0x28] sm:$0xff]   ;;  %v6628_v3 = vld [vmem:[%s9960_s11 + $0x30] sm:$0xff]  }
 0x938   :  { %v5172_v16 = vadd.f32 %v5171_v1, %v5170_v2  ;;  %5996 = vmatpush3.bf16.msra.mxu0 %v6627_v60  ;;  %6016 = vmatpush3.bf16.msra.mxu1 %v6627_v60 }
 0x939   :  { %v5155_v55 = vrot.slane %v5154_v52, 2  ;;  %v5164_v50 = vrot.slane %v5163_v11, 2  ;;  %v5181_v17 = vadd.f32 %v5180_v25, %v5179_v24  ;;  %5997 = vmatprep.subr.bf16.mxu0 %v10350_v21  ;;  %6017 = vmatprep.subr.bf16.mxu1 %v10350_v21 }
 0x93a   :  { %v5173_v5 = vrot.slane %v5172_v16, 2 }
 0x93b   :  { %v5156_v56 = vadd.f32 %v5155_v55, %v5154_v52  ;;  %v5165_v37 = vadd.f32 %v5164_v50, %v5163_v11  ;;  %v5182_v23 = vrot.slane %v5181_v17, 2 }
 0x93c   :  { %v5174_v38 = vadd.f32 %v5173_v5, %v5172_v16  ;;  %5998 = vmatpush3.bf16.msra.mxu0 %v6628_v3  ;;  %6018 = vmatpush3.bf16.msra.mxu1 %v6628_v3 }
 0x93d   :  { %v5157_v28 = vrot.slane %v5156_v56, 1  ;;  %v5166_v39 = vrot.slane %v5165_v37, 1  ;;  %v5183_v10 = vadd.f32 %v5182_v23, %v5181_v17  ;;  %5999 = vmatprep.subr.bf16.mxu0 %v10350_v21  ;;  %6019 = vmatprep.subr.bf16.mxu1 %v10350_v21 }
 0x93e   :  { %v5175_v18 = vrot.slane %v5174_v38, 1 }
 0x93f   :  { %v5158_v7 = vadd.f32 %v5157_v28, %v5156_v56  ;;  %v5167_v31 = vadd.f32 %v5166_v39, %v5165_v37  ;;  %v5184_v30 = vrot.slane %v5183_v10, 1  ;;  %v6629_v28 = vld [vmem:[%s9960_s11 + $0x38] sm:$0xff]   ;;  %s6678_s11 = smov 64  }
 0x940   :  { %v5176_v49 = vadd.f32 %v5175_v18, %v5174_v38  ;;  %6000 = vmatpush3.bf16.msra.mxu0 %v6629_v28  ;;  %6020 = vmatpush3.bf16.msra.mxu1 %v6629_v28 }
 0x941   :  { %v5185_v51 = vadd.f32 %v5184_v30, %v5183_v10  ;;  %v5186_v20 = vsel %vm4080_vm9, %v5158_v7, 0.0  ;;  %v5187_v4 = vsel %vm4080_vm9, %v5167_v31, 0.0 }
 0x942   :  { %v5188_v43 = vadd.f32 %v5187_v4, %v5186_v20  ;;  %v5189_v45 = vsel %vm4080_vm9, %v5176_v49, 0.0 }
 0x943   :  { %v5191_v53 = vsel %vm4080_vm9, %v5185_v51, 0.0 }
 0x944   :  { %v5190_v41 = vadd.f32 %v5189_v45, %v5188_v43 }
 0x946   :  { %v5192_v54 = vadd.f32 %v5191_v53, %v5190_v41 }
 0x948   :  { %v5193_v57 = vmul.f32 0.025, %v5192_v54 }
 0x94a   :  { %v5195_v14 = vadd.f32 1e-05, %v5193_v57 }
 0x94c   :  { %6634 = vrsqrt.f32 %v5195_v14 }
 0x956   :  { %v6635_v47 = vpop.eup %6634 }
 0x957   :  { %v5197_v9 = vmul.f32 %v6635_v47, %v5194_v36 }
 0x959   :  { %v5202_v61 = vrot.slane %v5197_v9, %v10336_v34 }
 0x95b   :  { %v5210_v32 = vmul.f32 %v5202_v61, %v9819_v44  ;;  %v5211_v8 = vmul.f32 %v5202_v61, %v9821_v33  ;;  %v5206_v27 = vmul.f32 %v5202_v61, %v9811_v62  ;;  %v5207_v19 = vmul.f32 %v5202_v61, %v9813_v15 }
 0x95c   :  { %v5204_v22 = vmul.f32 %v5202_v61, %v9806_v59  ;;  %v5205_v40 = vmul.f32 %v5202_v61, %v9809_v13  ;;  %v5208_v35 = vmul.f32 %v5202_v61, %v9815_v63  ;;  %v5209_v0 = vmul.f32 %v5202_v61, %v9817_v26 }
 0x95d   :  { %v5226_v46 = vadd.f32 %v5673_v6, %v5211_v8  ;;  %v5221_v44 = vadd.f32 %v5673_v6, %v5206_v27  ;;  %v5222_v48 = vadd.f32 %v5673_v6, %v5207_v19  ;;  %v5225_v33 = vadd.f32 %v5673_v6, %v5210_v32 }
 0x95e   :  { %v5219_v42 = vadd.f32 %v5673_v6, %v5204_v22  ;;  %v5220_v62 = vadd.f32 %v5673_v6, %v5205_v40  ;;  %v5223_v2 = vadd.f32 %v5673_v6, %v5208_v35  ;;  %v5224_v15 = vadd.f32 %v5673_v6, %v5209_v0 }
 0x95f   :  { %vm5234_vm5 = vcmp.gt.f32.partialorder %v5226_v46, 0.0  ;;  %v5242_v59 = vmul.f32 0.2, %v5226_v46  ;;  %vm5229_vm2 = vcmp.gt.f32.partialorder %v5221_v44, 0.0  ;;  %vm5230_vm6 = vcmp.gt.f32.partialorder %v5222_v48, 0.0 }
 0x960   :  { %v5237_v13 = vmul.f32 0.2, %v5221_v44  ;;  %v5238_v63 = vmul.f32 0.2, %v5222_v48  ;;  %vm5227_vm7 = vcmp.gt.f32.partialorder %v5219_v42, 0.0  ;;  %vm5228_vm10 = vcmp.gt.f32.partialorder %v5220_v62, 0.0 }
 0x961   :  { %v5235_v26 = vmul.f32 0.2, %v5219_v42  ;;  %v5236_v58 = vmul.f32 0.2, %v5220_v62  ;;  %vm5233_vm15 = vcmp.gt.f32.partialorder %v5225_v33, 0.0  ;;  %v5250_v29 = vsel %vm5234_vm5, %v5226_v46, %v5242_v59 }
 0x962   :  { %v5245_v12 = vsel %vm5229_vm2, %v5221_v44, %v5237_v13  ;;  %v5246_v24 = vsel %vm5230_vm6, %v5222_v48, %v5238_v63  ;;  %v5241_v1 = vmul.f32 0.2, %v5225_v33  ;;  %v5259_v52 = vrot.slane %v5250_v29, 7 }
 0x963   :  { %v5275_v11 = vrot.slane %v5246_v24, 1  ;;  %v6590_v25 = vpack.i.bf16 %v5246_v24, %v5245_v12  ;;  %v5274_v16 = vrot.slane %v5245_v12, 1  ;;  %v5243_v55 = vsel %vm5227_vm7, %v5219_v42, %v5235_v26 }
 0x964   :  { %v5244_v50 = vsel %vm5228_vm10, %v5220_v62, %v5236_v58  ;;  %v5271_v17 = vrot.slane %v5243_v55, 1  ;;  %v5249_v5 = vsel %vm5233_vm15, %v5225_v33, %v5241_v1  ;;  %vm5231_vm11 = vcmp.gt.f32.partialorder %v5223_v2, 0.0 }
 0x965   :  { %6591 = vrot.lane.b32.xlu1 %v6590_v25, %s6676_s8  ;;  %v5272_v56 = vrot.slane %v5244_v50, 1  ;;  %v6585_v37 = vpack.i.bf16 %v5244_v50, %v5243_v55  ;;  %v6600_v23 = vpack.i.bf16 %v5250_v29, %v5249_v5  ;;  %v5258_v38 = vrot.slane %v5249_v5, 7 }
 0x966   :  { %vm5232_vm4 = vcmp.gt.f32.partialorder %v5224_v15, 0.0  ;;  %v5239_v39 = vmul.f32 0.2, %v5223_v2  ;;  %v5240_v10 = vmul.f32 0.2, %v5224_v15  ;;  %v5276_v18 = vsel %vm99_vm1, %v5274_v16, %v5275_v11 }
 0x967   :  { %6586 = vrot.lane.b32.xlu0 %v6585_v37, %s6676_s8  ;;  %v5280_v7 = vsel %vm61_vm0, %v5275_v11, 0.0  ;;  %v5273_v21 = vsel %vm99_vm1, %v5271_v17, %v5272_v56  ;;  %v5279_v31 = vsel %vm61_vm0, %v5272_v56, 0.0  ;;  %v5260_v30 = vsel %vm61_vm0, %v5258_v38, %v5259_v52 }
 0x968   :  { %v5247_v49 = vsel %vm5231_vm11, %v5223_v2, %v5239_v39  ;;  %v5248_v51 = vsel %vm5232_vm4, %v5224_v15, %v5240_v10  ;;  %v6610_v20 = vpack.i.bf16 %v5280_v7, %v5276_v18  ;;  %v6605_v4 = vpack.i.bf16 %v5279_v31, %v5273_v21 }
 0x969   :  { %6601 = vrot.lane.b32.xlu1 %v6600_v23, %s6678_s11  ;;  %v5256_v43 = vrot.slane %v5248_v51, 7  ;;  %v6595_v45 = vpack.i.bf16 %v5248_v51, %v5247_v49  ;;  %v5255_v41 = vrot.slane %v5247_v49, 7  ;;  %v5266_v27 = vsel %vm61_vm0, 0.0, %v5258_v38 }
 0x96a   :  { %vm5327_vm1 = vcmask 785408   ;;  %vm5626_vm5 = vcmask 1024  }
 0x96b   :  { %6596 = vrot.lane.b32.xlu0 %v6595_v45, %s6678_s11  ;;  %v5257_v53 = vsel %vm61_vm0, %v5255_v41, %v5256_v43  ;;  %v5265_v19 = vsel %vm61_vm0, 0.0, %v5255_v41  ;;  %vm5481_vm0 = vcmask 517120  }
 0x96d   :  { %6611 = vrot.lane.b32.xlu1 %v6610_v20, %s6679_s26 }
 0x96f   :  { %6606 = vrot.lane.b32.xlu0 %v6605_v4, %s6679_s26 }
 0x9d7   :  { %v6592_v54 = vpop.permute.xlu1 %6591 }
 0x9d8   :  { %v6594_v36 = vunpack.i.h.bf16 %v6592_v54  ;;  %v6593_v47 = vunpack.i.l.bf16 %v6592_v54 }
 0x9d9   :  { %v6587_v57 = vpop.permute.xlu0 %6586 }
 0x9da   :  { %v6589_v9 = vunpack.i.h.bf16 %v6587_v57  ;;  %v6588_v61 = vunpack.i.l.bf16 %v6587_v57  ;;  %v5322_v0 = vsel %vm4080_vm9, %v5260_v30, %v6594_v36  ;;  %v5321_v60 = vsel %vm4080_vm9, %v5266_v27, %v6593_v47 }
 0x9db   :  { %v6602_v14 = vpop.permute.xlu1 %6601 }
 0x9dc   :  { %v6604_v6 = vunpack.i.h.bf16 %v6602_v14  ;;  %v6603_v32 = vunpack.i.l.bf16 %v6602_v14  ;;  %v5320_v48 = vsel %vm4080_vm9, %v5257_v53, %v6589_v9  ;;  %v5319_v33 = vsel %vm4080_vm9, %v5265_v19, %v6588_v61 }
 0x9dd   :  { %v6597_v8 = vpop.permute.xlu0 %6596 }
 0x9de   :  { %v6599_v22 = vunpack.i.h.bf16 %v6597_v8  ;;  %v6598_v40 = vunpack.i.l.bf16 %v6597_v8  ;;  %v5325_v42 = vsel %vm4912_vm14, %v5321_v60, %v6603_v32  ;;  %v5326_v62 = vsel %vm4912_vm14, %v5322_v0, %v6604_v6 }
 0x9df   :  { %v6612_v35 = vpop.permute.xlu1 %6611 }
 0x9e0   :  { %v6614_v46 = vunpack.i.h.bf16 %v6612_v35  ;;  %v6613_v44 = vunpack.i.l.bf16 %v6612_v35  ;;  %v5323_v26 = vsel %vm4912_vm14, %v5319_v33, %v6598_v40  ;;  %v5324_v58 = vsel %vm4912_vm14, %v5320_v48, %v6599_v22 }
 0x9e1   :  { %v6607_v2 = vpop.permute.xlu0 %6606 }
 0x9e2   :  { %v5331_v15 = vsel %vm5327_vm1, %v5326_v62, %v6614_v46  ;;  %v5330_v59 = vsel %vm5327_vm1, %v5325_v42, %v6613_v44  ;;  %v6609_v13 = vunpack.i.h.bf16 %v6607_v2  ;;  %v6608_v63 = vunpack.i.l.bf16 %v6607_v2 }
 0x9e3   :  { %v5349_v29 = vpack.c.bf16 %v5331_v15, %v5330_v59 }
 0x9e4   :  { %v5329_v3 = vsel %vm5327_vm1, %v5324_v58, %v6609_v13  ;;  %v5328_v12 = vsel %vm5327_vm1, %v5323_v26, %v6608_v63 }
 0x9e5   :  { %v5348_v24 = vpack.c.bf16 %v5329_v3, %v5328_v12  ;;  %6022 = vmatmul.mubr.bf16.vlgmr.msra.gmra.mrb[56].mxu1 %v5349_v29  ;;  %v5533_v12 = vld [vmem:[%s9963_s12] sm:$0x1] }
 0x9e7   :  { %6002 = vmatmul.mubr.bf16.vlgmr.msra.gmra.mrb[56].mxu0 %v5348_v24 }
 0xab8   :  { %v5473_v1 = vpop.f32.mrb[56].mxu1 }
 0xab9   :  { %v6023_v52 = vpop.f32.mrb[57].mxu1  ;;  %v5490_v16 = vsel %vm4912_vm14, %v5473_v1, 0.0 }
 0xaba   :  { %v5432_v11 = vpop.f32.mrb[56].mxu0  ;;  %v5476_v25 = vpop.f32.mrb[58].mxu1 }
 0xabb   :  { %v6003_v55 = vpop.f32.mrb[57].mxu0  ;;  %v5491_v50 = vsel %vm5481_vm0, %v5476_v25, 0.0  ;;  %v6024_v17 = vpop.f32.mrb[59].mxu1  ;;  %v5480_v37 = vsel %vm4912_vm14, %v5432_v11, 0.0 }
 0xabc   :  { %v5435_v5 = vpop.f32.mrb[58].mxu0  ;;  %v5492_v56 = vadd.f32 %v5491_v50, %v5490_v16 }
 0xabd   :  { %v5482_v23 = vsel %vm5481_vm0, %v5435_v5, 0.0  ;;  %v6004_v38 = vpop.f32.mrb[59].mxu0 }
 0xabe   :  { %v5483_v28 = vadd.f32 %v5482_v23, %v5480_v37  ;;  %v5493_v39 = vrot.slane %v5492_v56, 4  ;;  %v5575_v23 = vld [vmem:[%s9965_s14 + $0x8] sm:$0x3] }
 0xac0   :  { %v5484_v10 = vrot.slane %v5483_v28, 4  ;;  %v5494_v18 = vadd.f32 %v5493_v39, %v5492_v56 }
 0xac2   :  { %v5485_v7 = vadd.f32 %v5484_v10, %v5483_v28  ;;  %v5495_v21 = vrot.slane %v5494_v18, 2 }
 0xac4   :  { %v5486_v31 = vrot.slane %v5485_v7, 2  ;;  %v5496_v30 = vadd.f32 %v5495_v21, %v5494_v18 }
 0xac6   :  { %v5487_v49 = vadd.f32 %v5486_v31, %v5485_v7  ;;  %v5497_v51 = vrot.slane %v5496_v30, 1  ;;  %v5574_v7 = vld [vmem:[%s9965_s14] sm:$0xff] }
 0xac8   :  { %v5488_v20 = vrot.slane %v5487_v49, 1  ;;  %v5498_v4 = vadd.f32 %v5497_v51, %v5496_v30 }
 0xaca   :  { %v5489_v43 = vadd.f32 %v5488_v20, %v5487_v49  ;;  %v5500_v45 = vsel %vm4912_vm14, %v5498_v4, 0.0 }
 0xacc   :  { %v5499_v41 = vsel %vm4912_vm14, %v5489_v43, 0.0 }
 0xacd   :  { %v5501_v53 = vadd.f32 %v5500_v45, %v5499_v41 }
 0xacf   :  { %v5502_v54 = vmul.f32 0.05, %v5501_v53 }
 0xad1   :  { %v5503_v57 = vsub.f32 %v5432_v11, %v5502_v54  ;;  %v5504_v14 = vsub.f32 %v5435_v5, %v5502_v54  ;;  %v5505_v36 = vsub.f32 %v5473_v1, %v5502_v54  ;;  %v5506_v47 = vsub.f32 %v5476_v25, %v5502_v54  ;;  %v5682_v11 = vld [vmem:[%s9964_s13] ss:$0 sm:$0xff] }
 0xad3   :  { %v5507_v9 = vmul.f32 %v5503_v57, %v5503_v57  ;;  %v5508_v61 = vmul.f32 %v5504_v14, %v5504_v14  ;;  %v5509_v6 = vmul.f32 %v5505_v36, %v5505_v36  ;;  %v5510_v32 = vmul.f32 %v5506_v47, %v5506_v47 }
 0xad5   :  { %v5511_v8 = vsel %vm4912_vm14, %v5507_v9, 0.0  ;;  %v5512_v27 = vsel %vm5481_vm0, %v5508_v61, 0.0  ;;  %v5520_v19 = vsel %vm4912_vm14, %v5509_v6, 0.0  ;;  %v5521_v22 = vsel %vm5481_vm0, %v5510_v32, 0.0 }
 0xad6   :  { %v5513_v40 = vadd.f32 %v5512_v27, %v5511_v8  ;;  %v5522_v35 = vadd.f32 %v5521_v22, %v5520_v19 }
 0xad8   :  { %v5514_v0 = vrot.slane %v5513_v40, 4  ;;  %v5523_v60 = vrot.slane %v5522_v35, 4 }
 0xada   :  { %v5515_v46 = vadd.f32 %v5514_v0, %v5513_v40  ;;  %v5524_v44 = vadd.f32 %v5523_v60, %v5522_v35 }
 0xadc   :  { %v5516_v48 = vrot.slane %v5515_v46, 2  ;;  %v5525_v33 = vrot.slane %v5524_v44, 2 }
 0xade   :  { %v5517_v42 = vadd.f32 %v5516_v48, %v5515_v46  ;;  %v5526_v62 = vadd.f32 %v5525_v33, %v5524_v44 }
 0xae0   :  { %v5518_v2 = vrot.slane %v5517_v42, 1  ;;  %v5527_v15 = vrot.slane %v5526_v62, 1 }
 0xae2   :  { %v5519_v59 = vadd.f32 %v5518_v2, %v5517_v42  ;;  %v5528_v13 = vadd.f32 %v5527_v15, %v5526_v62 }
 0xae4   :  { %v5529_v63 = vsel %vm4912_vm14, %v5519_v59, 0.0  ;;  %v5530_v26 = vsel %vm4912_vm14, %v5528_v13, 0.0 }
 0xae5   :  { %v5531_v58 = vadd.f32 %v5530_v26, %v5529_v63 }
 0xae7   :  { %v5532_v29 = vmul.f32 0.05, %v5531_v58 }
 0xae9   :  { %v5534_v3 = vadd.f32 1e-05, %v5532_v29 }
 0xaeb   :  { %6636 = vrsqrt.f32 %v5534_v3 }
 0xaf5   :  { %v6637_v24 = vpop.eup %6636 }
 0xaf6   :  { %v5536_v1 = vmul.f32 %v6637_v24, %v5533_v12 }
 0xaf8   :  { %v5541_v52 = vrot.slane %v5536_v1, %v10336_v34 }
 0xafa   :  { %v5546_v25 = vmul.f32 %v5541_v52, %v5506_v47  ;;  %v5544_v16 = vmul.f32 %v5541_v52, %v5504_v14  ;;  %v5543_v55 = vmul.f32 %v5541_v52, %v5503_v57  ;;  %v5545_v50 = vmul.f32 %v5541_v52, %v5505_v36 }
 0xafc   :  { %v5557_v17 = vadd.f32 %v5682_v11, %v5546_v25  ;;  %v5555_v5 = vadd.f32 %v5682_v11, %v5544_v16  ;;  %v5554_v56 = vadd.f32 %v5682_v11, %v5543_v55  ;;  %v5556_v37 = vadd.f32 %v5682_v11, %v5545_v50 }
 0xafe   :  { %vm5561_vm9 = vcmp.gt.f32.partialorder %v5557_v17, 0.0  ;;  %v5565_v38 = vmul.f32 0.2, %v5557_v17  ;;  %vm5559_vm3 = vcmp.gt.f32.partialorder %v5555_v5, 0.0  ;;  %v5563_v34 = vmul.f32 0.2, %v5555_v5 }
 0xaff   :  { %vm5558_vm12 = vcmp.gt.f32.partialorder %v5554_v56, 0.0  ;;  %v5562_v28 = vmul.f32 0.2, %v5554_v56  ;;  %vm5560_vm13 = vcmp.gt.f32.partialorder %v5556_v37, 0.0  ;;  %v5564_v39 = vmul.f32 0.2, %v5556_v37 }
 0xb00   :  { %v5569_v10 = vsel %vm5561_vm9, %v5557_v17, %v5565_v38  ;;  %v5567_v18 = vsel %vm5559_vm3, %v5555_v5, %v5563_v34 }
 0xb01   :  { %v5579_v21 = vmul.f32 %v5575_v23, %v5569_v10  ;;  %5573 = vst.msk [vmem:[%s9966_s15 + $0x18] sm:$0x3] %vm5481_vm0, %v5569_v10  ;;  %v5577_v31 = vmul.f32 %v5575_v23, %v5567_v18  ;;  %5571 = vst.msk [vmem:[%s9966_s15 + $0x8] sm:$0x3] %vm5481_vm0, %v5567_v18  ;;  %v5566_v30 = vsel %vm5558_vm12, %v5554_v56, %v5562_v28 }
 0xb02   :  { %v5568_v49 = vsel %vm5560_vm13, %v5556_v37, %v5564_v39  ;;  %5570 = vst.msk [vmem:[%s9966_s15] sm:$0xff] %vm4912_vm14, %v5566_v30  ;;  %v5576_v4 = vmul.f32 %v5574_v7, %v5566_v30 }
 0xb03   :  { %5572 = vst.msk [vmem:[%s9966_s15 + $0x10] sm:$0xff] %vm4912_vm14, %v5568_v49  ;;  %v5589_v51 = vsel %vm5481_vm0, %v5579_v21, 0.0  ;;  %v5583_v20 = vsel %vm5481_vm0, %v5577_v31, 0.0  ;;  %v5578_v45 = vmul.f32 %v5574_v7, %v5568_v49 }
 0xb04   :  { %5590 = vadd.xlane.f32.xlu1 %v5589_v51  ;;  %5584 = vadd.xlane.f32.xlu0 %v5583_v20  ;;  %v5580_v43 = vsel %vm4912_vm14, %v5576_v4, 0.0 }
 0xb05   :  { %v5586_v41 = vsel %vm4912_vm14, %v5578_v45, 0.0  ;;  %vm5623_vm14 = vcmask 1041409  }
 0xb08   :  { %5581 = vadd.xlane.f32.xlu0 %v5580_v43 }
 0xb0c   :  { %5587 = vadd.xlane.f32.xlu0 %v5586_v41 }
 0xb91   :  { %v5585_v53 = vpop.xlane.xlu0 %5584  ;;  %v5591_v14 = vpop.xlane.xlu1 %5590 }
 0xb92   :  { %v5593_v54 = vsel %vm5592_vm8, %v5585_v53, 0.0  ;;  %v5601_v9 = vsel %vm5592_vm8, %v5591_v14, 0.0 }
 0xb95   :  { %v5582_v57 = vpop.xlane.xlu0 %5581 }
 0xb96   :  { %v5594_v36 = vadd.f32 %v5593_v54, %v5582_v57 }
 0xb98   :  { %v5595_v47 = vrot.slane %v5594_v36, 4 }
 0xb99   :  { %v5588_v61 = vpop.xlane.xlu0 %5587 }
 0xb9a   :  { %v5596_v6 = vadd.f32 %v5595_v47, %v5594_v36  ;;  %v5602_v32 = vadd.f32 %v5601_v9, %v5588_v61 }
 0xb9c   :  { %v5597_v8 = vrot.slane %v5596_v6, 2  ;;  %v5603_v27 = vrot.slane %v5602_v32, 4 }
 0xb9e   :  { %v5598_v19 = vadd.f32 %v5597_v8, %v5596_v6  ;;  %v5604_v22 = vadd.f32 %v5603_v27, %v5602_v32 }
 0xba0   :  { %v5599_v40 = vrot.slane %v5598_v19, 1  ;;  %v5605_v35 = vrot.slane %v5604_v22, 2 }
 0xba2   :  { %v5600_v0 = vadd.f32 %v5599_v40, %v5598_v19  ;;  %v5606_v60 = vadd.f32 %v5605_v35, %v5604_v22 }
 0xba4   :  { %v5609_v46 = vsub.f32 0.0, %v5600_v0  ;;  %v5607_v44 = vrot.slane %v5606_v60, 1 }
 0xba6   :  { %v5611_v48 = vmul.f32 1.442695, %v5609_v46  ;;  %v5608_v33 = vadd.f32 %v5607_v44, %v5606_v60 }
 0xba8   :  { %6638 = vpow2.f32 %v5611_v48  ;;  %v5610_v42 = vsub.f32 0.0, %v5608_v33 }
 0xbaa   :  { %v5613_v62 = vmul.f32 1.442695, %v5610_v42 }
 0xbac   :  { %6640 = vpow2.f32 %v5613_v62 }
 0xbb2   :  { %v6639_v2 = vpop.eup %6638 }
 0xbb3   :  { %v5615_v15 = vadd.f32 1.0, %v6639_v2 }
 0xbb5   :  { %6642 = vrcp.f32 %v5615_v15 }
 0xbb6   :  { %v6641_v59 = vpop.eup %6640 }
 0xbb7   :  { %v5616_v13 = vadd.f32 1.0, %v6641_v59 }
 0xbb9   :  { %6644 = vrcp.f32 %v5616_v13 }
 0xbbf   :  { %v6643_v63 = vpop.eup %6642 }
 0xbc3   :  { %v6645_v26 = vpop.eup %6644 }
 0xbc4   :  { %v5624_v58 = vsel %vm5623_vm14, %v6645_v26, %v6643_v63 }
 0xbc5   :  { %5627 = vst.msk [vmem:[%s9967_s16] sm:$0x3] %vm5626_vm5, %v5624_v58 }

</bundles_post_ra>
